<compile_context>
chip_gen: v6e
topology: v6e:2x2x1
jax: 0.10.0
libtpu: 0.0.40
codegen_flags: <defaults>
</compile_context>

<pallas_src>
import functools

import jax
import jax.numpy as jnp
from jax.experimental import pallas as pl
from jax.experimental.pallas import tpu as pltpu


def _gather_rows_kernel(ids_ref, emb_hbm, out_ref, sem, *, rows):
    """Gather `rows` embedding rows straight into the output block via DMA.

    ids_ref : (n_tokens,) int32 in SMEM (scalar prefetch)
    emb_hbm : (V, Hp) table ref left in HBM (pl.ANY)
    out_ref : (rows, Hp) VMEM output block
    sem     : single shared DMA semaphore
    """
    base = pl.program_id(0) * rows
    copies = []
    for r in range(rows):                        # static unroll; rows is compile-time
        tok = ids_ref[base + r]                  # scalar read from SMEM
        cp = pltpu.make_async_copy(
            emb_hbm.at[pl.ds(tok, 1), :],        # (1, Hp) row in HBM
            out_ref.at[pl.ds(r, 1), :],          # (1, Hp) row of the output block
            sem,                                 # all copies share one DMA sem
        )
        cp.start()
        copies.append(cp)
    for cp in copies:                            # all row DMAs stay in flight until here
        cp.wait()
    # No vector store: the pipeline writes the fully DMA-filled block back to HBM.


def _gather_call(ids_chunk, emb, rows):
    """One pallas_call gathering ids_chunk.shape[0] rows (a multiple of `rows`)."""
    n = ids_chunk.shape[0]
    V, Hp = emb.shape
    itemsize = jnp.dtype(emb.dtype).itemsize
    # Output is double-buffered by the auto-pipeline; leave generous headroom
    # but never exceed v7x's 64 MiB physical VMEM.
    vmem_limit = int(min(64 * 1024 * 1024,
                         max(8 * 1024 * 1024, 4 * rows * Hp * itemsize)))
    kernel = functools.partial(_gather_rows_kernel, rows=rows)
    return pl.pallas_call(
        kernel,
        out_shape=jax.ShapeDtypeStruct((n, Hp), emb.dtype),
        grid_spec=pltpu.PrefetchScalarGridSpec(
            num_scalar_prefetch=1,                        # ids -> SMEM
            grid=(n // rows,),
            in_specs=[pl.BlockSpec(memory_space=pl.ANY)],  # table stays in HBM
            out_specs=pl.BlockSpec((rows, Hp), lambda i, ids: (i, 0)),
            scratch_shapes=[pltpu.SemaphoreType.DMA],      # one shared DMA semaphore
        ),
        compiler_params=pltpu.CompilerParams(
            dimension_semantics=("parallel",),   # independent token blocks (megacore)
            vmem_limit_bytes=vmem_limit,
        ),
        cost_estimate=pl.CostEstimate(
            flops=0,
            transcendentals=0,
            bytes_accessed=2 * n * Hp * itemsize,   # read rows + write rows
        ),
    )(ids_chunk, emb)


def embeddings_forward(token_ids, emb_table, *, rows_per_step=128,
                       max_tokens_per_call=65536):
    """token_ids: (B, S) int, emb_table: (V, H) -> (B, S, H)."""
    B, S = token_ids.shape
    V, H = emb_table.shape
    N = B * S
    itemsize = jnp.dtype(emb_table.dtype).itemsize

    # Round the token block to the dtype's sublane-packing minimum
    # (8 for f32, 16 for bf16, 32 for int8/fp8) so (rows, Hp) is a legal dense tile.
    min_rows = max(8, 32 // itemsize)
    rows = max(int(rows_per_step), min_rows)
    rows = pl.cdiv(rows, min_rows) * min_rows

    # Lane-dense output: pad H up to a multiple of 128; pad columns sliced off below.
    Hp = pl.cdiv(H, 128) * 128
    emb = emb_table if Hp == H else jnp.pad(emb_table, ((0, 0), (0, Hp - H)))

    # PyTorch raises on out-of-range ids; we clamp so no OOB HBM DMA can occur.
    ids = jnp.clip(token_ids.reshape(N).astype(jnp.int32), 0, V - 1)
    n_pad = pl.cdiv(N, rows) * rows
    if n_pad != N:
        ids = jnp.pad(ids, (0, n_pad - N))   # pad slots gather row 0, sliced off below

    # Bound the prefetched-ids SMEM footprint per call by chunking huge N.
    chunk = max(rows, (max_tokens_per_call // rows) * rows)
    outs = [_gather_call(ids[s:s + chunk], emb, rows)
            for s in range(0, n_pad, chunk)]
    out_flat = outs[0] if len(outs) == 1 else jnp.concatenate(outs, axis=0)

    return out_flat[:N, :H].reshape(B, S, H)


def init_embedding_table(key, vocab_size, hidden_dim, pad_token_id):
    # nn.Embedding default init: N(0, 1); padding_idx row is zeroed.
    w = jax.random.normal(key, (vocab_size, hidden_dim), dtype=jnp.float32)
    w = w.at[pad_token_id].set(0.0)
    return w


if __name__ == "__main__":
    vocab_size = 64
    hidden_dim = 32
    pad_token_id = 0
    batch, seq = 2, 8

    key = jax.random.PRNGKey(0)
    k_w, k_ids = jax.random.split(key)

    emb_table = init_embedding_table(k_w, vocab_size, hidden_dim, pad_token_id)
    token_ids = jax.random.randint(k_ids, (batch, seq), 0, vocab_size, dtype=jnp.int32)
    # make sure at least one pad token is present to exercise padding_idx path
    token_ids = token_ids.at[0, 0].set(pad_token_id)

    # reference in plain JAX (same semantics as nn.Embedding forward)
    ref = emb_table[token_ids]

    # 1) default (performance-tuned) block size: single grid step at this tiny N
    out = jax.block_until_ready(embeddings_forward(token_ids, emb_table))
    assert out.shape == (batch, seq, hidden_dim)
    assert jnp.allclose(out, ref, atol=1e-6), "mismatch vs reference gather"
    assert jnp.allclose(out[0, 0], 0.0), "padding_idx row must be zero"

    # 2) small block size to exercise the multi-grid-step path as well
    out_small = jax.block_until_ready(
        embeddings_forward(token_ids, emb_table, rows_per_step=8))
    assert jnp.allclose(out_small, ref, atol=1e-6), "mismatch (multi-step path)"

    print("KERNEL_OK")
</pallas_src>

<mosaic_0001>
module attributes {stable_mosaic.version = 11 : i64} {
  func.func @_gather_rows_kernel(%arg0: i32, %arg1: memref<128xi32, #tpu.memory_space<smem>>, %arg2: memref<64x128xf32, #tpu.memory_space<any>>, %arg3: memref<128x128xf32, #tpu.memory_space<vmem>>, %arg4: memref<!tpu.dma_semaphore, #tpu.memory_space<semaphore_mem>>) attributes {dimension_semantics = [#tpu.dimension_semantics<parallel>], iteration_bounds = array<i64: 1>, scalar_prefetch = 1 : i64, scratch_operands = 1 : i64, tpu.core_type = #tpu.core_type<tc>, window_params = [{}, {transform_indices = @transform_1, window_bounds = array<i64: 128, 128>}]} {
    %c128_i32 = arith.constant 128 : i32
    %0 = arith.muli %arg0, %c128_i32 : i32
    %c0_i32 = arith.constant 0 : i32
    %1 = arith.addi %0, %c0_i32 : i32
    %2 = arith.index_cast %1 : i32 to index
    %3 = memref.load %arg1[%2] : memref<128xi32, #tpu.memory_space<smem>>
    %c0_i32_0 = arith.constant 0 : i32
    %4 = tpu.memref_slice %arg2[%3, %c0_i32_0] : memref<64x128xf32, #tpu.memory_space<any>> -> memref<1x128xf32, #tpu.memory_space<any>>
    %c0_i32_1 = arith.constant 0 : i32
    %c0_i32_2 = arith.constant 0 : i32
    %5 = tpu.memref_slice %arg3[%c0_i32_1, %c0_i32_2] : memref<128x128xf32, #tpu.memory_space<vmem>> -> memref<1x128xf32, #tpu.memory_space<vmem>>
    tpu.enqueue_dma source(%4 : memref<1x128xf32, #tpu.memory_space<any>>) target(%5 : memref<1x128xf32, #tpu.memory_space<vmem>>) target_semaphore(%arg4 : memref<!tpu.dma_semaphore, #tpu.memory_space<semaphore_mem>>)
    %c1_i32 = arith.constant 1 : i32
    %6 = arith.addi %0, %c1_i32 : i32
    %7 = arith.index_cast %6 : i32 to index
    %8 = memref.load %arg1[%7] : memref<128xi32, #tpu.memory_space<smem>>
    %c0_i32_3 = arith.constant 0 : i32
    %9 = tpu.memref_slice %arg2[%8, %c0_i32_3] : memref<64x128xf32, #tpu.memory_space<any>> -> memref<1x128xf32, #tpu.memory_space<any>>
    %c1_i32_4 = arith.constant 1 : i32
    %c0_i32_5 = arith.constant 0 : i32
    %10 = tpu.memref_slice %arg3[%c1_i32_4, %c0_i32_5] : memref<128x128xf32, #tpu.memory_space<vmem>> -> memref<1x128xf32, #tpu.memory_space<vmem>>
    tpu.enqueue_dma source(%9 : memref<1x128xf32, #tpu.memory_space<any>>) target(%10 : memref<1x128xf32, #tpu.memory_space<vmem>>) target_semaphore(%arg4 : memref<!tpu.dma_semaphore, #tpu.memory_space<semaphore_mem>>)
    %c2_i32 = arith.constant 2 : i32
    %11 = arith.addi %0, %c2_i32 : i32
    %12 = arith.index_cast %11 : i32 to index
    %13 = memref.load %arg1[%12] : memref<128xi32, #tpu.memory_space<smem>>
    %c0_i32_6 = arith.constant 0 : i32
    %14 = tpu.memref_slice %arg2[%13, %c0_i32_6] : memref<64x128xf32, #tpu.memory_space<any>> -> memref<1x128xf32, #tpu.memory_space<any>>
    %c2_i32_7 = arith.constant 2 : i32
    %c0_i32_8 = arith.constant 0 : i32
    %15 = tpu.memref_slice %arg3[%c2_i32_7, %c0_i32_8] : memref<128x128xf32, #tpu.memory_space<vmem>> -> memref<1x128xf32, #tpu.memory_space<vmem>>
    tpu.enqueue_dma source(%14 : memref<1x128xf32, #tpu.memory_space<any>>) target(%15 : memref<1x128xf32, #tpu.memory_space<vmem>>) target_semaphore(%arg4 : memref<!tpu.dma_semaphore, #tpu.memory_space<semaphore_mem>>)
    %c3_i32 = arith.constant 3 : i32
    %16 = arith.addi %0, %c3_i32 : i32
    %17 = arith.index_cast %16 : i32 to index
    %18 = memref.load %arg1[%17] : memref<128xi32, #tpu.memory_space<smem>>
    %c0_i32_9 = arith.constant 0 : i32
    %19 = tpu.memref_slice %arg2[%18, %c0_i32_9] : memref<64x128xf32, #tpu.memory_space<any>> -> memref<1x128xf32, #tpu.memory_space<any>>
    %c3_i32_10 = arith.constant 3 : i32
    %c0_i32_11 = arith.constant 0 : i32
    %20 = tpu.memref_slice %arg3[%c3_i32_10, %c0_i32_11] : memref<128x128xf32, #tpu.memory_space<vmem>> -> memref<1x128xf32, #tpu.memory_space<vmem>>
    tpu.enqueue_dma source(%19 : memref<1x128xf32, #tpu.memory_space<any>>) target(%20 : memref<1x128xf32, #tpu.memory_space<vmem>>) target_semaphore(%arg4 : memref<!tpu.dma_semaphore, #tpu.memory_space<semaphore_mem>>)
    %c4_i32 = arith.constant 4 : i32
    %21 = arith.addi %0, %c4_i32 : i32
    %22 = arith.index_cast %21 : i32 to index
    %23 = memref.load %arg1[%22] : memref<128xi32, #tpu.memory_space<smem>>
    %c0_i32_12 = arith.constant 0 : i32
    %24 = tpu.memref_slice %arg2[%23, %c0_i32_12] : memref<64x128xf32, #tpu.memory_space<any>> -> memref<1x128xf32, #tpu.memory_space<any>>
    %c4_i32_13 = arith.constant 4 : i32
    %c0_i32_14 = arith.constant 0 : i32
    %25 = tpu.memref_slice %arg3[%c4_i32_13, %c0_i32_14] : memref<128x128xf32, #tpu.memory_space<vmem>> -> memref<1x128xf32, #tpu.memory_space<vmem>>
    tpu.enqueue_dma source(%24 : memref<1x128xf32, #tpu.memory_space<any>>) target(%25 : memref<1x128xf32, #tpu.memory_space<vmem>>) target_semaphore(%arg4 : memref<!tpu.dma_semaphore, #tpu.memory_space<semaphore_mem>>)
    %c5_i32 = arith.constant 5 : i32
    %26 = arith.addi %0, %c5_i32 : i32
    %27 = arith.index_cast %26 : i32 to index
    %28 = memref.load %arg1[%27] : memref<128xi32, #tpu.memory_space<smem>>
    %c0_i32_15 = arith.constant 0 : i32
    %29 = tpu.memref_slice %arg2[%28, %c0_i32_15] : memref<64x128xf32, #tpu.memory_space<any>> -> memref<1x128xf32, #tpu.memory_space<any>>
    %c5_i32_16 = arith.constant 5 : i32
    %c0_i32_17 = arith.constant 0 : i32
    %30 = tpu.memref_slice %arg3[%c5_i32_16, %c0_i32_17] : memref<128x128xf32, #tpu.memory_space<vmem>> -> memref<1x128xf32, #tpu.memory_space<vmem>>
    tpu.enqueue_dma source(%29 : memref<1x128xf32, #tpu.memory_space<any>>) target(%30 : memref<1x128xf32, #tpu.memory_space<vmem>>) target_semaphore(%arg4 : memref<!tpu.dma_semaphore, #tpu.memory_space<semaphore_mem>>)
    %c6_i32 = arith.constant 6 : i32
    %31 = arith.addi %0, %c6_i32 : i32
    %32 = arith.index_cast %31 : i32 to index
    %33 = memref.load %arg1[%32] : memref<128xi32, #tpu.memory_space<smem>>
    %c0_i32_18 = arith.constant 0 : i32
    %34 = tpu.memref_slice %arg2[%33, %c0_i32_18] : memref<64x128xf32, #tpu.memory_space<any>> -> memref<1x128xf32, #tpu.memory_space<any>>
    %c6_i32_19 = arith.constant 6 : i32
    %c0_i32_20 = arith.constant 0 : i32
    %35 = tpu.memref_slice %arg3[%c6_i32_19, %c0_i32_20] : memref<128x128xf32, #tpu.memory_space<vmem>> -> memref<1x128xf32, #tpu.memory_space<vmem>>
    tpu.enqueue_dma source(%34 : memref<1x128xf32, #tpu.memory_space<any>>) target(%35 : memref<1x128xf32, #tpu.memory_space<vmem>>) target_semaphore(%arg4 : memref<!tpu.dma_semaphore, #tpu.memory_space<semaphore_mem>>)
    %c7_i32 = arith.constant 7 : i32
    %36 = arith.addi %0, %c7_i32 : i32
    %37 = arith.index_cast %36 : i32 to index
    %38 = memref.load %arg1[%37] : memref<128xi32, #tpu.memory_space<smem>>
    %c0_i32_21 = arith.constant 0 : i32
    %39 = tpu.memref_slice %arg2[%38, %c0_i32_21] : memref<64x128xf32, #tpu.memory_space<any>> -> memref<1x128xf32, #tpu.memory_space<any>>
    %c7_i32_22 = arith.constant 7 : i32
    %c0_i32_23 = arith.constant 0 : i32
    %40 = tpu.memref_slice %arg3[%c7_i32_22, %c0_i32_23] : memref<128x128xf32, #tpu.memory_space<vmem>> -> memref<1x128xf32, #tpu.memory_space<vmem>>
    tpu.enqueue_dma source(%39 : memref<1x128xf32, #tpu.memory_space<any>>) target(%40 : memref<1x128xf32, #tpu.memory_space<vmem>>) target_semaphore(%arg4 : memref<!tpu.dma_semaphore, #tpu.memory_space<semaphore_mem>>)
    %c8_i32 = arith.constant 8 : i32
    %41 = arith.addi %0, %c8_i32 : i32
    %42 = arith.index_cast %41 : i32 to index
    %43 = memref.load %arg1[%42] : memref<128xi32, #tpu.memory_space<smem>>
    %c0_i32_24 = arith.constant 0 : i32
    %44 = tpu.memref_slice %arg2[%43, %c0_i32_24] : memref<64x128xf32, #tpu.memory_space<any>> -> memref<1x128xf32, #tpu.memory_space<any>>
    %c8_i32_25 = arith.constant 8 : i32
    %c0_i32_26 = arith.constant 0 : i32
    %45 = tpu.memref_slice %arg3[%c8_i32_25, %c0_i32_26] : memref<128x128xf32, #tpu.memory_space<vmem>> -> memref<1x128xf32, #tpu.memory_space<vmem>>
    tpu.enqueue_dma source(%44 : memref<1x128xf32, #tpu.memory_space<any>>) target(%45 : memref<1x128xf32, #tpu.memory_space<vmem>>) target_semaphore(%arg4 : memref<!tpu.dma_semaphore, #tpu.memory_space<semaphore_mem>>)
    %c9_i32 = arith.constant 9 : i32
    %46 = arith.addi %0, %c9_i32 : i32
    %47 = arith.index_cast %46 : i32 to index
    %48 = memref.load %arg1[%47] : memref<128xi32, #tpu.memory_space<smem>>
    %c0_i32_27 = arith.constant 0 : i32
    %49 = tpu.memref_slice %arg2[%48, %c0_i32_27] : memref<64x128xf32, #tpu.memory_space<any>> -> memref<1x128xf32, #tpu.memory_space<any>>
    %c9_i32_28 = arith.constant 9 : i32
    %c0_i32_29 = arith.constant 0 : i32
    %50 = tpu.memref_slice %arg3[%c9_i32_28, %c0_i32_29] : memref<128x128xf32, #tpu.memory_space<vmem>> -> memref<1x128xf32, #tpu.memory_space<vmem>>
    tpu.enqueue_dma source(%49 : memref<1x128xf32, #tpu.memory_space<any>>) target(%50 : memref<1x128xf32, #tpu.memory_space<vmem>>) target_semaphore(%arg4 : memref<!tpu.dma_semaphore, #tpu.memory_space<semaphore_mem>>)
    %c10_i32 = arith.constant 10 : i32
    %51 = arith.addi %0, %c10_i32 : i32
    %52 = arith.index_cast %51 : i32 to index
    %53 = memref.load %arg1[%52] : memref<128xi32, #tpu.memory_space<smem>>
    %c0_i32_30 = arith.constant 0 : i32
    %54 = tpu.memref_slice %arg2[%53, %c0_i32_30] : memref<64x128xf32, #tpu.memory_space<any>> -> memref<1x128xf32, #tpu.memory_space<any>>
    %c10_i32_31 = arith.constant 10 : i32
    %c0_i32_32 = arith.constant 0 : i32
    %55 = tpu.memref_slice %arg3[%c10_i32_31, %c0_i32_32] : memref<128x128xf32, #tpu.memory_space<vmem>> -> memref<1x128xf32, #tpu.memory_space<vmem>>
    tpu.enqueue_dma source(%54 : memref<1x128xf32, #tpu.memory_space<any>>) target(%55 : memref<1x128xf32, #tpu.memory_space<vmem>>) target_semaphore(%arg4 : memref<!tpu.dma_semaphore, #tpu.memory_space<semaphore_mem>>)
    %c11_i32 = arith.constant 11 : i32
    %56 = arith.addi %0, %c11_i32 : i32
    %57 = arith.index_cast %56 : i32 to index
    %58 = memref.load %arg1[%57] : memref<128xi32, #tpu.memory_space<smem>>
    %c0_i32_33 = arith.constant 0 : i32
    %59 = tpu.memref_slice %arg2[%58, %c0_i32_33] : memref<64x128xf32, #tpu.memory_space<any>> -> memref<1x128xf32, #tpu.memory_space<any>>
    %c11_i32_34 = arith.constant 11 : i32
    %c0_i32_35 = arith.constant 0 : i32
    %60 = tpu.memref_slice %arg3[%c11_i32_34, %c0_i32_35] : memref<128x128xf32, #tpu.memory_space<vmem>> -> memref<1x128xf32, #tpu.memory_space<vmem>>
    tpu.enqueue_dma source(%59 : memref<1x128xf32, #tpu.memory_space<any>>) target(%60 : memref<1x128xf32, #tpu.memory_space<vmem>>) target_semaphore(%arg4 : memref<!tpu.dma_semaphore, #tpu.memory_space<semaphore_mem>>)
    %c12_i32 = arith.constant 12 : i32
    %61 = arith.addi %0, %c12_i32 : i32
    %62 = arith.index_cast %61 : i32 to index
    %63 = memref.load %arg1[%62] : memref<128xi32, #tpu.memory_space<smem>>
    %c0_i32_36 = arith.constant 0 : i32
    %64 = tpu.memref_slice %arg2[%63, %c0_i32_36] : memref<64x128xf32, #tpu.memory_space<any>> -> memref<1x128xf32, #tpu.memory_space<any>>
    %c12_i32_37 = arith.constant 12 : i32
    %c0_i32_38 = arith.constant 0 : i32
    %65 = tpu.memref_slice %arg3[%c12_i32_37, %c0_i32_38] : memref<128x128xf32, #tpu.memory_space<vmem>> -> memref<1x128xf32, #tpu.memory_space<vmem>>
    tpu.enqueue_dma source(%64 : memref<1x128xf32, #tpu.memory_space<any>>) target(%65 : memref<1x128xf32, #tpu.memory_space<vmem>>) target_semaphore(%arg4 : memref<!tpu.dma_semaphore, #tpu.memory_space<semaphore_mem>>)
    %c13_i32 = arith.constant 13 : i32
    %66 = arith.addi %0, %c13_i32 : i32
    %67 = arith.index_cast %66 : i32 to index
    %68 = memref.load %arg1[%67] : memref<128xi32, #tpu.memory_space<smem>>
    %c0_i32_39 = arith.constant 0 : i32
    %69 = tpu.memref_slice %arg2[%68, %c0_i32_39] : memref<64x128xf32, #tpu.memory_space<any>> -> memref<1x128xf32, #tpu.memory_space<any>>
    %c13_i32_40 = arith.constant 13 : i32
    %c0_i32_41 = arith.constant 0 : i32
    %70 = tpu.memref_slice %arg3[%c13_i32_40, %c0_i32_41] : memref<128x128xf32, #tpu.memory_space<vmem>> -> memref<1x128xf32, #tpu.memory_space<vmem>>
    tpu.enqueue_dma source(%69 : memref<1x128xf32, #tpu.memory_space<any>>) target(%70 : memref<1x128xf32, #tpu.memory_space<vmem>>) target_semaphore(%arg4 : memref<!tpu.dma_semaphore, #tpu.memory_space<semaphore_mem>>)
    %c14_i32 = arith.constant 14 : i32
    %71 = arith.addi %0, %c14_i32 : i32
    %72 = arith.index_cast %71 : i32 to index
    %73 = memref.load %arg1[%72] : memref<128xi32, #tpu.memory_space<smem>>
    %c0_i32_42 = arith.constant 0 : i32
    %74 = tpu.memref_slice %arg2[%73, %c0_i32_42] : memref<64x128xf32, #tpu.memory_space<any>> -> memref<1x128xf32, #tpu.memory_space<any>>
    %c14_i32_43 = arith.constant 14 : i32
    %c0_i32_44 = arith.constant 0 : i32
    %75 = tpu.memref_slice %arg3[%c14_i32_43, %c0_i32_44] : memref<128x128xf32, #tpu.memory_space<vmem>> -> memref<1x128xf32, #tpu.memory_space<vmem>>
    tpu.enqueue_dma source(%74 : memref<1x128xf32, #tpu.memory_space<any>>) target(%75 : memref<1x128xf32, #tpu.memory_space<vmem>>) target_semaphore(%arg4 : memref<!tpu.dma_semaphore, #tpu.memory_space<semaphore_mem>>)
    %c15_i32 = arith.constant 15 : i32
    %76 = arith.addi %0, %c15_i32 : i32
    %77 = arith.index_cast %76 : i32 to index
    %78 = memref.load %arg1[%77] : memref<128xi32, #tpu.memory_space<smem>>
    %c0_i32_45 = arith.constant 0 : i32
    %79 = tpu.memref_slice %arg2[%78, %c0_i32_45] : memref<64x128xf32, #tpu.memory_space<any>> -> memref<1x128xf32, #tpu.memory_space<any>>
    %c15_i32_46 = arith.constant 15 : i32
    %c0_i32_47 = arith.constant 0 : i32
    %80 = tpu.memref_slice %arg3[%c15_i32_46, %c0_i32_47] : memref<128x128xf32, #tpu.memory_space<vmem>> -> memref<1x128xf32, #tpu.memory_space<vmem>>
    tpu.enqueue_dma source(%79 : memref<1x128xf32, #tpu.memory_space<any>>) target(%80 : memref<1x128xf32, #tpu.memory_space<vmem>>) target_semaphore(%arg4 : memref<!tpu.dma_semaphore, #tpu.memory_space<semaphore_mem>>)
    %c16_i32 = arith.constant 16 : i32
    %81 = arith.addi %0, %c16_i32 : i32
    %82 = arith.index_cast %81 : i32 to index
    %83 = memref.load %arg1[%82] : memref<128xi32, #tpu.memory_space<smem>>
    %c0_i32_48 = arith.constant 0 : i32
    %84 = tpu.memref_slice %arg2[%83, %c0_i32_48] : memref<64x128xf32, #tpu.memory_space<any>> -> memref<1x128xf32, #tpu.memory_space<any>>
    %c16_i32_49 = arith.constant 16 : i32
    %c0_i32_50 = arith.constant 0 : i32
    %85 = tpu.memref_slice %arg3[%c16_i32_49, %c0_i32_50] : memref<128x128xf32, #tpu.memory_space<vmem>> -> memref<1x128xf32, #tpu.memory_space<vmem>>
    tpu.enqueue_dma source(%84 : memref<1x128xf32, #tpu.memory_space<any>>) target(%85 : memref<1x128xf32, #tpu.memory_space<vmem>>) target_semaphore(%arg4 : memref<!tpu.dma_semaphore, #tpu.memory_space<semaphore_mem>>)
    %c17_i32 = arith.constant 17 : i32
    %86 = arith.addi %0, %c17_i32 : i32
    %87 = arith.index_cast %86 : i32 to index
    %88 = memref.load %arg1[%87] : memref<128xi32, #tpu.memory_space<smem>>
    %c0_i32_51 = arith.constant 0 : i32
    %89 = tpu.memref_slice %arg2[%88, %c0_i32_51] : memref<64x128xf32, #tpu.memory_space<any>> -> memref<1x128xf32, #tpu.memory_space<any>>
    %c17_i32_52 = arith.constant 17 : i32
    %c0_i32_53 = arith.constant 0 : i32
    %90 = tpu.memref_slice %arg3[%c17_i32_52, %c0_i32_53] : memref<128x128xf32, #tpu.memory_space<vmem>> -> memref<1x128xf32, #tpu.memory_space<vmem>>
    tpu.enqueue_dma source(%89 : memref<1x128xf32, #tpu.memory_space<any>>) target(%90 : memref<1x128xf32, #tpu.memory_space<vmem>>) target_semaphore(%arg4 : memref<!tpu.dma_semaphore, #tpu.memory_space<semaphore_mem>>)
    %c18_i32 = arith.constant 18 : i32
    %91 = arith.addi %0, %c18_i32 : i32
    %92 = arith.index_cast %91 : i32 to index
    %93 = memref.load %arg1[%92] : memref<128xi32, #tpu.memory_space<smem>>
    %c0_i32_54 = arith.constant 0 : i32
    %94 = tpu.memref_slice %arg2[%93, %c0_i32_54] : memref<64x128xf32, #tpu.memory_space<any>> -> memref<1x128xf32, #tpu.memory_space<any>>
    %c18_i32_55 = arith.constant 18 : i32
    %c0_i32_56 = arith.constant 0 : i32
    %95 = tpu.memref_slice %arg3[%c18_i32_55, %c0_i32_56] : memref<128x128xf32, #tpu.memory_space<vmem>> -> memref<1x128xf32, #tpu.memory_space<vmem>>
    tpu.enqueue_dma source(%94 : memref<1x128xf32, #tpu.memory_space<any>>) target(%95 : memref<1x128xf32, #tpu.memory_space<vmem>>) target_semaphore(%arg4 : memref<!tpu.dma_semaphore, #tpu.memory_space<semaphore_mem>>)
    %c19_i32 = arith.constant 19 : i32
    %96 = arith.addi %0, %c19_i32 : i32
    %97 = arith.index_cast %96 : i32 to index
    %98 = memref.load %arg1[%97] : memref<128xi32, #tpu.memory_space<smem>>
    %c0_i32_57 = arith.constant 0 : i32
    %99 = tpu.memref_slice %arg2[%98, %c0_i32_57] : memref<64x128xf32, #tpu.memory_space<any>> -> memref<1x128xf32, #tpu.memory_space<any>>
    %c19_i32_58 = arith.constant 19 : i32
    %c0_i32_59 = arith.constant 0 : i32
    %100 = tpu.memref_slice %arg3[%c19_i32_58, %c0_i32_59] : memref<128x128xf32, #tpu.memory_space<vmem>> -> memref<1x128xf32, #tpu.memory_space<vmem>>
    tpu.enqueue_dma source(%99 : memref<1x128xf32, #tpu.memory_space<any>>) target(%100 : memref<1x128xf32, #tpu.memory_space<vmem>>) target_semaphore(%arg4 : memref<!tpu.dma_semaphore, #tpu.memory_space<semaphore_mem>>)
    %c20_i32 = arith.constant 20 : i32
    %101 = arith.addi %0, %c20_i32 : i32
    %102 = arith.index_cast %101 : i32 to index
    %103 = memref.load %arg1[%102] : memref<128xi32, #tpu.memory_space<smem>>
    %c0_i32_60 = arith.constant 0 : i32
    %104 = tpu.memref_slice %arg2[%103, %c0_i32_60] : memref<64x128xf32, #tpu.memory_space<any>> -> memref<1x128xf32, #tpu.memory_space<any>>
    %c20_i32_61 = arith.constant 20 : i32
    %c0_i32_62 = arith.constant 0 : i32
    %105 = tpu.memref_slice %arg3[%c20_i32_61, %c0_i32_62] : memref<128x128xf32, #tpu.memory_space<vmem>> -> memref<1x128xf32, #tpu.memory_space<vmem>>
    tpu.enqueue_dma source(%104 : memref<1x128xf32, #tpu.memory_space<any>>) target(%105 : memref<1x128xf32, #tpu.memory_space<vmem>>) target_semaphore(%arg4 : memref<!tpu.dma_semaphore, #tpu.memory_space<semaphore_mem>>)
    %c21_i32 = arith.constant 21 : i32
    %106 = arith.addi %0, %c21_i32 : i32
    %107 = arith.index_cast %106 : i32 to index
    %108 = memref.load %arg1[%107] : memref<128xi32, #tpu.memory_space<smem>>
    %c0_i32_63 = arith.constant 0 : i32
    %109 = tpu.memref_slice %arg2[%108, %c0_i32_63] : memref<64x128xf32, #tpu.memory_space<any>> -> memref<1x128xf32, #tpu.memory_space<any>>
    %c21_i32_64 = arith.constant 21 : i32
    %c0_i32_65 = arith.constant 0 : i32
    %110 = tpu.memref_slice %arg3[%c21_i32_64, %c0_i32_65] : memref<128x128xf32, #tpu.memory_space<vmem>> -> memref<1x128xf32, #tpu.memory_space<vmem>>
    tpu.enqueue_dma source(%109 : memref<1x128xf32, #tpu.memory_space<any>>) target(%110 : memref<1x128xf32, #tpu.memory_space<vmem>>) target_semaphore(%arg4 : memref<!tpu.dma_semaphore, #tpu.memory_space<semaphore_mem>>)
    %c22_i32 = arith.constant 22 : i32
    %111 = arith.addi %0, %c22_i32 : i32
    %112 = arith.index_cast %111 : i32 to index
    %113 = memref.load %arg1[%112] : memref<128xi32, #tpu.memory_space<smem>>
    %c0_i32_66 = arith.constant 0 : i32
    %114 = tpu.memref_slice %arg2[%113, %c0_i32_66] : memref<64x128xf32, #tpu.memory_space<any>> -> memref<1x128xf32, #tpu.memory_space<any>>
    %c22_i32_67 = arith.constant 22 : i32
    %c0_i32_68 = arith.constant 0 : i32
    %115 = tpu.memref_slice %arg3[%c22_i32_67, %c0_i32_68] : memref<128x128xf32, #tpu.memory_space<vmem>> -> memref<1x128xf32, #tpu.memory_space<vmem>>
    tpu.enqueue_dma source(%114 : memref<1x128xf32, #tpu.memory_space<any>>) target(%115 : memref<1x128xf32, #tpu.memory_space<vmem>>) target_semaphore(%arg4 : memref<!tpu.dma_semaphore, #tpu.memory_space<semaphore_mem>>)
    %c23_i32 = arith.constant 23 : i32
    %116 = arith.addi %0, %c23_i32 : i32
    %117 = arith.index_cast %116 : i32 to index
    %118 = memref.load %arg1[%117] : memref<128xi32, #tpu.memory_space<smem>>
    %c0_i32_69 = arith.constant 0 : i32
    %119 = tpu.memref_slice %arg2[%118, %c0_i32_69] : memref<64x128xf32, #tpu.memory_space<any>> -> memref<1x128xf32, #tpu.memory_space<any>>
    %c23_i32_70 = arith.constant 23 : i32
    %c0_i32_71 = arith.constant 0 : i32
    %120 = tpu.memref_slice %arg3[%c23_i32_70, %c0_i32_71] : memref<128x128xf32, #tpu.memory_space<vmem>> -> memref<1x128xf32, #tpu.memory_space<vmem>>
    tpu.enqueue_dma source(%119 : memref<1x128xf32, #tpu.memory_space<any>>) target(%120 : memref<1x128xf32, #tpu.memory_space<vmem>>) target_semaphore(%arg4 : memref<!tpu.dma_semaphore, #tpu.memory_space<semaphore_mem>>)
    %c24_i32 = arith.constant 24 : i32
    %121 = arith.addi %0, %c24_i32 : i32
    %122 = arith.index_cast %121 : i32 to index
    %123 = memref.load %arg1[%122] : memref<128xi32, #tpu.memory_space<smem>>
    %c0_i32_72 = arith.constant 0 : i32
    %124 = tpu.memref_slice %arg2[%123, %c0_i32_72] : memref<64x128xf32, #tpu.memory_space<any>> -> memref<1x128xf32, #tpu.memory_space<any>>
    %c24_i32_73 = arith.constant 24 : i32
    %c0_i32_74 = arith.constant 0 : i32
    %125 = tpu.memref_slice %arg3[%c24_i32_73, %c0_i32_74] : memref<128x128xf32, #tpu.memory_space<vmem>> -> memref<1x128xf32, #tpu.memory_space<vmem>>
    tpu.enqueue_dma source(%124 : memref<1x128xf32, #tpu.memory_space<any>>) target(%125 : memref<1x128xf32, #tpu.memory_space<vmem>>) target_semaphore(%arg4 : memref<!tpu.dma_semaphore, #tpu.memory_space<semaphore_mem>>)
    %c25_i32 = arith.constant 25 : i32
    %126 = arith.addi %0, %c25_i32 : i32
    %127 = arith.index_cast %126 : i32 to index
    %128 = memref.load %arg1[%127] : memref<128xi32, #tpu.memory_space<smem>>
    %c0_i32_75 = arith.constant 0 : i32
    %129 = tpu.memref_slice %arg2[%128, %c0_i32_75] : memref<64x128xf32, #tpu.memory_space<any>> -> memref<1x128xf32, #tpu.memory_space<any>>
    %c25_i32_76 = arith.constant 25 : i32
    %c0_i32_77 = arith.constant 0 : i32
    %130 = tpu.memref_slice %arg3[%c25_i32_76, %c0_i32_77] : memref<128x128xf32, #tpu.memory_space<vmem>> -> memref<1x128xf32, #tpu.memory_space<vmem>>
    tpu.enqueue_dma source(%129 : memref<1x128xf32, #tpu.memory_space<any>>) target(%130 : memref<1x128xf32, #tpu.memory_space<vmem>>) target_semaphore(%arg4 : memref<!tpu.dma_semaphore, #tpu.memory_space<semaphore_mem>>)
    %c26_i32 = arith.constant 26 : i32
    %131 = arith.addi %0, %c26_i32 : i32
    %132 = arith.index_cast %131 : i32 to index
    %133 = memref.load %arg1[%132] : memref<128xi32, #tpu.memory_space<smem>>
    %c0_i32_78 = arith.constant 0 : i32
    %134 = tpu.memref_slice %arg2[%133, %c0_i32_78] : memref<64x128xf32, #tpu.memory_space<any>> -> memref<1x128xf32, #tpu.memory_space<any>>
    %c26_i32_79 = arith.constant 26 : i32
    %c0_i32_80 = arith.constant 0 : i32
    %135 = tpu.memref_slice %arg3[%c26_i32_79, %c0_i32_80] : memref<128x128xf32, #tpu.memory_space<vmem>> -> memref<1x128xf32, #tpu.memory_space<vmem>>
    tpu.enqueue_dma source(%134 : memref<1x128xf32, #tpu.memory_space<any>>) target(%135 : memref<1x128xf32, #tpu.memory_space<vmem>>) target_semaphore(%arg4 : memref<!tpu.dma_semaphore, #tpu.memory_space<semaphore_mem>>)
    %c27_i32 = arith.constant 27 : i32
    %136 = arith.addi %0, %c27_i32 : i32
    %137 = arith.index_cast %136 : i32 to index
    %138 = memref.load %arg1[%137] : memref<128xi32, #tpu.memory_space<smem>>
    %c0_i32_81 = arith.constant 0 : i32
    %139 = tpu.memref_slice %arg2[%138, %c0_i32_81] : memref<64x128xf32, #tpu.memory_space<any>> -> memref<1x128xf32, #tpu.memory_space<any>>
    %c27_i32_82 = arith.constant 27 : i32
    %c0_i32_83 = arith.constant 0 : i32
    %140 = tpu.memref_slice %arg3[%c27_i32_82, %c0_i32_83] : memref<128x128xf32, #tpu.memory_space<vmem>> -> memref<1x128xf32, #tpu.memory_space<vmem>>
    tpu.enqueue_dma source(%139 : memref<1x128xf32, #tpu.memory_space<any>>) target(%140 : memref<1x128xf32, #tpu.memory_space<vmem>>) target_semaphore(%arg4 : memref<!tpu.dma_semaphore, #tpu.memory_space<semaphore_mem>>)
    %c28_i32 = arith.constant 28 : i32
    %141 = arith.addi %0, %c28_i32 : i32
    %142 = arith.index_cast %141 : i32 to index
    %143 = memref.load %arg1[%142] : memref<128xi32, #tpu.memory_space<smem>>
    %c0_i32_84 = arith.constant 0 : i32
    %144 = tpu.memref_slice %arg2[%143, %c0_i32_84] : memref<64x128xf32, #tpu.memory_space<any>> -> memref<1x128xf32, #tpu.memory_space<any>>
    %c28_i32_85 = arith.constant 28 : i32
    %c0_i32_86 = arith.constant 0 : i32
    %145 = tpu.memref_slice %arg3[%c28_i32_85, %c0_i32_86] : memref<128x128xf32, #tpu.memory_space<vmem>> -> memref<1x128xf32, #tpu.memory_space<vmem>>
    tpu.enqueue_dma source(%144 : memref<1x128xf32, #tpu.memory_space<any>>) target(%145 : memref<1x128xf32, #tpu.memory_space<vmem>>) target_semaphore(%arg4 : memref<!tpu.dma_semaphore, #tpu.memory_space<semaphore_mem>>)
    %c29_i32 = arith.constant 29 : i32
    %146 = arith.addi %0, %c29_i32 : i32
    %147 = arith.index_cast %146 : i32 to index
    %148 = memref.load %arg1[%147] : memref<128xi32, #tpu.memory_space<smem>>
    %c0_i32_87 = arith.constant 0 : i32
    %149 = tpu.memref_slice %arg2[%148, %c0_i32_87] : memref<64x128xf32, #tpu.memory_space<any>> -> memref<1x128xf32, #tpu.memory_space<any>>
    %c29_i32_88 = arith.constant 29 : i32
    %c0_i32_89 = arith.constant 0 : i32
    %150 = tpu.memref_slice %arg3[%c29_i32_88, %c0_i32_89] : memref<128x128xf32, #tpu.memory_space<vmem>> -> memref<1x128xf32, #tpu.memory_space<vmem>>
    tpu.enqueue_dma source(%149 : memref<1x128xf32, #tpu.memory_space<any>>) target(%150 : memref<1x128xf32, #tpu.memory_space<vmem>>) target_semaphore(%arg4 : memref<!tpu.dma_semaphore, #tpu.memory_space<semaphore_mem>>)
    %c30_i32 = arith.constant 30 : i32
    %151 = arith.addi %0, %c30_i32 : i32
    %152 = arith.index_cast %151 : i32 to index
    %153 = memref.load %arg1[%152] : memref<128xi32, #tpu.memory_space<smem>>
    %c0_i32_90 = arith.constant 0 : i32
    %154 = tpu.memref_slice %arg2[%153, %c0_i32_90] : memref<64x128xf32, #tpu.memory_space<any>> -> memref<1x128xf32, #tpu.memory_space<any>>
    %c30_i32_91 = arith.constant 30 : i32
    %c0_i32_92 = arith.constant 0 : i32
    %155 = tpu.memref_slice %arg3[%c30_i32_91, %c0_i32_92] : memref<128x128xf32, #tpu.memory_space<vmem>> -> memref<1x128xf32, #tpu.memory_space<vmem>>
    tpu.enqueue_dma source(%154 : memref<1x128xf32, #tpu.memory_space<any>>) target(%155 : memref<1x128xf32, #tpu.memory_space<vmem>>) target_semaphore(%arg4 : memref<!tpu.dma_semaphore, #tpu.memory_space<semaphore_mem>>)
    %c31_i32 = arith.constant 31 : i32
    %156 = arith.addi %0, %c31_i32 : i32
    %157 = arith.index_cast %156 : i32 to index
    %158 = memref.load %arg1[%157] : memref<128xi32, #tpu.memory_space<smem>>
    %c0_i32_93 = arith.constant 0 : i32
    %159 = tpu.memref_slice %arg2[%158, %c0_i32_93] : memref<64x128xf32, #tpu.memory_space<any>> -> memref<1x128xf32, #tpu.memory_space<any>>
    %c31_i32_94 = arith.constant 31 : i32
    %c0_i32_95 = arith.constant 0 : i32
    %160 = tpu.memref_slice %arg3[%c31_i32_94, %c0_i32_95] : memref<128x128xf32, #tpu.memory_space<vmem>> -> memref<1x128xf32, #tpu.memory_space<vmem>>
    tpu.enqueue_dma source(%159 : memref<1x128xf32, #tpu.memory_space<any>>) target(%160 : memref<1x128xf32, #tpu.memory_space<vmem>>) target_semaphore(%arg4 : memref<!tpu.dma_semaphore, #tpu.memory_space<semaphore_mem>>)
    %c32_i32 = arith.constant 32 : i32
    %161 = arith.addi %0, %c32_i32 : i32
    %162 = arith.index_cast %161 : i32 to index
    %163 = memref.load %arg1[%162] : memref<128xi32, #tpu.memory_space<smem>>
    %c0_i32_96 = arith.constant 0 : i32
    %164 = tpu.memref_slice %arg2[%163, %c0_i32_96] : memref<64x128xf32, #tpu.memory_space<any>> -> memref<1x128xf32, #tpu.memory_space<any>>
    %c32_i32_97 = arith.constant 32 : i32
    %c0_i32_98 = arith.constant 0 : i32
    %165 = tpu.memref_slice %arg3[%c32_i32_97, %c0_i32_98] : memref<128x128xf32, #tpu.memory_space<vmem>> -> memref<1x128xf32, #tpu.memory_space<vmem>>
    tpu.enqueue_dma source(%164 : memref<1x128xf32, #tpu.memory_space<any>>) target(%165 : memref<1x128xf32, #tpu.memory_space<vmem>>) target_semaphore(%arg4 : memref<!tpu.dma_semaphore, #tpu.memory_space<semaphore_mem>>)
    %c33_i32 = arith.constant 33 : i32
    %166 = arith.addi %0, %c33_i32 : i32
    %167 = arith.index_cast %166 : i32 to index
    %168 = memref.load %arg1[%167] : memref<128xi32, #tpu.memory_space<smem>>
    %c0_i32_99 = arith.constant 0 : i32
    %169 = tpu.memref_slice %arg2[%168, %c0_i32_99] : memref<64x128xf32, #tpu.memory_space<any>> -> memref<1x128xf32, #tpu.memory_space<any>>
    %c33_i32_100 = arith.constant 33 : i32
    %c0_i32_101 = arith.constant 0 : i32
    %170 = tpu.memref_slice %arg3[%c33_i32_100, %c0_i32_101] : memref<128x128xf32, #tpu.memory_space<vmem>> -> memref<1x128xf32, #tpu.memory_space<vmem>>
    tpu.enqueue_dma source(%169 : memref<1x128xf32, #tpu.memory_space<any>>) target(%170 : memref<1x128xf32, #tpu.memory_space<vmem>>) target_semaphore(%arg4 : memref<!tpu.dma_semaphore, #tpu.memory_space<semaphore_mem>>)
    %c34_i32 = arith.constant 34 : i32
    %171 = arith.addi %0, %c34_i32 : i32
    %172 = arith.index_cast %171 : i32 to index
    %173 = memref.load %arg1[%172] : memref<128xi32, #tpu.memory_space<smem>>
    %c0_i32_102 = arith.constant 0 : i32
    %174 = tpu.memref_slice %arg2[%173, %c0_i32_102] : memref<64x128xf32, #tpu.memory_space<any>> -> memref<1x128xf32, #tpu.memory_space<any>>
    %c34_i32_103 = arith.constant 34 : i32
    %c0_i32_104 = arith.constant 0 : i32
    %175 = tpu.memref_slice %arg3[%c34_i32_103, %c0_i32_104] : memref<128x128xf32, #tpu.memory_space<vmem>> -> memref<1x128xf32, #tpu.memory_space<vmem>>
    tpu.enqueue_dma source(%174 : memref<1x128xf32, #tpu.memory_space<any>>) target(%175 : memref<1x128xf32, #tpu.memory_space<vmem>>) target_semaphore(%arg4 : memref<!tpu.dma_semaphore, #tpu.memory_space<semaphore_mem>>)
    %c35_i32 = arith.constant 35 : i32
    %176 = arith.addi %0, %c35_i32 : i32
    %177 = arith.index_cast %176 : i32 to index
    %178 = memref.load %arg1[%177] : memref<128xi32, #tpu.memory_space<smem>>
    %c0_i32_105 = arith.constant 0 : i32
    %179 = tpu.memref_slice %arg2[%178, %c0_i32_105] : memref<64x128xf32, #tpu.memory_space<any>> -> memref<1x128xf32, #tpu.memory_space<any>>
    %c35_i32_106 = arith.constant 35 : i32
    %c0_i32_107 = arith.constant 0 : i32
    %180 = tpu.memref_slice %arg3[%c35_i32_106, %c0_i32_107] : memref<128x128xf32, #tpu.memory_space<vmem>> -> memref<1x128xf32, #tpu.memory_space<vmem>>
    tpu.enqueue_dma source(%179 : memref<1x128xf32, #tpu.memory_space<any>>) target(%180 : memref<1x128xf32, #tpu.memory_space<vmem>>) target_semaphore(%arg4 : memref<!tpu.dma_semaphore, #tpu.memory_space<semaphore_mem>>)
    %c36_i32 = arith.constant 36 : i32
    %181 = arith.addi %0, %c36_i32 : i32
    %182 = arith.index_cast %181 : i32 to index
    %183 = memref.load %arg1[%182] : memref<128xi32, #tpu.memory_space<smem>>
    %c0_i32_108 = arith.constant 0 : i32
    %184 = tpu.memref_slice %arg2[%183, %c0_i32_108] : memref<64x128xf32, #tpu.memory_space<any>> -> memref<1x128xf32, #tpu.memory_space<any>>
    %c36_i32_109 = arith.constant 36 : i32
    %c0_i32_110 = arith.constant 0 : i32
    %185 = tpu.memref_slice %arg3[%c36_i32_109, %c0_i32_110] : memref<128x128xf32, #tpu.memory_space<vmem>> -> memref<1x128xf32, #tpu.memory_space<vmem>>
    tpu.enqueue_dma source(%184 : memref<1x128xf32, #tpu.memory_space<any>>) target(%185 : memref<1x128xf32, #tpu.memory_space<vmem>>) target_semaphore(%arg4 : memref<!tpu.dma_semaphore, #tpu.memory_space<semaphore_mem>>)
    %c37_i32 = arith.constant 37 : i32
    %186 = arith.addi %0, %c37_i32 : i32
    %187 = arith.index_cast %186 : i32 to index
    %188 = memref.load %arg1[%187] : memref<128xi32, #tpu.memory_space<smem>>
    %c0_i32_111 = arith.constant 0 : i32
    %189 = tpu.memref_slice %arg2[%188, %c0_i32_111] : memref<64x128xf32, #tpu.memory_space<any>> -> memref<1x128xf32, #tpu.memory_space<any>>
    %c37_i32_112 = arith.constant 37 : i32
    %c0_i32_113 = arith.constant 0 : i32
    %190 = tpu.memref_slice %arg3[%c37_i32_112, %c0_i32_113] : memref<128x128xf32, #tpu.memory_space<vmem>> -> memref<1x128xf32, #tpu.memory_space<vmem>>
    tpu.enqueue_dma source(%189 : memref<1x128xf32, #tpu.memory_space<any>>) target(%190 : memref<1x128xf32, #tpu.memory_space<vmem>>) target_semaphore(%arg4 : memref<!tpu.dma_semaphore, #tpu.memory_space<semaphore_mem>>)
    %c38_i32 = arith.constant 38 : i32
    %191 = arith.addi %0, %c38_i32 : i32
    %192 = arith.index_cast %191 : i32 to index
    %193 = memref.load %arg1[%192] : memref<128xi32, #tpu.memory_space<smem>>
    %c0_i32_114 = arith.constant 0 : i32
    %194 = tpu.memref_slice %arg2[%193, %c0_i32_114] : memref<64x128xf32, #tpu.memory_space<any>> -> memref<1x128xf32, #tpu.memory_space<any>>
    %c38_i32_115 = arith.constant 38 : i32
    %c0_i32_116 = arith.constant 0 : i32
    %195 = tpu.memref_slice %arg3[%c38_i32_115, %c0_i32_116] : memref<128x128xf32, #tpu.memory_space<vmem>> -> memref<1x128xf32, #tpu.memory_space<vmem>>
    tpu.enqueue_dma source(%194 : memref<1x128xf32, #tpu.memory_space<any>>) target(%195 : memref<1x128xf32, #tpu.memory_space<vmem>>) target_semaphore(%arg4 : memref<!tpu.dma_semaphore, #tpu.memory_space<semaphore_mem>>)
    %c39_i32 = arith.constant 39 : i32
    %196 = arith.addi %0, %c39_i32 : i32
    %197 = arith.index_cast %196 : i32 to index
    %198 = memref.load %arg1[%197] : memref<128xi32, #tpu.memory_space<smem>>
    %c0_i32_117 = arith.constant 0 : i32
    %199 = tpu.memref_slice %arg2[%198, %c0_i32_117] : memref<64x128xf32, #tpu.memory_space<any>> -> memref<1x128xf32, #tpu.memory_space<any>>
    %c39_i32_118 = arith.constant 39 : i32
    %c0_i32_119 = arith.constant 0 : i32
    %200 = tpu.memref_slice %arg3[%c39_i32_118, %c0_i32_119] : memref<128x128xf32, #tpu.memory_space<vmem>> -> memref<1x128xf32, #tpu.memory_space<vmem>>
    tpu.enqueue_dma source(%199 : memref<1x128xf32, #tpu.memory_space<any>>) target(%200 : memref<1x128xf32, #tpu.memory_space<vmem>>) target_semaphore(%arg4 : memref<!tpu.dma_semaphore, #tpu.memory_space<semaphore_mem>>)
    %c40_i32 = arith.constant 40 : i32
    %201 = arith.addi %0, %c40_i32 : i32
    %202 = arith.index_cast %201 : i32 to index
    %203 = memref.load %arg1[%202] : memref<128xi32, #tpu.memory_space<smem>>
    %c0_i32_120 = arith.constant 0 : i32
    %204 = tpu.memref_slice %arg2[%203, %c0_i32_120] : memref<64x128xf32, #tpu.memory_space<any>> -> memref<1x128xf32, #tpu.memory_space<any>>
    %c40_i32_121 = arith.constant 40 : i32
    %c0_i32_122 = arith.constant 0 : i32
    %205 = tpu.memref_slice %arg3[%c40_i32_121, %c0_i32_122] : memref<128x128xf32, #tpu.memory_space<vmem>> -> memref<1x128xf32, #tpu.memory_space<vmem>>
    tpu.enqueue_dma source(%204 : memref<1x128xf32, #tpu.memory_space<any>>) target(%205 : memref<1x128xf32, #tpu.memory_space<vmem>>) target_semaphore(%arg4 : memref<!tpu.dma_semaphore, #tpu.memory_space<semaphore_mem>>)
    %c41_i32 = arith.constant 41 : i32
    %206 = arith.addi %0, %c41_i32 : i32
    %207 = arith.index_cast %206 : i32 to index
    %208 = memref.load %arg1[%207] : memref<128xi32, #tpu.memory_space<smem>>
    %c0_i32_123 = arith.constant 0 : i32
    %209 = tpu.memref_slice %arg2[%208, %c0_i32_123] : memref<64x128xf32, #tpu.memory_space<any>> -> memref<1x128xf32, #tpu.memory_space<any>>
    %c41_i32_124 = arith.constant 41 : i32
    %c0_i32_125 = arith.constant 0 : i32
    %210 = tpu.memref_slice %arg3[%c41_i32_124, %c0_i32_125] : memref<128x128xf32, #tpu.memory_space<vmem>> -> memref<1x128xf32, #tpu.memory_space<vmem>>
    tpu.enqueue_dma source(%209 : memref<1x128xf32, #tpu.memory_space<any>>) target(%210 : memref<1x128xf32, #tpu.memory_space<vmem>>) target_semaphore(%arg4 : memref<!tpu.dma_semaphore, #tpu.memory_space<semaphore_mem>>)
    %c42_i32 = arith.constant 42 : i32
    %211 = arith.addi %0, %c42_i32 : i32
    %212 = arith.index_cast %211 : i32 to index
    %213 = memref.load %arg1[%212] : memref<128xi32, #tpu.memory_space<smem>>
    %c0_i32_126 = arith.constant 0 : i32
    %214 = tpu.memref_slice %arg2[%213, %c0_i32_126] : memref<64x128xf32, #tpu.memory_space<any>> -> memref<1x128xf32, #tpu.memory_space<any>>
    %c42_i32_127 = arith.constant 42 : i32
    %c0_i32_128 = arith.constant 0 : i32
    %215 = tpu.memref_slice %arg3[%c42_i32_127, %c0_i32_128] : memref<128x128xf32, #tpu.memory_space<vmem>> -> memref<1x128xf32, #tpu.memory_space<vmem>>
    tpu.enqueue_dma source(%214 : memref<1x128xf32, #tpu.memory_space<any>>) target(%215 : memref<1x128xf32, #tpu.memory_space<vmem>>) target_semaphore(%arg4 : memref<!tpu.dma_semaphore, #tpu.memory_space<semaphore_mem>>)
    %c43_i32 = arith.constant 43 : i32
    %216 = arith.addi %0, %c43_i32 : i32
    %217 = arith.index_cast %216 : i32 to index
    %218 = memref.load %arg1[%217] : memref<128xi32, #tpu.memory_space<smem>>
    %c0_i32_129 = arith.constant 0 : i32
    %219 = tpu.memref_slice %arg2[%218, %c0_i32_129] : memref<64x128xf32, #tpu.memory_space<any>> -> memref<1x128xf32, #tpu.memory_space<any>>
    %c43_i32_130 = arith.constant 43 : i32
    %c0_i32_131 = arith.constant 0 : i32
    %220 = tpu.memref_slice %arg3[%c43_i32_130, %c0_i32_131] : memref<128x128xf32, #tpu.memory_space<vmem>> -> memref<1x128xf32, #tpu.memory_space<vmem>>
    tpu.enqueue_dma source(%219 : memref<1x128xf32, #tpu.memory_space<any>>) target(%220 : memref<1x128xf32, #tpu.memory_space<vmem>>) target_semaphore(%arg4 : memref<!tpu.dma_semaphore, #tpu.memory_space<semaphore_mem>>)
    %c44_i32 = arith.constant 44 : i32
    %221 = arith.addi %0, %c44_i32 : i32
    %222 = arith.index_cast %221 : i32 to index
    %223 = memref.load %arg1[%222] : memref<128xi32, #tpu.memory_space<smem>>
    %c0_i32_132 = arith.constant 0 : i32
    %224 = tpu.memref_slice %arg2[%223, %c0_i32_132] : memref<64x128xf32, #tpu.memory_space<any>> -> memref<1x128xf32, #tpu.memory_space<any>>
    %c44_i32_133 = arith.constant 44 : i32
    %c0_i32_134 = arith.constant 0 : i32
    %225 = tpu.memref_slice %arg3[%c44_i32_133, %c0_i32_134] : memref<128x128xf32, #tpu.memory_space<vmem>> -> memref<1x128xf32, #tpu.memory_space<vmem>>
    tpu.enqueue_dma source(%224 : memref<1x128xf32, #tpu.memory_space<any>>) target(%225 : memref<1x128xf32, #tpu.memory_space<vmem>>) target_semaphore(%arg4 : memref<!tpu.dma_semaphore, #tpu.memory_space<semaphore_mem>>)
    %c45_i32 = arith.constant 45 : i32
    %226 = arith.addi %0, %c45_i32 : i32
    %227 = arith.index_cast %226 : i32 to index
    %228 = memref.load %arg1[%227] : memref<128xi32, #tpu.memory_space<smem>>
    %c0_i32_135 = arith.constant 0 : i32
    %229 = tpu.memref_slice %arg2[%228, %c0_i32_135] : memref<64x128xf32, #tpu.memory_space<any>> -> memref<1x128xf32, #tpu.memory_space<any>>
    %c45_i32_136 = arith.constant 45 : i32
    %c0_i32_137 = arith.constant 0 : i32
    %230 = tpu.memref_slice %arg3[%c45_i32_136, %c0_i32_137] : memref<128x128xf32, #tpu.memory_space<vmem>> -> memref<1x128xf32, #tpu.memory_space<vmem>>
    tpu.enqueue_dma source(%229 : memref<1x128xf32, #tpu.memory_space<any>>) target(%230 : memref<1x128xf32, #tpu.memory_space<vmem>>) target_semaphore(%arg4 : memref<!tpu.dma_semaphore, #tpu.memory_space<semaphore_mem>>)
    %c46_i32 = arith.constant 46 : i32
    %231 = arith.addi %0, %c46_i32 : i32
    %232 = arith.index_cast %231 : i32 to index
    %233 = memref.load %arg1[%232] : memref<128xi32, #tpu.memory_space<smem>>
    %c0_i32_138 = arith.constant 0 : i32
    %234 = tpu.memref_slice %arg2[%233, %c0_i32_138] : memref<64x128xf32, #tpu.memory_space<any>> -> memref<1x128xf32, #tpu.memory_space<any>>
    %c46_i32_139 = arith.constant 46 : i32
    %c0_i32_140 = arith.constant 0 : i32
    %235 = tpu.memref_slice %arg3[%c46_i32_139, %c0_i32_140] : memref<128x128xf32, #tpu.memory_space<vmem>> -> memref<1x128xf32, #tpu.memory_space<vmem>>
    tpu.enqueue_dma source(%234 : memref<1x128xf32, #tpu.memory_space<any>>) target(%235 : memref<1x128xf32, #tpu.memory_space<vmem>>) target_semaphore(%arg4 : memref<!tpu.dma_semaphore, #tpu.memory_space<semaphore_mem>>)
    %c47_i32 = arith.constant 47 : i32
    %236 = arith.addi %0, %c47_i32 : i32
    %237 = arith.index_cast %236 : i32 to index
    %238 = memref.load %arg1[%237] : memref<128xi32, #tpu.memory_space<smem>>
    %c0_i32_141 = arith.constant 0 : i32
    %239 = tpu.memref_slice %arg2[%238, %c0_i32_141] : memref<64x128xf32, #tpu.memory_space<any>> -> memref<1x128xf32, #tpu.memory_space<any>>
    %c47_i32_142 = arith.constant 47 : i32
    %c0_i32_143 = arith.constant 0 : i32
    %240 = tpu.memref_slice %arg3[%c47_i32_142, %c0_i32_143] : memref<128x128xf32, #tpu.memory_space<vmem>> -> memref<1x128xf32, #tpu.memory_space<vmem>>
    tpu.enqueue_dma source(%239 : memref<1x128xf32, #tpu.memory_space<any>>) target(%240 : memref<1x128xf32, #tpu.memory_space<vmem>>) target_semaphore(%arg4 : memref<!tpu.dma_semaphore, #tpu.memory_space<semaphore_mem>>)
    %c48_i32 = arith.constant 48 : i32
    %241 = arith.addi %0, %c48_i32 : i32
    %242 = arith.index_cast %241 : i32 to index
    %243 = memref.load %arg1[%242] : memref<128xi32, #tpu.memory_space<smem>>
    %c0_i32_144 = arith.constant 0 : i32
    %244 = tpu.memref_slice %arg2[%243, %c0_i32_144] : memref<64x128xf32, #tpu.memory_space<any>> -> memref<1x128xf32, #tpu.memory_space<any>>
    %c48_i32_145 = arith.constant 48 : i32
    %c0_i32_146 = arith.constant 0 : i32
    %245 = tpu.memref_slice %arg3[%c48_i32_145, %c0_i32_146] : memref<128x128xf32, #tpu.memory_space<vmem>> -> memref<1x128xf32, #tpu.memory_space<vmem>>
    tpu.enqueue_dma source(%244 : memref<1x128xf32, #tpu.memory_space<any>>) target(%245 : memref<1x128xf32, #tpu.memory_space<vmem>>) target_semaphore(%arg4 : memref<!tpu.dma_semaphore, #tpu.memory_space<semaphore_mem>>)
    %c49_i32 = arith.constant 49 : i32
    %246 = arith.addi %0, %c49_i32 : i32
    %247 = arith.index_cast %246 : i32 to index
    %248 = memref.load %arg1[%247] : memref<128xi32, #tpu.memory_space<smem>>
    %c0_i32_147 = arith.constant 0 : i32
    %249 = tpu.memref_slice %arg2[%248, %c0_i32_147] : memref<64x128xf32, #tpu.memory_space<any>> -> memref<1x128xf32, #tpu.memory_space<any>>
    %c49_i32_148 = arith.constant 49 : i32
    %c0_i32_149 = arith.constant 0 : i32
    %250 = tpu.memref_slice %arg3[%c49_i32_148, %c0_i32_149] : memref<128x128xf32, #tpu.memory_space<vmem>> -> memref<1x128xf32, #tpu.memory_space<vmem>>
    tpu.enqueue_dma source(%249 : memref<1x128xf32, #tpu.memory_space<any>>) target(%250 : memref<1x128xf32, #tpu.memory_space<vmem>>) target_semaphore(%arg4 : memref<!tpu.dma_semaphore, #tpu.memory_space<semaphore_mem>>)
    %c50_i32 = arith.constant 50 : i32
    %251 = arith.addi %0, %c50_i32 : i32
    %252 = arith.index_cast %251 : i32 to index
    %253 = memref.load %arg1[%252] : memref<128xi32, #tpu.memory_space<smem>>
    %c0_i32_150 = arith.constant 0 : i32
    %254 = tpu.memref_slice %arg2[%253, %c0_i32_150] : memref<64x128xf32, #tpu.memory_space<any>> -> memref<1x128xf32, #tpu.memory_space<any>>
    %c50_i32_151 = arith.constant 50 : i32
    %c0_i32_152 = arith.constant 0 : i32
    %255 = tpu.memref_slice %arg3[%c50_i32_151, %c0_i32_152] : memref<128x128xf32, #tpu.memory_space<vmem>> -> memref<1x128xf32, #tpu.memory_space<vmem>>
    tpu.enqueue_dma source(%254 : memref<1x128xf32, #tpu.memory_space<any>>) target(%255 : memref<1x128xf32, #tpu.memory_space<vmem>>) target_semaphore(%arg4 : memref<!tpu.dma_semaphore, #tpu.memory_space<semaphore_mem>>)
    %c51_i32 = arith.constant 51 : i32
    %256 = arith.addi %0, %c51_i32 : i32
    %257 = arith.index_cast %256 : i32 to index
    %258 = memref.load %arg1[%257] : memref<128xi32, #tpu.memory_space<smem>>
    %c0_i32_153 = arith.constant 0 : i32
    %259 = tpu.memref_slice %arg2[%258, %c0_i32_153] : memref<64x128xf32, #tpu.memory_space<any>> -> memref<1x128xf32, #tpu.memory_space<any>>
    %c51_i32_154 = arith.constant 51 : i32
    %c0_i32_155 = arith.constant 0 : i32
    %260 = tpu.memref_slice %arg3[%c51_i32_154, %c0_i32_155] : memref<128x128xf32, #tpu.memory_space<vmem>> -> memref<1x128xf32, #tpu.memory_space<vmem>>
    tpu.enqueue_dma source(%259 : memref<1x128xf32, #tpu.memory_space<any>>) target(%260 : memref<1x128xf32, #tpu.memory_space<vmem>>) target_semaphore(%arg4 : memref<!tpu.dma_semaphore, #tpu.memory_space<semaphore_mem>>)
    %c52_i32 = arith.constant 52 : i32
    %261 = arith.addi %0, %c52_i32 : i32
    %262 = arith.index_cast %261 : i32 to index
    %263 = memref.load %arg1[%262] : memref<128xi32, #tpu.memory_space<smem>>
    %c0_i32_156 = arith.constant 0 : i32
    %264 = tpu.memref_slice %arg2[%263, %c0_i32_156] : memref<64x128xf32, #tpu.memory_space<any>> -> memref<1x128xf32, #tpu.memory_space<any>>
    %c52_i32_157 = arith.constant 52 : i32
    %c0_i32_158 = arith.constant 0 : i32
    %265 = tpu.memref_slice %arg3[%c52_i32_157, %c0_i32_158] : memref<128x128xf32, #tpu.memory_space<vmem>> -> memref<1x128xf32, #tpu.memory_space<vmem>>
    tpu.enqueue_dma source(%264 : memref<1x128xf32, #tpu.memory_space<any>>) target(%265 : memref<1x128xf32, #tpu.memory_space<vmem>>) target_semaphore(%arg4 : memref<!tpu.dma_semaphore, #tpu.memory_space<semaphore_mem>>)
    %c53_i32 = arith.constant 53 : i32
    %266 = arith.addi %0, %c53_i32 : i32
    %267 = arith.index_cast %266 : i32 to index
    %268 = memref.load %arg1[%267] : memref<128xi32, #tpu.memory_space<smem>>
    %c0_i32_159 = arith.constant 0 : i32
    %269 = tpu.memref_slice %arg2[%268, %c0_i32_159] : memref<64x128xf32, #tpu.memory_space<any>> -> memref<1x128xf32, #tpu.memory_space<any>>
    %c53_i32_160 = arith.constant 53 : i32
    %c0_i32_161 = arith.constant 0 : i32
    %270 = tpu.memref_slice %arg3[%c53_i32_160, %c0_i32_161] : memref<128x128xf32, #tpu.memory_space<vmem>> -> memref<1x128xf32, #tpu.memory_space<vmem>>
    tpu.enqueue_dma source(%269 : memref<1x128xf32, #tpu.memory_space<any>>) target(%270 : memref<1x128xf32, #tpu.memory_space<vmem>>) target_semaphore(%arg4 : memref<!tpu.dma_semaphore, #tpu.memory_space<semaphore_mem>>)
    %c54_i32 = arith.constant 54 : i32
    %271 = arith.addi %0, %c54_i32 : i32
    %272 = arith.index_cast %271 : i32 to index
    %273 = memref.load %arg1[%272] : memref<128xi32, #tpu.memory_space<smem>>
    %c0_i32_162 = arith.constant 0 : i32
    %274 = tpu.memref_slice %arg2[%273, %c0_i32_162] : memref<64x128xf32, #tpu.memory_space<any>> -> memref<1x128xf32, #tpu.memory_space<any>>
    %c54_i32_163 = arith.constant 54 : i32
    %c0_i32_164 = arith.constant 0 : i32
    %275 = tpu.memref_slice %arg3[%c54_i32_163, %c0_i32_164] : memref<128x128xf32, #tpu.memory_space<vmem>> -> memref<1x128xf32, #tpu.memory_space<vmem>>
    tpu.enqueue_dma source(%274 : memref<1x128xf32, #tpu.memory_space<any>>) target(%275 : memref<1x128xf32, #tpu.memory_space<vmem>>) target_semaphore(%arg4 : memref<!tpu.dma_semaphore, #tpu.memory_space<semaphore_mem>>)
    %c55_i32 = arith.constant 55 : i32
    %276 = arith.addi %0, %c55_i32 : i32
    %277 = arith.index_cast %276 : i32 to index
    %278 = memref.load %arg1[%277] : memref<128xi32, #tpu.memory_space<smem>>
    %c0_i32_165 = arith.constant 0 : i32
    %279 = tpu.memref_slice %arg2[%278, %c0_i32_165] : memref<64x128xf32, #tpu.memory_space<any>> -> memref<1x128xf32, #tpu.memory_space<any>>
    %c55_i32_166 = arith.constant 55 : i32
    %c0_i32_167 = arith.constant 0 : i32
    %280 = tpu.memref_slice %arg3[%c55_i32_166, %c0_i32_167] : memref<128x128xf32, #tpu.memory_space<vmem>> -> memref<1x128xf32, #tpu.memory_space<vmem>>
    tpu.enqueue_dma source(%279 : memref<1x128xf32, #tpu.memory_space<any>>) target(%280 : memref<1x128xf32, #tpu.memory_space<vmem>>) target_semaphore(%arg4 : memref<!tpu.dma_semaphore, #tpu.memory_space<semaphore_mem>>)
    %c56_i32 = arith.constant 56 : i32
    %281 = arith.addi %0, %c56_i32 : i32
    %282 = arith.index_cast %281 : i32 to index
    %283 = memref.load %arg1[%282] : memref<128xi32, #tpu.memory_space<smem>>
    %c0_i32_168 = arith.constant 0 : i32
    %284 = tpu.memref_slice %arg2[%283, %c0_i32_168] : memref<64x128xf32, #tpu.memory_space<any>> -> memref<1x128xf32, #tpu.memory_space<any>>
    %c56_i32_169 = arith.constant 56 : i32
    %c0_i32_170 = arith.constant 0 : i32
    %285 = tpu.memref_slice %arg3[%c56_i32_169, %c0_i32_170] : memref<128x128xf32, #tpu.memory_space<vmem>> -> memref<1x128xf32, #tpu.memory_space<vmem>>
    tpu.enqueue_dma source(%284 : memref<1x128xf32, #tpu.memory_space<any>>) target(%285 : memref<1x128xf32, #tpu.memory_space<vmem>>) target_semaphore(%arg4 : memref<!tpu.dma_semaphore, #tpu.memory_space<semaphore_mem>>)
    %c57_i32 = arith.constant 57 : i32
    %286 = arith.addi %0, %c57_i32 : i32
    %287 = arith.index_cast %286 : i32 to index
    %288 = memref.load %arg1[%287] : memref<128xi32, #tpu.memory_space<smem>>
    %c0_i32_171 = arith.constant 0 : i32
    %289 = tpu.memref_slice %arg2[%288, %c0_i32_171] : memref<64x128xf32, #tpu.memory_space<any>> -> memref<1x128xf32, #tpu.memory_space<any>>
    %c57_i32_172 = arith.constant 57 : i32
    %c0_i32_173 = arith.constant 0 : i32
    %290 = tpu.memref_slice %arg3[%c57_i32_172, %c0_i32_173] : memref<128x128xf32, #tpu.memory_space<vmem>> -> memref<1x128xf32, #tpu.memory_space<vmem>>
    tpu.enqueue_dma source(%289 : memref<1x128xf32, #tpu.memory_space<any>>) target(%290 : memref<1x128xf32, #tpu.memory_space<vmem>>) target_semaphore(%arg4 : memref<!tpu.dma_semaphore, #tpu.memory_space<semaphore_mem>>)
    %c58_i32 = arith.constant 58 : i32
    %291 = arith.addi %0, %c58_i32 : i32
    %292 = arith.index_cast %291 : i32 to index
    %293 = memref.load %arg1[%292] : memref<128xi32, #tpu.memory_space<smem>>
    %c0_i32_174 = arith.constant 0 : i32
    %294 = tpu.memref_slice %arg2[%293, %c0_i32_174] : memref<64x128xf32, #tpu.memory_space<any>> -> memref<1x128xf32, #tpu.memory_space<any>>
    %c58_i32_175 = arith.constant 58 : i32
    %c0_i32_176 = arith.constant 0 : i32
    %295 = tpu.memref_slice %arg3[%c58_i32_175, %c0_i32_176] : memref<128x128xf32, #tpu.memory_space<vmem>> -> memref<1x128xf32, #tpu.memory_space<vmem>>
    tpu.enqueue_dma source(%294 : memref<1x128xf32, #tpu.memory_space<any>>) target(%295 : memref<1x128xf32, #tpu.memory_space<vmem>>) target_semaphore(%arg4 : memref<!tpu.dma_semaphore, #tpu.memory_space<semaphore_mem>>)
    %c59_i32 = arith.constant 59 : i32
    %296 = arith.addi %0, %c59_i32 : i32
    %297 = arith.index_cast %296 : i32 to index
    %298 = memref.load %arg1[%297] : memref<128xi32, #tpu.memory_space<smem>>
    %c0_i32_177 = arith.constant 0 : i32
    %299 = tpu.memref_slice %arg2[%298, %c0_i32_177] : memref<64x128xf32, #tpu.memory_space<any>> -> memref<1x128xf32, #tpu.memory_space<any>>
    %c59_i32_178 = arith.constant 59 : i32
    %c0_i32_179 = arith.constant 0 : i32
    %300 = tpu.memref_slice %arg3[%c59_i32_178, %c0_i32_179] : memref<128x128xf32, #tpu.memory_space<vmem>> -> memref<1x128xf32, #tpu.memory_space<vmem>>
    tpu.enqueue_dma source(%299 : memref<1x128xf32, #tpu.memory_space<any>>) target(%300 : memref<1x128xf32, #tpu.memory_space<vmem>>) target_semaphore(%arg4 : memref<!tpu.dma_semaphore, #tpu.memory_space<semaphore_mem>>)
    %c60_i32 = arith.constant 60 : i32
    %301 = arith.addi %0, %c60_i32 : i32
    %302 = arith.index_cast %301 : i32 to index
    %303 = memref.load %arg1[%302] : memref<128xi32, #tpu.memory_space<smem>>
    %c0_i32_180 = arith.constant 0 : i32
    %304 = tpu.memref_slice %arg2[%303, %c0_i32_180] : memref<64x128xf32, #tpu.memory_space<any>> -> memref<1x128xf32, #tpu.memory_space<any>>
    %c60_i32_181 = arith.constant 60 : i32
    %c0_i32_182 = arith.constant 0 : i32
    %305 = tpu.memref_slice %arg3[%c60_i32_181, %c0_i32_182] : memref<128x128xf32, #tpu.memory_space<vmem>> -> memref<1x128xf32, #tpu.memory_space<vmem>>
    tpu.enqueue_dma source(%304 : memref<1x128xf32, #tpu.memory_space<any>>) target(%305 : memref<1x128xf32, #tpu.memory_space<vmem>>) target_semaphore(%arg4 : memref<!tpu.dma_semaphore, #tpu.memory_space<semaphore_mem>>)
    %c61_i32 = arith.constant 61 : i32
    %306 = arith.addi %0, %c61_i32 : i32
    %307 = arith.index_cast %306 : i32 to index
    %308 = memref.load %arg1[%307] : memref<128xi32, #tpu.memory_space<smem>>
    %c0_i32_183 = arith.constant 0 : i32
    %309 = tpu.memref_slice %arg2[%308, %c0_i32_183] : memref<64x128xf32, #tpu.memory_space<any>> -> memref<1x128xf32, #tpu.memory_space<any>>
    %c61_i32_184 = arith.constant 61 : i32
    %c0_i32_185 = arith.constant 0 : i32
    %310 = tpu.memref_slice %arg3[%c61_i32_184, %c0_i32_185] : memref<128x128xf32, #tpu.memory_space<vmem>> -> memref<1x128xf32, #tpu.memory_space<vmem>>
    tpu.enqueue_dma source(%309 : memref<1x128xf32, #tpu.memory_space<any>>) target(%310 : memref<1x128xf32, #tpu.memory_space<vmem>>) target_semaphore(%arg4 : memref<!tpu.dma_semaphore, #tpu.memory_space<semaphore_mem>>)
    %c62_i32 = arith.constant 62 : i32
    %311 = arith.addi %0, %c62_i32 : i32
    %312 = arith.index_cast %311 : i32 to index
    %313 = memref.load %arg1[%312] : memref<128xi32, #tpu.memory_space<smem>>
    %c0_i32_186 = arith.constant 0 : i32
    %314 = tpu.memref_slice %arg2[%313, %c0_i32_186] : memref<64x128xf32, #tpu.memory_space<any>> -> memref<1x128xf32, #tpu.memory_space<any>>
    %c62_i32_187 = arith.constant 62 : i32
    %c0_i32_188 = arith.constant 0 : i32
    %315 = tpu.memref_slice %arg3[%c62_i32_187, %c0_i32_188] : memref<128x128xf32, #tpu.memory_space<vmem>> -> memref<1x128xf32, #tpu.memory_space<vmem>>
    tpu.enqueue_dma source(%314 : memref<1x128xf32, #tpu.memory_space<any>>) target(%315 : memref<1x128xf32, #tpu.memory_space<vmem>>) target_semaphore(%arg4 : memref<!tpu.dma_semaphore, #tpu.memory_space<semaphore_mem>>)
    %c63_i32 = arith.constant 63 : i32
    %316 = arith.addi %0, %c63_i32 : i32
    %317 = arith.index_cast %316 : i32 to index
    %318 = memref.load %arg1[%317] : memref<128xi32, #tpu.memory_space<smem>>
    %c0_i32_189 = arith.constant 0 : i32
    %319 = tpu.memref_slice %arg2[%318, %c0_i32_189] : memref<64x128xf32, #tpu.memory_space<any>> -> memref<1x128xf32, #tpu.memory_space<any>>
    %c63_i32_190 = arith.constant 63 : i32
    %c0_i32_191 = arith.constant 0 : i32
    %320 = tpu.memref_slice %arg3[%c63_i32_190, %c0_i32_191] : memref<128x128xf32, #tpu.memory_space<vmem>> -> memref<1x128xf32, #tpu.memory_space<vmem>>
    tpu.enqueue_dma source(%319 : memref<1x128xf32, #tpu.memory_space<any>>) target(%320 : memref<1x128xf32, #tpu.memory_space<vmem>>) target_semaphore(%arg4 : memref<!tpu.dma_semaphore, #tpu.memory_space<semaphore_mem>>)
    %c64_i32 = arith.constant 64 : i32
    %321 = arith.addi %0, %c64_i32 : i32
    %322 = arith.index_cast %321 : i32 to index
    %323 = memref.load %arg1[%322] : memref<128xi32, #tpu.memory_space<smem>>
    %c0_i32_192 = arith.constant 0 : i32
    %324 = tpu.memref_slice %arg2[%323, %c0_i32_192] : memref<64x128xf32, #tpu.memory_space<any>> -> memref<1x128xf32, #tpu.memory_space<any>>
    %c64_i32_193 = arith.constant 64 : i32
    %c0_i32_194 = arith.constant 0 : i32
    %325 = tpu.memref_slice %arg3[%c64_i32_193, %c0_i32_194] : memref<128x128xf32, #tpu.memory_space<vmem>> -> memref<1x128xf32, #tpu.memory_space<vmem>>
    tpu.enqueue_dma source(%324 : memref<1x128xf32, #tpu.memory_space<any>>) target(%325 : memref<1x128xf32, #tpu.memory_space<vmem>>) target_semaphore(%arg4 : memref<!tpu.dma_semaphore, #tpu.memory_space<semaphore_mem>>)
    %c65_i32 = arith.constant 65 : i32
    %326 = arith.addi %0, %c65_i32 : i32
    %327 = arith.index_cast %326 : i32 to index
    %328 = memref.load %arg1[%327] : memref<128xi32, #tpu.memory_space<smem>>
    %c0_i32_195 = arith.constant 0 : i32
    %329 = tpu.memref_slice %arg2[%328, %c0_i32_195] : memref<64x128xf32, #tpu.memory_space<any>> -> memref<1x128xf32, #tpu.memory_space<any>>
    %c65_i32_196 = arith.constant 65 : i32
    %c0_i32_197 = arith.constant 0 : i32
    %330 = tpu.memref_slice %arg3[%c65_i32_196, %c0_i32_197] : memref<128x128xf32, #tpu.memory_space<vmem>> -> memref<1x128xf32, #tpu.memory_space<vmem>>
    tpu.enqueue_dma source(%329 : memref<1x128xf32, #tpu.memory_space<any>>) target(%330 : memref<1x128xf32, #tpu.memory_space<vmem>>) target_semaphore(%arg4 : memref<!tpu.dma_semaphore, #tpu.memory_space<semaphore_mem>>)
    %c66_i32 = arith.constant 66 : i32
    %331 = arith.addi %0, %c66_i32 : i32
    %332 = arith.index_cast %331 : i32 to index
    %333 = memref.load %arg1[%332] : memref<128xi32, #tpu.memory_space<smem>>
    %c0_i32_198 = arith.constant 0 : i32
    %334 = tpu.memref_slice %arg2[%333, %c0_i32_198] : memref<64x128xf32, #tpu.memory_space<any>> -> memref<1x128xf32, #tpu.memory_space<any>>
    %c66_i32_199 = arith.constant 66 : i32
    %c0_i32_200 = arith.constant 0 : i32
    %335 = tpu.memref_slice %arg3[%c66_i32_199, %c0_i32_200] : memref<128x128xf32, #tpu.memory_space<vmem>> -> memref<1x128xf32, #tpu.memory_space<vmem>>
    tpu.enqueue_dma source(%334 : memref<1x128xf32, #tpu.memory_space<any>>) target(%335 : memref<1x128xf32, #tpu.memory_space<vmem>>) target_semaphore(%arg4 : memref<!tpu.dma_semaphore, #tpu.memory_space<semaphore_mem>>)
    %c67_i32 = arith.constant 67 : i32
    %336 = arith.addi %0, %c67_i32 : i32
    %337 = arith.index_cast %336 : i32 to index
    %338 = memref.load %arg1[%337] : memref<128xi32, #tpu.memory_space<smem>>
    %c0_i32_201 = arith.constant 0 : i32
    %339 = tpu.memref_slice %arg2[%338, %c0_i32_201] : memref<64x128xf32, #tpu.memory_space<any>> -> memref<1x128xf32, #tpu.memory_space<any>>
    %c67_i32_202 = arith.constant 67 : i32
    %c0_i32_203 = arith.constant 0 : i32
    %340 = tpu.memref_slice %arg3[%c67_i32_202, %c0_i32_203] : memref<128x128xf32, #tpu.memory_space<vmem>> -> memref<1x128xf32, #tpu.memory_space<vmem>>
    tpu.enqueue_dma source(%339 : memref<1x128xf32, #tpu.memory_space<any>>) target(%340 : memref<1x128xf32, #tpu.memory_space<vmem>>) target_semaphore(%arg4 : memref<!tpu.dma_semaphore, #tpu.memory_space<semaphore_mem>>)
    %c68_i32 = arith.constant 68 : i32
    %341 = arith.addi %0, %c68_i32 : i32
    %342 = arith.index_cast %341 : i32 to index
    %343 = memref.load %arg1[%342] : memref<128xi32, #tpu.memory_space<smem>>
    %c0_i32_204 = arith.constant 0 : i32
    %344 = tpu.memref_slice %arg2[%343, %c0_i32_204] : memref<64x128xf32, #tpu.memory_space<any>> -> memref<1x128xf32, #tpu.memory_space<any>>
    %c68_i32_205 = arith.constant 68 : i32
    %c0_i32_206 = arith.constant 0 : i32
    %345 = tpu.memref_slice %arg3[%c68_i32_205, %c0_i32_206] : memref<128x128xf32, #tpu.memory_space<vmem>> -> memref<1x128xf32, #tpu.memory_space<vmem>>
    tpu.enqueue_dma source(%344 : memref<1x128xf32, #tpu.memory_space<any>>) target(%345 : memref<1x128xf32, #tpu.memory_space<vmem>>) target_semaphore(%arg4 : memref<!tpu.dma_semaphore, #tpu.memory_space<semaphore_mem>>)
    %c69_i32 = arith.constant 69 : i32
    %346 = arith.addi %0, %c69_i32 : i32
    %347 = arith.index_cast %346 : i32 to index
    %348 = memref.load %arg1[%347] : memref<128xi32, #tpu.memory_space<smem>>
    %c0_i32_207 = arith.constant 0 : i32
    %349 = tpu.memref_slice %arg2[%348, %c0_i32_207] : memref<64x128xf32, #tpu.memory_space<any>> -> memref<1x128xf32, #tpu.memory_space<any>>
    %c69_i32_208 = arith.constant 69 : i32
    %c0_i32_209 = arith.constant 0 : i32
    %350 = tpu.memref_slice %arg3[%c69_i32_208, %c0_i32_209] : memref<128x128xf32, #tpu.memory_space<vmem>> -> memref<1x128xf32, #tpu.memory_space<vmem>>
    tpu.enqueue_dma source(%349 : memref<1x128xf32, #tpu.memory_space<any>>) target(%350 : memref<1x128xf32, #tpu.memory_space<vmem>>) target_semaphore(%arg4 : memref<!tpu.dma_semaphore, #tpu.memory_space<semaphore_mem>>)
    %c70_i32 = arith.constant 70 : i32
    %351 = arith.addi %0, %c70_i32 : i32
    %352 = arith.index_cast %351 : i32 to index
    %353 = memref.load %arg1[%352] : memref<128xi32, #tpu.memory_space<smem>>
    %c0_i32_210 = arith.constant 0 : i32
    %354 = tpu.memref_slice %arg2[%353, %c0_i32_210] : memref<64x128xf32, #tpu.memory_space<any>> -> memref<1x128xf32, #tpu.memory_space<any>>
    %c70_i32_211 = arith.constant 70 : i32
    %c0_i32_212 = arith.constant 0 : i32
    %355 = tpu.memref_slice %arg3[%c70_i32_211, %c0_i32_212] : memref<128x128xf32, #tpu.memory_space<vmem>> -> memref<1x128xf32, #tpu.memory_space<vmem>>
    tpu.enqueue_dma source(%354 : memref<1x128xf32, #tpu.memory_space<any>>) target(%355 : memref<1x128xf32, #tpu.memory_space<vmem>>) target_semaphore(%arg4 : memref<!tpu.dma_semaphore, #tpu.memory_space<semaphore_mem>>)
    %c71_i32 = arith.constant 71 : i32
    %356 = arith.addi %0, %c71_i32 : i32
    %357 = arith.index_cast %356 : i32 to index
    %358 = memref.load %arg1[%357] : memref<128xi32, #tpu.memory_space<smem>>
    %c0_i32_213 = arith.constant 0 : i32
    %359 = tpu.memref_slice %arg2[%358, %c0_i32_213] : memref<64x128xf32, #tpu.memory_space<any>> -> memref<1x128xf32, #tpu.memory_space<any>>
    %c71_i32_214 = arith.constant 71 : i32
    %c0_i32_215 = arith.constant 0 : i32
    %360 = tpu.memref_slice %arg3[%c71_i32_214, %c0_i32_215] : memref<128x128xf32, #tpu.memory_space<vmem>> -> memref<1x128xf32, #tpu.memory_space<vmem>>
    tpu.enqueue_dma source(%359 : memref<1x128xf32, #tpu.memory_space<any>>) target(%360 : memref<1x128xf32, #tpu.memory_space<vmem>>) target_semaphore(%arg4 : memref<!tpu.dma_semaphore, #tpu.memory_space<semaphore_mem>>)
    %c72_i32 = arith.constant 72 : i32
    %361 = arith.addi %0, %c72_i32 : i32
    %362 = arith.index_cast %361 : i32 to index
    %363 = memref.load %arg1[%362] : memref<128xi32, #tpu.memory_space<smem>>
    %c0_i32_216 = arith.constant 0 : i32
    %364 = tpu.memref_slice %arg2[%363, %c0_i32_216] : memref<64x128xf32, #tpu.memory_space<any>> -> memref<1x128xf32, #tpu.memory_space<any>>
    %c72_i32_217 = arith.constant 72 : i32
    %c0_i32_218 = arith.constant 0 : i32
    %365 = tpu.memref_slice %arg3[%c72_i32_217, %c0_i32_218] : memref<128x128xf32, #tpu.memory_space<vmem>> -> memref<1x128xf32, #tpu.memory_space<vmem>>
    tpu.enqueue_dma source(%364 : memref<1x128xf32, #tpu.memory_space<any>>) target(%365 : memref<1x128xf32, #tpu.memory_space<vmem>>) target_semaphore(%arg4 : memref<!tpu.dma_semaphore, #tpu.memory_space<semaphore_mem>>)
    %c73_i32 = arith.constant 73 : i32
    %366 = arith.addi %0, %c73_i32 : i32
    %367 = arith.index_cast %366 : i32 to index
    %368 = memref.load %arg1[%367] : memref<128xi32, #tpu.memory_space<smem>>
    %c0_i32_219 = arith.constant 0 : i32
    %369 = tpu.memref_slice %arg2[%368, %c0_i32_219] : memref<64x128xf32, #tpu.memory_space<any>> -> memref<1x128xf32, #tpu.memory_space<any>>
    %c73_i32_220 = arith.constant 73 : i32
    %c0_i32_221 = arith.constant 0 : i32
    %370 = tpu.memref_slice %arg3[%c73_i32_220, %c0_i32_221] : memref<128x128xf32, #tpu.memory_space<vmem>> -> memref<1x128xf32, #tpu.memory_space<vmem>>
    tpu.enqueue_dma source(%369 : memref<1x128xf32, #tpu.memory_space<any>>) target(%370 : memref<1x128xf32, #tpu.memory_space<vmem>>) target_semaphore(%arg4 : memref<!tpu.dma_semaphore, #tpu.memory_space<semaphore_mem>>)
    %c74_i32 = arith.constant 74 : i32
    %371 = arith.addi %0, %c74_i32 : i32
    %372 = arith.index_cast %371 : i32 to index
    %373 = memref.load %arg1[%372] : memref<128xi32, #tpu.memory_space<smem>>
    %c0_i32_222 = arith.constant 0 : i32
    %374 = tpu.memref_slice %arg2[%373, %c0_i32_222] : memref<64x128xf32, #tpu.memory_space<any>> -> memref<1x128xf32, #tpu.memory_space<any>>
    %c74_i32_223 = arith.constant 74 : i32
    %c0_i32_224 = arith.constant 0 : i32
    %375 = tpu.memref_slice %arg3[%c74_i32_223, %c0_i32_224] : memref<128x128xf32, #tpu.memory_space<vmem>> -> memref<1x128xf32, #tpu.memory_space<vmem>>
    tpu.enqueue_dma source(%374 : memref<1x128xf32, #tpu.memory_space<any>>) target(%375 : memref<1x128xf32, #tpu.memory_space<vmem>>) target_semaphore(%arg4 : memref<!tpu.dma_semaphore, #tpu.memory_space<semaphore_mem>>)
    %c75_i32 = arith.constant 75 : i32
    %376 = arith.addi %0, %c75_i32 : i32
    %377 = arith.index_cast %376 : i32 to index
    %378 = memref.load %arg1[%377] : memref<128xi32, #tpu.memory_space<smem>>
    %c0_i32_225 = arith.constant 0 : i32
    %379 = tpu.memref_slice %arg2[%378, %c0_i32_225] : memref<64x128xf32, #tpu.memory_space<any>> -> memref<1x128xf32, #tpu.memory_space<any>>
    %c75_i32_226 = arith.constant 75 : i32
    %c0_i32_227 = arith.constant 0 : i32
    %380 = tpu.memref_slice %arg3[%c75_i32_226, %c0_i32_227] : memref<128x128xf32, #tpu.memory_space<vmem>> -> memref<1x128xf32, #tpu.memory_space<vmem>>
    tpu.enqueue_dma source(%379 : memref<1x128xf32, #tpu.memory_space<any>>) target(%380 : memref<1x128xf32, #tpu.memory_space<vmem>>) target_semaphore(%arg4 : memref<!tpu.dma_semaphore, #tpu.memory_space<semaphore_mem>>)
    %c76_i32 = arith.constant 76 : i32
    %381 = arith.addi %0, %c76_i32 : i32
    %382 = arith.index_cast %381 : i32 to index
    %383 = memref.load %arg1[%382] : memref<128xi32, #tpu.memory_space<smem>>
    %c0_i32_228 = arith.constant 0 : i32
    %384 = tpu.memref_slice %arg2[%383, %c0_i32_228] : memref<64x128xf32, #tpu.memory_space<any>> -> memref<1x128xf32, #tpu.memory_space<any>>
    %c76_i32_229 = arith.constant 76 : i32
    %c0_i32_230 = arith.constant 0 : i32
    %385 = tpu.memref_slice %arg3[%c76_i32_229, %c0_i32_230] : memref<128x128xf32, #tpu.memory_space<vmem>> -> memref<1x128xf32, #tpu.memory_space<vmem>>
    tpu.enqueue_dma source(%384 : memref<1x128xf32, #tpu.memory_space<any>>) target(%385 : memref<1x128xf32, #tpu.memory_space<vmem>>) target_semaphore(%arg4 : memref<!tpu.dma_semaphore, #tpu.memory_space<semaphore_mem>>)
    %c77_i32 = arith.constant 77 : i32
    %386 = arith.addi %0, %c77_i32 : i32
    %387 = arith.index_cast %386 : i32 to index
    %388 = memref.load %arg1[%387] : memref<128xi32, #tpu.memory_space<smem>>
    %c0_i32_231 = arith.constant 0 : i32
    %389 = tpu.memref_slice %arg2[%388, %c0_i32_231] : memref<64x128xf32, #tpu.memory_space<any>> -> memref<1x128xf32, #tpu.memory_space<any>>
    %c77_i32_232 = arith.constant 77 : i32
    %c0_i32_233 = arith.constant 0 : i32
    %390 = tpu.memref_slice %arg3[%c77_i32_232, %c0_i32_233] : memref<128x128xf32, #tpu.memory_space<vmem>> -> memref<1x128xf32, #tpu.memory_space<vmem>>
    tpu.enqueue_dma source(%389 : memref<1x128xf32, #tpu.memory_space<any>>) target(%390 : memref<1x128xf32, #tpu.memory_space<vmem>>) target_semaphore(%arg4 : memref<!tpu.dma_semaphore, #tpu.memory_space<semaphore_mem>>)
    %c78_i32 = arith.constant 78 : i32
    %391 = arith.addi %0, %c78_i32 : i32
    %392 = arith.index_cast %391 : i32 to index
    %393 = memref.load %arg1[%392] : memref<128xi32, #tpu.memory_space<smem>>
    %c0_i32_234 = arith.constant 0 : i32
    %394 = tpu.memref_slice %arg2[%393, %c0_i32_234] : memref<64x128xf32, #tpu.memory_space<any>> -> memref<1x128xf32, #tpu.memory_space<any>>
    %c78_i32_235 = arith.constant 78 : i32
    %c0_i32_236 = arith.constant 0 : i32
    %395 = tpu.memref_slice %arg3[%c78_i32_235, %c0_i32_236] : memref<128x128xf32, #tpu.memory_space<vmem>> -> memref<1x128xf32, #tpu.memory_space<vmem>>
    tpu.enqueue_dma source(%394 : memref<1x128xf32, #tpu.memory_space<any>>) target(%395 : memref<1x128xf32, #tpu.memory_space<vmem>>) target_semaphore(%arg4 : memref<!tpu.dma_semaphore, #tpu.memory_space<semaphore_mem>>)
    %c79_i32 = arith.constant 79 : i32
    %396 = arith.addi %0, %c79_i32 : i32
    %397 = arith.index_cast %396 : i32 to index
    %398 = memref.load %arg1[%397] : memref<128xi32, #tpu.memory_space<smem>>
    %c0_i32_237 = arith.constant 0 : i32
    %399 = tpu.memref_slice %arg2[%398, %c0_i32_237] : memref<64x128xf32, #tpu.memory_space<any>> -> memref<1x128xf32, #tpu.memory_space<any>>
    %c79_i32_238 = arith.constant 79 : i32
    %c0_i32_239 = arith.constant 0 : i32
    %400 = tpu.memref_slice %arg3[%c79_i32_238, %c0_i32_239] : memref<128x128xf32, #tpu.memory_space<vmem>> -> memref<1x128xf32, #tpu.memory_space<vmem>>
    tpu.enqueue_dma source(%399 : memref<1x128xf32, #tpu.memory_space<any>>) target(%400 : memref<1x128xf32, #tpu.memory_space<vmem>>) target_semaphore(%arg4 : memref<!tpu.dma_semaphore, #tpu.memory_space<semaphore_mem>>)
    %c80_i32 = arith.constant 80 : i32
    %401 = arith.addi %0, %c80_i32 : i32
    %402 = arith.index_cast %401 : i32 to index
    %403 = memref.load %arg1[%402] : memref<128xi32, #tpu.memory_space<smem>>
    %c0_i32_240 = arith.constant 0 : i32
    %404 = tpu.memref_slice %arg2[%403, %c0_i32_240] : memref<64x128xf32, #tpu.memory_space<any>> -> memref<1x128xf32, #tpu.memory_space<any>>
    %c80_i32_241 = arith.constant 80 : i32
    %c0_i32_242 = arith.constant 0 : i32
    %405 = tpu.memref_slice %arg3[%c80_i32_241, %c0_i32_242] : memref<128x128xf32, #tpu.memory_space<vmem>> -> memref<1x128xf32, #tpu.memory_space<vmem>>
    tpu.enqueue_dma source(%404 : memref<1x128xf32, #tpu.memory_space<any>>) target(%405 : memref<1x128xf32, #tpu.memory_space<vmem>>) target_semaphore(%arg4 : memref<!tpu.dma_semaphore, #tpu.memory_space<semaphore_mem>>)
    %c81_i32 = arith.constant 81 : i32
    %406 = arith.addi %0, %c81_i32 : i32
    %407 = arith.index_cast %406 : i32 to index
    %408 = memref.load %arg1[%407] : memref<128xi32, #tpu.memory_space<smem>>
    %c0_i32_243 = arith.constant 0 : i32
    %409 = tpu.memref_slice %arg2[%408, %c0_i32_243] : memref<64x128xf32, #tpu.memory_space<any>> -> memref<1x128xf32, #tpu.memory_space<any>>
    %c81_i32_244 = arith.constant 81 : i32
    %c0_i32_245 = arith.constant 0 : i32
    %410 = tpu.memref_slice %arg3[%c81_i32_244, %c0_i32_245] : memref<128x128xf32, #tpu.memory_space<vmem>> -> memref<1x128xf32, #tpu.memory_space<vmem>>
    tpu.enqueue_dma source(%409 : memref<1x128xf32, #tpu.memory_space<any>>) target(%410 : memref<1x128xf32, #tpu.memory_space<vmem>>) target_semaphore(%arg4 : memref<!tpu.dma_semaphore, #tpu.memory_space<semaphore_mem>>)
    %c82_i32 = arith.constant 82 : i32
    %411 = arith.addi %0, %c82_i32 : i32
    %412 = arith.index_cast %411 : i32 to index
    %413 = memref.load %arg1[%412] : memref<128xi32, #tpu.memory_space<smem>>
    %c0_i32_246 = arith.constant 0 : i32
    %414 = tpu.memref_slice %arg2[%413, %c0_i32_246] : memref<64x128xf32, #tpu.memory_space<any>> -> memref<1x128xf32, #tpu.memory_space<any>>
    %c82_i32_247 = arith.constant 82 : i32
    %c0_i32_248 = arith.constant 0 : i32
    %415 = tpu.memref_slice %arg3[%c82_i32_247, %c0_i32_248] : memref<128x128xf32, #tpu.memory_space<vmem>> -> memref<1x128xf32, #tpu.memory_space<vmem>>
    tpu.enqueue_dma source(%414 : memref<1x128xf32, #tpu.memory_space<any>>) target(%415 : memref<1x128xf32, #tpu.memory_space<vmem>>) target_semaphore(%arg4 : memref<!tpu.dma_semaphore, #tpu.memory_space<semaphore_mem>>)
    %c83_i32 = arith.constant 83 : i32
    %416 = arith.addi %0, %c83_i32 : i32
    %417 = arith.index_cast %416 : i32 to index
    %418 = memref.load %arg1[%417] : memref<128xi32, #tpu.memory_space<smem>>
    %c0_i32_249 = arith.constant 0 : i32
    %419 = tpu.memref_slice %arg2[%418, %c0_i32_249] : memref<64x128xf32, #tpu.memory_space<any>> -> memref<1x128xf32, #tpu.memory_space<any>>
    %c83_i32_250 = arith.constant 83 : i32
    %c0_i32_251 = arith.constant 0 : i32
    %420 = tpu.memref_slice %arg3[%c83_i32_250, %c0_i32_251] : memref<128x128xf32, #tpu.memory_space<vmem>> -> memref<1x128xf32, #tpu.memory_space<vmem>>
    tpu.enqueue_dma source(%419 : memref<1x128xf32, #tpu.memory_space<any>>) target(%420 : memref<1x128xf32, #tpu.memory_space<vmem>>) target_semaphore(%arg4 : memref<!tpu.dma_semaphore, #tpu.memory_space<semaphore_mem>>)
    %c84_i32 = arith.constant 84 : i32
    %421 = arith.addi %0, %c84_i32 : i32
    %422 = arith.index_cast %421 : i32 to index
    %423 = memref.load %arg1[%422] : memref<128xi32, #tpu.memory_space<smem>>
    %c0_i32_252 = arith.constant 0 : i32
    %424 = tpu.memref_slice %arg2[%423, %c0_i32_252] : memref<64x128xf32, #tpu.memory_space<any>> -> memref<1x128xf32, #tpu.memory_space<any>>
    %c84_i32_253 = arith.constant 84 : i32
    %c0_i32_254 = arith.constant 0 : i32
    %425 = tpu.memref_slice %arg3[%c84_i32_253, %c0_i32_254] : memref<128x128xf32, #tpu.memory_space<vmem>> -> memref<1x128xf32, #tpu.memory_space<vmem>>
    tpu.enqueue_dma source(%424 : memref<1x128xf32, #tpu.memory_space<any>>) target(%425 : memref<1x128xf32, #tpu.memory_space<vmem>>) target_semaphore(%arg4 : memref<!tpu.dma_semaphore, #tpu.memory_space<semaphore_mem>>)
    %c85_i32 = arith.constant 85 : i32
    %426 = arith.addi %0, %c85_i32 : i32
    %427 = arith.index_cast %426 : i32 to index
    %428 = memref.load %arg1[%427] : memref<128xi32, #tpu.memory_space<smem>>
    %c0_i32_255 = arith.constant 0 : i32
    %429 = tpu.memref_slice %arg2[%428, %c0_i32_255] : memref<64x128xf32, #tpu.memory_space<any>> -> memref<1x128xf32, #tpu.memory_space<any>>
    %c85_i32_256 = arith.constant 85 : i32
    %c0_i32_257 = arith.constant 0 : i32
    %430 = tpu.memref_slice %arg3[%c85_i32_256, %c0_i32_257] : memref<128x128xf32, #tpu.memory_space<vmem>> -> memref<1x128xf32, #tpu.memory_space<vmem>>
    tpu.enqueue_dma source(%429 : memref<1x128xf32, #tpu.memory_space<any>>) target(%430 : memref<1x128xf32, #tpu.memory_space<vmem>>) target_semaphore(%arg4 : memref<!tpu.dma_semaphore, #tpu.memory_space<semaphore_mem>>)
    %c86_i32 = arith.constant 86 : i32
    %431 = arith.addi %0, %c86_i32 : i32
    %432 = arith.index_cast %431 : i32 to index
    %433 = memref.load %arg1[%432] : memref<128xi32, #tpu.memory_space<smem>>
    %c0_i32_258 = arith.constant 0 : i32
    %434 = tpu.memref_slice %arg2[%433, %c0_i32_258] : memref<64x128xf32, #tpu.memory_space<any>> -> memref<1x128xf32, #tpu.memory_space<any>>
    %c86_i32_259 = arith.constant 86 : i32
    %c0_i32_260 = arith.constant 0 : i32
    %435 = tpu.memref_slice %arg3[%c86_i32_259, %c0_i32_260] : memref<128x128xf32, #tpu.memory_space<vmem>> -> memref<1x128xf32, #tpu.memory_space<vmem>>
    tpu.enqueue_dma source(%434 : memref<1x128xf32, #tpu.memory_space<any>>) target(%435 : memref<1x128xf32, #tpu.memory_space<vmem>>) target_semaphore(%arg4 : memref<!tpu.dma_semaphore, #tpu.memory_space<semaphore_mem>>)
    %c87_i32 = arith.constant 87 : i32
    %436 = arith.addi %0, %c87_i32 : i32
    %437 = arith.index_cast %436 : i32 to index
    %438 = memref.load %arg1[%437] : memref<128xi32, #tpu.memory_space<smem>>
    %c0_i32_261 = arith.constant 0 : i32
    %439 = tpu.memref_slice %arg2[%438, %c0_i32_261] : memref<64x128xf32, #tpu.memory_space<any>> -> memref<1x128xf32, #tpu.memory_space<any>>
    %c87_i32_262 = arith.constant 87 : i32
    %c0_i32_263 = arith.constant 0 : i32
    %440 = tpu.memref_slice %arg3[%c87_i32_262, %c0_i32_263] : memref<128x128xf32, #tpu.memory_space<vmem>> -> memref<1x128xf32, #tpu.memory_space<vmem>>
    tpu.enqueue_dma source(%439 : memref<1x128xf32, #tpu.memory_space<any>>) target(%440 : memref<1x128xf32, #tpu.memory_space<vmem>>) target_semaphore(%arg4 : memref<!tpu.dma_semaphore, #tpu.memory_space<semaphore_mem>>)
    %c88_i32 = arith.constant 88 : i32
    %441 = arith.addi %0, %c88_i32 : i32
    %442 = arith.index_cast %441 : i32 to index
    %443 = memref.load %arg1[%442] : memref<128xi32, #tpu.memory_space<smem>>
    %c0_i32_264 = arith.constant 0 : i32
    %444 = tpu.memref_slice %arg2[%443, %c0_i32_264] : memref<64x128xf32, #tpu.memory_space<any>> -> memref<1x128xf32, #tpu.memory_space<any>>
    %c88_i32_265 = arith.constant 88 : i32
    %c0_i32_266 = arith.constant 0 : i32
    %445 = tpu.memref_slice %arg3[%c88_i32_265, %c0_i32_266] : memref<128x128xf32, #tpu.memory_space<vmem>> -> memref<1x128xf32, #tpu.memory_space<vmem>>
    tpu.enqueue_dma source(%444 : memref<1x128xf32, #tpu.memory_space<any>>) target(%445 : memref<1x128xf32, #tpu.memory_space<vmem>>) target_semaphore(%arg4 : memref<!tpu.dma_semaphore, #tpu.memory_space<semaphore_mem>>)
    %c89_i32 = arith.constant 89 : i32
    %446 = arith.addi %0, %c89_i32 : i32
    %447 = arith.index_cast %446 : i32 to index
    %448 = memref.load %arg1[%447] : memref<128xi32, #tpu.memory_space<smem>>
    %c0_i32_267 = arith.constant 0 : i32
    %449 = tpu.memref_slice %arg2[%448, %c0_i32_267] : memref<64x128xf32, #tpu.memory_space<any>> -> memref<1x128xf32, #tpu.memory_space<any>>
    %c89_i32_268 = arith.constant 89 : i32
    %c0_i32_269 = arith.constant 0 : i32
    %450 = tpu.memref_slice %arg3[%c89_i32_268, %c0_i32_269] : memref<128x128xf32, #tpu.memory_space<vmem>> -> memref<1x128xf32, #tpu.memory_space<vmem>>
    tpu.enqueue_dma source(%449 : memref<1x128xf32, #tpu.memory_space<any>>) target(%450 : memref<1x128xf32, #tpu.memory_space<vmem>>) target_semaphore(%arg4 : memref<!tpu.dma_semaphore, #tpu.memory_space<semaphore_mem>>)
    %c90_i32 = arith.constant 90 : i32
    %451 = arith.addi %0, %c90_i32 : i32
    %452 = arith.index_cast %451 : i32 to index
    %453 = memref.load %arg1[%452] : memref<128xi32, #tpu.memory_space<smem>>
    %c0_i32_270 = arith.constant 0 : i32
    %454 = tpu.memref_slice %arg2[%453, %c0_i32_270] : memref<64x128xf32, #tpu.memory_space<any>> -> memref<1x128xf32, #tpu.memory_space<any>>
    %c90_i32_271 = arith.constant 90 : i32
    %c0_i32_272 = arith.constant 0 : i32
    %455 = tpu.memref_slice %arg3[%c90_i32_271, %c0_i32_272] : memref<128x128xf32, #tpu.memory_space<vmem>> -> memref<1x128xf32, #tpu.memory_space<vmem>>
    tpu.enqueue_dma source(%454 : memref<1x128xf32, #tpu.memory_space<any>>) target(%455 : memref<1x128xf32, #tpu.memory_space<vmem>>) target_semaphore(%arg4 : memref<!tpu.dma_semaphore, #tpu.memory_space<semaphore_mem>>)
    %c91_i32 = arith.constant 91 : i32
    %456 = arith.addi %0, %c91_i32 : i32
    %457 = arith.index_cast %456 : i32 to index
    %458 = memref.load %arg1[%457] : memref<128xi32, #tpu.memory_space<smem>>
    %c0_i32_273 = arith.constant 0 : i32
    %459 = tpu.memref_slice %arg2[%458, %c0_i32_273] : memref<64x128xf32, #tpu.memory_space<any>> -> memref<1x128xf32, #tpu.memory_space<any>>
    %c91_i32_274 = arith.constant 91 : i32
    %c0_i32_275 = arith.constant 0 : i32
    %460 = tpu.memref_slice %arg3[%c91_i32_274, %c0_i32_275] : memref<128x128xf32, #tpu.memory_space<vmem>> -> memref<1x128xf32, #tpu.memory_space<vmem>>
    tpu.enqueue_dma source(%459 : memref<1x128xf32, #tpu.memory_space<any>>) target(%460 : memref<1x128xf32, #tpu.memory_space<vmem>>) target_semaphore(%arg4 : memref<!tpu.dma_semaphore, #tpu.memory_space<semaphore_mem>>)
    %c92_i32 = arith.constant 92 : i32
    %461 = arith.addi %0, %c92_i32 : i32
    %462 = arith.index_cast %461 : i32 to index
    %463 = memref.load %arg1[%462] : memref<128xi32, #tpu.memory_space<smem>>
    %c0_i32_276 = arith.constant 0 : i32
    %464 = tpu.memref_slice %arg2[%463, %c0_i32_276] : memref<64x128xf32, #tpu.memory_space<any>> -> memref<1x128xf32, #tpu.memory_space<any>>
    %c92_i32_277 = arith.constant 92 : i32
    %c0_i32_278 = arith.constant 0 : i32
    %465 = tpu.memref_slice %arg3[%c92_i32_277, %c0_i32_278] : memref<128x128xf32, #tpu.memory_space<vmem>> -> memref<1x128xf32, #tpu.memory_space<vmem>>
    tpu.enqueue_dma source(%464 : memref<1x128xf32, #tpu.memory_space<any>>) target(%465 : memref<1x128xf32, #tpu.memory_space<vmem>>) target_semaphore(%arg4 : memref<!tpu.dma_semaphore, #tpu.memory_space<semaphore_mem>>)
    %c93_i32 = arith.constant 93 : i32
    %466 = arith.addi %0, %c93_i32 : i32
    %467 = arith.index_cast %466 : i32 to index
    %468 = memref.load %arg1[%467] : memref<128xi32, #tpu.memory_space<smem>>
    %c0_i32_279 = arith.constant 0 : i32
    %469 = tpu.memref_slice %arg2[%468, %c0_i32_279] : memref<64x128xf32, #tpu.memory_space<any>> -> memref<1x128xf32, #tpu.memory_space<any>>
    %c93_i32_280 = arith.constant 93 : i32
    %c0_i32_281 = arith.constant 0 : i32
    %470 = tpu.memref_slice %arg3[%c93_i32_280, %c0_i32_281] : memref<128x128xf32, #tpu.memory_space<vmem>> -> memref<1x128xf32, #tpu.memory_space<vmem>>
    tpu.enqueue_dma source(%469 : memref<1x128xf32, #tpu.memory_space<any>>) target(%470 : memref<1x128xf32, #tpu.memory_space<vmem>>) target_semaphore(%arg4 : memref<!tpu.dma_semaphore, #tpu.memory_space<semaphore_mem>>)
    %c94_i32 = arith.constant 94 : i32
    %471 = arith.addi %0, %c94_i32 : i32
    %472 = arith.index_cast %471 : i32 to index
    %473 = memref.load %arg1[%472] : memref<128xi32, #tpu.memory_space<smem>>
    %c0_i32_282 = arith.constant 0 : i32
    %474 = tpu.memref_slice %arg2[%473, %c0_i32_282] : memref<64x128xf32, #tpu.memory_space<any>> -> memref<1x128xf32, #tpu.memory_space<any>>
    %c94_i32_283 = arith.constant 94 : i32
    %c0_i32_284 = arith.constant 0 : i32
    %475 = tpu.memref_slice %arg3[%c94_i32_283, %c0_i32_284] : memref<128x128xf32, #tpu.memory_space<vmem>> -> memref<1x128xf32, #tpu.memory_space<vmem>>
    tpu.enqueue_dma source(%474 : memref<1x128xf32, #tpu.memory_space<any>>) target(%475 : memref<1x128xf32, #tpu.memory_space<vmem>>) target_semaphore(%arg4 : memref<!tpu.dma_semaphore, #tpu.memory_space<semaphore_mem>>)
    %c95_i32 = arith.constant 95 : i32
    %476 = arith.addi %0, %c95_i32 : i32
    %477 = arith.index_cast %476 : i32 to index
    %478 = memref.load %arg1[%477] : memref<128xi32, #tpu.memory_space<smem>>
    %c0_i32_285 = arith.constant 0 : i32
    %479 = tpu.memref_slice %arg2[%478, %c0_i32_285] : memref<64x128xf32, #tpu.memory_space<any>> -> memref<1x128xf32, #tpu.memory_space<any>>
    %c95_i32_286 = arith.constant 95 : i32
    %c0_i32_287 = arith.constant 0 : i32
    %480 = tpu.memref_slice %arg3[%c95_i32_286, %c0_i32_287] : memref<128x128xf32, #tpu.memory_space<vmem>> -> memref<1x128xf32, #tpu.memory_space<vmem>>
    tpu.enqueue_dma source(%479 : memref<1x128xf32, #tpu.memory_space<any>>) target(%480 : memref<1x128xf32, #tpu.memory_space<vmem>>) target_semaphore(%arg4 : memref<!tpu.dma_semaphore, #tpu.memory_space<semaphore_mem>>)
    %c96_i32 = arith.constant 96 : i32
    %481 = arith.addi %0, %c96_i32 : i32
    %482 = arith.index_cast %481 : i32 to index
    %483 = memref.load %arg1[%482] : memref<128xi32, #tpu.memory_space<smem>>
    %c0_i32_288 = arith.constant 0 : i32
    %484 = tpu.memref_slice %arg2[%483, %c0_i32_288] : memref<64x128xf32, #tpu.memory_space<any>> -> memref<1x128xf32, #tpu.memory_space<any>>
    %c96_i32_289 = arith.constant 96 : i32
    %c0_i32_290 = arith.constant 0 : i32
    %485 = tpu.memref_slice %arg3[%c96_i32_289, %c0_i32_290] : memref<128x128xf32, #tpu.memory_space<vmem>> -> memref<1x128xf32, #tpu.memory_space<vmem>>
    tpu.enqueue_dma source(%484 : memref<1x128xf32, #tpu.memory_space<any>>) target(%485 : memref<1x128xf32, #tpu.memory_space<vmem>>) target_semaphore(%arg4 : memref<!tpu.dma_semaphore, #tpu.memory_space<semaphore_mem>>)
    %c97_i32 = arith.constant 97 : i32
    %486 = arith.addi %0, %c97_i32 : i32
    %487 = arith.index_cast %486 : i32 to index
    %488 = memref.load %arg1[%487] : memref<128xi32, #tpu.memory_space<smem>>
    %c0_i32_291 = arith.constant 0 : i32
    %489 = tpu.memref_slice %arg2[%488, %c0_i32_291] : memref<64x128xf32, #tpu.memory_space<any>> -> memref<1x128xf32, #tpu.memory_space<any>>
    %c97_i32_292 = arith.constant 97 : i32
    %c0_i32_293 = arith.constant 0 : i32
    %490 = tpu.memref_slice %arg3[%c97_i32_292, %c0_i32_293] : memref<128x128xf32, #tpu.memory_space<vmem>> -> memref<1x128xf32, #tpu.memory_space<vmem>>
    tpu.enqueue_dma source(%489 : memref<1x128xf32, #tpu.memory_space<any>>) target(%490 : memref<1x128xf32, #tpu.memory_space<vmem>>) target_semaphore(%arg4 : memref<!tpu.dma_semaphore, #tpu.memory_space<semaphore_mem>>)
    %c98_i32 = arith.constant 98 : i32
    %491 = arith.addi %0, %c98_i32 : i32
    %492 = arith.index_cast %491 : i32 to index
    %493 = memref.load %arg1[%492] : memref<128xi32, #tpu.memory_space<smem>>
    %c0_i32_294 = arith.constant 0 : i32
    %494 = tpu.memref_slice %arg2[%493, %c0_i32_294] : memref<64x128xf32, #tpu.memory_space<any>> -> memref<1x128xf32, #tpu.memory_space<any>>
    %c98_i32_295 = arith.constant 98 : i32
    %c0_i32_296 = arith.constant 0 : i32
    %495 = tpu.memref_slice %arg3[%c98_i32_295, %c0_i32_296] : memref<128x128xf32, #tpu.memory_space<vmem>> -> memref<1x128xf32, #tpu.memory_space<vmem>>
    tpu.enqueue_dma source(%494 : memref<1x128xf32, #tpu.memory_space<any>>) target(%495 : memref<1x128xf32, #tpu.memory_space<vmem>>) target_semaphore(%arg4 : memref<!tpu.dma_semaphore, #tpu.memory_space<semaphore_mem>>)
    %c99_i32 = arith.constant 99 : i32
    %496 = arith.addi %0, %c99_i32 : i32
    %497 = arith.index_cast %496 : i32 to index
    %498 = memref.load %arg1[%497] : memref<128xi32, #tpu.memory_space<smem>>
    %c0_i32_297 = arith.constant 0 : i32
    %499 = tpu.memref_slice %arg2[%498, %c0_i32_297] : memref<64x128xf32, #tpu.memory_space<any>> -> memref<1x128xf32, #tpu.memory_space<any>>
    %c99_i32_298 = arith.constant 99 : i32
    %c0_i32_299 = arith.constant 0 : i32
    %500 = tpu.memref_slice %arg3[%c99_i32_298, %c0_i32_299] : memref<128x128xf32, #tpu.memory_space<vmem>> -> memref<1x128xf32, #tpu.memory_space<vmem>>
    tpu.enqueue_dma source(%499 : memref<1x128xf32, #tpu.memory_space<any>>) target(%500 : memref<1x128xf32, #tpu.memory_space<vmem>>) target_semaphore(%arg4 : memref<!tpu.dma_semaphore, #tpu.memory_space<semaphore_mem>>)
    %c100_i32 = arith.constant 100 : i32
    %501 = arith.addi %0, %c100_i32 : i32
    %502 = arith.index_cast %501 : i32 to index
    %503 = memref.load %arg1[%502] : memref<128xi32, #tpu.memory_space<smem>>
    %c0_i32_300 = arith.constant 0 : i32
    %504 = tpu.memref_slice %arg2[%503, %c0_i32_300] : memref<64x128xf32, #tpu.memory_space<any>> -> memref<1x128xf32, #tpu.memory_space<any>>
    %c100_i32_301 = arith.constant 100 : i32
    %c0_i32_302 = arith.constant 0 : i32
    %505 = tpu.memref_slice %arg3[%c100_i32_301, %c0_i32_302] : memref<128x128xf32, #tpu.memory_space<vmem>> -> memref<1x128xf32, #tpu.memory_space<vmem>>
    tpu.enqueue_dma source(%504 : memref<1x128xf32, #tpu.memory_space<any>>) target(%505 : memref<1x128xf32, #tpu.memory_space<vmem>>) target_semaphore(%arg4 : memref<!tpu.dma_semaphore, #tpu.memory_space<semaphore_mem>>)
    %c101_i32 = arith.constant 101 : i32
    %506 = arith.addi %0, %c101_i32 : i32
    %507 = arith.index_cast %506 : i32 to index
    %508 = memref.load %arg1[%507] : memref<128xi32, #tpu.memory_space<smem>>
    %c0_i32_303 = arith.constant 0 : i32
    %509 = tpu.memref_slice %arg2[%508, %c0_i32_303] : memref<64x128xf32, #tpu.memory_space<any>> -> memref<1x128xf32, #tpu.memory_space<any>>
    %c101_i32_304 = arith.constant 101 : i32
    %c0_i32_305 = arith.constant 0 : i32
    %510 = tpu.memref_slice %arg3[%c101_i32_304, %c0_i32_305] : memref<128x128xf32, #tpu.memory_space<vmem>> -> memref<1x128xf32, #tpu.memory_space<vmem>>
    tpu.enqueue_dma source(%509 : memref<1x128xf32, #tpu.memory_space<any>>) target(%510 : memref<1x128xf32, #tpu.memory_space<vmem>>) target_semaphore(%arg4 : memref<!tpu.dma_semaphore, #tpu.memory_space<semaphore_mem>>)
    %c102_i32 = arith.constant 102 : i32
    %511 = arith.addi %0, %c102_i32 : i32
    %512 = arith.index_cast %511 : i32 to index
    %513 = memref.load %arg1[%512] : memref<128xi32, #tpu.memory_space<smem>>
    %c0_i32_306 = arith.constant 0 : i32
    %514 = tpu.memref_slice %arg2[%513, %c0_i32_306] : memref<64x128xf32, #tpu.memory_space<any>> -> memref<1x128xf32, #tpu.memory_space<any>>
    %c102_i32_307 = arith.constant 102 : i32
    %c0_i32_308 = arith.constant 0 : i32
    %515 = tpu.memref_slice %arg3[%c102_i32_307, %c0_i32_308] : memref<128x128xf32, #tpu.memory_space<vmem>> -> memref<1x128xf32, #tpu.memory_space<vmem>>
    tpu.enqueue_dma source(%514 : memref<1x128xf32, #tpu.memory_space<any>>) target(%515 : memref<1x128xf32, #tpu.memory_space<vmem>>) target_semaphore(%arg4 : memref<!tpu.dma_semaphore, #tpu.memory_space<semaphore_mem>>)
    %c103_i32 = arith.constant 103 : i32
    %516 = arith.addi %0, %c103_i32 : i32
    %517 = arith.index_cast %516 : i32 to index
    %518 = memref.load %arg1[%517] : memref<128xi32, #tpu.memory_space<smem>>
    %c0_i32_309 = arith.constant 0 : i32
    %519 = tpu.memref_slice %arg2[%518, %c0_i32_309] : memref<64x128xf32, #tpu.memory_space<any>> -> memref<1x128xf32, #tpu.memory_space<any>>
    %c103_i32_310 = arith.constant 103 : i32
    %c0_i32_311 = arith.constant 0 : i32
    %520 = tpu.memref_slice %arg3[%c103_i32_310, %c0_i32_311] : memref<128x128xf32, #tpu.memory_space<vmem>> -> memref<1x128xf32, #tpu.memory_space<vmem>>
    tpu.enqueue_dma source(%519 : memref<1x128xf32, #tpu.memory_space<any>>) target(%520 : memref<1x128xf32, #tpu.memory_space<vmem>>) target_semaphore(%arg4 : memref<!tpu.dma_semaphore, #tpu.memory_space<semaphore_mem>>)
    %c104_i32 = arith.constant 104 : i32
    %521 = arith.addi %0, %c104_i32 : i32
    %522 = arith.index_cast %521 : i32 to index
    %523 = memref.load %arg1[%522] : memref<128xi32, #tpu.memory_space<smem>>
    %c0_i32_312 = arith.constant 0 : i32
    %524 = tpu.memref_slice %arg2[%523, %c0_i32_312] : memref<64x128xf32, #tpu.memory_space<any>> -> memref<1x128xf32, #tpu.memory_space<any>>
    %c104_i32_313 = arith.constant 104 : i32
    %c0_i32_314 = arith.constant 0 : i32
    %525 = tpu.memref_slice %arg3[%c104_i32_313, %c0_i32_314] : memref<128x128xf32, #tpu.memory_space<vmem>> -> memref<1x128xf32, #tpu.memory_space<vmem>>
    tpu.enqueue_dma source(%524 : memref<1x128xf32, #tpu.memory_space<any>>) target(%525 : memref<1x128xf32, #tpu.memory_space<vmem>>) target_semaphore(%arg4 : memref<!tpu.dma_semaphore, #tpu.memory_space<semaphore_mem>>)
    %c105_i32 = arith.constant 105 : i32
    %526 = arith.addi %0, %c105_i32 : i32
    %527 = arith.index_cast %526 : i32 to index
    %528 = memref.load %arg1[%527] : memref<128xi32, #tpu.memory_space<smem>>
    %c0_i32_315 = arith.constant 0 : i32
    %529 = tpu.memref_slice %arg2[%528, %c0_i32_315] : memref<64x128xf32, #tpu.memory_space<any>> -> memref<1x128xf32, #tpu.memory_space<any>>
    %c105_i32_316 = arith.constant 105 : i32
    %c0_i32_317 = arith.constant 0 : i32
    %530 = tpu.memref_slice %arg3[%c105_i32_316, %c0_i32_317] : memref<128x128xf32, #tpu.memory_space<vmem>> -> memref<1x128xf32, #tpu.memory_space<vmem>>
    tpu.enqueue_dma source(%529 : memref<1x128xf32, #tpu.memory_space<any>>) target(%530 : memref<1x128xf32, #tpu.memory_space<vmem>>) target_semaphore(%arg4 : memref<!tpu.dma_semaphore, #tpu.memory_space<semaphore_mem>>)
    %c106_i32 = arith.constant 106 : i32
    %531 = arith.addi %0, %c106_i32 : i32
    %532 = arith.index_cast %531 : i32 to index
    %533 = memref.load %arg1[%532] : memref<128xi32, #tpu.memory_space<smem>>
    %c0_i32_318 = arith.constant 0 : i32
    %534 = tpu.memref_slice %arg2[%533, %c0_i32_318] : memref<64x128xf32, #tpu.memory_space<any>> -> memref<1x128xf32, #tpu.memory_space<any>>
    %c106_i32_319 = arith.constant 106 : i32
    %c0_i32_320 = arith.constant 0 : i32
    %535 = tpu.memref_slice %arg3[%c106_i32_319, %c0_i32_320] : memref<128x128xf32, #tpu.memory_space<vmem>> -> memref<1x128xf32, #tpu.memory_space<vmem>>
    tpu.enqueue_dma source(%534 : memref<1x128xf32, #tpu.memory_space<any>>) target(%535 : memref<1x128xf32, #tpu.memory_space<vmem>>) target_semaphore(%arg4 : memref<!tpu.dma_semaphore, #tpu.memory_space<semaphore_mem>>)
    %c107_i32 = arith.constant 107 : i32
    %536 = arith.addi %0, %c107_i32 : i32
    %537 = arith.index_cast %536 : i32 to index
    %538 = memref.load %arg1[%537] : memref<128xi32, #tpu.memory_space<smem>>
    %c0_i32_321 = arith.constant 0 : i32
    %539 = tpu.memref_slice %arg2[%538, %c0_i32_321] : memref<64x128xf32, #tpu.memory_space<any>> -> memref<1x128xf32, #tpu.memory_space<any>>
    %c107_i32_322 = arith.constant 107 : i32
    %c0_i32_323 = arith.constant 0 : i32
    %540 = tpu.memref_slice %arg3[%c107_i32_322, %c0_i32_323] : memref<128x128xf32, #tpu.memory_space<vmem>> -> memref<1x128xf32, #tpu.memory_space<vmem>>
    tpu.enqueue_dma source(%539 : memref<1x128xf32, #tpu.memory_space<any>>) target(%540 : memref<1x128xf32, #tpu.memory_space<vmem>>) target_semaphore(%arg4 : memref<!tpu.dma_semaphore, #tpu.memory_space<semaphore_mem>>)
    %c108_i32 = arith.constant 108 : i32
    %541 = arith.addi %0, %c108_i32 : i32
    %542 = arith.index_cast %541 : i32 to index
    %543 = memref.load %arg1[%542] : memref<128xi32, #tpu.memory_space<smem>>
    %c0_i32_324 = arith.constant 0 : i32
    %544 = tpu.memref_slice %arg2[%543, %c0_i32_324] : memref<64x128xf32, #tpu.memory_space<any>> -> memref<1x128xf32, #tpu.memory_space<any>>
    %c108_i32_325 = arith.constant 108 : i32
    %c0_i32_326 = arith.constant 0 : i32
    %545 = tpu.memref_slice %arg3[%c108_i32_325, %c0_i32_326] : memref<128x128xf32, #tpu.memory_space<vmem>> -> memref<1x128xf32, #tpu.memory_space<vmem>>
    tpu.enqueue_dma source(%544 : memref<1x128xf32, #tpu.memory_space<any>>) target(%545 : memref<1x128xf32, #tpu.memory_space<vmem>>) target_semaphore(%arg4 : memref<!tpu.dma_semaphore, #tpu.memory_space<semaphore_mem>>)
    %c109_i32 = arith.constant 109 : i32
    %546 = arith.addi %0, %c109_i32 : i32
    %547 = arith.index_cast %546 : i32 to index
    %548 = memref.load %arg1[%547] : memref<128xi32, #tpu.memory_space<smem>>
    %c0_i32_327 = arith.constant 0 : i32
    %549 = tpu.memref_slice %arg2[%548, %c0_i32_327] : memref<64x128xf32, #tpu.memory_space<any>> -> memref<1x128xf32, #tpu.memory_space<any>>
    %c109_i32_328 = arith.constant 109 : i32
    %c0_i32_329 = arith.constant 0 : i32
    %550 = tpu.memref_slice %arg3[%c109_i32_328, %c0_i32_329] : memref<128x128xf32, #tpu.memory_space<vmem>> -> memref<1x128xf32, #tpu.memory_space<vmem>>
    tpu.enqueue_dma source(%549 : memref<1x128xf32, #tpu.memory_space<any>>) target(%550 : memref<1x128xf32, #tpu.memory_space<vmem>>) target_semaphore(%arg4 : memref<!tpu.dma_semaphore, #tpu.memory_space<semaphore_mem>>)
    %c110_i32 = arith.constant 110 : i32
    %551 = arith.addi %0, %c110_i32 : i32
    %552 = arith.index_cast %551 : i32 to index
    %553 = memref.load %arg1[%552] : memref<128xi32, #tpu.memory_space<smem>>
    %c0_i32_330 = arith.constant 0 : i32
    %554 = tpu.memref_slice %arg2[%553, %c0_i32_330] : memref<64x128xf32, #tpu.memory_space<any>> -> memref<1x128xf32, #tpu.memory_space<any>>
    %c110_i32_331 = arith.constant 110 : i32
    %c0_i32_332 = arith.constant 0 : i32
    %555 = tpu.memref_slice %arg3[%c110_i32_331, %c0_i32_332] : memref<128x128xf32, #tpu.memory_space<vmem>> -> memref<1x128xf32, #tpu.memory_space<vmem>>
    tpu.enqueue_dma source(%554 : memref<1x128xf32, #tpu.memory_space<any>>) target(%555 : memref<1x128xf32, #tpu.memory_space<vmem>>) target_semaphore(%arg4 : memref<!tpu.dma_semaphore, #tpu.memory_space<semaphore_mem>>)
    %c111_i32 = arith.constant 111 : i32
    %556 = arith.addi %0, %c111_i32 : i32
    %557 = arith.index_cast %556 : i32 to index
    %558 = memref.load %arg1[%557] : memref<128xi32, #tpu.memory_space<smem>>
    %c0_i32_333 = arith.constant 0 : i32
    %559 = tpu.memref_slice %arg2[%558, %c0_i32_333] : memref<64x128xf32, #tpu.memory_space<any>> -> memref<1x128xf32, #tpu.memory_space<any>>
    %c111_i32_334 = arith.constant 111 : i32
    %c0_i32_335 = arith.constant 0 : i32
    %560 = tpu.memref_slice %arg3[%c111_i32_334, %c0_i32_335] : memref<128x128xf32, #tpu.memory_space<vmem>> -> memref<1x128xf32, #tpu.memory_space<vmem>>
    tpu.enqueue_dma source(%559 : memref<1x128xf32, #tpu.memory_space<any>>) target(%560 : memref<1x128xf32, #tpu.memory_space<vmem>>) target_semaphore(%arg4 : memref<!tpu.dma_semaphore, #tpu.memory_space<semaphore_mem>>)
    %c112_i32 = arith.constant 112 : i32
    %561 = arith.addi %0, %c112_i32 : i32
    %562 = arith.index_cast %561 : i32 to index
    %563 = memref.load %arg1[%562] : memref<128xi32, #tpu.memory_space<smem>>
    %c0_i32_336 = arith.constant 0 : i32
    %564 = tpu.memref_slice %arg2[%563, %c0_i32_336] : memref<64x128xf32, #tpu.memory_space<any>> -> memref<1x128xf32, #tpu.memory_space<any>>
    %c112_i32_337 = arith.constant 112 : i32
    %c0_i32_338 = arith.constant 0 : i32
    %565 = tpu.memref_slice %arg3[%c112_i32_337, %c0_i32_338] : memref<128x128xf32, #tpu.memory_space<vmem>> -> memref<1x128xf32, #tpu.memory_space<vmem>>
    tpu.enqueue_dma source(%564 : memref<1x128xf32, #tpu.memory_space<any>>) target(%565 : memref<1x128xf32, #tpu.memory_space<vmem>>) target_semaphore(%arg4 : memref<!tpu.dma_semaphore, #tpu.memory_space<semaphore_mem>>)
    %c113_i32 = arith.constant 113 : i32
    %566 = arith.addi %0, %c113_i32 : i32
    %567 = arith.index_cast %566 : i32 to index
    %568 = memref.load %arg1[%567] : memref<128xi32, #tpu.memory_space<smem>>
    %c0_i32_339 = arith.constant 0 : i32
    %569 = tpu.memref_slice %arg2[%568, %c0_i32_339] : memref<64x128xf32, #tpu.memory_space<any>> -> memref<1x128xf32, #tpu.memory_space<any>>
    %c113_i32_340 = arith.constant 113 : i32
    %c0_i32_341 = arith.constant 0 : i32
    %570 = tpu.memref_slice %arg3[%c113_i32_340, %c0_i32_341] : memref<128x128xf32, #tpu.memory_space<vmem>> -> memref<1x128xf32, #tpu.memory_space<vmem>>
    tpu.enqueue_dma source(%569 : memref<1x128xf32, #tpu.memory_space<any>>) target(%570 : memref<1x128xf32, #tpu.memory_space<vmem>>) target_semaphore(%arg4 : memref<!tpu.dma_semaphore, #tpu.memory_space<semaphore_mem>>)
    %c114_i32 = arith.constant 114 : i32
    %571 = arith.addi %0, %c114_i32 : i32
    %572 = arith.index_cast %571 : i32 to index
    %573 = memref.load %arg1[%572] : memref<128xi32, #tpu.memory_space<smem>>
    %c0_i32_342 = arith.constant 0 : i32
    %574 = tpu.memref_slice %arg2[%573, %c0_i32_342] : memref<64x128xf32, #tpu.memory_space<any>> -> memref<1x128xf32, #tpu.memory_space<any>>
    %c114_i32_343 = arith.constant 114 : i32
    %c0_i32_344 = arith.constant 0 : i32
    %575 = tpu.memref_slice %arg3[%c114_i32_343, %c0_i32_344] : memref<128x128xf32, #tpu.memory_space<vmem>> -> memref<1x128xf32, #tpu.memory_space<vmem>>
    tpu.enqueue_dma source(%574 : memref<1x128xf32, #tpu.memory_space<any>>) target(%575 : memref<1x128xf32, #tpu.memory_space<vmem>>) target_semaphore(%arg4 : memref<!tpu.dma_semaphore, #tpu.memory_space<semaphore_mem>>)
    %c115_i32 = arith.constant 115 : i32
    %576 = arith.addi %0, %c115_i32 : i32
    %577 = arith.index_cast %576 : i32 to index
    %578 = memref.load %arg1[%577] : memref<128xi32, #tpu.memory_space<smem>>
    %c0_i32_345 = arith.constant 0 : i32
    %579 = tpu.memref_slice %arg2[%578, %c0_i32_345] : memref<64x128xf32, #tpu.memory_space<any>> -> memref<1x128xf32, #tpu.memory_space<any>>
    %c115_i32_346 = arith.constant 115 : i32
    %c0_i32_347 = arith.constant 0 : i32
    %580 = tpu.memref_slice %arg3[%c115_i32_346, %c0_i32_347] : memref<128x128xf32, #tpu.memory_space<vmem>> -> memref<1x128xf32, #tpu.memory_space<vmem>>
    tpu.enqueue_dma source(%579 : memref<1x128xf32, #tpu.memory_space<any>>) target(%580 : memref<1x128xf32, #tpu.memory_space<vmem>>) target_semaphore(%arg4 : memref<!tpu.dma_semaphore, #tpu.memory_space<semaphore_mem>>)
    %c116_i32 = arith.constant 116 : i32
    %581 = arith.addi %0, %c116_i32 : i32
    %582 = arith.index_cast %581 : i32 to index
    %583 = memref.load %arg1[%582] : memref<128xi32, #tpu.memory_space<smem>>
    %c0_i32_348 = arith.constant 0 : i32
    %584 = tpu.memref_slice %arg2[%583, %c0_i32_348] : memref<64x128xf32, #tpu.memory_space<any>> -> memref<1x128xf32, #tpu.memory_space<any>>
    %c116_i32_349 = arith.constant 116 : i32
    %c0_i32_350 = arith.constant 0 : i32
    %585 = tpu.memref_slice %arg3[%c116_i32_349, %c0_i32_350] : memref<128x128xf32, #tpu.memory_space<vmem>> -> memref<1x128xf32, #tpu.memory_space<vmem>>
    tpu.enqueue_dma source(%584 : memref<1x128xf32, #tpu.memory_space<any>>) target(%585 : memref<1x128xf32, #tpu.memory_space<vmem>>) target_semaphore(%arg4 : memref<!tpu.dma_semaphore, #tpu.memory_space<semaphore_mem>>)
    %c117_i32 = arith.constant 117 : i32
    %586 = arith.addi %0, %c117_i32 : i32
    %587 = arith.index_cast %586 : i32 to index
    %588 = memref.load %arg1[%587] : memref<128xi32, #tpu.memory_space<smem>>
    %c0_i32_351 = arith.constant 0 : i32
    %589 = tpu.memref_slice %arg2[%588, %c0_i32_351] : memref<64x128xf32, #tpu.memory_space<any>> -> memref<1x128xf32, #tpu.memory_space<any>>
    %c117_i32_352 = arith.constant 117 : i32
    %c0_i32_353 = arith.constant 0 : i32
    %590 = tpu.memref_slice %arg3[%c117_i32_352, %c0_i32_353] : memref<128x128xf32, #tpu.memory_space<vmem>> -> memref<1x128xf32, #tpu.memory_space<vmem>>
    tpu.enqueue_dma source(%589 : memref<1x128xf32, #tpu.memory_space<any>>) target(%590 : memref<1x128xf32, #tpu.memory_space<vmem>>) target_semaphore(%arg4 : memref<!tpu.dma_semaphore, #tpu.memory_space<semaphore_mem>>)
    %c118_i32 = arith.constant 118 : i32
    %591 = arith.addi %0, %c118_i32 : i32
    %592 = arith.index_cast %591 : i32 to index
    %593 = memref.load %arg1[%592] : memref<128xi32, #tpu.memory_space<smem>>
    %c0_i32_354 = arith.constant 0 : i32
    %594 = tpu.memref_slice %arg2[%593, %c0_i32_354] : memref<64x128xf32, #tpu.memory_space<any>> -> memref<1x128xf32, #tpu.memory_space<any>>
    %c118_i32_355 = arith.constant 118 : i32
    %c0_i32_356 = arith.constant 0 : i32
    %595 = tpu.memref_slice %arg3[%c118_i32_355, %c0_i32_356] : memref<128x128xf32, #tpu.memory_space<vmem>> -> memref<1x128xf32, #tpu.memory_space<vmem>>
    tpu.enqueue_dma source(%594 : memref<1x128xf32, #tpu.memory_space<any>>) target(%595 : memref<1x128xf32, #tpu.memory_space<vmem>>) target_semaphore(%arg4 : memref<!tpu.dma_semaphore, #tpu.memory_space<semaphore_mem>>)
    %c119_i32 = arith.constant 119 : i32
    %596 = arith.addi %0, %c119_i32 : i32
    %597 = arith.index_cast %596 : i32 to index
    %598 = memref.load %arg1[%597] : memref<128xi32, #tpu.memory_space<smem>>
    %c0_i32_357 = arith.constant 0 : i32
    %599 = tpu.memref_slice %arg2[%598, %c0_i32_357] : memref<64x128xf32, #tpu.memory_space<any>> -> memref<1x128xf32, #tpu.memory_space<any>>
    %c119_i32_358 = arith.constant 119 : i32
    %c0_i32_359 = arith.constant 0 : i32
    %600 = tpu.memref_slice %arg3[%c119_i32_358, %c0_i32_359] : memref<128x128xf32, #tpu.memory_space<vmem>> -> memref<1x128xf32, #tpu.memory_space<vmem>>
    tpu.enqueue_dma source(%599 : memref<1x128xf32, #tpu.memory_space<any>>) target(%600 : memref<1x128xf32, #tpu.memory_space<vmem>>) target_semaphore(%arg4 : memref<!tpu.dma_semaphore, #tpu.memory_space<semaphore_mem>>)
    %c120_i32 = arith.constant 120 : i32
    %601 = arith.addi %0, %c120_i32 : i32
    %602 = arith.index_cast %601 : i32 to index
    %603 = memref.load %arg1[%602] : memref<128xi32, #tpu.memory_space<smem>>
    %c0_i32_360 = arith.constant 0 : i32
    %604 = tpu.memref_slice %arg2[%603, %c0_i32_360] : memref<64x128xf32, #tpu.memory_space<any>> -> memref<1x128xf32, #tpu.memory_space<any>>
    %c120_i32_361 = arith.constant 120 : i32
    %c0_i32_362 = arith.constant 0 : i32
    %605 = tpu.memref_slice %arg3[%c120_i32_361, %c0_i32_362] : memref<128x128xf32, #tpu.memory_space<vmem>> -> memref<1x128xf32, #tpu.memory_space<vmem>>
    tpu.enqueue_dma source(%604 : memref<1x128xf32, #tpu.memory_space<any>>) target(%605 : memref<1x128xf32, #tpu.memory_space<vmem>>) target_semaphore(%arg4 : memref<!tpu.dma_semaphore, #tpu.memory_space<semaphore_mem>>)
    %c121_i32 = arith.constant 121 : i32
    %606 = arith.addi %0, %c121_i32 : i32
    %607 = arith.index_cast %606 : i32 to index
    %608 = memref.load %arg1[%607] : memref<128xi32, #tpu.memory_space<smem>>
    %c0_i32_363 = arith.constant 0 : i32
    %609 = tpu.memref_slice %arg2[%608, %c0_i32_363] : memref<64x128xf32, #tpu.memory_space<any>> -> memref<1x128xf32, #tpu.memory_space<any>>
    %c121_i32_364 = arith.constant 121 : i32
    %c0_i32_365 = arith.constant 0 : i32
    %610 = tpu.memref_slice %arg3[%c121_i32_364, %c0_i32_365] : memref<128x128xf32, #tpu.memory_space<vmem>> -> memref<1x128xf32, #tpu.memory_space<vmem>>
    tpu.enqueue_dma source(%609 : memref<1x128xf32, #tpu.memory_space<any>>) target(%610 : memref<1x128xf32, #tpu.memory_space<vmem>>) target_semaphore(%arg4 : memref<!tpu.dma_semaphore, #tpu.memory_space<semaphore_mem>>)
    %c122_i32 = arith.constant 122 : i32
    %611 = arith.addi %0, %c122_i32 : i32
    %612 = arith.index_cast %611 : i32 to index
    %613 = memref.load %arg1[%612] : memref<128xi32, #tpu.memory_space<smem>>
    %c0_i32_366 = arith.constant 0 : i32
    %614 = tpu.memref_slice %arg2[%613, %c0_i32_366] : memref<64x128xf32, #tpu.memory_space<any>> -> memref<1x128xf32, #tpu.memory_space<any>>
    %c122_i32_367 = arith.constant 122 : i32
    %c0_i32_368 = arith.constant 0 : i32
    %615 = tpu.memref_slice %arg3[%c122_i32_367, %c0_i32_368] : memref<128x128xf32, #tpu.memory_space<vmem>> -> memref<1x128xf32, #tpu.memory_space<vmem>>
    tpu.enqueue_dma source(%614 : memref<1x128xf32, #tpu.memory_space<any>>) target(%615 : memref<1x128xf32, #tpu.memory_space<vmem>>) target_semaphore(%arg4 : memref<!tpu.dma_semaphore, #tpu.memory_space<semaphore_mem>>)
    %c123_i32 = arith.constant 123 : i32
    %616 = arith.addi %0, %c123_i32 : i32
    %617 = arith.index_cast %616 : i32 to index
    %618 = memref.load %arg1[%617] : memref<128xi32, #tpu.memory_space<smem>>
    %c0_i32_369 = arith.constant 0 : i32
    %619 = tpu.memref_slice %arg2[%618, %c0_i32_369] : memref<64x128xf32, #tpu.memory_space<any>> -> memref<1x128xf32, #tpu.memory_space<any>>
    %c123_i32_370 = arith.constant 123 : i32
    %c0_i32_371 = arith.constant 0 : i32
    %620 = tpu.memref_slice %arg3[%c123_i32_370, %c0_i32_371] : memref<128x128xf32, #tpu.memory_space<vmem>> -> memref<1x128xf32, #tpu.memory_space<vmem>>
    tpu.enqueue_dma source(%619 : memref<1x128xf32, #tpu.memory_space<any>>) target(%620 : memref<1x128xf32, #tpu.memory_space<vmem>>) target_semaphore(%arg4 : memref<!tpu.dma_semaphore, #tpu.memory_space<semaphore_mem>>)
    %c124_i32 = arith.constant 124 : i32
    %621 = arith.addi %0, %c124_i32 : i32
    %622 = arith.index_cast %621 : i32 to index
    %623 = memref.load %arg1[%622] : memref<128xi32, #tpu.memory_space<smem>>
    %c0_i32_372 = arith.constant 0 : i32
    %624 = tpu.memref_slice %arg2[%623, %c0_i32_372] : memref<64x128xf32, #tpu.memory_space<any>> -> memref<1x128xf32, #tpu.memory_space<any>>
    %c124_i32_373 = arith.constant 124 : i32
    %c0_i32_374 = arith.constant 0 : i32
    %625 = tpu.memref_slice %arg3[%c124_i32_373, %c0_i32_374] : memref<128x128xf32, #tpu.memory_space<vmem>> -> memref<1x128xf32, #tpu.memory_space<vmem>>
    tpu.enqueue_dma source(%624 : memref<1x128xf32, #tpu.memory_space<any>>) target(%625 : memref<1x128xf32, #tpu.memory_space<vmem>>) target_semaphore(%arg4 : memref<!tpu.dma_semaphore, #tpu.memory_space<semaphore_mem>>)
    %c125_i32 = arith.constant 125 : i32
    %626 = arith.addi %0, %c125_i32 : i32
    %627 = arith.index_cast %626 : i32 to index
    %628 = memref.load %arg1[%627] : memref<128xi32, #tpu.memory_space<smem>>
    %c0_i32_375 = arith.constant 0 : i32
    %629 = tpu.memref_slice %arg2[%628, %c0_i32_375] : memref<64x128xf32, #tpu.memory_space<any>> -> memref<1x128xf32, #tpu.memory_space<any>>
    %c125_i32_376 = arith.constant 125 : i32
    %c0_i32_377 = arith.constant 0 : i32
    %630 = tpu.memref_slice %arg3[%c125_i32_376, %c0_i32_377] : memref<128x128xf32, #tpu.memory_space<vmem>> -> memref<1x128xf32, #tpu.memory_space<vmem>>
    tpu.enqueue_dma source(%629 : memref<1x128xf32, #tpu.memory_space<any>>) target(%630 : memref<1x128xf32, #tpu.memory_space<vmem>>) target_semaphore(%arg4 : memref<!tpu.dma_semaphore, #tpu.memory_space<semaphore_mem>>)
    %c126_i32 = arith.constant 126 : i32
    %631 = arith.addi %0, %c126_i32 : i32
    %632 = arith.index_cast %631 : i32 to index
    %633 = memref.load %arg1[%632] : memref<128xi32, #tpu.memory_space<smem>>
    %c0_i32_378 = arith.constant 0 : i32
    %634 = tpu.memref_slice %arg2[%633, %c0_i32_378] : memref<64x128xf32, #tpu.memory_space<any>> -> memref<1x128xf32, #tpu.memory_space<any>>
    %c126_i32_379 = arith.constant 126 : i32
    %c0_i32_380 = arith.constant 0 : i32
    %635 = tpu.memref_slice %arg3[%c126_i32_379, %c0_i32_380] : memref<128x128xf32, #tpu.memory_space<vmem>> -> memref<1x128xf32, #tpu.memory_space<vmem>>
    tpu.enqueue_dma source(%634 : memref<1x128xf32, #tpu.memory_space<any>>) target(%635 : memref<1x128xf32, #tpu.memory_space<vmem>>) target_semaphore(%arg4 : memref<!tpu.dma_semaphore, #tpu.memory_space<semaphore_mem>>)
    %c127_i32 = arith.constant 127 : i32
    %636 = arith.addi %0, %c127_i32 : i32
    %637 = arith.index_cast %636 : i32 to index
    %638 = memref.load %arg1[%637] : memref<128xi32, #tpu.memory_space<smem>>
    %c0_i32_381 = arith.constant 0 : i32
    %639 = tpu.memref_slice %arg2[%638, %c0_i32_381] : memref<64x128xf32, #tpu.memory_space<any>> -> memref<1x128xf32, #tpu.memory_space<any>>
    %c127_i32_382 = arith.constant 127 : i32
    %c0_i32_383 = arith.constant 0 : i32
    %640 = tpu.memref_slice %arg3[%c127_i32_382, %c0_i32_383] : memref<128x128xf32, #tpu.memory_space<vmem>> -> memref<1x128xf32, #tpu.memory_space<vmem>>
    tpu.enqueue_dma source(%639 : memref<1x128xf32, #tpu.memory_space<any>>) target(%640 : memref<1x128xf32, #tpu.memory_space<vmem>>) target_semaphore(%arg4 : memref<!tpu.dma_semaphore, #tpu.memory_space<semaphore_mem>>)
    %c0_i32_384 = arith.constant 0 : i32
    %641 = tpu.memref_slice %arg2[%3, %c0_i32_384] : memref<64x128xf32, #tpu.memory_space<any>> -> memref<1x128xf32, #tpu.memory_space<any>>
    %c0_i32_385 = arith.constant 0 : i32
    %c0_i32_386 = arith.constant 0 : i32
    %642 = tpu.memref_slice %arg3[%c0_i32_385, %c0_i32_386] : memref<128x128xf32, #tpu.memory_space<vmem>> -> memref<1x128xf32, #tpu.memory_space<vmem>>
    tpu.wait_dma2 semaphore(%arg4 : memref<!tpu.dma_semaphore, #tpu.memory_space<semaphore_mem>>) src(%641 : memref<1x128xf32, #tpu.memory_space<any>>) dst(%642 : memref<1x128xf32, #tpu.memory_space<vmem>>)
    %c0_i32_387 = arith.constant 0 : i32
    %643 = tpu.memref_slice %arg2[%8, %c0_i32_387] : memref<64x128xf32, #tpu.memory_space<any>> -> memref<1x128xf32, #tpu.memory_space<any>>
    %c1_i32_388 = arith.constant 1 : i32
    %c0_i32_389 = arith.constant 0 : i32
    %644 = tpu.memref_slice %arg3[%c1_i32_388, %c0_i32_389] : memref<128x128xf32, #tpu.memory_space<vmem>> -> memref<1x128xf32, #tpu.memory_space<vmem>>
    tpu.wait_dma2 semaphore(%arg4 : memref<!tpu.dma_semaphore, #tpu.memory_space<semaphore_mem>>) src(%643 : memref<1x128xf32, #tpu.memory_space<any>>) dst(%644 : memref<1x128xf32, #tpu.memory_space<vmem>>)
    %c0_i32_390 = arith.constant 0 : i32
    %645 = tpu.memref_slice %arg2[%13, %c0_i32_390] : memref<64x128xf32, #tpu.memory_space<any>> -> memref<1x128xf32, #tpu.memory_space<any>>
    %c2_i32_391 = arith.constant 2 : i32
    %c0_i32_392 = arith.constant 0 : i32
    %646 = tpu.memref_slice %arg3[%c2_i32_391, %c0_i32_392] : memref<128x128xf32, #tpu.memory_space<vmem>> -> memref<1x128xf32, #tpu.memory_space<vmem>>
    tpu.wait_dma2 semaphore(%arg4 : memref<!tpu.dma_semaphore, #tpu.memory_space<semaphore_mem>>) src(%645 : memref<1x128xf32, #tpu.memory_space<any>>) dst(%646 : memref<1x128xf32, #tpu.memory_space<vmem>>)
    %c0_i32_393 = arith.constant 0 : i32
    %647 = tpu.memref_slice %arg2[%18, %c0_i32_393] : memref<64x128xf32, #tpu.memory_space<any>> -> memref<1x128xf32, #tpu.memory_space<any>>
    %c3_i32_394 = arith.constant 3 : i32
    %c0_i32_395 = arith.constant 0 : i32
    %648 = tpu.memref_slice %arg3[%c3_i32_394, %c0_i32_395] : memref<128x128xf32, #tpu.memory_space<vmem>> -> memref<1x128xf32, #tpu.memory_space<vmem>>
    tpu.wait_dma2 semaphore(%arg4 : memref<!tpu.dma_semaphore, #tpu.memory_space<semaphore_mem>>) src(%647 : memref<1x128xf32, #tpu.memory_space<any>>) dst(%648 : memref<1x128xf32, #tpu.memory_space<vmem>>)
    %c0_i32_396 = arith.constant 0 : i32
    %649 = tpu.memref_slice %arg2[%23, %c0_i32_396] : memref<64x128xf32, #tpu.memory_space<any>> -> memref<1x128xf32, #tpu.memory_space<any>>
    %c4_i32_397 = arith.constant 4 : i32
    %c0_i32_398 = arith.constant 0 : i32
    %650 = tpu.memref_slice %arg3[%c4_i32_397, %c0_i32_398] : memref<128x128xf32, #tpu.memory_space<vmem>> -> memref<1x128xf32, #tpu.memory_space<vmem>>
    tpu.wait_dma2 semaphore(%arg4 : memref<!tpu.dma_semaphore, #tpu.memory_space<semaphore_mem>>) src(%649 : memref<1x128xf32, #tpu.memory_space<any>>) dst(%650 : memref<1x128xf32, #tpu.memory_space<vmem>>)
    %c0_i32_399 = arith.constant 0 : i32
    %651 = tpu.memref_slice %arg2[%28, %c0_i32_399] : memref<64x128xf32, #tpu.memory_space<any>> -> memref<1x128xf32, #tpu.memory_space<any>>
    %c5_i32_400 = arith.constant 5 : i32
    %c0_i32_401 = arith.constant 0 : i32
    %652 = tpu.memref_slice %arg3[%c5_i32_400, %c0_i32_401] : memref<128x128xf32, #tpu.memory_space<vmem>> -> memref<1x128xf32, #tpu.memory_space<vmem>>
    tpu.wait_dma2 semaphore(%arg4 : memref<!tpu.dma_semaphore, #tpu.memory_space<semaphore_mem>>) src(%651 : memref<1x128xf32, #tpu.memory_space<any>>) dst(%652 : memref<1x128xf32, #tpu.memory_space<vmem>>)
    %c0_i32_402 = arith.constant 0 : i32
    %653 = tpu.memref_slice %arg2[%33, %c0_i32_402] : memref<64x128xf32, #tpu.memory_space<any>> -> memref<1x128xf32, #tpu.memory_space<any>>
    %c6_i32_403 = arith.constant 6 : i32
    %c0_i32_404 = arith.constant 0 : i32
    %654 = tpu.memref_slice %arg3[%c6_i32_403, %c0_i32_404] : memref<128x128xf32, #tpu.memory_space<vmem>> -> memref<1x128xf32, #tpu.memory_space<vmem>>
    tpu.wait_dma2 semaphore(%arg4 : memref<!tpu.dma_semaphore, #tpu.memory_space<semaphore_mem>>) src(%653 : memref<1x128xf32, #tpu.memory_space<any>>) dst(%654 : memref<1x128xf32, #tpu.memory_space<vmem>>)
    %c0_i32_405 = arith.constant 0 : i32
    %655 = tpu.memref_slice %arg2[%38, %c0_i32_405] : memref<64x128xf32, #tpu.memory_space<any>> -> memref<1x128xf32, #tpu.memory_space<any>>
    %c7_i32_406 = arith.constant 7 : i32
    %c0_i32_407 = arith.constant 0 : i32
    %656 = tpu.memref_slice %arg3[%c7_i32_406, %c0_i32_407] : memref<128x128xf32, #tpu.memory_space<vmem>> -> memref<1x128xf32, #tpu.memory_space<vmem>>
    tpu.wait_dma2 semaphore(%arg4 : memref<!tpu.dma_semaphore, #tpu.memory_space<semaphore_mem>>) src(%655 : memref<1x128xf32, #tpu.memory_space<any>>) dst(%656 : memref<1x128xf32, #tpu.memory_space<vmem>>)
    %c0_i32_408 = arith.constant 0 : i32
    %657 = tpu.memref_slice %arg2[%43, %c0_i32_408] : memref<64x128xf32, #tpu.memory_space<any>> -> memref<1x128xf32, #tpu.memory_space<any>>
    %c8_i32_409 = arith.constant 8 : i32
    %c0_i32_410 = arith.constant 0 : i32
    %658 = tpu.memref_slice %arg3[%c8_i32_409, %c0_i32_410] : memref<128x128xf32, #tpu.memory_space<vmem>> -> memref<1x128xf32, #tpu.memory_space<vmem>>
    tpu.wait_dma2 semaphore(%arg4 : memref<!tpu.dma_semaphore, #tpu.memory_space<semaphore_mem>>) src(%657 : memref<1x128xf32, #tpu.memory_space<any>>) dst(%658 : memref<1x128xf32, #tpu.memory_space<vmem>>)
    %c0_i32_411 = arith.constant 0 : i32
    %659 = tpu.memref_slice %arg2[%48, %c0_i32_411] : memref<64x128xf32, #tpu.memory_space<any>> -> memref<1x128xf32, #tpu.memory_space<any>>
    %c9_i32_412 = arith.constant 9 : i32
    %c0_i32_413 = arith.constant 0 : i32
    %660 = tpu.memref_slice %arg3[%c9_i32_412, %c0_i32_413] : memref<128x128xf32, #tpu.memory_space<vmem>> -> memref<1x128xf32, #tpu.memory_space<vmem>>
    tpu.wait_dma2 semaphore(%arg4 : memref<!tpu.dma_semaphore, #tpu.memory_space<semaphore_mem>>) src(%659 : memref<1x128xf32, #tpu.memory_space<any>>) dst(%660 : memref<1x128xf32, #tpu.memory_space<vmem>>)
    %c0_i32_414 = arith.constant 0 : i32
    %661 = tpu.memref_slice %arg2[%53, %c0_i32_414] : memref<64x128xf32, #tpu.memory_space<any>> -> memref<1x128xf32, #tpu.memory_space<any>>
    %c10_i32_415 = arith.constant 10 : i32
    %c0_i32_416 = arith.constant 0 : i32
    %662 = tpu.memref_slice %arg3[%c10_i32_415, %c0_i32_416] : memref<128x128xf32, #tpu.memory_space<vmem>> -> memref<1x128xf32, #tpu.memory_space<vmem>>
    tpu.wait_dma2 semaphore(%arg4 : memref<!tpu.dma_semaphore, #tpu.memory_space<semaphore_mem>>) src(%661 : memref<1x128xf32, #tpu.memory_space<any>>) dst(%662 : memref<1x128xf32, #tpu.memory_space<vmem>>)
    %c0_i32_417 = arith.constant 0 : i32
    %663 = tpu.memref_slice %arg2[%58, %c0_i32_417] : memref<64x128xf32, #tpu.memory_space<any>> -> memref<1x128xf32, #tpu.memory_space<any>>
    %c11_i32_418 = arith.constant 11 : i32
    %c0_i32_419 = arith.constant 0 : i32
    %664 = tpu.memref_slice %arg3[%c11_i32_418, %c0_i32_419] : memref<128x128xf32, #tpu.memory_space<vmem>> -> memref<1x128xf32, #tpu.memory_space<vmem>>
    tpu.wait_dma2 semaphore(%arg4 : memref<!tpu.dma_semaphore, #tpu.memory_space<semaphore_mem>>) src(%663 : memref<1x128xf32, #tpu.memory_space<any>>) dst(%664 : memref<1x128xf32, #tpu.memory_space<vmem>>)
    %c0_i32_420 = arith.constant 0 : i32
    %665 = tpu.memref_slice %arg2[%63, %c0_i32_420] : memref<64x128xf32, #tpu.memory_space<any>> -> memref<1x128xf32, #tpu.memory_space<any>>
    %c12_i32_421 = arith.constant 12 : i32
    %c0_i32_422 = arith.constant 0 : i32
    %666 = tpu.memref_slice %arg3[%c12_i32_421, %c0_i32_422] : memref<128x128xf32, #tpu.memory_space<vmem>> -> memref<1x128xf32, #tpu.memory_space<vmem>>
    tpu.wait_dma2 semaphore(%arg4 : memref<!tpu.dma_semaphore, #tpu.memory_space<semaphore_mem>>) src(%665 : memref<1x128xf32, #tpu.memory_space<any>>) dst(%666 : memref<1x128xf32, #tpu.memory_space<vmem>>)
    %c0_i32_423 = arith.constant 0 : i32
    %667 = tpu.memref_slice %arg2[%68, %c0_i32_423] : memref<64x128xf32, #tpu.memory_space<any>> -> memref<1x128xf32, #tpu.memory_space<any>>
    %c13_i32_424 = arith.constant 13 : i32
    %c0_i32_425 = arith.constant 0 : i32
    %668 = tpu.memref_slice %arg3[%c13_i32_424, %c0_i32_425] : memref<128x128xf32, #tpu.memory_space<vmem>> -> memref<1x128xf32, #tpu.memory_space<vmem>>
    tpu.wait_dma2 semaphore(%arg4 : memref<!tpu.dma_semaphore, #tpu.memory_space<semaphore_mem>>) src(%667 : memref<1x128xf32, #tpu.memory_space<any>>) dst(%668 : memref<1x128xf32, #tpu.memory_space<vmem>>)
    %c0_i32_426 = arith.constant 0 : i32
    %669 = tpu.memref_slice %arg2[%73, %c0_i32_426] : memref<64x128xf32, #tpu.memory_space<any>> -> memref<1x128xf32, #tpu.memory_space<any>>
    %c14_i32_427 = arith.constant 14 : i32
    %c0_i32_428 = arith.constant 0 : i32
    %670 = tpu.memref_slice %arg3[%c14_i32_427, %c0_i32_428] : memref<128x128xf32, #tpu.memory_space<vmem>> -> memref<1x128xf32, #tpu.memory_space<vmem>>
    tpu.wait_dma2 semaphore(%arg4 : memref<!tpu.dma_semaphore, #tpu.memory_space<semaphore_mem>>) src(%669 : memref<1x128xf32, #tpu.memory_space<any>>) dst(%670 : memref<1x128xf32, #tpu.memory_space<vmem>>)
    %c0_i32_429 = arith.constant 0 : i32
    %671 = tpu.memref_slice %arg2[%78, %c0_i32_429] : memref<64x128xf32, #tpu.memory_space<any>> -> memref<1x128xf32, #tpu.memory_space<any>>
    %c15_i32_430 = arith.constant 15 : i32
    %c0_i32_431 = arith.constant 0 : i32
    %672 = tpu.memref_slice %arg3[%c15_i32_430, %c0_i32_431] : memref<128x128xf32, #tpu.memory_space<vmem>> -> memref<1x128xf32, #tpu.memory_space<vmem>>
    tpu.wait_dma2 semaphore(%arg4 : memref<!tpu.dma_semaphore, #tpu.memory_space<semaphore_mem>>) src(%671 : memref<1x128xf32, #tpu.memory_space<any>>) dst(%672 : memref<1x128xf32, #tpu.memory_space<vmem>>)
    %c0_i32_432 = arith.constant 0 : i32
    %673 = tpu.memref_slice %arg2[%83, %c0_i32_432] : memref<64x128xf32, #tpu.memory_space<any>> -> memref<1x128xf32, #tpu.memory_space<any>>
    %c16_i32_433 = arith.constant 16 : i32
    %c0_i32_434 = arith.constant 0 : i32
    %674 = tpu.memref_slice %arg3[%c16_i32_433, %c0_i32_434] : memref<128x128xf32, #tpu.memory_space<vmem>> -> memref<1x128xf32, #tpu.memory_space<vmem>>
    tpu.wait_dma2 semaphore(%arg4 : memref<!tpu.dma_semaphore, #tpu.memory_space<semaphore_mem>>) src(%673 : memref<1x128xf32, #tpu.memory_space<any>>) dst(%674 : memref<1x128xf32, #tpu.memory_space<vmem>>)
    %c0_i32_435 = arith.constant 0 : i32
    %675 = tpu.memref_slice %arg2[%88, %c0_i32_435] : memref<64x128xf32, #tpu.memory_space<any>> -> memref<1x128xf32, #tpu.memory_space<any>>
    %c17_i32_436 = arith.constant 17 : i32
    %c0_i32_437 = arith.constant 0 : i32
    %676 = tpu.memref_slice %arg3[%c17_i32_436, %c0_i32_437] : memref<128x128xf32, #tpu.memory_space<vmem>> -> memref<1x128xf32, #tpu.memory_space<vmem>>
    tpu.wait_dma2 semaphore(%arg4 : memref<!tpu.dma_semaphore, #tpu.memory_space<semaphore_mem>>) src(%675 : memref<1x128xf32, #tpu.memory_space<any>>) dst(%676 : memref<1x128xf32, #tpu.memory_space<vmem>>)
    %c0_i32_438 = arith.constant 0 : i32
    %677 = tpu.memref_slice %arg2[%93, %c0_i32_438] : memref<64x128xf32, #tpu.memory_space<any>> -> memref<1x128xf32, #tpu.memory_space<any>>
    %c18_i32_439 = arith.constant 18 : i32
    %c0_i32_440 = arith.constant 0 : i32
    %678 = tpu.memref_slice %arg3[%c18_i32_439, %c0_i32_440] : memref<128x128xf32, #tpu.memory_space<vmem>> -> memref<1x128xf32, #tpu.memory_space<vmem>>
    tpu.wait_dma2 semaphore(%arg4 : memref<!tpu.dma_semaphore, #tpu.memory_space<semaphore_mem>>) src(%677 : memref<1x128xf32, #tpu.memory_space<any>>) dst(%678 : memref<1x128xf32, #tpu.memory_space<vmem>>)
    %c0_i32_441 = arith.constant 0 : i32
    %679 = tpu.memref_slice %arg2[%98, %c0_i32_441] : memref<64x128xf32, #tpu.memory_space<any>> -> memref<1x128xf32, #tpu.memory_space<any>>
    %c19_i32_442 = arith.constant 19 : i32
    %c0_i32_443 = arith.constant 0 : i32
    %680 = tpu.memref_slice %arg3[%c19_i32_442, %c0_i32_443] : memref<128x128xf32, #tpu.memory_space<vmem>> -> memref<1x128xf32, #tpu.memory_space<vmem>>
    tpu.wait_dma2 semaphore(%arg4 : memref<!tpu.dma_semaphore, #tpu.memory_space<semaphore_mem>>) src(%679 : memref<1x128xf32, #tpu.memory_space<any>>) dst(%680 : memref<1x128xf32, #tpu.memory_space<vmem>>)
    %c0_i32_444 = arith.constant 0 : i32
    %681 = tpu.memref_slice %arg2[%103, %c0_i32_444] : memref<64x128xf32, #tpu.memory_space<any>> -> memref<1x128xf32, #tpu.memory_space<any>>
    %c20_i32_445 = arith.constant 20 : i32
    %c0_i32_446 = arith.constant 0 : i32
    %682 = tpu.memref_slice %arg3[%c20_i32_445, %c0_i32_446] : memref<128x128xf32, #tpu.memory_space<vmem>> -> memref<1x128xf32, #tpu.memory_space<vmem>>
    tpu.wait_dma2 semaphore(%arg4 : memref<!tpu.dma_semaphore, #tpu.memory_space<semaphore_mem>>) src(%681 : memref<1x128xf32, #tpu.memory_space<any>>) dst(%682 : memref<1x128xf32, #tpu.memory_space<vmem>>)
    %c0_i32_447 = arith.constant 0 : i32
    %683 = tpu.memref_slice %arg2[%108, %c0_i32_447] : memref<64x128xf32, #tpu.memory_space<any>> -> memref<1x128xf32, #tpu.memory_space<any>>
    %c21_i32_448 = arith.constant 21 : i32
    %c0_i32_449 = arith.constant 0 : i32
    %684 = tpu.memref_slice %arg3[%c21_i32_448, %c0_i32_449] : memref<128x128xf32, #tpu.memory_space<vmem>> -> memref<1x128xf32, #tpu.memory_space<vmem>>
    tpu.wait_dma2 semaphore(%arg4 : memref<!tpu.dma_semaphore, #tpu.memory_space<semaphore_mem>>) src(%683 : memref<1x128xf32, #tpu.memory_space<any>>) dst(%684 : memref<1x128xf32, #tpu.memory_space<vmem>>)
    %c0_i32_450 = arith.constant 0 : i32
    %685 = tpu.memref_slice %arg2[%113, %c0_i32_450] : memref<64x128xf32, #tpu.memory_space<any>> -> memref<1x128xf32, #tpu.memory_space<any>>
    %c22_i32_451 = arith.constant 22 : i32
    %c0_i32_452 = arith.constant 0 : i32
    %686 = tpu.memref_slice %arg3[%c22_i32_451, %c0_i32_452] : memref<128x128xf32, #tpu.memory_space<vmem>> -> memref<1x128xf32, #tpu.memory_space<vmem>>
    tpu.wait_dma2 semaphore(%arg4 : memref<!tpu.dma_semaphore, #tpu.memory_space<semaphore_mem>>) src(%685 : memref<1x128xf32, #tpu.memory_space<any>>) dst(%686 : memref<1x128xf32, #tpu.memory_space<vmem>>)
    %c0_i32_453 = arith.constant 0 : i32
    %687 = tpu.memref_slice %arg2[%118, %c0_i32_453] : memref<64x128xf32, #tpu.memory_space<any>> -> memref<1x128xf32, #tpu.memory_space<any>>
    %c23_i32_454 = arith.constant 23 : i32
    %c0_i32_455 = arith.constant 0 : i32
    %688 = tpu.memref_slice %arg3[%c23_i32_454, %c0_i32_455] : memref<128x128xf32, #tpu.memory_space<vmem>> -> memref<1x128xf32, #tpu.memory_space<vmem>>
    tpu.wait_dma2 semaphore(%arg4 : memref<!tpu.dma_semaphore, #tpu.memory_space<semaphore_mem>>) src(%687 : memref<1x128xf32, #tpu.memory_space<any>>) dst(%688 : memref<1x128xf32, #tpu.memory_space<vmem>>)
    %c0_i32_456 = arith.constant 0 : i32
    %689 = tpu.memref_slice %arg2[%123, %c0_i32_456] : memref<64x128xf32, #tpu.memory_space<any>> -> memref<1x128xf32, #tpu.memory_space<any>>
    %c24_i32_457 = arith.constant 24 : i32
    %c0_i32_458 = arith.constant 0 : i32
    %690 = tpu.memref_slice %arg3[%c24_i32_457, %c0_i32_458] : memref<128x128xf32, #tpu.memory_space<vmem>> -> memref<1x128xf32, #tpu.memory_space<vmem>>
    tpu.wait_dma2 semaphore(%arg4 : memref<!tpu.dma_semaphore, #tpu.memory_space<semaphore_mem>>) src(%689 : memref<1x128xf32, #tpu.memory_space<any>>) dst(%690 : memref<1x128xf32, #tpu.memory_space<vmem>>)
    %c0_i32_459 = arith.constant 0 : i32
    %691 = tpu.memref_slice %arg2[%128, %c0_i32_459] : memref<64x128xf32, #tpu.memory_space<any>> -> memref<1x128xf32, #tpu.memory_space<any>>
    %c25_i32_460 = arith.constant 25 : i32
    %c0_i32_461 = arith.constant 0 : i32
    %692 = tpu.memref_slice %arg3[%c25_i32_460, %c0_i32_461] : memref<128x128xf32, #tpu.memory_space<vmem>> -> memref<1x128xf32, #tpu.memory_space<vmem>>
    tpu.wait_dma2 semaphore(%arg4 : memref<!tpu.dma_semaphore, #tpu.memory_space<semaphore_mem>>) src(%691 : memref<1x128xf32, #tpu.memory_space<any>>) dst(%692 : memref<1x128xf32, #tpu.memory_space<vmem>>)
    %c0_i32_462 = arith.constant 0 : i32
    %693 = tpu.memref_slice %arg2[%133, %c0_i32_462] : memref<64x128xf32, #tpu.memory_space<any>> -> memref<1x128xf32, #tpu.memory_space<any>>
    %c26_i32_463 = arith.constant 26 : i32
    %c0_i32_464 = arith.constant 0 : i32
    %694 = tpu.memref_slice %arg3[%c26_i32_463, %c0_i32_464] : memref<128x128xf32, #tpu.memory_space<vmem>> -> memref<1x128xf32, #tpu.memory_space<vmem>>
    tpu.wait_dma2 semaphore(%arg4 : memref<!tpu.dma_semaphore, #tpu.memory_space<semaphore_mem>>) src(%693 : memref<1x128xf32, #tpu.memory_space<any>>) dst(%694 : memref<1x128xf32, #tpu.memory_space<vmem>>)
    %c0_i32_465 = arith.constant 0 : i32
    %695 = tpu.memref_slice %arg2[%138, %c0_i32_465] : memref<64x128xf32, #tpu.memory_space<any>> -> memref<1x128xf32, #tpu.memory_space<any>>
    %c27_i32_466 = arith.constant 27 : i32
    %c0_i32_467 = arith.constant 0 : i32
    %696 = tpu.memref_slice %arg3[%c27_i32_466, %c0_i32_467] : memref<128x128xf32, #tpu.memory_space<vmem>> -> memref<1x128xf32, #tpu.memory_space<vmem>>
    tpu.wait_dma2 semaphore(%arg4 : memref<!tpu.dma_semaphore, #tpu.memory_space<semaphore_mem>>) src(%695 : memref<1x128xf32, #tpu.memory_space<any>>) dst(%696 : memref<1x128xf32, #tpu.memory_space<vmem>>)
    %c0_i32_468 = arith.constant 0 : i32
    %697 = tpu.memref_slice %arg2[%143, %c0_i32_468] : memref<64x128xf32, #tpu.memory_space<any>> -> memref<1x128xf32, #tpu.memory_space<any>>
    %c28_i32_469 = arith.constant 28 : i32
    %c0_i32_470 = arith.constant 0 : i32
    %698 = tpu.memref_slice %arg3[%c28_i32_469, %c0_i32_470] : memref<128x128xf32, #tpu.memory_space<vmem>> -> memref<1x128xf32, #tpu.memory_space<vmem>>
    tpu.wait_dma2 semaphore(%arg4 : memref<!tpu.dma_semaphore, #tpu.memory_space<semaphore_mem>>) src(%697 : memref<1x128xf32, #tpu.memory_space<any>>) dst(%698 : memref<1x128xf32, #tpu.memory_space<vmem>>)
    %c0_i32_471 = arith.constant 0 : i32
    %699 = tpu.memref_slice %arg2[%148, %c0_i32_471] : memref<64x128xf32, #tpu.memory_space<any>> -> memref<1x128xf32, #tpu.memory_space<any>>
    %c29_i32_472 = arith.constant 29 : i32
    %c0_i32_473 = arith.constant 0 : i32
    %700 = tpu.memref_slice %arg3[%c29_i32_472, %c0_i32_473] : memref<128x128xf32, #tpu.memory_space<vmem>> -> memref<1x128xf32, #tpu.memory_space<vmem>>
    tpu.wait_dma2 semaphore(%arg4 : memref<!tpu.dma_semaphore, #tpu.memory_space<semaphore_mem>>) src(%699 : memref<1x128xf32, #tpu.memory_space<any>>) dst(%700 : memref<1x128xf32, #tpu.memory_space<vmem>>)
    %c0_i32_474 = arith.constant 0 : i32
    %701 = tpu.memref_slice %arg2[%153, %c0_i32_474] : memref<64x128xf32, #tpu.memory_space<any>> -> memref<1x128xf32, #tpu.memory_space<any>>
    %c30_i32_475 = arith.constant 30 : i32
    %c0_i32_476 = arith.constant 0 : i32
    %702 = tpu.memref_slice %arg3[%c30_i32_475, %c0_i32_476] : memref<128x128xf32, #tpu.memory_space<vmem>> -> memref<1x128xf32, #tpu.memory_space<vmem>>
    tpu.wait_dma2 semaphore(%arg4 : memref<!tpu.dma_semaphore, #tpu.memory_space<semaphore_mem>>) src(%701 : memref<1x128xf32, #tpu.memory_space<any>>) dst(%702 : memref<1x128xf32, #tpu.memory_space<vmem>>)
    %c0_i32_477 = arith.constant 0 : i32
    %703 = tpu.memref_slice %arg2[%158, %c0_i32_477] : memref<64x128xf32, #tpu.memory_space<any>> -> memref<1x128xf32, #tpu.memory_space<any>>
    %c31_i32_478 = arith.constant 31 : i32
    %c0_i32_479 = arith.constant 0 : i32
    %704 = tpu.memref_slice %arg3[%c31_i32_478, %c0_i32_479] : memref<128x128xf32, #tpu.memory_space<vmem>> -> memref<1x128xf32, #tpu.memory_space<vmem>>
    tpu.wait_dma2 semaphore(%arg4 : memref<!tpu.dma_semaphore, #tpu.memory_space<semaphore_mem>>) src(%703 : memref<1x128xf32, #tpu.memory_space<any>>) dst(%704 : memref<1x128xf32, #tpu.memory_space<vmem>>)
    %c0_i32_480 = arith.constant 0 : i32
    %705 = tpu.memref_slice %arg2[%163, %c0_i32_480] : memref<64x128xf32, #tpu.memory_space<any>> -> memref<1x128xf32, #tpu.memory_space<any>>
    %c32_i32_481 = arith.constant 32 : i32
    %c0_i32_482 = arith.constant 0 : i32
    %706 = tpu.memref_slice %arg3[%c32_i32_481, %c0_i32_482] : memref<128x128xf32, #tpu.memory_space<vmem>> -> memref<1x128xf32, #tpu.memory_space<vmem>>
    tpu.wait_dma2 semaphore(%arg4 : memref<!tpu.dma_semaphore, #tpu.memory_space<semaphore_mem>>) src(%705 : memref<1x128xf32, #tpu.memory_space<any>>) dst(%706 : memref<1x128xf32, #tpu.memory_space<vmem>>)
    %c0_i32_483 = arith.constant 0 : i32
    %707 = tpu.memref_slice %arg2[%168, %c0_i32_483] : memref<64x128xf32, #tpu.memory_space<any>> -> memref<1x128xf32, #tpu.memory_space<any>>
    %c33_i32_484 = arith.constant 33 : i32
    %c0_i32_485 = arith.constant 0 : i32
    %708 = tpu.memref_slice %arg3[%c33_i32_484, %c0_i32_485] : memref<128x128xf32, #tpu.memory_space<vmem>> -> memref<1x128xf32, #tpu.memory_space<vmem>>
    tpu.wait_dma2 semaphore(%arg4 : memref<!tpu.dma_semaphore, #tpu.memory_space<semaphore_mem>>) src(%707 : memref<1x128xf32, #tpu.memory_space<any>>) dst(%708 : memref<1x128xf32, #tpu.memory_space<vmem>>)
    %c0_i32_486 = arith.constant 0 : i32
    %709 = tpu.memref_slice %arg2[%173, %c0_i32_486] : memref<64x128xf32, #tpu.memory_space<any>> -> memref<1x128xf32, #tpu.memory_space<any>>
    %c34_i32_487 = arith.constant 34 : i32
    %c0_i32_488 = arith.constant 0 : i32
    %710 = tpu.memref_slice %arg3[%c34_i32_487, %c0_i32_488] : memref<128x128xf32, #tpu.memory_space<vmem>> -> memref<1x128xf32, #tpu.memory_space<vmem>>
    tpu.wait_dma2 semaphore(%arg4 : memref<!tpu.dma_semaphore, #tpu.memory_space<semaphore_mem>>) src(%709 : memref<1x128xf32, #tpu.memory_space<any>>) dst(%710 : memref<1x128xf32, #tpu.memory_space<vmem>>)
    %c0_i32_489 = arith.constant 0 : i32
    %711 = tpu.memref_slice %arg2[%178, %c0_i32_489] : memref<64x128xf32, #tpu.memory_space<any>> -> memref<1x128xf32, #tpu.memory_space<any>>
    %c35_i32_490 = arith.constant 35 : i32
    %c0_i32_491 = arith.constant 0 : i32
    %712 = tpu.memref_slice %arg3[%c35_i32_490, %c0_i32_491] : memref<128x128xf32, #tpu.memory_space<vmem>> -> memref<1x128xf32, #tpu.memory_space<vmem>>
    tpu.wait_dma2 semaphore(%arg4 : memref<!tpu.dma_semaphore, #tpu.memory_space<semaphore_mem>>) src(%711 : memref<1x128xf32, #tpu.memory_space<any>>) dst(%712 : memref<1x128xf32, #tpu.memory_space<vmem>>)
    %c0_i32_492 = arith.constant 0 : i32
    %713 = tpu.memref_slice %arg2[%183, %c0_i32_492] : memref<64x128xf32, #tpu.memory_space<any>> -> memref<1x128xf32, #tpu.memory_space<any>>
    %c36_i32_493 = arith.constant 36 : i32
    %c0_i32_494 = arith.constant 0 : i32
    %714 = tpu.memref_slice %arg3[%c36_i32_493, %c0_i32_494] : memref<128x128xf32, #tpu.memory_space<vmem>> -> memref<1x128xf32, #tpu.memory_space<vmem>>
    tpu.wait_dma2 semaphore(%arg4 : memref<!tpu.dma_semaphore, #tpu.memory_space<semaphore_mem>>) src(%713 : memref<1x128xf32, #tpu.memory_space<any>>) dst(%714 : memref<1x128xf32, #tpu.memory_space<vmem>>)
    %c0_i32_495 = arith.constant 0 : i32
    %715 = tpu.memref_slice %arg2[%188, %c0_i32_495] : memref<64x128xf32, #tpu.memory_space<any>> -> memref<1x128xf32, #tpu.memory_space<any>>
    %c37_i32_496 = arith.constant 37 : i32
    %c0_i32_497 = arith.constant 0 : i32
    %716 = tpu.memref_slice %arg3[%c37_i32_496, %c0_i32_497] : memref<128x128xf32, #tpu.memory_space<vmem>> -> memref<1x128xf32, #tpu.memory_space<vmem>>
    tpu.wait_dma2 semaphore(%arg4 : memref<!tpu.dma_semaphore, #tpu.memory_space<semaphore_mem>>) src(%715 : memref<1x128xf32, #tpu.memory_space<any>>) dst(%716 : memref<1x128xf32, #tpu.memory_space<vmem>>)
    %c0_i32_498 = arith.constant 0 : i32
    %717 = tpu.memref_slice %arg2[%193, %c0_i32_498] : memref<64x128xf32, #tpu.memory_space<any>> -> memref<1x128xf32, #tpu.memory_space<any>>
    %c38_i32_499 = arith.constant 38 : i32
    %c0_i32_500 = arith.constant 0 : i32
    %718 = tpu.memref_slice %arg3[%c38_i32_499, %c0_i32_500] : memref<128x128xf32, #tpu.memory_space<vmem>> -> memref<1x128xf32, #tpu.memory_space<vmem>>
    tpu.wait_dma2 semaphore(%arg4 : memref<!tpu.dma_semaphore, #tpu.memory_space<semaphore_mem>>) src(%717 : memref<1x128xf32, #tpu.memory_space<any>>) dst(%718 : memref<1x128xf32, #tpu.memory_space<vmem>>)
    %c0_i32_501 = arith.constant 0 : i32
    %719 = tpu.memref_slice %arg2[%198, %c0_i32_501] : memref<64x128xf32, #tpu.memory_space<any>> -> memref<1x128xf32, #tpu.memory_space<any>>
    %c39_i32_502 = arith.constant 39 : i32
    %c0_i32_503 = arith.constant 0 : i32
    %720 = tpu.memref_slice %arg3[%c39_i32_502, %c0_i32_503] : memref<128x128xf32, #tpu.memory_space<vmem>> -> memref<1x128xf32, #tpu.memory_space<vmem>>
    tpu.wait_dma2 semaphore(%arg4 : memref<!tpu.dma_semaphore, #tpu.memory_space<semaphore_mem>>) src(%719 : memref<1x128xf32, #tpu.memory_space<any>>) dst(%720 : memref<1x128xf32, #tpu.memory_space<vmem>>)
    %c0_i32_504 = arith.constant 0 : i32
    %721 = tpu.memref_slice %arg2[%203, %c0_i32_504] : memref<64x128xf32, #tpu.memory_space<any>> -> memref<1x128xf32, #tpu.memory_space<any>>
    %c40_i32_505 = arith.constant 40 : i32
    %c0_i32_506 = arith.constant 0 : i32
    %722 = tpu.memref_slice %arg3[%c40_i32_505, %c0_i32_506] : memref<128x128xf32, #tpu.memory_space<vmem>> -> memref<1x128xf32, #tpu.memory_space<vmem>>
    tpu.wait_dma2 semaphore(%arg4 : memref<!tpu.dma_semaphore, #tpu.memory_space<semaphore_mem>>) src(%721 : memref<1x128xf32, #tpu.memory_space<any>>) dst(%722 : memref<1x128xf32, #tpu.memory_space<vmem>>)
    %c0_i32_507 = arith.constant 0 : i32
    %723 = tpu.memref_slice %arg2[%208, %c0_i32_507] : memref<64x128xf32, #tpu.memory_space<any>> -> memref<1x128xf32, #tpu.memory_space<any>>
    %c41_i32_508 = arith.constant 41 : i32
    %c0_i32_509 = arith.constant 0 : i32
    %724 = tpu.memref_slice %arg3[%c41_i32_508, %c0_i32_509] : memref<128x128xf32, #tpu.memory_space<vmem>> -> memref<1x128xf32, #tpu.memory_space<vmem>>
    tpu.wait_dma2 semaphore(%arg4 : memref<!tpu.dma_semaphore, #tpu.memory_space<semaphore_mem>>) src(%723 : memref<1x128xf32, #tpu.memory_space<any>>) dst(%724 : memref<1x128xf32, #tpu.memory_space<vmem>>)
    %c0_i32_510 = arith.constant 0 : i32
    %725 = tpu.memref_slice %arg2[%213, %c0_i32_510] : memref<64x128xf32, #tpu.memory_space<any>> -> memref<1x128xf32, #tpu.memory_space<any>>
    %c42_i32_511 = arith.constant 42 : i32
    %c0_i32_512 = arith.constant 0 : i32
    %726 = tpu.memref_slice %arg3[%c42_i32_511, %c0_i32_512] : memref<128x128xf32, #tpu.memory_space<vmem>> -> memref<1x128xf32, #tpu.memory_space<vmem>>
    tpu.wait_dma2 semaphore(%arg4 : memref<!tpu.dma_semaphore, #tpu.memory_space<semaphore_mem>>) src(%725 : memref<1x128xf32, #tpu.memory_space<any>>) dst(%726 : memref<1x128xf32, #tpu.memory_space<vmem>>)
    %c0_i32_513 = arith.constant 0 : i32
    %727 = tpu.memref_slice %arg2[%218, %c0_i32_513] : memref<64x128xf32, #tpu.memory_space<any>> -> memref<1x128xf32, #tpu.memory_space<any>>
    %c43_i32_514 = arith.constant 43 : i32
    %c0_i32_515 = arith.constant 0 : i32
    %728 = tpu.memref_slice %arg3[%c43_i32_514, %c0_i32_515] : memref<128x128xf32, #tpu.memory_space<vmem>> -> memref<1x128xf32, #tpu.memory_space<vmem>>
    tpu.wait_dma2 semaphore(%arg4 : memref<!tpu.dma_semaphore, #tpu.memory_space<semaphore_mem>>) src(%727 : memref<1x128xf32, #tpu.memory_space<any>>) dst(%728 : memref<1x128xf32, #tpu.memory_space<vmem>>)
    %c0_i32_516 = arith.constant 0 : i32
    %729 = tpu.memref_slice %arg2[%223, %c0_i32_516] : memref<64x128xf32, #tpu.memory_space<any>> -> memref<1x128xf32, #tpu.memory_space<any>>
    %c44_i32_517 = arith.constant 44 : i32
    %c0_i32_518 = arith.constant 0 : i32
    %730 = tpu.memref_slice %arg3[%c44_i32_517, %c0_i32_518] : memref<128x128xf32, #tpu.memory_space<vmem>> -> memref<1x128xf32, #tpu.memory_space<vmem>>
    tpu.wait_dma2 semaphore(%arg4 : memref<!tpu.dma_semaphore, #tpu.memory_space<semaphore_mem>>) src(%729 : memref<1x128xf32, #tpu.memory_space<any>>) dst(%730 : memref<1x128xf32, #tpu.memory_space<vmem>>)
    %c0_i32_519 = arith.constant 0 : i32
    %731 = tpu.memref_slice %arg2[%228, %c0_i32_519] : memref<64x128xf32, #tpu.memory_space<any>> -> memref<1x128xf32, #tpu.memory_space<any>>
    %c45_i32_520 = arith.constant 45 : i32
    %c0_i32_521 = arith.constant 0 : i32
    %732 = tpu.memref_slice %arg3[%c45_i32_520, %c0_i32_521] : memref<128x128xf32, #tpu.memory_space<vmem>> -> memref<1x128xf32, #tpu.memory_space<vmem>>
    tpu.wait_dma2 semaphore(%arg4 : memref<!tpu.dma_semaphore, #tpu.memory_space<semaphore_mem>>) src(%731 : memref<1x128xf32, #tpu.memory_space<any>>) dst(%732 : memref<1x128xf32, #tpu.memory_space<vmem>>)
    %c0_i32_522 = arith.constant 0 : i32
    %733 = tpu.memref_slice %arg2[%233, %c0_i32_522] : memref<64x128xf32, #tpu.memory_space<any>> -> memref<1x128xf32, #tpu.memory_space<any>>
    %c46_i32_523 = arith.constant 46 : i32
    %c0_i32_524 = arith.constant 0 : i32
    %734 = tpu.memref_slice %arg3[%c46_i32_523, %c0_i32_524] : memref<128x128xf32, #tpu.memory_space<vmem>> -> memref<1x128xf32, #tpu.memory_space<vmem>>
    tpu.wait_dma2 semaphore(%arg4 : memref<!tpu.dma_semaphore, #tpu.memory_space<semaphore_mem>>) src(%733 : memref<1x128xf32, #tpu.memory_space<any>>) dst(%734 : memref<1x128xf32, #tpu.memory_space<vmem>>)
    %c0_i32_525 = arith.constant 0 : i32
    %735 = tpu.memref_slice %arg2[%238, %c0_i32_525] : memref<64x128xf32, #tpu.memory_space<any>> -> memref<1x128xf32, #tpu.memory_space<any>>
    %c47_i32_526 = arith.constant 47 : i32
    %c0_i32_527 = arith.constant 0 : i32
    %736 = tpu.memref_slice %arg3[%c47_i32_526, %c0_i32_527] : memref<128x128xf32, #tpu.memory_space<vmem>> -> memref<1x128xf32, #tpu.memory_space<vmem>>
    tpu.wait_dma2 semaphore(%arg4 : memref<!tpu.dma_semaphore, #tpu.memory_space<semaphore_mem>>) src(%735 : memref<1x128xf32, #tpu.memory_space<any>>) dst(%736 : memref<1x128xf32, #tpu.memory_space<vmem>>)
    %c0_i32_528 = arith.constant 0 : i32
    %737 = tpu.memref_slice %arg2[%243, %c0_i32_528] : memref<64x128xf32, #tpu.memory_space<any>> -> memref<1x128xf32, #tpu.memory_space<any>>
    %c48_i32_529 = arith.constant 48 : i32
    %c0_i32_530 = arith.constant 0 : i32
    %738 = tpu.memref_slice %arg3[%c48_i32_529, %c0_i32_530] : memref<128x128xf32, #tpu.memory_space<vmem>> -> memref<1x128xf32, #tpu.memory_space<vmem>>
    tpu.wait_dma2 semaphore(%arg4 : memref<!tpu.dma_semaphore, #tpu.memory_space<semaphore_mem>>) src(%737 : memref<1x128xf32, #tpu.memory_space<any>>) dst(%738 : memref<1x128xf32, #tpu.memory_space<vmem>>)
    %c0_i32_531 = arith.constant 0 : i32
    %739 = tpu.memref_slice %arg2[%248, %c0_i32_531] : memref<64x128xf32, #tpu.memory_space<any>> -> memref<1x128xf32, #tpu.memory_space<any>>
    %c49_i32_532 = arith.constant 49 : i32
    %c0_i32_533 = arith.constant 0 : i32
    %740 = tpu.memref_slice %arg3[%c49_i32_532, %c0_i32_533] : memref<128x128xf32, #tpu.memory_space<vmem>> -> memref<1x128xf32, #tpu.memory_space<vmem>>
    tpu.wait_dma2 semaphore(%arg4 : memref<!tpu.dma_semaphore, #tpu.memory_space<semaphore_mem>>) src(%739 : memref<1x128xf32, #tpu.memory_space<any>>) dst(%740 : memref<1x128xf32, #tpu.memory_space<vmem>>)
    %c0_i32_534 = arith.constant 0 : i32
    %741 = tpu.memref_slice %arg2[%253, %c0_i32_534] : memref<64x128xf32, #tpu.memory_space<any>> -> memref<1x128xf32, #tpu.memory_space<any>>
    %c50_i32_535 = arith.constant 50 : i32
    %c0_i32_536 = arith.constant 0 : i32
    %742 = tpu.memref_slice %arg3[%c50_i32_535, %c0_i32_536] : memref<128x128xf32, #tpu.memory_space<vmem>> -> memref<1x128xf32, #tpu.memory_space<vmem>>
    tpu.wait_dma2 semaphore(%arg4 : memref<!tpu.dma_semaphore, #tpu.memory_space<semaphore_mem>>) src(%741 : memref<1x128xf32, #tpu.memory_space<any>>) dst(%742 : memref<1x128xf32, #tpu.memory_space<vmem>>)
    %c0_i32_537 = arith.constant 0 : i32
    %743 = tpu.memref_slice %arg2[%258, %c0_i32_537] : memref<64x128xf32, #tpu.memory_space<any>> -> memref<1x128xf32, #tpu.memory_space<any>>
    %c51_i32_538 = arith.constant 51 : i32
    %c0_i32_539 = arith.constant 0 : i32
    %744 = tpu.memref_slice %arg3[%c51_i32_538, %c0_i32_539] : memref<128x128xf32, #tpu.memory_space<vmem>> -> memref<1x128xf32, #tpu.memory_space<vmem>>
    tpu.wait_dma2 semaphore(%arg4 : memref<!tpu.dma_semaphore, #tpu.memory_space<semaphore_mem>>) src(%743 : memref<1x128xf32, #tpu.memory_space<any>>) dst(%744 : memref<1x128xf32, #tpu.memory_space<vmem>>)
    %c0_i32_540 = arith.constant 0 : i32
    %745 = tpu.memref_slice %arg2[%263, %c0_i32_540] : memref<64x128xf32, #tpu.memory_space<any>> -> memref<1x128xf32, #tpu.memory_space<any>>
    %c52_i32_541 = arith.constant 52 : i32
    %c0_i32_542 = arith.constant 0 : i32
    %746 = tpu.memref_slice %arg3[%c52_i32_541, %c0_i32_542] : memref<128x128xf32, #tpu.memory_space<vmem>> -> memref<1x128xf32, #tpu.memory_space<vmem>>
    tpu.wait_dma2 semaphore(%arg4 : memref<!tpu.dma_semaphore, #tpu.memory_space<semaphore_mem>>) src(%745 : memref<1x128xf32, #tpu.memory_space<any>>) dst(%746 : memref<1x128xf32, #tpu.memory_space<vmem>>)
    %c0_i32_543 = arith.constant 0 : i32
    %747 = tpu.memref_slice %arg2[%268, %c0_i32_543] : memref<64x128xf32, #tpu.memory_space<any>> -> memref<1x128xf32, #tpu.memory_space<any>>
    %c53_i32_544 = arith.constant 53 : i32
    %c0_i32_545 = arith.constant 0 : i32
    %748 = tpu.memref_slice %arg3[%c53_i32_544, %c0_i32_545] : memref<128x128xf32, #tpu.memory_space<vmem>> -> memref<1x128xf32, #tpu.memory_space<vmem>>
    tpu.wait_dma2 semaphore(%arg4 : memref<!tpu.dma_semaphore, #tpu.memory_space<semaphore_mem>>) src(%747 : memref<1x128xf32, #tpu.memory_space<any>>) dst(%748 : memref<1x128xf32, #tpu.memory_space<vmem>>)
    %c0_i32_546 = arith.constant 0 : i32
    %749 = tpu.memref_slice %arg2[%273, %c0_i32_546] : memref<64x128xf32, #tpu.memory_space<any>> -> memref<1x128xf32, #tpu.memory_space<any>>
    %c54_i32_547 = arith.constant 54 : i32
    %c0_i32_548 = arith.constant 0 : i32
    %750 = tpu.memref_slice %arg3[%c54_i32_547, %c0_i32_548] : memref<128x128xf32, #tpu.memory_space<vmem>> -> memref<1x128xf32, #tpu.memory_space<vmem>>
    tpu.wait_dma2 semaphore(%arg4 : memref<!tpu.dma_semaphore, #tpu.memory_space<semaphore_mem>>) src(%749 : memref<1x128xf32, #tpu.memory_space<any>>) dst(%750 : memref<1x128xf32, #tpu.memory_space<vmem>>)
    %c0_i32_549 = arith.constant 0 : i32
    %751 = tpu.memref_slice %arg2[%278, %c0_i32_549] : memref<64x128xf32, #tpu.memory_space<any>> -> memref<1x128xf32, #tpu.memory_space<any>>
    %c55_i32_550 = arith.constant 55 : i32
    %c0_i32_551 = arith.constant 0 : i32
    %752 = tpu.memref_slice %arg3[%c55_i32_550, %c0_i32_551] : memref<128x128xf32, #tpu.memory_space<vmem>> -> memref<1x128xf32, #tpu.memory_space<vmem>>
    tpu.wait_dma2 semaphore(%arg4 : memref<!tpu.dma_semaphore, #tpu.memory_space<semaphore_mem>>) src(%751 : memref<1x128xf32, #tpu.memory_space<any>>) dst(%752 : memref<1x128xf32, #tpu.memory_space<vmem>>)
    %c0_i32_552 = arith.constant 0 : i32
    %753 = tpu.memref_slice %arg2[%283, %c0_i32_552] : memref<64x128xf32, #tpu.memory_space<any>> -> memref<1x128xf32, #tpu.memory_space<any>>
    %c56_i32_553 = arith.constant 56 : i32
    %c0_i32_554 = arith.constant 0 : i32
    %754 = tpu.memref_slice %arg3[%c56_i32_553, %c0_i32_554] : memref<128x128xf32, #tpu.memory_space<vmem>> -> memref<1x128xf32, #tpu.memory_space<vmem>>
    tpu.wait_dma2 semaphore(%arg4 : memref<!tpu.dma_semaphore, #tpu.memory_space<semaphore_mem>>) src(%753 : memref<1x128xf32, #tpu.memory_space<any>>) dst(%754 : memref<1x128xf32, #tpu.memory_space<vmem>>)
    %c0_i32_555 = arith.constant 0 : i32
    %755 = tpu.memref_slice %arg2[%288, %c0_i32_555] : memref<64x128xf32, #tpu.memory_space<any>> -> memref<1x128xf32, #tpu.memory_space<any>>
    %c57_i32_556 = arith.constant 57 : i32
    %c0_i32_557 = arith.constant 0 : i32
    %756 = tpu.memref_slice %arg3[%c57_i32_556, %c0_i32_557] : memref<128x128xf32, #tpu.memory_space<vmem>> -> memref<1x128xf32, #tpu.memory_space<vmem>>
    tpu.wait_dma2 semaphore(%arg4 : memref<!tpu.dma_semaphore, #tpu.memory_space<semaphore_mem>>) src(%755 : memref<1x128xf32, #tpu.memory_space<any>>) dst(%756 : memref<1x128xf32, #tpu.memory_space<vmem>>)
    %c0_i32_558 = arith.constant 0 : i32
    %757 = tpu.memref_slice %arg2[%293, %c0_i32_558] : memref<64x128xf32, #tpu.memory_space<any>> -> memref<1x128xf32, #tpu.memory_space<any>>
    %c58_i32_559 = arith.constant 58 : i32
    %c0_i32_560 = arith.constant 0 : i32
    %758 = tpu.memref_slice %arg3[%c58_i32_559, %c0_i32_560] : memref<128x128xf32, #tpu.memory_space<vmem>> -> memref<1x128xf32, #tpu.memory_space<vmem>>
    tpu.wait_dma2 semaphore(%arg4 : memref<!tpu.dma_semaphore, #tpu.memory_space<semaphore_mem>>) src(%757 : memref<1x128xf32, #tpu.memory_space<any>>) dst(%758 : memref<1x128xf32, #tpu.memory_space<vmem>>)
    %c0_i32_561 = arith.constant 0 : i32
    %759 = tpu.memref_slice %arg2[%298, %c0_i32_561] : memref<64x128xf32, #tpu.memory_space<any>> -> memref<1x128xf32, #tpu.memory_space<any>>
    %c59_i32_562 = arith.constant 59 : i32
    %c0_i32_563 = arith.constant 0 : i32
    %760 = tpu.memref_slice %arg3[%c59_i32_562, %c0_i32_563] : memref<128x128xf32, #tpu.memory_space<vmem>> -> memref<1x128xf32, #tpu.memory_space<vmem>>
    tpu.wait_dma2 semaphore(%arg4 : memref<!tpu.dma_semaphore, #tpu.memory_space<semaphore_mem>>) src(%759 : memref<1x128xf32, #tpu.memory_space<any>>) dst(%760 : memref<1x128xf32, #tpu.memory_space<vmem>>)
    %c0_i32_564 = arith.constant 0 : i32
    %761 = tpu.memref_slice %arg2[%303, %c0_i32_564] : memref<64x128xf32, #tpu.memory_space<any>> -> memref<1x128xf32, #tpu.memory_space<any>>
    %c60_i32_565 = arith.constant 60 : i32
    %c0_i32_566 = arith.constant 0 : i32
    %762 = tpu.memref_slice %arg3[%c60_i32_565, %c0_i32_566] : memref<128x128xf32, #tpu.memory_space<vmem>> -> memref<1x128xf32, #tpu.memory_space<vmem>>
    tpu.wait_dma2 semaphore(%arg4 : memref<!tpu.dma_semaphore, #tpu.memory_space<semaphore_mem>>) src(%761 : memref<1x128xf32, #tpu.memory_space<any>>) dst(%762 : memref<1x128xf32, #tpu.memory_space<vmem>>)
    %c0_i32_567 = arith.constant 0 : i32
    %763 = tpu.memref_slice %arg2[%308, %c0_i32_567] : memref<64x128xf32, #tpu.memory_space<any>> -> memref<1x128xf32, #tpu.memory_space<any>>
    %c61_i32_568 = arith.constant 61 : i32
    %c0_i32_569 = arith.constant 0 : i32
    %764 = tpu.memref_slice %arg3[%c61_i32_568, %c0_i32_569] : memref<128x128xf32, #tpu.memory_space<vmem>> -> memref<1x128xf32, #tpu.memory_space<vmem>>
    tpu.wait_dma2 semaphore(%arg4 : memref<!tpu.dma_semaphore, #tpu.memory_space<semaphore_mem>>) src(%763 : memref<1x128xf32, #tpu.memory_space<any>>) dst(%764 : memref<1x128xf32, #tpu.memory_space<vmem>>)
    %c0_i32_570 = arith.constant 0 : i32
    %765 = tpu.memref_slice %arg2[%313, %c0_i32_570] : memref<64x128xf32, #tpu.memory_space<any>> -> memref<1x128xf32, #tpu.memory_space<any>>
    %c62_i32_571 = arith.constant 62 : i32
    %c0_i32_572 = arith.constant 0 : i32
    %766 = tpu.memref_slice %arg3[%c62_i32_571, %c0_i32_572] : memref<128x128xf32, #tpu.memory_space<vmem>> -> memref<1x128xf32, #tpu.memory_space<vmem>>
    tpu.wait_dma2 semaphore(%arg4 : memref<!tpu.dma_semaphore, #tpu.memory_space<semaphore_mem>>) src(%765 : memref<1x128xf32, #tpu.memory_space<any>>) dst(%766 : memref<1x128xf32, #tpu.memory_space<vmem>>)
    %c0_i32_573 = arith.constant 0 : i32
    %767 = tpu.memref_slice %arg2[%318, %c0_i32_573] : memref<64x128xf32, #tpu.memory_space<any>> -> memref<1x128xf32, #tpu.memory_space<any>>
    %c63_i32_574 = arith.constant 63 : i32
    %c0_i32_575 = arith.constant 0 : i32
    %768 = tpu.memref_slice %arg3[%c63_i32_574, %c0_i32_575] : memref<128x128xf32, #tpu.memory_space<vmem>> -> memref<1x128xf32, #tpu.memory_space<vmem>>
    tpu.wait_dma2 semaphore(%arg4 : memref<!tpu.dma_semaphore, #tpu.memory_space<semaphore_mem>>) src(%767 : memref<1x128xf32, #tpu.memory_space<any>>) dst(%768 : memref<1x128xf32, #tpu.memory_space<vmem>>)
    %c0_i32_576 = arith.constant 0 : i32
    %769 = tpu.memref_slice %arg2[%323, %c0_i32_576] : memref<64x128xf32, #tpu.memory_space<any>> -> memref<1x128xf32, #tpu.memory_space<any>>
    %c64_i32_577 = arith.constant 64 : i32
    %c0_i32_578 = arith.constant 0 : i32
    %770 = tpu.memref_slice %arg3[%c64_i32_577, %c0_i32_578] : memref<128x128xf32, #tpu.memory_space<vmem>> -> memref<1x128xf32, #tpu.memory_space<vmem>>
    tpu.wait_dma2 semaphore(%arg4 : memref<!tpu.dma_semaphore, #tpu.memory_space<semaphore_mem>>) src(%769 : memref<1x128xf32, #tpu.memory_space<any>>) dst(%770 : memref<1x128xf32, #tpu.memory_space<vmem>>)
    %c0_i32_579 = arith.constant 0 : i32
    %771 = tpu.memref_slice %arg2[%328, %c0_i32_579] : memref<64x128xf32, #tpu.memory_space<any>> -> memref<1x128xf32, #tpu.memory_space<any>>
    %c65_i32_580 = arith.constant 65 : i32
    %c0_i32_581 = arith.constant 0 : i32
    %772 = tpu.memref_slice %arg3[%c65_i32_580, %c0_i32_581] : memref<128x128xf32, #tpu.memory_space<vmem>> -> memref<1x128xf32, #tpu.memory_space<vmem>>
    tpu.wait_dma2 semaphore(%arg4 : memref<!tpu.dma_semaphore, #tpu.memory_space<semaphore_mem>>) src(%771 : memref<1x128xf32, #tpu.memory_space<any>>) dst(%772 : memref<1x128xf32, #tpu.memory_space<vmem>>)
    %c0_i32_582 = arith.constant 0 : i32
    %773 = tpu.memref_slice %arg2[%333, %c0_i32_582] : memref<64x128xf32, #tpu.memory_space<any>> -> memref<1x128xf32, #tpu.memory_space<any>>
    %c66_i32_583 = arith.constant 66 : i32
    %c0_i32_584 = arith.constant 0 : i32
    %774 = tpu.memref_slice %arg3[%c66_i32_583, %c0_i32_584] : memref<128x128xf32, #tpu.memory_space<vmem>> -> memref<1x128xf32, #tpu.memory_space<vmem>>
    tpu.wait_dma2 semaphore(%arg4 : memref<!tpu.dma_semaphore, #tpu.memory_space<semaphore_mem>>) src(%773 : memref<1x128xf32, #tpu.memory_space<any>>) dst(%774 : memref<1x128xf32, #tpu.memory_space<vmem>>)
    %c0_i32_585 = arith.constant 0 : i32
    %775 = tpu.memref_slice %arg2[%338, %c0_i32_585] : memref<64x128xf32, #tpu.memory_space<any>> -> memref<1x128xf32, #tpu.memory_space<any>>
    %c67_i32_586 = arith.constant 67 : i32
    %c0_i32_587 = arith.constant 0 : i32
    %776 = tpu.memref_slice %arg3[%c67_i32_586, %c0_i32_587] : memref<128x128xf32, #tpu.memory_space<vmem>> -> memref<1x128xf32, #tpu.memory_space<vmem>>
    tpu.wait_dma2 semaphore(%arg4 : memref<!tpu.dma_semaphore, #tpu.memory_space<semaphore_mem>>) src(%775 : memref<1x128xf32, #tpu.memory_space<any>>) dst(%776 : memref<1x128xf32, #tpu.memory_space<vmem>>)
    %c0_i32_588 = arith.constant 0 : i32
    %777 = tpu.memref_slice %arg2[%343, %c0_i32_588] : memref<64x128xf32, #tpu.memory_space<any>> -> memref<1x128xf32, #tpu.memory_space<any>>
    %c68_i32_589 = arith.constant 68 : i32
    %c0_i32_590 = arith.constant 0 : i32
    %778 = tpu.memref_slice %arg3[%c68_i32_589, %c0_i32_590] : memref<128x128xf32, #tpu.memory_space<vmem>> -> memref<1x128xf32, #tpu.memory_space<vmem>>
    tpu.wait_dma2 semaphore(%arg4 : memref<!tpu.dma_semaphore, #tpu.memory_space<semaphore_mem>>) src(%777 : memref<1x128xf32, #tpu.memory_space<any>>) dst(%778 : memref<1x128xf32, #tpu.memory_space<vmem>>)
    %c0_i32_591 = arith.constant 0 : i32
    %779 = tpu.memref_slice %arg2[%348, %c0_i32_591] : memref<64x128xf32, #tpu.memory_space<any>> -> memref<1x128xf32, #tpu.memory_space<any>>
    %c69_i32_592 = arith.constant 69 : i32
    %c0_i32_593 = arith.constant 0 : i32
    %780 = tpu.memref_slice %arg3[%c69_i32_592, %c0_i32_593] : memref<128x128xf32, #tpu.memory_space<vmem>> -> memref<1x128xf32, #tpu.memory_space<vmem>>
    tpu.wait_dma2 semaphore(%arg4 : memref<!tpu.dma_semaphore, #tpu.memory_space<semaphore_mem>>) src(%779 : memref<1x128xf32, #tpu.memory_space<any>>) dst(%780 : memref<1x128xf32, #tpu.memory_space<vmem>>)
    %c0_i32_594 = arith.constant 0 : i32
    %781 = tpu.memref_slice %arg2[%353, %c0_i32_594] : memref<64x128xf32, #tpu.memory_space<any>> -> memref<1x128xf32, #tpu.memory_space<any>>
    %c70_i32_595 = arith.constant 70 : i32
    %c0_i32_596 = arith.constant 0 : i32
    %782 = tpu.memref_slice %arg3[%c70_i32_595, %c0_i32_596] : memref<128x128xf32, #tpu.memory_space<vmem>> -> memref<1x128xf32, #tpu.memory_space<vmem>>
    tpu.wait_dma2 semaphore(%arg4 : memref<!tpu.dma_semaphore, #tpu.memory_space<semaphore_mem>>) src(%781 : memref<1x128xf32, #tpu.memory_space<any>>) dst(%782 : memref<1x128xf32, #tpu.memory_space<vmem>>)
    %c0_i32_597 = arith.constant 0 : i32
    %783 = tpu.memref_slice %arg2[%358, %c0_i32_597] : memref<64x128xf32, #tpu.memory_space<any>> -> memref<1x128xf32, #tpu.memory_space<any>>
    %c71_i32_598 = arith.constant 71 : i32
    %c0_i32_599 = arith.constant 0 : i32
    %784 = tpu.memref_slice %arg3[%c71_i32_598, %c0_i32_599] : memref<128x128xf32, #tpu.memory_space<vmem>> -> memref<1x128xf32, #tpu.memory_space<vmem>>
    tpu.wait_dma2 semaphore(%arg4 : memref<!tpu.dma_semaphore, #tpu.memory_space<semaphore_mem>>) src(%783 : memref<1x128xf32, #tpu.memory_space<any>>) dst(%784 : memref<1x128xf32, #tpu.memory_space<vmem>>)
    %c0_i32_600 = arith.constant 0 : i32
    %785 = tpu.memref_slice %arg2[%363, %c0_i32_600] : memref<64x128xf32, #tpu.memory_space<any>> -> memref<1x128xf32, #tpu.memory_space<any>>
    %c72_i32_601 = arith.constant 72 : i32
    %c0_i32_602 = arith.constant 0 : i32
    %786 = tpu.memref_slice %arg3[%c72_i32_601, %c0_i32_602] : memref<128x128xf32, #tpu.memory_space<vmem>> -> memref<1x128xf32, #tpu.memory_space<vmem>>
    tpu.wait_dma2 semaphore(%arg4 : memref<!tpu.dma_semaphore, #tpu.memory_space<semaphore_mem>>) src(%785 : memref<1x128xf32, #tpu.memory_space<any>>) dst(%786 : memref<1x128xf32, #tpu.memory_space<vmem>>)
    %c0_i32_603 = arith.constant 0 : i32
    %787 = tpu.memref_slice %arg2[%368, %c0_i32_603] : memref<64x128xf32, #tpu.memory_space<any>> -> memref<1x128xf32, #tpu.memory_space<any>>
    %c73_i32_604 = arith.constant 73 : i32
    %c0_i32_605 = arith.constant 0 : i32
    %788 = tpu.memref_slice %arg3[%c73_i32_604, %c0_i32_605] : memref<128x128xf32, #tpu.memory_space<vmem>> -> memref<1x128xf32, #tpu.memory_space<vmem>>
    tpu.wait_dma2 semaphore(%arg4 : memref<!tpu.dma_semaphore, #tpu.memory_space<semaphore_mem>>) src(%787 : memref<1x128xf32, #tpu.memory_space<any>>) dst(%788 : memref<1x128xf32, #tpu.memory_space<vmem>>)
    %c0_i32_606 = arith.constant 0 : i32
    %789 = tpu.memref_slice %arg2[%373, %c0_i32_606] : memref<64x128xf32, #tpu.memory_space<any>> -> memref<1x128xf32, #tpu.memory_space<any>>
    %c74_i32_607 = arith.constant 74 : i32
    %c0_i32_608 = arith.constant 0 : i32
    %790 = tpu.memref_slice %arg3[%c74_i32_607, %c0_i32_608] : memref<128x128xf32, #tpu.memory_space<vmem>> -> memref<1x128xf32, #tpu.memory_space<vmem>>
    tpu.wait_dma2 semaphore(%arg4 : memref<!tpu.dma_semaphore, #tpu.memory_space<semaphore_mem>>) src(%789 : memref<1x128xf32, #tpu.memory_space<any>>) dst(%790 : memref<1x128xf32, #tpu.memory_space<vmem>>)
    %c0_i32_609 = arith.constant 0 : i32
    %791 = tpu.memref_slice %arg2[%378, %c0_i32_609] : memref<64x128xf32, #tpu.memory_space<any>> -> memref<1x128xf32, #tpu.memory_space<any>>
    %c75_i32_610 = arith.constant 75 : i32
    %c0_i32_611 = arith.constant 0 : i32
    %792 = tpu.memref_slice %arg3[%c75_i32_610, %c0_i32_611] : memref<128x128xf32, #tpu.memory_space<vmem>> -> memref<1x128xf32, #tpu.memory_space<vmem>>
    tpu.wait_dma2 semaphore(%arg4 : memref<!tpu.dma_semaphore, #tpu.memory_space<semaphore_mem>>) src(%791 : memref<1x128xf32, #tpu.memory_space<any>>) dst(%792 : memref<1x128xf32, #tpu.memory_space<vmem>>)
    %c0_i32_612 = arith.constant 0 : i32
    %793 = tpu.memref_slice %arg2[%383, %c0_i32_612] : memref<64x128xf32, #tpu.memory_space<any>> -> memref<1x128xf32, #tpu.memory_space<any>>
    %c76_i32_613 = arith.constant 76 : i32
    %c0_i32_614 = arith.constant 0 : i32
    %794 = tpu.memref_slice %arg3[%c76_i32_613, %c0_i32_614] : memref<128x128xf32, #tpu.memory_space<vmem>> -> memref<1x128xf32, #tpu.memory_space<vmem>>
    tpu.wait_dma2 semaphore(%arg4 : memref<!tpu.dma_semaphore, #tpu.memory_space<semaphore_mem>>) src(%793 : memref<1x128xf32, #tpu.memory_space<any>>) dst(%794 : memref<1x128xf32, #tpu.memory_space<vmem>>)
    %c0_i32_615 = arith.constant 0 : i32
    %795 = tpu.memref_slice %arg2[%388, %c0_i32_615] : memref<64x128xf32, #tpu.memory_space<any>> -> memref<1x128xf32, #tpu.memory_space<any>>
    %c77_i32_616 = arith.constant 77 : i32
    %c0_i32_617 = arith.constant 0 : i32
    %796 = tpu.memref_slice %arg3[%c77_i32_616, %c0_i32_617] : memref<128x128xf32, #tpu.memory_space<vmem>> -> memref<1x128xf32, #tpu.memory_space<vmem>>
    tpu.wait_dma2 semaphore(%arg4 : memref<!tpu.dma_semaphore, #tpu.memory_space<semaphore_mem>>) src(%795 : memref<1x128xf32, #tpu.memory_space<any>>) dst(%796 : memref<1x128xf32, #tpu.memory_space<vmem>>)
    %c0_i32_618 = arith.constant 0 : i32
    %797 = tpu.memref_slice %arg2[%393, %c0_i32_618] : memref<64x128xf32, #tpu.memory_space<any>> -> memref<1x128xf32, #tpu.memory_space<any>>
    %c78_i32_619 = arith.constant 78 : i32
    %c0_i32_620 = arith.constant 0 : i32
    %798 = tpu.memref_slice %arg3[%c78_i32_619, %c0_i32_620] : memref<128x128xf32, #tpu.memory_space<vmem>> -> memref<1x128xf32, #tpu.memory_space<vmem>>
    tpu.wait_dma2 semaphore(%arg4 : memref<!tpu.dma_semaphore, #tpu.memory_space<semaphore_mem>>) src(%797 : memref<1x128xf32, #tpu.memory_space<any>>) dst(%798 : memref<1x128xf32, #tpu.memory_space<vmem>>)
    %c0_i32_621 = arith.constant 0 : i32
    %799 = tpu.memref_slice %arg2[%398, %c0_i32_621] : memref<64x128xf32, #tpu.memory_space<any>> -> memref<1x128xf32, #tpu.memory_space<any>>
    %c79_i32_622 = arith.constant 79 : i32
    %c0_i32_623 = arith.constant 0 : i32
    %800 = tpu.memref_slice %arg3[%c79_i32_622, %c0_i32_623] : memref<128x128xf32, #tpu.memory_space<vmem>> -> memref<1x128xf32, #tpu.memory_space<vmem>>
    tpu.wait_dma2 semaphore(%arg4 : memref<!tpu.dma_semaphore, #tpu.memory_space<semaphore_mem>>) src(%799 : memref<1x128xf32, #tpu.memory_space<any>>) dst(%800 : memref<1x128xf32, #tpu.memory_space<vmem>>)
    %c0_i32_624 = arith.constant 0 : i32
    %801 = tpu.memref_slice %arg2[%403, %c0_i32_624] : memref<64x128xf32, #tpu.memory_space<any>> -> memref<1x128xf32, #tpu.memory_space<any>>
    %c80_i32_625 = arith.constant 80 : i32
    %c0_i32_626 = arith.constant 0 : i32
    %802 = tpu.memref_slice %arg3[%c80_i32_625, %c0_i32_626] : memref<128x128xf32, #tpu.memory_space<vmem>> -> memref<1x128xf32, #tpu.memory_space<vmem>>
    tpu.wait_dma2 semaphore(%arg4 : memref<!tpu.dma_semaphore, #tpu.memory_space<semaphore_mem>>) src(%801 : memref<1x128xf32, #tpu.memory_space<any>>) dst(%802 : memref<1x128xf32, #tpu.memory_space<vmem>>)
    %c0_i32_627 = arith.constant 0 : i32
    %803 = tpu.memref_slice %arg2[%408, %c0_i32_627] : memref<64x128xf32, #tpu.memory_space<any>> -> memref<1x128xf32, #tpu.memory_space<any>>
    %c81_i32_628 = arith.constant 81 : i32
    %c0_i32_629 = arith.constant 0 : i32
    %804 = tpu.memref_slice %arg3[%c81_i32_628, %c0_i32_629] : memref<128x128xf32, #tpu.memory_space<vmem>> -> memref<1x128xf32, #tpu.memory_space<vmem>>
    tpu.wait_dma2 semaphore(%arg4 : memref<!tpu.dma_semaphore, #tpu.memory_space<semaphore_mem>>) src(%803 : memref<1x128xf32, #tpu.memory_space<any>>) dst(%804 : memref<1x128xf32, #tpu.memory_space<vmem>>)
    %c0_i32_630 = arith.constant 0 : i32
    %805 = tpu.memref_slice %arg2[%413, %c0_i32_630] : memref<64x128xf32, #tpu.memory_space<any>> -> memref<1x128xf32, #tpu.memory_space<any>>
    %c82_i32_631 = arith.constant 82 : i32
    %c0_i32_632 = arith.constant 0 : i32
    %806 = tpu.memref_slice %arg3[%c82_i32_631, %c0_i32_632] : memref<128x128xf32, #tpu.memory_space<vmem>> -> memref<1x128xf32, #tpu.memory_space<vmem>>
    tpu.wait_dma2 semaphore(%arg4 : memref<!tpu.dma_semaphore, #tpu.memory_space<semaphore_mem>>) src(%805 : memref<1x128xf32, #tpu.memory_space<any>>) dst(%806 : memref<1x128xf32, #tpu.memory_space<vmem>>)
    %c0_i32_633 = arith.constant 0 : i32
    %807 = tpu.memref_slice %arg2[%418, %c0_i32_633] : memref<64x128xf32, #tpu.memory_space<any>> -> memref<1x128xf32, #tpu.memory_space<any>>
    %c83_i32_634 = arith.constant 83 : i32
    %c0_i32_635 = arith.constant 0 : i32
    %808 = tpu.memref_slice %arg3[%c83_i32_634, %c0_i32_635] : memref<128x128xf32, #tpu.memory_space<vmem>> -> memref<1x128xf32, #tpu.memory_space<vmem>>
    tpu.wait_dma2 semaphore(%arg4 : memref<!tpu.dma_semaphore, #tpu.memory_space<semaphore_mem>>) src(%807 : memref<1x128xf32, #tpu.memory_space<any>>) dst(%808 : memref<1x128xf32, #tpu.memory_space<vmem>>)
    %c0_i32_636 = arith.constant 0 : i32
    %809 = tpu.memref_slice %arg2[%423, %c0_i32_636] : memref<64x128xf32, #tpu.memory_space<any>> -> memref<1x128xf32, #tpu.memory_space<any>>
    %c84_i32_637 = arith.constant 84 : i32
    %c0_i32_638 = arith.constant 0 : i32
    %810 = tpu.memref_slice %arg3[%c84_i32_637, %c0_i32_638] : memref<128x128xf32, #tpu.memory_space<vmem>> -> memref<1x128xf32, #tpu.memory_space<vmem>>
    tpu.wait_dma2 semaphore(%arg4 : memref<!tpu.dma_semaphore, #tpu.memory_space<semaphore_mem>>) src(%809 : memref<1x128xf32, #tpu.memory_space<any>>) dst(%810 : memref<1x128xf32, #tpu.memory_space<vmem>>)
    %c0_i32_639 = arith.constant 0 : i32
    %811 = tpu.memref_slice %arg2[%428, %c0_i32_639] : memref<64x128xf32, #tpu.memory_space<any>> -> memref<1x128xf32, #tpu.memory_space<any>>
    %c85_i32_640 = arith.constant 85 : i32
    %c0_i32_641 = arith.constant 0 : i32
    %812 = tpu.memref_slice %arg3[%c85_i32_640, %c0_i32_641] : memref<128x128xf32, #tpu.memory_space<vmem>> -> memref<1x128xf32, #tpu.memory_space<vmem>>
    tpu.wait_dma2 semaphore(%arg4 : memref<!tpu.dma_semaphore, #tpu.memory_space<semaphore_mem>>) src(%811 : memref<1x128xf32, #tpu.memory_space<any>>) dst(%812 : memref<1x128xf32, #tpu.memory_space<vmem>>)
    %c0_i32_642 = arith.constant 0 : i32
    %813 = tpu.memref_slice %arg2[%433, %c0_i32_642] : memref<64x128xf32, #tpu.memory_space<any>> -> memref<1x128xf32, #tpu.memory_space<any>>
    %c86_i32_643 = arith.constant 86 : i32
    %c0_i32_644 = arith.constant 0 : i32
    %814 = tpu.memref_slice %arg3[%c86_i32_643, %c0_i32_644] : memref<128x128xf32, #tpu.memory_space<vmem>> -> memref<1x128xf32, #tpu.memory_space<vmem>>
    tpu.wait_dma2 semaphore(%arg4 : memref<!tpu.dma_semaphore, #tpu.memory_space<semaphore_mem>>) src(%813 : memref<1x128xf32, #tpu.memory_space<any>>) dst(%814 : memref<1x128xf32, #tpu.memory_space<vmem>>)
    %c0_i32_645 = arith.constant 0 : i32
    %815 = tpu.memref_slice %arg2[%438, %c0_i32_645] : memref<64x128xf32, #tpu.memory_space<any>> -> memref<1x128xf32, #tpu.memory_space<any>>
    %c87_i32_646 = arith.constant 87 : i32
    %c0_i32_647 = arith.constant 0 : i32
    %816 = tpu.memref_slice %arg3[%c87_i32_646, %c0_i32_647] : memref<128x128xf32, #tpu.memory_space<vmem>> -> memref<1x128xf32, #tpu.memory_space<vmem>>
    tpu.wait_dma2 semaphore(%arg4 : memref<!tpu.dma_semaphore, #tpu.memory_space<semaphore_mem>>) src(%815 : memref<1x128xf32, #tpu.memory_space<any>>) dst(%816 : memref<1x128xf32, #tpu.memory_space<vmem>>)
    %c0_i32_648 = arith.constant 0 : i32
    %817 = tpu.memref_slice %arg2[%443, %c0_i32_648] : memref<64x128xf32, #tpu.memory_space<any>> -> memref<1x128xf32, #tpu.memory_space<any>>
    %c88_i32_649 = arith.constant 88 : i32
    %c0_i32_650 = arith.constant 0 : i32
    %818 = tpu.memref_slice %arg3[%c88_i32_649, %c0_i32_650] : memref<128x128xf32, #tpu.memory_space<vmem>> -> memref<1x128xf32, #tpu.memory_space<vmem>>
    tpu.wait_dma2 semaphore(%arg4 : memref<!tpu.dma_semaphore, #tpu.memory_space<semaphore_mem>>) src(%817 : memref<1x128xf32, #tpu.memory_space<any>>) dst(%818 : memref<1x128xf32, #tpu.memory_space<vmem>>)
    %c0_i32_651 = arith.constant 0 : i32
    %819 = tpu.memref_slice %arg2[%448, %c0_i32_651] : memref<64x128xf32, #tpu.memory_space<any>> -> memref<1x128xf32, #tpu.memory_space<any>>
    %c89_i32_652 = arith.constant 89 : i32
    %c0_i32_653 = arith.constant 0 : i32
    %820 = tpu.memref_slice %arg3[%c89_i32_652, %c0_i32_653] : memref<128x128xf32, #tpu.memory_space<vmem>> -> memref<1x128xf32, #tpu.memory_space<vmem>>
    tpu.wait_dma2 semaphore(%arg4 : memref<!tpu.dma_semaphore, #tpu.memory_space<semaphore_mem>>) src(%819 : memref<1x128xf32, #tpu.memory_space<any>>) dst(%820 : memref<1x128xf32, #tpu.memory_space<vmem>>)
    %c0_i32_654 = arith.constant 0 : i32
    %821 = tpu.memref_slice %arg2[%453, %c0_i32_654] : memref<64x128xf32, #tpu.memory_space<any>> -> memref<1x128xf32, #tpu.memory_space<any>>
    %c90_i32_655 = arith.constant 90 : i32
    %c0_i32_656 = arith.constant 0 : i32
    %822 = tpu.memref_slice %arg3[%c90_i32_655, %c0_i32_656] : memref<128x128xf32, #tpu.memory_space<vmem>> -> memref<1x128xf32, #tpu.memory_space<vmem>>
    tpu.wait_dma2 semaphore(%arg4 : memref<!tpu.dma_semaphore, #tpu.memory_space<semaphore_mem>>) src(%821 : memref<1x128xf32, #tpu.memory_space<any>>) dst(%822 : memref<1x128xf32, #tpu.memory_space<vmem>>)
    %c0_i32_657 = arith.constant 0 : i32
    %823 = tpu.memref_slice %arg2[%458, %c0_i32_657] : memref<64x128xf32, #tpu.memory_space<any>> -> memref<1x128xf32, #tpu.memory_space<any>>
    %c91_i32_658 = arith.constant 91 : i32
    %c0_i32_659 = arith.constant 0 : i32
    %824 = tpu.memref_slice %arg3[%c91_i32_658, %c0_i32_659] : memref<128x128xf32, #tpu.memory_space<vmem>> -> memref<1x128xf32, #tpu.memory_space<vmem>>
    tpu.wait_dma2 semaphore(%arg4 : memref<!tpu.dma_semaphore, #tpu.memory_space<semaphore_mem>>) src(%823 : memref<1x128xf32, #tpu.memory_space<any>>) dst(%824 : memref<1x128xf32, #tpu.memory_space<vmem>>)
    %c0_i32_660 = arith.constant 0 : i32
    %825 = tpu.memref_slice %arg2[%463, %c0_i32_660] : memref<64x128xf32, #tpu.memory_space<any>> -> memref<1x128xf32, #tpu.memory_space<any>>
    %c92_i32_661 = arith.constant 92 : i32
    %c0_i32_662 = arith.constant 0 : i32
    %826 = tpu.memref_slice %arg3[%c92_i32_661, %c0_i32_662] : memref<128x128xf32, #tpu.memory_space<vmem>> -> memref<1x128xf32, #tpu.memory_space<vmem>>
    tpu.wait_dma2 semaphore(%arg4 : memref<!tpu.dma_semaphore, #tpu.memory_space<semaphore_mem>>) src(%825 : memref<1x128xf32, #tpu.memory_space<any>>) dst(%826 : memref<1x128xf32, #tpu.memory_space<vmem>>)
    %c0_i32_663 = arith.constant 0 : i32
    %827 = tpu.memref_slice %arg2[%468, %c0_i32_663] : memref<64x128xf32, #tpu.memory_space<any>> -> memref<1x128xf32, #tpu.memory_space<any>>
    %c93_i32_664 = arith.constant 93 : i32
    %c0_i32_665 = arith.constant 0 : i32
    %828 = tpu.memref_slice %arg3[%c93_i32_664, %c0_i32_665] : memref<128x128xf32, #tpu.memory_space<vmem>> -> memref<1x128xf32, #tpu.memory_space<vmem>>
    tpu.wait_dma2 semaphore(%arg4 : memref<!tpu.dma_semaphore, #tpu.memory_space<semaphore_mem>>) src(%827 : memref<1x128xf32, #tpu.memory_space<any>>) dst(%828 : memref<1x128xf32, #tpu.memory_space<vmem>>)
    %c0_i32_666 = arith.constant 0 : i32
    %829 = tpu.memref_slice %arg2[%473, %c0_i32_666] : memref<64x128xf32, #tpu.memory_space<any>> -> memref<1x128xf32, #tpu.memory_space<any>>
    %c94_i32_667 = arith.constant 94 : i32
    %c0_i32_668 = arith.constant 0 : i32
    %830 = tpu.memref_slice %arg3[%c94_i32_667, %c0_i32_668] : memref<128x128xf32, #tpu.memory_space<vmem>> -> memref<1x128xf32, #tpu.memory_space<vmem>>
    tpu.wait_dma2 semaphore(%arg4 : memref<!tpu.dma_semaphore, #tpu.memory_space<semaphore_mem>>) src(%829 : memref<1x128xf32, #tpu.memory_space<any>>) dst(%830 : memref<1x128xf32, #tpu.memory_space<vmem>>)
    %c0_i32_669 = arith.constant 0 : i32
    %831 = tpu.memref_slice %arg2[%478, %c0_i32_669] : memref<64x128xf32, #tpu.memory_space<any>> -> memref<1x128xf32, #tpu.memory_space<any>>
    %c95_i32_670 = arith.constant 95 : i32
    %c0_i32_671 = arith.constant 0 : i32
    %832 = tpu.memref_slice %arg3[%c95_i32_670, %c0_i32_671] : memref<128x128xf32, #tpu.memory_space<vmem>> -> memref<1x128xf32, #tpu.memory_space<vmem>>
    tpu.wait_dma2 semaphore(%arg4 : memref<!tpu.dma_semaphore, #tpu.memory_space<semaphore_mem>>) src(%831 : memref<1x128xf32, #tpu.memory_space<any>>) dst(%832 : memref<1x128xf32, #tpu.memory_space<vmem>>)
    %c0_i32_672 = arith.constant 0 : i32
    %833 = tpu.memref_slice %arg2[%483, %c0_i32_672] : memref<64x128xf32, #tpu.memory_space<any>> -> memref<1x128xf32, #tpu.memory_space<any>>
    %c96_i32_673 = arith.constant 96 : i32
    %c0_i32_674 = arith.constant 0 : i32
    %834 = tpu.memref_slice %arg3[%c96_i32_673, %c0_i32_674] : memref<128x128xf32, #tpu.memory_space<vmem>> -> memref<1x128xf32, #tpu.memory_space<vmem>>
    tpu.wait_dma2 semaphore(%arg4 : memref<!tpu.dma_semaphore, #tpu.memory_space<semaphore_mem>>) src(%833 : memref<1x128xf32, #tpu.memory_space<any>>) dst(%834 : memref<1x128xf32, #tpu.memory_space<vmem>>)
    %c0_i32_675 = arith.constant 0 : i32
    %835 = tpu.memref_slice %arg2[%488, %c0_i32_675] : memref<64x128xf32, #tpu.memory_space<any>> -> memref<1x128xf32, #tpu.memory_space<any>>
    %c97_i32_676 = arith.constant 97 : i32
    %c0_i32_677 = arith.constant 0 : i32
    %836 = tpu.memref_slice %arg3[%c97_i32_676, %c0_i32_677] : memref<128x128xf32, #tpu.memory_space<vmem>> -> memref<1x128xf32, #tpu.memory_space<vmem>>
    tpu.wait_dma2 semaphore(%arg4 : memref<!tpu.dma_semaphore, #tpu.memory_space<semaphore_mem>>) src(%835 : memref<1x128xf32, #tpu.memory_space<any>>) dst(%836 : memref<1x128xf32, #tpu.memory_space<vmem>>)
    %c0_i32_678 = arith.constant 0 : i32
    %837 = tpu.memref_slice %arg2[%493, %c0_i32_678] : memref<64x128xf32, #tpu.memory_space<any>> -> memref<1x128xf32, #tpu.memory_space<any>>
    %c98_i32_679 = arith.constant 98 : i32
    %c0_i32_680 = arith.constant 0 : i32
    %838 = tpu.memref_slice %arg3[%c98_i32_679, %c0_i32_680] : memref<128x128xf32, #tpu.memory_space<vmem>> -> memref<1x128xf32, #tpu.memory_space<vmem>>
    tpu.wait_dma2 semaphore(%arg4 : memref<!tpu.dma_semaphore, #tpu.memory_space<semaphore_mem>>) src(%837 : memref<1x128xf32, #tpu.memory_space<any>>) dst(%838 : memref<1x128xf32, #tpu.memory_space<vmem>>)
    %c0_i32_681 = arith.constant 0 : i32
    %839 = tpu.memref_slice %arg2[%498, %c0_i32_681] : memref<64x128xf32, #tpu.memory_space<any>> -> memref<1x128xf32, #tpu.memory_space<any>>
    %c99_i32_682 = arith.constant 99 : i32
    %c0_i32_683 = arith.constant 0 : i32
    %840 = tpu.memref_slice %arg3[%c99_i32_682, %c0_i32_683] : memref<128x128xf32, #tpu.memory_space<vmem>> -> memref<1x128xf32, #tpu.memory_space<vmem>>
    tpu.wait_dma2 semaphore(%arg4 : memref<!tpu.dma_semaphore, #tpu.memory_space<semaphore_mem>>) src(%839 : memref<1x128xf32, #tpu.memory_space<any>>) dst(%840 : memref<1x128xf32, #tpu.memory_space<vmem>>)
    %c0_i32_684 = arith.constant 0 : i32
    %841 = tpu.memref_slice %arg2[%503, %c0_i32_684] : memref<64x128xf32, #tpu.memory_space<any>> -> memref<1x128xf32, #tpu.memory_space<any>>
    %c100_i32_685 = arith.constant 100 : i32
    %c0_i32_686 = arith.constant 0 : i32
    %842 = tpu.memref_slice %arg3[%c100_i32_685, %c0_i32_686] : memref<128x128xf32, #tpu.memory_space<vmem>> -> memref<1x128xf32, #tpu.memory_space<vmem>>
    tpu.wait_dma2 semaphore(%arg4 : memref<!tpu.dma_semaphore, #tpu.memory_space<semaphore_mem>>) src(%841 : memref<1x128xf32, #tpu.memory_space<any>>) dst(%842 : memref<1x128xf32, #tpu.memory_space<vmem>>)
    %c0_i32_687 = arith.constant 0 : i32
    %843 = tpu.memref_slice %arg2[%508, %c0_i32_687] : memref<64x128xf32, #tpu.memory_space<any>> -> memref<1x128xf32, #tpu.memory_space<any>>
    %c101_i32_688 = arith.constant 101 : i32
    %c0_i32_689 = arith.constant 0 : i32
    %844 = tpu.memref_slice %arg3[%c101_i32_688, %c0_i32_689] : memref<128x128xf32, #tpu.memory_space<vmem>> -> memref<1x128xf32, #tpu.memory_space<vmem>>
    tpu.wait_dma2 semaphore(%arg4 : memref<!tpu.dma_semaphore, #tpu.memory_space<semaphore_mem>>) src(%843 : memref<1x128xf32, #tpu.memory_space<any>>) dst(%844 : memref<1x128xf32, #tpu.memory_space<vmem>>)
    %c0_i32_690 = arith.constant 0 : i32
    %845 = tpu.memref_slice %arg2[%513, %c0_i32_690] : memref<64x128xf32, #tpu.memory_space<any>> -> memref<1x128xf32, #tpu.memory_space<any>>
    %c102_i32_691 = arith.constant 102 : i32
    %c0_i32_692 = arith.constant 0 : i32
    %846 = tpu.memref_slice %arg3[%c102_i32_691, %c0_i32_692] : memref<128x128xf32, #tpu.memory_space<vmem>> -> memref<1x128xf32, #tpu.memory_space<vmem>>
    tpu.wait_dma2 semaphore(%arg4 : memref<!tpu.dma_semaphore, #tpu.memory_space<semaphore_mem>>) src(%845 : memref<1x128xf32, #tpu.memory_space<any>>) dst(%846 : memref<1x128xf32, #tpu.memory_space<vmem>>)
    %c0_i32_693 = arith.constant 0 : i32
    %847 = tpu.memref_slice %arg2[%518, %c0_i32_693] : memref<64x128xf32, #tpu.memory_space<any>> -> memref<1x128xf32, #tpu.memory_space<any>>
    %c103_i32_694 = arith.constant 103 : i32
    %c0_i32_695 = arith.constant 0 : i32
    %848 = tpu.memref_slice %arg3[%c103_i32_694, %c0_i32_695] : memref<128x128xf32, #tpu.memory_space<vmem>> -> memref<1x128xf32, #tpu.memory_space<vmem>>
    tpu.wait_dma2 semaphore(%arg4 : memref<!tpu.dma_semaphore, #tpu.memory_space<semaphore_mem>>) src(%847 : memref<1x128xf32, #tpu.memory_space<any>>) dst(%848 : memref<1x128xf32, #tpu.memory_space<vmem>>)
    %c0_i32_696 = arith.constant 0 : i32
    %849 = tpu.memref_slice %arg2[%523, %c0_i32_696] : memref<64x128xf32, #tpu.memory_space<any>> -> memref<1x128xf32, #tpu.memory_space<any>>
    %c104_i32_697 = arith.constant 104 : i32
    %c0_i32_698 = arith.constant 0 : i32
    %850 = tpu.memref_slice %arg3[%c104_i32_697, %c0_i32_698] : memref<128x128xf32, #tpu.memory_space<vmem>> -> memref<1x128xf32, #tpu.memory_space<vmem>>
    tpu.wait_dma2 semaphore(%arg4 : memref<!tpu.dma_semaphore, #tpu.memory_space<semaphore_mem>>) src(%849 : memref<1x128xf32, #tpu.memory_space<any>>) dst(%850 : memref<1x128xf32, #tpu.memory_space<vmem>>)
    %c0_i32_699 = arith.constant 0 : i32
    %851 = tpu.memref_slice %arg2[%528, %c0_i32_699] : memref<64x128xf32, #tpu.memory_space<any>> -> memref<1x128xf32, #tpu.memory_space<any>>
    %c105_i32_700 = arith.constant 105 : i32
    %c0_i32_701 = arith.constant 0 : i32
    %852 = tpu.memref_slice %arg3[%c105_i32_700, %c0_i32_701] : memref<128x128xf32, #tpu.memory_space<vmem>> -> memref<1x128xf32, #tpu.memory_space<vmem>>
    tpu.wait_dma2 semaphore(%arg4 : memref<!tpu.dma_semaphore, #tpu.memory_space<semaphore_mem>>) src(%851 : memref<1x128xf32, #tpu.memory_space<any>>) dst(%852 : memref<1x128xf32, #tpu.memory_space<vmem>>)
    %c0_i32_702 = arith.constant 0 : i32
    %853 = tpu.memref_slice %arg2[%533, %c0_i32_702] : memref<64x128xf32, #tpu.memory_space<any>> -> memref<1x128xf32, #tpu.memory_space<any>>
    %c106_i32_703 = arith.constant 106 : i32
    %c0_i32_704 = arith.constant 0 : i32
    %854 = tpu.memref_slice %arg3[%c106_i32_703, %c0_i32_704] : memref<128x128xf32, #tpu.memory_space<vmem>> -> memref<1x128xf32, #tpu.memory_space<vmem>>
    tpu.wait_dma2 semaphore(%arg4 : memref<!tpu.dma_semaphore, #tpu.memory_space<semaphore_mem>>) src(%853 : memref<1x128xf32, #tpu.memory_space<any>>) dst(%854 : memref<1x128xf32, #tpu.memory_space<vmem>>)
    %c0_i32_705 = arith.constant 0 : i32
    %855 = tpu.memref_slice %arg2[%538, %c0_i32_705] : memref<64x128xf32, #tpu.memory_space<any>> -> memref<1x128xf32, #tpu.memory_space<any>>
    %c107_i32_706 = arith.constant 107 : i32
    %c0_i32_707 = arith.constant 0 : i32
    %856 = tpu.memref_slice %arg3[%c107_i32_706, %c0_i32_707] : memref<128x128xf32, #tpu.memory_space<vmem>> -> memref<1x128xf32, #tpu.memory_space<vmem>>
    tpu.wait_dma2 semaphore(%arg4 : memref<!tpu.dma_semaphore, #tpu.memory_space<semaphore_mem>>) src(%855 : memref<1x128xf32, #tpu.memory_space<any>>) dst(%856 : memref<1x128xf32, #tpu.memory_space<vmem>>)
    %c0_i32_708 = arith.constant 0 : i32
    %857 = tpu.memref_slice %arg2[%543, %c0_i32_708] : memref<64x128xf32, #tpu.memory_space<any>> -> memref<1x128xf32, #tpu.memory_space<any>>
    %c108_i32_709 = arith.constant 108 : i32
    %c0_i32_710 = arith.constant 0 : i32
    %858 = tpu.memref_slice %arg3[%c108_i32_709, %c0_i32_710] : memref<128x128xf32, #tpu.memory_space<vmem>> -> memref<1x128xf32, #tpu.memory_space<vmem>>
    tpu.wait_dma2 semaphore(%arg4 : memref<!tpu.dma_semaphore, #tpu.memory_space<semaphore_mem>>) src(%857 : memref<1x128xf32, #tpu.memory_space<any>>) dst(%858 : memref<1x128xf32, #tpu.memory_space<vmem>>)
    %c0_i32_711 = arith.constant 0 : i32
    %859 = tpu.memref_slice %arg2[%548, %c0_i32_711] : memref<64x128xf32, #tpu.memory_space<any>> -> memref<1x128xf32, #tpu.memory_space<any>>
    %c109_i32_712 = arith.constant 109 : i32
    %c0_i32_713 = arith.constant 0 : i32
    %860 = tpu.memref_slice %arg3[%c109_i32_712, %c0_i32_713] : memref<128x128xf32, #tpu.memory_space<vmem>> -> memref<1x128xf32, #tpu.memory_space<vmem>>
    tpu.wait_dma2 semaphore(%arg4 : memref<!tpu.dma_semaphore, #tpu.memory_space<semaphore_mem>>) src(%859 : memref<1x128xf32, #tpu.memory_space<any>>) dst(%860 : memref<1x128xf32, #tpu.memory_space<vmem>>)
    %c0_i32_714 = arith.constant 0 : i32
    %861 = tpu.memref_slice %arg2[%553, %c0_i32_714] : memref<64x128xf32, #tpu.memory_space<any>> -> memref<1x128xf32, #tpu.memory_space<any>>
    %c110_i32_715 = arith.constant 110 : i32
    %c0_i32_716 = arith.constant 0 : i32
    %862 = tpu.memref_slice %arg3[%c110_i32_715, %c0_i32_716] : memref<128x128xf32, #tpu.memory_space<vmem>> -> memref<1x128xf32, #tpu.memory_space<vmem>>
    tpu.wait_dma2 semaphore(%arg4 : memref<!tpu.dma_semaphore, #tpu.memory_space<semaphore_mem>>) src(%861 : memref<1x128xf32, #tpu.memory_space<any>>) dst(%862 : memref<1x128xf32, #tpu.memory_space<vmem>>)
    %c0_i32_717 = arith.constant 0 : i32
    %863 = tpu.memref_slice %arg2[%558, %c0_i32_717] : memref<64x128xf32, #tpu.memory_space<any>> -> memref<1x128xf32, #tpu.memory_space<any>>
    %c111_i32_718 = arith.constant 111 : i32
    %c0_i32_719 = arith.constant 0 : i32
    %864 = tpu.memref_slice %arg3[%c111_i32_718, %c0_i32_719] : memref<128x128xf32, #tpu.memory_space<vmem>> -> memref<1x128xf32, #tpu.memory_space<vmem>>
    tpu.wait_dma2 semaphore(%arg4 : memref<!tpu.dma_semaphore, #tpu.memory_space<semaphore_mem>>) src(%863 : memref<1x128xf32, #tpu.memory_space<any>>) dst(%864 : memref<1x128xf32, #tpu.memory_space<vmem>>)
    %c0_i32_720 = arith.constant 0 : i32
    %865 = tpu.memref_slice %arg2[%563, %c0_i32_720] : memref<64x128xf32, #tpu.memory_space<any>> -> memref<1x128xf32, #tpu.memory_space<any>>
    %c112_i32_721 = arith.constant 112 : i32
    %c0_i32_722 = arith.constant 0 : i32
    %866 = tpu.memref_slice %arg3[%c112_i32_721, %c0_i32_722] : memref<128x128xf32, #tpu.memory_space<vmem>> -> memref<1x128xf32, #tpu.memory_space<vmem>>
    tpu.wait_dma2 semaphore(%arg4 : memref<!tpu.dma_semaphore, #tpu.memory_space<semaphore_mem>>) src(%865 : memref<1x128xf32, #tpu.memory_space<any>>) dst(%866 : memref<1x128xf32, #tpu.memory_space<vmem>>)
    %c0_i32_723 = arith.constant 0 : i32
    %867 = tpu.memref_slice %arg2[%568, %c0_i32_723] : memref<64x128xf32, #tpu.memory_space<any>> -> memref<1x128xf32, #tpu.memory_space<any>>
    %c113_i32_724 = arith.constant 113 : i32
    %c0_i32_725 = arith.constant 0 : i32
    %868 = tpu.memref_slice %arg3[%c113_i32_724, %c0_i32_725] : memref<128x128xf32, #tpu.memory_space<vmem>> -> memref<1x128xf32, #tpu.memory_space<vmem>>
    tpu.wait_dma2 semaphore(%arg4 : memref<!tpu.dma_semaphore, #tpu.memory_space<semaphore_mem>>) src(%867 : memref<1x128xf32, #tpu.memory_space<any>>) dst(%868 : memref<1x128xf32, #tpu.memory_space<vmem>>)
    %c0_i32_726 = arith.constant 0 : i32
    %869 = tpu.memref_slice %arg2[%573, %c0_i32_726] : memref<64x128xf32, #tpu.memory_space<any>> -> memref<1x128xf32, #tpu.memory_space<any>>
    %c114_i32_727 = arith.constant 114 : i32
    %c0_i32_728 = arith.constant 0 : i32
    %870 = tpu.memref_slice %arg3[%c114_i32_727, %c0_i32_728] : memref<128x128xf32, #tpu.memory_space<vmem>> -> memref<1x128xf32, #tpu.memory_space<vmem>>
    tpu.wait_dma2 semaphore(%arg4 : memref<!tpu.dma_semaphore, #tpu.memory_space<semaphore_mem>>) src(%869 : memref<1x128xf32, #tpu.memory_space<any>>) dst(%870 : memref<1x128xf32, #tpu.memory_space<vmem>>)
    %c0_i32_729 = arith.constant 0 : i32
    %871 = tpu.memref_slice %arg2[%578, %c0_i32_729] : memref<64x128xf32, #tpu.memory_space<any>> -> memref<1x128xf32, #tpu.memory_space<any>>
    %c115_i32_730 = arith.constant 115 : i32
    %c0_i32_731 = arith.constant 0 : i32
    %872 = tpu.memref_slice %arg3[%c115_i32_730, %c0_i32_731] : memref<128x128xf32, #tpu.memory_space<vmem>> -> memref<1x128xf32, #tpu.memory_space<vmem>>
    tpu.wait_dma2 semaphore(%arg4 : memref<!tpu.dma_semaphore, #tpu.memory_space<semaphore_mem>>) src(%871 : memref<1x128xf32, #tpu.memory_space<any>>) dst(%872 : memref<1x128xf32, #tpu.memory_space<vmem>>)
    %c0_i32_732 = arith.constant 0 : i32
    %873 = tpu.memref_slice %arg2[%583, %c0_i32_732] : memref<64x128xf32, #tpu.memory_space<any>> -> memref<1x128xf32, #tpu.memory_space<any>>
    %c116_i32_733 = arith.constant 116 : i32
    %c0_i32_734 = arith.constant 0 : i32
    %874 = tpu.memref_slice %arg3[%c116_i32_733, %c0_i32_734] : memref<128x128xf32, #tpu.memory_space<vmem>> -> memref<1x128xf32, #tpu.memory_space<vmem>>
    tpu.wait_dma2 semaphore(%arg4 : memref<!tpu.dma_semaphore, #tpu.memory_space<semaphore_mem>>) src(%873 : memref<1x128xf32, #tpu.memory_space<any>>) dst(%874 : memref<1x128xf32, #tpu.memory_space<vmem>>)
    %c0_i32_735 = arith.constant 0 : i32
    %875 = tpu.memref_slice %arg2[%588, %c0_i32_735] : memref<64x128xf32, #tpu.memory_space<any>> -> memref<1x128xf32, #tpu.memory_space<any>>
    %c117_i32_736 = arith.constant 117 : i32
    %c0_i32_737 = arith.constant 0 : i32
    %876 = tpu.memref_slice %arg3[%c117_i32_736, %c0_i32_737] : memref<128x128xf32, #tpu.memory_space<vmem>> -> memref<1x128xf32, #tpu.memory_space<vmem>>
    tpu.wait_dma2 semaphore(%arg4 : memref<!tpu.dma_semaphore, #tpu.memory_space<semaphore_mem>>) src(%875 : memref<1x128xf32, #tpu.memory_space<any>>) dst(%876 : memref<1x128xf32, #tpu.memory_space<vmem>>)
    %c0_i32_738 = arith.constant 0 : i32
    %877 = tpu.memref_slice %arg2[%593, %c0_i32_738] : memref<64x128xf32, #tpu.memory_space<any>> -> memref<1x128xf32, #tpu.memory_space<any>>
    %c118_i32_739 = arith.constant 118 : i32
    %c0_i32_740 = arith.constant 0 : i32
    %878 = tpu.memref_slice %arg3[%c118_i32_739, %c0_i32_740] : memref<128x128xf32, #tpu.memory_space<vmem>> -> memref<1x128xf32, #tpu.memory_space<vmem>>
    tpu.wait_dma2 semaphore(%arg4 : memref<!tpu.dma_semaphore, #tpu.memory_space<semaphore_mem>>) src(%877 : memref<1x128xf32, #tpu.memory_space<any>>) dst(%878 : memref<1x128xf32, #tpu.memory_space<vmem>>)
    %c0_i32_741 = arith.constant 0 : i32
    %879 = tpu.memref_slice %arg2[%598, %c0_i32_741] : memref<64x128xf32, #tpu.memory_space<any>> -> memref<1x128xf32, #tpu.memory_space<any>>
    %c119_i32_742 = arith.constant 119 : i32
    %c0_i32_743 = arith.constant 0 : i32
    %880 = tpu.memref_slice %arg3[%c119_i32_742, %c0_i32_743] : memref<128x128xf32, #tpu.memory_space<vmem>> -> memref<1x128xf32, #tpu.memory_space<vmem>>
    tpu.wait_dma2 semaphore(%arg4 : memref<!tpu.dma_semaphore, #tpu.memory_space<semaphore_mem>>) src(%879 : memref<1x128xf32, #tpu.memory_space<any>>) dst(%880 : memref<1x128xf32, #tpu.memory_space<vmem>>)
    %c0_i32_744 = arith.constant 0 : i32
    %881 = tpu.memref_slice %arg2[%603, %c0_i32_744] : memref<64x128xf32, #tpu.memory_space<any>> -> memref<1x128xf32, #tpu.memory_space<any>>
    %c120_i32_745 = arith.constant 120 : i32
    %c0_i32_746 = arith.constant 0 : i32
    %882 = tpu.memref_slice %arg3[%c120_i32_745, %c0_i32_746] : memref<128x128xf32, #tpu.memory_space<vmem>> -> memref<1x128xf32, #tpu.memory_space<vmem>>
    tpu.wait_dma2 semaphore(%arg4 : memref<!tpu.dma_semaphore, #tpu.memory_space<semaphore_mem>>) src(%881 : memref<1x128xf32, #tpu.memory_space<any>>) dst(%882 : memref<1x128xf32, #tpu.memory_space<vmem>>)
    %c0_i32_747 = arith.constant 0 : i32
    %883 = tpu.memref_slice %arg2[%608, %c0_i32_747] : memref<64x128xf32, #tpu.memory_space<any>> -> memref<1x128xf32, #tpu.memory_space<any>>
    %c121_i32_748 = arith.constant 121 : i32
    %c0_i32_749 = arith.constant 0 : i32
    %884 = tpu.memref_slice %arg3[%c121_i32_748, %c0_i32_749] : memref<128x128xf32, #tpu.memory_space<vmem>> -> memref<1x128xf32, #tpu.memory_space<vmem>>
    tpu.wait_dma2 semaphore(%arg4 : memref<!tpu.dma_semaphore, #tpu.memory_space<semaphore_mem>>) src(%883 : memref<1x128xf32, #tpu.memory_space<any>>) dst(%884 : memref<1x128xf32, #tpu.memory_space<vmem>>)
    %c0_i32_750 = arith.constant 0 : i32
    %885 = tpu.memref_slice %arg2[%613, %c0_i32_750] : memref<64x128xf32, #tpu.memory_space<any>> -> memref<1x128xf32, #tpu.memory_space<any>>
    %c122_i32_751 = arith.constant 122 : i32
    %c0_i32_752 = arith.constant 0 : i32
    %886 = tpu.memref_slice %arg3[%c122_i32_751, %c0_i32_752] : memref<128x128xf32, #tpu.memory_space<vmem>> -> memref<1x128xf32, #tpu.memory_space<vmem>>
    tpu.wait_dma2 semaphore(%arg4 : memref<!tpu.dma_semaphore, #tpu.memory_space<semaphore_mem>>) src(%885 : memref<1x128xf32, #tpu.memory_space<any>>) dst(%886 : memref<1x128xf32, #tpu.memory_space<vmem>>)
    %c0_i32_753 = arith.constant 0 : i32
    %887 = tpu.memref_slice %arg2[%618, %c0_i32_753] : memref<64x128xf32, #tpu.memory_space<any>> -> memref<1x128xf32, #tpu.memory_space<any>>
    %c123_i32_754 = arith.constant 123 : i32
    %c0_i32_755 = arith.constant 0 : i32
    %888 = tpu.memref_slice %arg3[%c123_i32_754, %c0_i32_755] : memref<128x128xf32, #tpu.memory_space<vmem>> -> memref<1x128xf32, #tpu.memory_space<vmem>>
    tpu.wait_dma2 semaphore(%arg4 : memref<!tpu.dma_semaphore, #tpu.memory_space<semaphore_mem>>) src(%887 : memref<1x128xf32, #tpu.memory_space<any>>) dst(%888 : memref<1x128xf32, #tpu.memory_space<vmem>>)
    %c0_i32_756 = arith.constant 0 : i32
    %889 = tpu.memref_slice %arg2[%623, %c0_i32_756] : memref<64x128xf32, #tpu.memory_space<any>> -> memref<1x128xf32, #tpu.memory_space<any>>
    %c124_i32_757 = arith.constant 124 : i32
    %c0_i32_758 = arith.constant 0 : i32
    %890 = tpu.memref_slice %arg3[%c124_i32_757, %c0_i32_758] : memref<128x128xf32, #tpu.memory_space<vmem>> -> memref<1x128xf32, #tpu.memory_space<vmem>>
    tpu.wait_dma2 semaphore(%arg4 : memref<!tpu.dma_semaphore, #tpu.memory_space<semaphore_mem>>) src(%889 : memref<1x128xf32, #tpu.memory_space<any>>) dst(%890 : memref<1x128xf32, #tpu.memory_space<vmem>>)
    %c0_i32_759 = arith.constant 0 : i32
    %891 = tpu.memref_slice %arg2[%628, %c0_i32_759] : memref<64x128xf32, #tpu.memory_space<any>> -> memref<1x128xf32, #tpu.memory_space<any>>
    %c125_i32_760 = arith.constant 125 : i32
    %c0_i32_761 = arith.constant 0 : i32
    %892 = tpu.memref_slice %arg3[%c125_i32_760, %c0_i32_761] : memref<128x128xf32, #tpu.memory_space<vmem>> -> memref<1x128xf32, #tpu.memory_space<vmem>>
    tpu.wait_dma2 semaphore(%arg4 : memref<!tpu.dma_semaphore, #tpu.memory_space<semaphore_mem>>) src(%891 : memref<1x128xf32, #tpu.memory_space<any>>) dst(%892 : memref<1x128xf32, #tpu.memory_space<vmem>>)
    %c0_i32_762 = arith.constant 0 : i32
    %893 = tpu.memref_slice %arg2[%633, %c0_i32_762] : memref<64x128xf32, #tpu.memory_space<any>> -> memref<1x128xf32, #tpu.memory_space<any>>
    %c126_i32_763 = arith.constant 126 : i32
    %c0_i32_764 = arith.constant 0 : i32
    %894 = tpu.memref_slice %arg3[%c126_i32_763, %c0_i32_764] : memref<128x128xf32, #tpu.memory_space<vmem>> -> memref<1x128xf32, #tpu.memory_space<vmem>>
    tpu.wait_dma2 semaphore(%arg4 : memref<!tpu.dma_semaphore, #tpu.memory_space<semaphore_mem>>) src(%893 : memref<1x128xf32, #tpu.memory_space<any>>) dst(%894 : memref<1x128xf32, #tpu.memory_space<vmem>>)
    %c0_i32_765 = arith.constant 0 : i32
    %895 = tpu.memref_slice %arg2[%638, %c0_i32_765] : memref<64x128xf32, #tpu.memory_space<any>> -> memref<1x128xf32, #tpu.memory_space<any>>
    %c127_i32_766 = arith.constant 127 : i32
    %c0_i32_767 = arith.constant 0 : i32
    %896 = tpu.memref_slice %arg3[%c127_i32_766, %c0_i32_767] : memref<128x128xf32, #tpu.memory_space<vmem>> -> memref<1x128xf32, #tpu.memory_space<vmem>>
    tpu.wait_dma2 semaphore(%arg4 : memref<!tpu.dma_semaphore, #tpu.memory_space<semaphore_mem>>) src(%895 : memref<1x128xf32, #tpu.memory_space<any>>) dst(%896 : memref<1x128xf32, #tpu.memory_space<vmem>>)
    return
  }
  func.func @transform_1(%arg0: i32, %arg1: memref<128xi32, #tpu.memory_space<smem>>) -> (i32, i32) {
    %c0_i32 = arith.constant 0 : i32
    %c0_i32_0 = arith.constant 0 : i32
    return %arg0, %c0_i32 : i32, i32
  }
}

</mosaic_0001>

<bundles_post_ra>
// kernel: tpu_custom_call.1
= control target key start
LH: loop header
LB: loop body
LE: loop exit
PB: predicated region body
PF: predicated region fallthrough
CT: control target
= control target key end

     0   :  { %s5831_s9 = smov [#allocation4]   ;;  %s7796_s0 = inlined_call_operand.hbm [shape: s32[128], index: 0, kind: input, shape index: {}]   ;;  %s7797_s1 = inlined_call_operand.hbm [shape: f32[64,128], index: 1, kind: input, shape index: {}]   ;;  %s7798_s2 = inlined_call_operand.hbm [shape: f32[128,128], index: 2, kind: output, shape index: {}]  }
   0x1   :  { %8 = dma.hbm_to_smem %s7796_s0, 16, %s5831_s9, [#allocation3] }
   0x2   :  { %5825 = dma.done.wait [#allocation3], 16 }
   0x3   :  { %5826 = vsyncadd [#allocation3], 4294967280 }
   0x4   :  { %10 = sfence }
   0x5   :  { %11 = vsyncpa [#allocation6], 0  ;;  %s13_s12 = sld [smem:[#allocation4]]  ;;  %s5832_s13 = smov [#allocation5]  }
   0x6   :  { %s23_s14 = sshll.u32 %s5832_s13, 4  ;;  %s5980_s15 = sld [smem:[#allocation4 + $0x1]]  ;;  %s5982_s14 = int_to_ptr.vmem [resolvable:$true] %s23_s14 }
   0x7   :  { %s5833_s16 = smov [#allocation5 + $0x1]   ;;  %s5984_s18 = sld [smem:[#allocation4 + $0x2]] }
   0x8   :  { %s39_s17 = sshll.u32 %s5833_s16, 4  ;;  %s5834_s19 = smov [#allocation5 + $0x2]   ;;  %s5986_s17 = int_to_ptr.vmem [resolvable:$true] %s39_s17 }
   0x9   :  { %s55_s0 = sshll.u32 %s5834_s19, 4  ;;  %s5988_s20 = sld [smem:[#allocation4 + $0x3]]  ;;  %s5990_s0 = int_to_ptr.vmem [resolvable:$true] %s55_s0 }
   0xa   :  { %s5999_s29 = scalar_lea.hbm %s7797_s1, 1024 }
   0xb   :  { %s2594_s21 = sshll.u32 %s13_s12, 4 }
   0xc   :  { %s15_s24 = scalar_lea.hbm %s7797_s1, %s2594_s21  ;;  %s2596_s25 = sshll.u32 %s5980_s15, 4 }
   0xd   :  { %s2989_s26 = scalar_lea.hbm %s15_s24, 16  ;;  %p2992_p1 = scmp.lt.s32.totalorder %s15_s24, %s7797_s1 }
   0xe   :  { %p2990_p0 = scmp.ne.s32.totalorder %s15_s24, %s2989_s26  ;;  %p2993_p2 = scmp.lt.s32.totalorder %s5999_s29, %s2989_s26 }
  0x10   :  { %p2994_p3 = por %p2993_p2, %p2992_p1 }
  0x12   :  { %p2995_p4 = pnand %p2994_p3, %p2990_p0 }
  0x14   :  { %2998 = shalt.err (!%p2995_p4)  }
  0x15   :  { %s2999_s4 = scalar_lea.vmem %s5982_s14, 16  ;;  %s6008_s5 = scalar_lea.vmem %s5982_s14, 2048 }
  0x16   :  { %p3000_p5 = scmp.ne.s32.totalorder %s5982_s14, %s2999_s4  ;;  %p3004_p6 = scmp.lt.s32.totalorder %s5982_s14, %s5982_s14 }
  0x17   :  { %p3005_p7 = scmp.lt.s32.totalorder %s6008_s5, %s2999_s4 }
  0x19   :  { %p3006_p8 = por %p3005_p7, %p3004_p6 }
  0x1b   :  { %p3007_p9 = pnand %p3006_p8, %p3000_p5 }
  0x1d   :  { %3010 = shalt.err (!%p3007_p9)  }
  0x1e   :  { %26 = dma.hbm_to_vmem [thread:$0]  %s15_s24, 16, %s5982_s14, [#allocation2] }
  0x1f   :  { %s30_s8 = scalar_lea.hbm %s7797_s1, %s2596_s25  ;;  %s2598_s9 = sshll.u32 %s5984_s18, 4 }
  0x20   :  { %s3011_s10 = scalar_lea.hbm %s30_s8, 16  ;;  %p3014_p11 = scmp.lt.s32.totalorder %s30_s8, %s7797_s1 }
  0x21   :  { %p3012_p10 = scmp.ne.s32.totalorder %s30_s8, %s3011_s10  ;;  %p3015_p12 = scmp.lt.s32.totalorder %s5999_s29, %s3011_s10 }
  0x23   :  { %p3016_p13 = por %p3015_p12, %p3014_p11 }
  0x25   :  { %p3017_p0 = pnand %p3016_p13, %p3012_p10 }
  0x27   :  { %3020 = shalt.err (!%p3017_p0)  }
  0x28   :  { %s3021_s13 = scalar_lea.vmem %s5986_s17, 16  ;;  %p3026_p2 = scmp.lt.s32.totalorder %s5986_s17, %s5982_s14 }
  0x29   :  { %p3022_p1 = scmp.ne.s32.totalorder %s5986_s17, %s3021_s13  ;;  %p3027_p3 = scmp.lt.s32.totalorder %s6008_s5, %s3021_s13 }
  0x2b   :  { %p3028_p4 = por %p3027_p3, %p3026_p2 }
  0x2d   :  { %p3029_p5 = pnand %p3028_p4, %p3022_p1 }
  0x2f   :  { %3032 = shalt.err (!%p3029_p5)  }
  0x30   :  { %42 = dma.hbm_to_vmem [thread:$0]  %s30_s8, 16, %s5986_s17, [#allocation2] }
  0x31   :  { %s46_s18 = scalar_lea.hbm %s7797_s1, %s2598_s9  ;;  %s2600_s19 = sshll.u32 %s5988_s20, 4 }
  0x32   :  { %s3033_s21 = scalar_lea.hbm %s46_s18, 16  ;;  %p3036_p8 = scmp.lt.s32.totalorder %s46_s18, %s7797_s1 }
  0x33   :  { %p3034_p7 = scmp.ne.s32.totalorder %s46_s18, %s3033_s21  ;;  %p3037_p9 = scmp.lt.s32.totalorder %s5999_s29, %s3033_s21 }
  0x35   :  { %p3038_p10 = por %p3037_p9, %p3036_p8 }
  0x37   :  { %p3039_p11 = pnand %p3038_p10, %p3034_p7 }
  0x39   :  { %3042 = shalt.err (!%p3039_p11)  }
  0x3a   :  { %s3043_s17 = scalar_lea.vmem %s5990_s0, 16  ;;  %p3048_p13 = scmp.lt.s32.totalorder %s5990_s0, %s5982_s14 }
  0x3b   :  { %p3044_p12 = scmp.ne.s32.totalorder %s5990_s0, %s3043_s17  ;;  %p3049_p0 = scmp.lt.s32.totalorder %s6008_s5, %s3043_s17 }
  0x3d   :  { %p3050_p1 = por %p3049_p0, %p3048_p13 }
  0x3f   :  { %p3051_p2 = pnand %p3050_p1, %p3044_p12 }
  0x41   :  { %3054 = shalt.err (!%p3051_p2)  }
  0x42   :  { %58 = dma.hbm_to_vmem [thread:$0]  %s46_s18, 16, %s5990_s0, [#allocation2] }
  0x43   :  { %s62_s25 = scalar_lea.hbm %s7797_s1, %s2600_s19  ;;  %s5835_s26 = smov [#allocation5 + $0x3]  }
  0x44   :  { %s71_s27 = sshll.u32 %s5835_s26, 4  ;;  %s2601_s28 = sld [smem:[#allocation4 + $0x4]]  ;;  %s72_s27 = int_to_ptr.vmem [resolvable:$true] %s71_s27 }
  0x45   :  { %s3055_s30 = scalar_lea.hbm %s62_s25, 16  ;;  %p3058_p4 = scmp.lt.s32.totalorder %s62_s25, %s7797_s1 }
  0x46   :  { %p3056_p3 = scmp.ne.s32.totalorder %s62_s25, %s3055_s30  ;;  %p3059_p5 = scmp.lt.s32.totalorder %s5999_s29, %s3055_s30 }
  0x48   :  { %p3060_p7 = por %p3059_p5, %p3058_p4 }
  0x4a   :  { %p3061_p8 = pnand %p3060_p7, %p3056_p3 }
  0x4c   :  { %3064 = shalt.err (!%p3061_p8)  }
  0x4d   :  { %s3065_s6 = scalar_lea.vmem %s72_s27, 16  ;;  %p3070_p10 = scmp.lt.s32.totalorder %s72_s27, %s5982_s14 }
  0x4e   :  { %p3066_p9 = scmp.ne.s32.totalorder %s72_s27, %s3065_s6  ;;  %p3071_p11 = scmp.lt.s32.totalorder %s6008_s5, %s3065_s6 }
  0x50   :  { %p3072_p12 = por %p3071_p11, %p3070_p10 }
  0x52   :  { %p3073_p13 = pnand %p3072_p12, %p3066_p9 }
  0x54   :  { %3076 = shalt.err (!%p3073_p13)  }
  0x55   :  { %74 = dma.hbm_to_vmem [thread:$0]  %s62_s25, 16, %s72_s27, [#allocation2] }
  0x56   :  { %s5836_s0 = smov [#allocation5 + $0x4]   ;;  %s2603_s8 = sld [smem:[#allocation4 + $0x5]] }
  0x57   :  { %s87_s7 = sshll.u32 %s5836_s0, 4  ;;  %s5837_s9 = smov [#allocation5 + $0x5]   ;;  %s88_s7 = int_to_ptr.vmem [resolvable:$true] %s87_s7 }
  0x58   :  { %s103_s10 = sshll.u32 %s5837_s9, 4  ;;  %s6054_s11 = sld [smem:[#allocation4 + $0x6]]  ;;  %s6056_s10 = int_to_ptr.vmem [resolvable:$true] %s103_s10 }
  0x59   :  { %s2602_s12 = sshll.u32 %s2601_s28, 4 }
  0x5a   :  { %s78_s16 = scalar_lea.hbm %s7797_s1, %s2602_s12 }
  0x5b   :  { %s3077_s18 = scalar_lea.hbm %s78_s16, 16  ;;  %p3080_p1 = scmp.lt.s32.totalorder %s78_s16, %s7797_s1 }
  0x5c   :  { %p3078_p0 = scmp.ne.s32.totalorder %s78_s16, %s3077_s18  ;;  %p3081_p2 = scmp.lt.s32.totalorder %s5999_s29, %s3077_s18 }
  0x5e   :  { %p3082_p3 = por %p3081_p2, %p3080_p1 }
  0x60   :  { %p3083_p4 = pnand %p3082_p3, %p3078_p0 }
  0x62   :  { %3086 = shalt.err (!%p3083_p4)  }
  0x63   :  { %s3087_s22 = scalar_lea.vmem %s88_s7, 16  ;;  %p3092_p7 = scmp.lt.s32.totalorder %s88_s7, %s5982_s14 }
  0x64   :  { %p3088_p5 = scmp.ne.s32.totalorder %s88_s7, %s3087_s22  ;;  %p3093_p8 = scmp.lt.s32.totalorder %s6008_s5, %s3087_s22 }
  0x66   :  { %p3094_p9 = por %p3093_p8, %p3092_p7 }
  0x68   :  { %p3095_p10 = pnand %p3094_p9, %p3088_p5 }
  0x6a   :  { %3098 = shalt.err (!%p3095_p10)  }
  0x6b   :  { %90 = dma.hbm_to_vmem [thread:$0]  %s78_s16, 16, %s88_s7, [#allocation2] }
  0x6c   :  { %s2604_s23 = sshll.u32 %s2603_s8, 4  ;;  %s5838_s17 = smov [#allocation5 + $0x6]  }
  0x6d   :  { %s119_s20 = sshll.u32 %s5838_s17, 4  ;;  %s94_s26 = scalar_lea.hbm %s7797_s1, %s2604_s23  ;;  %s6070_s20 = int_to_ptr.vmem [resolvable:$true] %s119_s20 }
  0x6e   :  { %s3099_s27 = scalar_lea.hbm %s94_s26, 16  ;;  %p3102_p12 = scmp.lt.s32.totalorder %s94_s26, %s7797_s1 }
  0x6f   :  { %p3100_p11 = scmp.ne.s32.totalorder %s94_s26, %s3099_s27  ;;  %p3103_p13 = scmp.lt.s32.totalorder %s5999_s29, %s3099_s27 }
  0x71   :  { %p3104_p0 = por %p3103_p13, %p3102_p12 }
  0x73   :  { %p3105_p1 = pnand %p3104_p0, %p3100_p11 }
  0x75   :  { %3108 = shalt.err (!%p3105_p1)  }
  0x76   :  { %s3109_s3 = scalar_lea.vmem %s6056_s10, 16  ;;  %p3114_p3 = scmp.lt.s32.totalorder %s6056_s10, %s5982_s14 }
  0x77   :  { %p3110_p2 = scmp.ne.s32.totalorder %s6056_s10, %s3109_s3  ;;  %p3115_p4 = scmp.lt.s32.totalorder %s6008_s5, %s3109_s3 }
  0x79   :  { %p3116_p5 = por %p3115_p4, %p3114_p3 }
  0x7b   :  { %p3117_p7 = pnand %p3116_p5, %p3110_p2 }
  0x7d   :  { %3120 = shalt.err (!%p3117_p7)  }
  0x7e   :  { %106 = dma.hbm_to_vmem [thread:$0]  %s94_s26, 16, %s6056_s10, [#allocation2] }
  0x7f   :  { %s2606_s4 = sshll.u32 %s6054_s11, 4  ;;  %s2607_s6 = sld [smem:[#allocation4 + $0x7]] }
  0x80   :  { %s110_s8 = scalar_lea.hbm %s7797_s1, %s2606_s4 }
  0x81   :  { %s3121_s9 = scalar_lea.hbm %s110_s8, 16  ;;  %p3124_p9 = scmp.lt.s32.totalorder %s110_s8, %s7797_s1 }
  0x82   :  { %p3122_p8 = scmp.ne.s32.totalorder %s110_s8, %s3121_s9  ;;  %p3125_p10 = scmp.lt.s32.totalorder %s5999_s29, %s3121_s9 }
  0x84   :  { %p3126_p11 = por %p3125_p10, %p3124_p9 }
  0x86   :  { %p3127_p12 = pnand %p3126_p11, %p3122_p8 }
  0x88   :  { %3130 = shalt.err (!%p3127_p12)  }
  0x89   :  { %s3131_s10 = scalar_lea.vmem %s6070_s20, 16  ;;  %p3136_p0 = scmp.lt.s32.totalorder %s6070_s20, %s5982_s14 }
  0x8a   :  { %p3132_p13 = scmp.ne.s32.totalorder %s6070_s20, %s3131_s10  ;;  %p3137_p1 = scmp.lt.s32.totalorder %s6008_s5, %s3131_s10 }
  0x8c   :  { %p3138_p2 = por %p3137_p1, %p3136_p0 }
  0x8e   :  { %p3139_p3 = pnand %p3138_p2, %p3132_p13 }
  0x90   :  { %3142 = shalt.err (!%p3139_p3)  }
  0x91   :  { %122 = dma.hbm_to_vmem [thread:$0]  %s110_s8, 16, %s6070_s20, [#allocation2] }
  0x92   :  { %s5839_s11 = smov [#allocation5 + $0x7]   ;;  %s2609_s16 = sld [smem:[#allocation4 + $0x8]] }
  0x93   :  { %s135_s15 = sshll.u32 %s5839_s11, 4  ;;  %s5840_s18 = smov [#allocation5 + $0x8]   ;;  %s136_s15 = int_to_ptr.vmem [resolvable:$true] %s135_s15 }
  0x94   :  { %s151_s19 = sshll.u32 %s5840_s18, 4  ;;  %s6096_s21 = sld [smem:[#allocation4 + $0x9]]  ;;  %s6098_s19 = int_to_ptr.vmem [resolvable:$true] %s151_s19 }
  0x95   :  { %s2608_s22 = sshll.u32 %s2607_s6, 4 }
  0x96   :  { %s126_s24 = scalar_lea.hbm %s7797_s1, %s2608_s22 }
  0x97   :  { %s3143_s25 = scalar_lea.hbm %s126_s24, 16  ;;  %p3146_p5 = scmp.lt.s32.totalorder %s126_s24, %s7797_s1 }
  0x98   :  { %p3144_p4 = scmp.ne.s32.totalorder %s126_s24, %s3143_s25  ;;  %p3147_p7 = scmp.lt.s32.totalorder %s5999_s29, %s3143_s25 }
  0x9a   :  { %p3148_p8 = por %p3147_p7, %p3146_p5 }
  0x9c   :  { %p3149_p9 = pnand %p3148_p8, %p3144_p4 }
  0x9e   :  { %3152 = shalt.err (!%p3149_p9)  }
  0x9f   :  { %s3153_s20 = scalar_lea.vmem %s136_s15, 16  ;;  %p3158_p11 = scmp.lt.s32.totalorder %s136_s15, %s5982_s14 }
  0xa0   :  { %p3154_p10 = scmp.ne.s32.totalorder %s136_s15, %s3153_s20  ;;  %p3159_p12 = scmp.lt.s32.totalorder %s6008_s5, %s3153_s20 }
  0xa2   :  { %p3160_p13 = por %p3159_p12, %p3158_p11 }
  0xa4   :  { %p3161_p0 = pnand %p3160_p13, %p3154_p10 }
  0xa6   :  { %3164 = shalt.err (!%p3161_p0)  }
  0xa7   :  { %138 = dma.hbm_to_vmem [thread:$0]  %s126_s24, 16, %s136_s15, [#allocation2] }
  0xa8   :  { %s2610_s28 = sshll.u32 %s2609_s16, 4  ;;  %s5841_s30 = smov [#allocation5 + $0x9]  }
  0xa9   :  { %s167_s3 = sshll.u32 %s5841_s30, 4  ;;  %s142_s0 = scalar_lea.hbm %s7797_s1, %s2610_s28  ;;  %s6112_s3 = int_to_ptr.vmem [resolvable:$true] %s167_s3 }
  0xaa   :  { %s3165_s7 = scalar_lea.hbm %s142_s0, 16  ;;  %p3168_p2 = scmp.lt.s32.totalorder %s142_s0, %s7797_s1 }
  0xab   :  { %p3166_p1 = scmp.ne.s32.totalorder %s142_s0, %s3165_s7  ;;  %p3169_p3 = scmp.lt.s32.totalorder %s5999_s29, %s3165_s7 }
  0xad   :  { %p3170_p4 = por %p3169_p3, %p3168_p2 }
  0xaf   :  { %p3171_p5 = pnand %p3170_p4, %p3166_p1 }
  0xb1   :  { %3174 = shalt.err (!%p3171_p5)  }
  0xb2   :  { %s3175_s12 = scalar_lea.vmem %s6098_s19, 16  ;;  %p3180_p8 = scmp.lt.s32.totalorder %s6098_s19, %s5982_s14 }
  0xb3   :  { %p3176_p7 = scmp.ne.s32.totalorder %s6098_s19, %s3175_s12  ;;  %p3181_p9 = scmp.lt.s32.totalorder %s6008_s5, %s3175_s12 }
  0xb5   :  { %p3182_p10 = por %p3181_p9, %p3180_p8 }
  0xb7   :  { %p3183_p11 = pnand %p3182_p10, %p3176_p7 }
  0xb9   :  { %3186 = shalt.err (!%p3183_p11)  }
  0xba   :  { %154 = dma.hbm_to_vmem [thread:$0]  %s142_s0, 16, %s6098_s19, [#allocation2] }
  0xbb   :  { %s2612_s13 = sshll.u32 %s6096_s21, 4  ;;  %s2613_s10 = sld [smem:[#allocation4 + $0xa]] }
  0xbc   :  { %s158_s16 = scalar_lea.hbm %s7797_s1, %s2612_s13 }
  0xbd   :  { %s3187_s18 = scalar_lea.hbm %s158_s16, 16  ;;  %p3190_p13 = scmp.lt.s32.totalorder %s158_s16, %s7797_s1 }
  0xbe   :  { %p3188_p12 = scmp.ne.s32.totalorder %s158_s16, %s3187_s18  ;;  %p3191_p0 = scmp.lt.s32.totalorder %s5999_s29, %s3187_s18 }
  0xc0   :  { %p3192_p1 = por %p3191_p0, %p3190_p13 }
  0xc2   :  { %p3193_p2 = pnand %p3192_p1, %p3188_p12 }
  0xc4   :  { %3196 = shalt.err (!%p3193_p2)  }
  0xc5   :  { %s3197_s19 = scalar_lea.vmem %s6112_s3, 16  ;;  %p3202_p4 = scmp.lt.s32.totalorder %s6112_s3, %s5982_s14 }
  0xc6   :  { %p3198_p3 = scmp.ne.s32.totalorder %s6112_s3, %s3197_s19  ;;  %p3203_p5 = scmp.lt.s32.totalorder %s6008_s5, %s3197_s19 }
  0xc8   :  { %p3204_p7 = por %p3203_p5, %p3202_p4 }
  0xca   :  { %p3205_p8 = pnand %p3204_p7, %p3198_p3 }
  0xcc   :  { %3208 = shalt.err (!%p3205_p8)  }
  0xcd   :  { %170 = dma.hbm_to_vmem [thread:$0]  %s158_s16, 16, %s6112_s3, [#allocation2] }
  0xce   :  { %s5842_s21 = smov [#allocation5 + $0xa]   ;;  %s2615_s24 = sld [smem:[#allocation4 + $0xb]] }
  0xcf   :  { %s183_s17 = sshll.u32 %s5842_s21, 4  ;;  %s5843_s25 = smov [#allocation5 + $0xb]   ;;  %s184_s17 = int_to_ptr.vmem [resolvable:$true] %s183_s17 }
  0xd0   :  { %s199_s26 = sshll.u32 %s5843_s25, 4  ;;  %s6138_s27 = sld [smem:[#allocation4 + $0xc]]  ;;  %s6140_s26 = int_to_ptr.vmem [resolvable:$true] %s199_s26 }
  0xd1   :  { %s2614_s20 = sshll.u32 %s2613_s10, 4 }
  0xd2   :  { %s174_s4 = scalar_lea.hbm %s7797_s1, %s2614_s20 }
  0xd3   :  { %s3209_s6 = scalar_lea.hbm %s174_s4, 16  ;;  %p3212_p10 = scmp.lt.s32.totalorder %s174_s4, %s7797_s1 }
  0xd4   :  { %p3210_p9 = scmp.ne.s32.totalorder %s174_s4, %s3209_s6  ;;  %p3213_p11 = scmp.lt.s32.totalorder %s5999_s29, %s3209_s6 }
  0xd6   :  { %p3214_p12 = por %p3213_p11, %p3212_p10 }
  0xd8   :  { %p3215_p13 = pnand %p3214_p12, %p3210_p9 }
  0xda   :  { %3218 = shalt.err (!%p3215_p13)  }
  0xdb   :  { %s3219_s3 = scalar_lea.vmem %s184_s17, 16  ;;  %p3224_p1 = scmp.lt.s32.totalorder %s184_s17, %s5982_s14 }
  0xdc   :  { %p3220_p0 = scmp.ne.s32.totalorder %s184_s17, %s3219_s3  ;;  %p3225_p2 = scmp.lt.s32.totalorder %s6008_s5, %s3219_s3 }
  0xde   :  { %p3226_p3 = por %p3225_p2, %p3224_p1 }
  0xe0   :  { %p3227_p4 = pnand %p3226_p3, %p3220_p0 }
  0xe2   :  { %3230 = shalt.err (!%p3227_p4)  }
  0xe3   :  { %186 = dma.hbm_to_vmem [thread:$0]  %s174_s4, 16, %s184_s17, [#allocation2] }
  0xe4   :  { %s2616_s8 = sshll.u32 %s2615_s24, 4  ;;  %s5844_s9 = smov [#allocation5 + $0xc]  }
  0xe5   :  { %s215_s12 = sshll.u32 %s5844_s9, 4  ;;  %s190_s11 = scalar_lea.hbm %s7797_s1, %s2616_s8  ;;  %s6154_s12 = int_to_ptr.vmem [resolvable:$true] %s215_s12 }
  0xe6   :  { %s3231_s15 = scalar_lea.hbm %s190_s11, 16  ;;  %p3234_p7 = scmp.lt.s32.totalorder %s190_s11, %s7797_s1 }
  0xe7   :  { %p3232_p5 = scmp.ne.s32.totalorder %s190_s11, %s3231_s15  ;;  %p3235_p8 = scmp.lt.s32.totalorder %s5999_s29, %s3231_s15 }
  0xe9   :  { %p3236_p9 = por %p3235_p8, %p3234_p7 }
  0xeb   :  { %p3237_p10 = pnand %p3236_p9, %p3232_p5 }
  0xed   :  { %3240 = shalt.err (!%p3237_p10)  }
  0xee   :  { %s3241_s22 = scalar_lea.vmem %s6140_s26, 16  ;;  %p3246_p12 = scmp.lt.s32.totalorder %s6140_s26, %s5982_s14 }
  0xef   :  { %p3242_p11 = scmp.ne.s32.totalorder %s6140_s26, %s3241_s22  ;;  %p3247_p13 = scmp.lt.s32.totalorder %s6008_s5, %s3241_s22 }
  0xf1   :  { %p3248_p0 = por %p3247_p13, %p3246_p12 }
  0xf3   :  { %p3249_p1 = pnand %p3248_p0, %p3242_p11 }
  0xf5   :  { %3252 = shalt.err (!%p3249_p1)  }
  0xf6   :  { %202 = dma.hbm_to_vmem [thread:$0]  %s190_s11, 16, %s6140_s26, [#allocation2] }
  0xf7   :  { %s2618_s23 = sshll.u32 %s6138_s27, 4  ;;  %s2619_s19 = sld [smem:[#allocation4 + $0xd]] }
  0xf8   :  { %s206_s24 = scalar_lea.hbm %s7797_s1, %s2618_s23 }
  0xf9   :  { %s3253_s25 = scalar_lea.hbm %s206_s24, 16  ;;  %p3256_p3 = scmp.lt.s32.totalorder %s206_s24, %s7797_s1 }
  0xfa   :  { %p3254_p2 = scmp.ne.s32.totalorder %s206_s24, %s3253_s25  ;;  %p3257_p4 = scmp.lt.s32.totalorder %s5999_s29, %s3253_s25 }
  0xfc   :  { %p3258_p5 = por %p3257_p4, %p3256_p3 }
  0xfe   :  { %p3259_p7 = pnand %p3258_p5, %p3254_p2 }
 0x100   :  { %3262 = shalt.err (!%p3259_p7)  }
 0x101   :  { %s3263_s26 = scalar_lea.vmem %s6154_s12, 16  ;;  %p3268_p9 = scmp.lt.s32.totalorder %s6154_s12, %s5982_s14 }
 0x102   :  { %p3264_p8 = scmp.ne.s32.totalorder %s6154_s12, %s3263_s26  ;;  %p3269_p10 = scmp.lt.s32.totalorder %s6008_s5, %s3263_s26 }
 0x104   :  { %p3270_p11 = por %p3269_p10, %p3268_p9 }
 0x106   :  { %p3271_p12 = pnand %p3270_p11, %p3264_p8 }
 0x108   :  { %3274 = shalt.err (!%p3271_p12)  }
 0x109   :  { %218 = dma.hbm_to_vmem [thread:$0]  %s206_s24, 16, %s6154_s12, [#allocation2] }
 0x10a   :  { %s5845_s27 = smov [#allocation5 + $0xd]   ;;  %s2621_s4 = sld [smem:[#allocation4 + $0xe]] }
 0x10b   :  { %s231_s30 = sshll.u32 %s5845_s27, 4  ;;  %s5846_s6 = smov [#allocation5 + $0xe]   ;;  %s232_s30 = int_to_ptr.vmem [resolvable:$true] %s231_s30 }
 0x10c   :  { %s247_s0 = sshll.u32 %s5846_s6, 4  ;;  %s6180_s7 = sld [smem:[#allocation4 + $0xf]]  ;;  %s6182_s0 = int_to_ptr.vmem [resolvable:$true] %s247_s0 }
 0x10d   :  { %s2620_s3 = sshll.u32 %s2619_s19, 4 }
 0x10e   :  { %s222_s13 = scalar_lea.hbm %s7797_s1, %s2620_s3 }
 0x10f   :  { %s3275_s10 = scalar_lea.hbm %s222_s13, 16  ;;  %p3278_p0 = scmp.lt.s32.totalorder %s222_s13, %s7797_s1 }
 0x110   :  { %p3276_p13 = scmp.ne.s32.totalorder %s222_s13, %s3275_s10  ;;  %p3279_p1 = scmp.lt.s32.totalorder %s5999_s29, %s3275_s10 }
 0x112   :  { %p3280_p2 = por %p3279_p1, %p3278_p0 }
 0x114   :  { %p3281_p3 = pnand %p3280_p2, %p3276_p13 }
 0x116   :  { %3284 = shalt.err (!%p3281_p3)  }
 0x117   :  { %s3285_s12 = scalar_lea.vmem %s232_s30, 16  ;;  %p3290_p5 = scmp.lt.s32.totalorder %s232_s30, %s5982_s14 }
 0x118   :  { %p3286_p4 = scmp.ne.s32.totalorder %s232_s30, %s3285_s12  ;;  %p3291_p7 = scmp.lt.s32.totalorder %s6008_s5, %s3285_s12 }
 0x11a   :  { %p3292_p8 = por %p3291_p7, %p3290_p5 }
 0x11c   :  { %p3293_p9 = pnand %p3292_p8, %p3286_p4 }
 0x11e   :  { %3296 = shalt.err (!%p3293_p9)  }
 0x11f   :  { %234 = dma.hbm_to_vmem [thread:$0]  %s222_s13, 16, %s232_s30, [#allocation2] }
 0x120   :  { %s2622_s16 = sshll.u32 %s2621_s4, 4  ;;  %s5847_s18 = smov [#allocation5 + $0xf]  }
 0x121   :  { %s263_s22 = sshll.u32 %s5847_s18, 4  ;;  %s238_s21 = scalar_lea.hbm %s7797_s1, %s2622_s16  ;;  %s6196_s22 = int_to_ptr.vmem [resolvable:$true] %s263_s22 }
 0x122   :  { %s3297_s17 = scalar_lea.hbm %s238_s21, 16  ;;  %p3300_p11 = scmp.lt.s32.totalorder %s238_s21, %s7797_s1 }
 0x123   :  { %p3298_p10 = scmp.ne.s32.totalorder %s238_s21, %s3297_s17  ;;  %p3301_p12 = scmp.lt.s32.totalorder %s5999_s29, %s3297_s17 }
 0x125   :  { %p3302_p13 = por %p3301_p12, %p3300_p11 }
 0x127   :  { %p3303_p0 = pnand %p3302_p13, %p3298_p10 }
 0x129   :  { %3306 = shalt.err (!%p3303_p0)  }
 0x12a   :  { %s3307_s20 = scalar_lea.vmem %s6182_s0, 16  ;;  %p3312_p2 = scmp.lt.s32.totalorder %s6182_s0, %s5982_s14 }
 0x12b   :  { %p3308_p1 = scmp.ne.s32.totalorder %s6182_s0, %s3307_s20  ;;  %p3313_p3 = scmp.lt.s32.totalorder %s6008_s5, %s3307_s20 }
 0x12d   :  { %p3314_p4 = por %p3313_p3, %p3312_p2 }
 0x12f   :  { %p3315_p5 = pnand %p3314_p4, %p3308_p1 }
 0x131   :  { %3318 = shalt.err (!%p3315_p5)  }
 0x132   :  { %250 = dma.hbm_to_vmem [thread:$0]  %s238_s21, 16, %s6182_s0, [#allocation2] }
 0x133   :  { %s2624_s28 = sshll.u32 %s6180_s7, 4  ;;  %s2625_s26 = sld [smem:[#allocation4 + $0x10]] }
 0x134   :  { %s254_s4 = scalar_lea.hbm %s7797_s1, %s2624_s28 }
 0x135   :  { %s3319_s6 = scalar_lea.hbm %s254_s4, 16  ;;  %p3322_p8 = scmp.lt.s32.totalorder %s254_s4, %s7797_s1 }
 0x136   :  { %p3320_p7 = scmp.ne.s32.totalorder %s254_s4, %s3319_s6  ;;  %p3323_p9 = scmp.lt.s32.totalorder %s5999_s29, %s3319_s6 }
 0x138   :  { %p3324_p10 = por %p3323_p9, %p3322_p8 }
 0x13a   :  { %p3325_p11 = pnand %p3324_p10, %p3320_p7 }
 0x13c   :  { %3328 = shalt.err (!%p3325_p11)  }
 0x13d   :  { %s3329_s0 = scalar_lea.vmem %s6196_s22, 16  ;;  %p3334_p13 = scmp.lt.s32.totalorder %s6196_s22, %s5982_s14 }
 0x13e   :  { %p3330_p12 = scmp.ne.s32.totalorder %s6196_s22, %s3329_s0  ;;  %p3335_p0 = scmp.lt.s32.totalorder %s6008_s5, %s3329_s0 }
 0x140   :  { %p3336_p1 = por %p3335_p0, %p3334_p13 }
 0x142   :  { %p3337_p2 = pnand %p3336_p1, %p3330_p12 }
 0x144   :  { %3340 = shalt.err (!%p3337_p2)  }
 0x145   :  { %266 = dma.hbm_to_vmem [thread:$0]  %s254_s4, 16, %s6196_s22, [#allocation2] }
 0x146   :  { %s5848_s7 = smov [#allocation5 + $0x10]   ;;  %s2627_s13 = sld [smem:[#allocation4 + $0x11]] }
 0x147   :  { %s279_s9 = sshll.u32 %s5848_s7, 4  ;;  %s5849_s10 = smov [#allocation5 + $0x11]   ;;  %s280_s9 = int_to_ptr.vmem [resolvable:$true] %s279_s9 }
 0x148   :  { %s295_s11 = sshll.u32 %s5849_s10, 4  ;;  %s6222_s15 = sld [smem:[#allocation4 + $0x12]]  ;;  %s6224_s11 = int_to_ptr.vmem [resolvable:$true] %s295_s11 }
 0x149   :  { %s2626_s12 = sshll.u32 %s2625_s26, 4 }
 0x14a   :  { %s270_s23 = scalar_lea.hbm %s7797_s1, %s2626_s12 }
 0x14b   :  { %s3341_s19 = scalar_lea.hbm %s270_s23, 16  ;;  %p3344_p4 = scmp.lt.s32.totalorder %s270_s23, %s7797_s1 }
 0x14c   :  { %p3342_p3 = scmp.ne.s32.totalorder %s270_s23, %s3341_s19  ;;  %p3345_p5 = scmp.lt.s32.totalorder %s5999_s29, %s3341_s19 }
 0x14e   :  { %p3346_p7 = por %p3345_p5, %p3344_p4 }
 0x150   :  { %p3347_p8 = pnand %p3346_p7, %p3342_p3 }
 0x152   :  { %3350 = shalt.err (!%p3347_p8)  }
 0x153   :  { %s3351_s22 = scalar_lea.vmem %s280_s9, 16  ;;  %p3356_p10 = scmp.lt.s32.totalorder %s280_s9, %s5982_s14 }
 0x154   :  { %p3352_p9 = scmp.ne.s32.totalorder %s280_s9, %s3351_s22  ;;  %p3357_p11 = scmp.lt.s32.totalorder %s6008_s5, %s3351_s22 }
 0x156   :  { %p3358_p12 = por %p3357_p11, %p3356_p10 }
 0x158   :  { %p3359_p13 = pnand %p3358_p12, %p3352_p9 }
 0x15a   :  { %3362 = shalt.err (!%p3359_p13)  }
 0x15b   :  { %282 = dma.hbm_to_vmem [thread:$0]  %s270_s23, 16, %s280_s9, [#allocation2] }
 0x15c   :  { %s2628_s24 = sshll.u32 %s2627_s13, 4  ;;  %s5850_s25 = smov [#allocation5 + $0x12]  }
 0x15d   :  { %s311_s20 = sshll.u32 %s5850_s25, 4  ;;  %s286_s27 = scalar_lea.hbm %s7797_s1, %s2628_s24  ;;  %s6238_s20 = int_to_ptr.vmem [resolvable:$true] %s311_s20 }
 0x15e   :  { %s3363_s30 = scalar_lea.hbm %s286_s27, 16  ;;  %p3366_p1 = scmp.lt.s32.totalorder %s286_s27, %s7797_s1 }
 0x15f   :  { %p3364_p0 = scmp.ne.s32.totalorder %s286_s27, %s3363_s30  ;;  %p3367_p2 = scmp.lt.s32.totalorder %s5999_s29, %s3363_s30 }
 0x161   :  { %p3368_p3 = por %p3367_p2, %p3366_p1 }
 0x163   :  { %p3369_p4 = pnand %p3368_p3, %p3364_p0 }
 0x165   :  { %3372 = shalt.err (!%p3369_p4)  }
 0x166   :  { %s3373_s3 = scalar_lea.vmem %s6224_s11, 16  ;;  %p3378_p7 = scmp.lt.s32.totalorder %s6224_s11, %s5982_s14 }
 0x167   :  { %p3374_p5 = scmp.ne.s32.totalorder %s6224_s11, %s3373_s3  ;;  %p3379_p8 = scmp.lt.s32.totalorder %s6008_s5, %s3373_s3 }
 0x169   :  { %p3380_p9 = por %p3379_p8, %p3378_p7 }
 0x16b   :  { %p3381_p10 = pnand %p3380_p9, %p3374_p5 }
 0x16d   :  { %3384 = shalt.err (!%p3381_p10)  }
 0x16e   :  { %298 = dma.hbm_to_vmem [thread:$0]  %s286_s27, 16, %s6224_s11, [#allocation2] }
 0x16f   :  { %s2630_s8 = sshll.u32 %s6222_s15, 4  ;;  %s2631_s0 = sld [smem:[#allocation4 + $0x13]] }
 0x170   :  { %s302_s13 = scalar_lea.hbm %s7797_s1, %s2630_s8 }
 0x171   :  { %s3385_s10 = scalar_lea.hbm %s302_s13, 16  ;;  %p3388_p12 = scmp.lt.s32.totalorder %s302_s13, %s7797_s1 }
 0x172   :  { %p3386_p11 = scmp.ne.s32.totalorder %s302_s13, %s3385_s10  ;;  %p3389_p13 = scmp.lt.s32.totalorder %s5999_s29, %s3385_s10 }
 0x174   :  { %p3390_p0 = por %p3389_p13, %p3388_p12 }
 0x176   :  { %p3391_p1 = pnand %p3390_p0, %p3386_p11 }
 0x178   :  { %3394 = shalt.err (!%p3391_p1)  }
 0x179   :  { %s3395_s11 = scalar_lea.vmem %s6238_s20, 16  ;;  %p3400_p3 = scmp.lt.s32.totalorder %s6238_s20, %s5982_s14 }
 0x17a   :  { %p3396_p2 = scmp.ne.s32.totalorder %s6238_s20, %s3395_s11  ;;  %p3401_p4 = scmp.lt.s32.totalorder %s6008_s5, %s3395_s11 }
 0x17c   :  { %p3402_p5 = por %p3401_p4, %p3400_p3 }
 0x17e   :  { %p3403_p7 = pnand %p3402_p5, %p3396_p2 }
 0x180   :  { %3406 = shalt.err (!%p3403_p7)  }
 0x181   :  { %314 = dma.hbm_to_vmem [thread:$0]  %s302_s13, 16, %s6238_s20, [#allocation2] }
 0x182   :  { %s5851_s15 = smov [#allocation5 + $0x13]   ;;  %s2633_s23 = sld [smem:[#allocation4 + $0x14]] }
 0x183   :  { %s327_s18 = sshll.u32 %s5851_s15, 4  ;;  %s5852_s19 = smov [#allocation5 + $0x14]   ;;  %s328_s18 = int_to_ptr.vmem [resolvable:$true] %s327_s18 }
 0x184   :  { %s343_s21 = sshll.u32 %s5852_s19, 4  ;;  %s6264_s17 = sld [smem:[#allocation4 + $0x15]]  ;;  %s6266_s21 = int_to_ptr.vmem [resolvable:$true] %s343_s21 }
 0x185   :  { %s2632_s22 = sshll.u32 %s2631_s0, 4 }
 0x186   :  { %s318_s28 = scalar_lea.hbm %s7797_s1, %s2632_s22 }
 0x187   :  { %s3407_s26 = scalar_lea.hbm %s318_s28, 16  ;;  %p3410_p9 = scmp.lt.s32.totalorder %s318_s28, %s7797_s1 }
 0x188   :  { %p3408_p8 = scmp.ne.s32.totalorder %s318_s28, %s3407_s26  ;;  %p3411_p10 = scmp.lt.s32.totalorder %s5999_s29, %s3407_s26 }
 0x18a   :  { %p3412_p11 = por %p3411_p10, %p3410_p9 }
 0x18c   :  { %p3413_p12 = pnand %p3412_p11, %p3408_p8 }
 0x18e   :  { %3416 = shalt.err (!%p3413_p12)  }
 0x18f   :  { %s3417_s20 = scalar_lea.vmem %s328_s18, 16  ;;  %p3422_p0 = scmp.lt.s32.totalorder %s328_s18, %s5982_s14 }
 0x190   :  { %p3418_p13 = scmp.ne.s32.totalorder %s328_s18, %s3417_s20  ;;  %p3423_p1 = scmp.lt.s32.totalorder %s6008_s5, %s3417_s20 }
 0x192   :  { %p3424_p2 = por %p3423_p1, %p3422_p0 }
 0x194   :  { %p3425_p3 = pnand %p3424_p2, %p3418_p13 }
 0x196   :  { %3428 = shalt.err (!%p3425_p3)  }
 0x197   :  { %330 = dma.hbm_to_vmem [thread:$0]  %s318_s28, 16, %s328_s18, [#allocation2] }
 0x198   :  { %s2634_s4 = sshll.u32 %s2633_s23, 4  ;;  %s5853_s6 = smov [#allocation5 + $0x15]  }
 0x199   :  { %s359_s3 = sshll.u32 %s5853_s6, 4  ;;  %s334_s7 = scalar_lea.hbm %s7797_s1, %s2634_s4  ;;  %s6280_s3 = int_to_ptr.vmem [resolvable:$true] %s359_s3 }
 0x19a   :  { %s3429_s9 = scalar_lea.hbm %s334_s7, 16  ;;  %p3432_p5 = scmp.lt.s32.totalorder %s334_s7, %s7797_s1 }
 0x19b   :  { %p3430_p4 = scmp.ne.s32.totalorder %s334_s7, %s3429_s9  ;;  %p3433_p7 = scmp.lt.s32.totalorder %s5999_s29, %s3429_s9 }
 0x19d   :  { %p3434_p8 = por %p3433_p7, %p3432_p5 }
 0x19f   :  { %p3435_p9 = pnand %p3434_p8, %p3430_p4 }
 0x1a1   :  { %3438 = shalt.err (!%p3435_p9)  }
 0x1a2   :  { %s3439_s12 = scalar_lea.vmem %s6266_s21, 16  ;;  %p3444_p11 = scmp.lt.s32.totalorder %s6266_s21, %s5982_s14 }
 0x1a3   :  { %p3440_p10 = scmp.ne.s32.totalorder %s6266_s21, %s3439_s12  ;;  %p3445_p12 = scmp.lt.s32.totalorder %s6008_s5, %s3439_s12 }
 0x1a5   :  { %p3446_p13 = por %p3445_p12, %p3444_p11 }
 0x1a7   :  { %p3447_p0 = pnand %p3446_p13, %p3440_p10 }
 0x1a9   :  { %3450 = shalt.err (!%p3447_p0)  }
 0x1aa   :  { %346 = dma.hbm_to_vmem [thread:$0]  %s334_s7, 16, %s6266_s21, [#allocation2] }
 0x1ab   :  { %s2636_s16 = sshll.u32 %s6264_s17, 4  ;;  %s2637_s11 = sld [smem:[#allocation4 + $0x16]] }
 0x1ac   :  { %s350_s23 = scalar_lea.hbm %s7797_s1, %s2636_s16 }
 0x1ad   :  { %s3451_s19 = scalar_lea.hbm %s350_s23, 16  ;;  %p3454_p2 = scmp.lt.s32.totalorder %s350_s23, %s7797_s1 }
 0x1ae   :  { %p3452_p1 = scmp.ne.s32.totalorder %s350_s23, %s3451_s19  ;;  %p3455_p3 = scmp.lt.s32.totalorder %s5999_s29, %s3451_s19 }
 0x1b0   :  { %p3456_p4 = por %p3455_p3, %p3454_p2 }
 0x1b2   :  { %p3457_p5 = pnand %p3456_p4, %p3452_p1 }
 0x1b4   :  { %3460 = shalt.err (!%p3457_p5)  }
 0x1b5   :  { %s3461_s21 = scalar_lea.vmem %s6280_s3, 16  ;;  %p3466_p8 = scmp.lt.s32.totalorder %s6280_s3, %s5982_s14 }
 0x1b6   :  { %p3462_p7 = scmp.ne.s32.totalorder %s6280_s3, %s3461_s21  ;;  %p3467_p9 = scmp.lt.s32.totalorder %s6008_s5, %s3461_s21 }
 0x1b8   :  { %p3468_p10 = por %p3467_p9, %p3466_p8 }
 0x1ba   :  { %p3469_p11 = pnand %p3468_p10, %p3462_p7 }
 0x1bc   :  { %3472 = shalt.err (!%p3469_p11)  }
 0x1bd   :  { %362 = dma.hbm_to_vmem [thread:$0]  %s350_s23, 16, %s6280_s3, [#allocation2] }
 0x1be   :  { %s5854_s17 = smov [#allocation5 + $0x16]   ;;  %s2639_s28 = sld [smem:[#allocation4 + $0x17]] }
 0x1bf   :  { %s375_s25 = sshll.u32 %s5854_s17, 4  ;;  %s5855_s26 = smov [#allocation5 + $0x17]   ;;  %s376_s25 = int_to_ptr.vmem [resolvable:$true] %s375_s25 }
 0x1c0   :  { %s391_s27 = sshll.u32 %s5855_s26, 4  ;;  %s6306_s30 = sld [smem:[#allocation4 + $0x18]]  ;;  %s6308_s27 = int_to_ptr.vmem [resolvable:$true] %s391_s27 }
 0x1c1   :  { %s2638_s20 = sshll.u32 %s2637_s11, 4 }
 0x1c2   :  { %s366_s8 = scalar_lea.hbm %s7797_s1, %s2638_s20 }
 0x1c3   :  { %s3473_s0 = scalar_lea.hbm %s366_s8, 16  ;;  %p3476_p13 = scmp.lt.s32.totalorder %s366_s8, %s7797_s1 }
 0x1c4   :  { %p3474_p12 = scmp.ne.s32.totalorder %s366_s8, %s3473_s0  ;;  %p3477_p0 = scmp.lt.s32.totalorder %s5999_s29, %s3473_s0 }
 0x1c6   :  { %p3478_p1 = por %p3477_p0, %p3476_p13 }
 0x1c8   :  { %p3479_p2 = pnand %p3478_p1, %p3474_p12 }
 0x1ca   :  { %3482 = shalt.err (!%p3479_p2)  }
 0x1cb   :  { %s3483_s3 = scalar_lea.vmem %s376_s25, 16  ;;  %p3488_p4 = scmp.lt.s32.totalorder %s376_s25, %s5982_s14 }
 0x1cc   :  { %p3484_p3 = scmp.ne.s32.totalorder %s376_s25, %s3483_s3  ;;  %p3489_p5 = scmp.lt.s32.totalorder %s6008_s5, %s3483_s3 }
 0x1ce   :  { %p3490_p7 = por %p3489_p5, %p3488_p4 }
 0x1d0   :  { %p3491_p8 = pnand %p3490_p7, %p3484_p3 }
 0x1d2   :  { %3494 = shalt.err (!%p3491_p8)  }
 0x1d3   :  { %378 = dma.hbm_to_vmem [thread:$0]  %s366_s8, 16, %s376_s25, [#allocation2] }
 0x1d4   :  { %s2640_s13 = sshll.u32 %s2639_s28, 4  ;;  %s5856_s10 = smov [#allocation5 + $0x18]  }
 0x1d5   :  { %s407_s12 = sshll.u32 %s5856_s10, 4  ;;  %s382_s15 = scalar_lea.hbm %s7797_s1, %s2640_s13  ;;  %s6322_s12 = int_to_ptr.vmem [resolvable:$true] %s407_s12 }
 0x1d6   :  { %s3495_s18 = scalar_lea.hbm %s382_s15, 16  ;;  %p3498_p10 = scmp.lt.s32.totalorder %s382_s15, %s7797_s1 }
 0x1d7   :  { %p3496_p9 = scmp.ne.s32.totalorder %s382_s15, %s3495_s18  ;;  %p3499_p11 = scmp.lt.s32.totalorder %s5999_s29, %s3495_s18 }
 0x1d9   :  { %p3500_p12 = por %p3499_p11, %p3498_p10 }
 0x1db   :  { %p3501_p13 = pnand %p3500_p12, %p3496_p9 }
 0x1dd   :  { %3504 = shalt.err (!%p3501_p13)  }
 0x1de   :  { %s3505_s22 = scalar_lea.vmem %s6308_s27, 16  ;;  %p3510_p1 = scmp.lt.s32.totalorder %s6308_s27, %s5982_s14 }
 0x1df   :  { %p3506_p0 = scmp.ne.s32.totalorder %s6308_s27, %s3505_s22  ;;  %p3511_p2 = scmp.lt.s32.totalorder %s6008_s5, %s3505_s22 }
 0x1e1   :  { %p3512_p3 = por %p3511_p2, %p3510_p1 }
 0x1e3   :  { %p3513_p4 = pnand %p3512_p3, %p3506_p0 }
 0x1e5   :  { %3516 = shalt.err (!%p3513_p4)  }
 0x1e6   :  { %394 = dma.hbm_to_vmem [thread:$0]  %s382_s15, 16, %s6308_s27, [#allocation2] }
 0x1e7   :  { %s2642_s24 = sshll.u32 %s6306_s30, 4  ;;  %s2643_s21 = sld [smem:[#allocation4 + $0x19]] }
 0x1e8   :  { %s398_s28 = scalar_lea.hbm %s7797_s1, %s2642_s24 }
 0x1e9   :  { %s3517_s26 = scalar_lea.hbm %s398_s28, 16  ;;  %p3520_p7 = scmp.lt.s32.totalorder %s398_s28, %s7797_s1 }
 0x1ea   :  { %p3518_p5 = scmp.ne.s32.totalorder %s398_s28, %s3517_s26  ;;  %p3521_p8 = scmp.lt.s32.totalorder %s5999_s29, %s3517_s26 }
 0x1ec   :  { %p3522_p9 = por %p3521_p8, %p3520_p7 }
 0x1ee   :  { %p3523_p10 = pnand %p3522_p9, %p3518_p5 }
 0x1f0   :  { %3526 = shalt.err (!%p3523_p10)  }
 0x1f1   :  { %s3527_s27 = scalar_lea.vmem %s6322_s12, 16  ;;  %p3532_p12 = scmp.lt.s32.totalorder %s6322_s12, %s5982_s14 }
 0x1f2   :  { %p3528_p11 = scmp.ne.s32.totalorder %s6322_s12, %s3527_s27  ;;  %p3533_p13 = scmp.lt.s32.totalorder %s6008_s5, %s3527_s27 }
 0x1f4   :  { %p3534_p0 = por %p3533_p13, %p3532_p12 }
 0x1f6   :  { %p3535_p1 = pnand %p3534_p0, %p3528_p11 }
 0x1f8   :  { %3538 = shalt.err (!%p3535_p1)  }
 0x1f9   :  { %410 = dma.hbm_to_vmem [thread:$0]  %s398_s28, 16, %s6322_s12, [#allocation2] }
 0x1fa   :  { %s5857_s30 = smov [#allocation5 + $0x19]   ;;  %s2645_s8 = sld [smem:[#allocation4 + $0x1a]] }
 0x1fb   :  { %s423_s6 = sshll.u32 %s5857_s30, 4  ;;  %s5858_s0 = smov [#allocation5 + $0x1a]   ;;  %s424_s6 = int_to_ptr.vmem [resolvable:$true] %s423_s6 }
 0x1fc   :  { %s439_s7 = sshll.u32 %s5858_s0, 4  ;;  %s6348_s9 = sld [smem:[#allocation4 + $0x1b]]  ;;  %s6350_s7 = int_to_ptr.vmem [resolvable:$true] %s439_s7 }
 0x1fd   :  { %s2644_s3 = sshll.u32 %s2643_s21, 4 }
 0x1fe   :  { %s414_s16 = scalar_lea.hbm %s7797_s1, %s2644_s3 }
 0x1ff   :  { %s3539_s11 = scalar_lea.hbm %s414_s16, 16  ;;  %p3542_p3 = scmp.lt.s32.totalorder %s414_s16, %s7797_s1 }
 0x200   :  { %p3540_p2 = scmp.ne.s32.totalorder %s414_s16, %s3539_s11  ;;  %p3543_p4 = scmp.lt.s32.totalorder %s5999_s29, %s3539_s11 }
 0x202   :  { %p3544_p5 = por %p3543_p4, %p3542_p3 }
 0x204   :  { %p3545_p7 = pnand %p3544_p5, %p3540_p2 }
 0x206   :  { %3548 = shalt.err (!%p3545_p7)  }
 0x207   :  { %s3549_s12 = scalar_lea.vmem %s424_s6, 16  ;;  %p3554_p9 = scmp.lt.s32.totalorder %s424_s6, %s5982_s14 }
 0x208   :  { %p3550_p8 = scmp.ne.s32.totalorder %s424_s6, %s3549_s12  ;;  %p3555_p10 = scmp.lt.s32.totalorder %s6008_s5, %s3549_s12 }
 0x20a   :  { %p3556_p11 = por %p3555_p10, %p3554_p9 }
 0x20c   :  { %p3557_p12 = pnand %p3556_p11, %p3550_p8 }
 0x20e   :  { %3560 = shalt.err (!%p3557_p12)  }
 0x20f   :  { %426 = dma.hbm_to_vmem [thread:$0]  %s414_s16, 16, %s424_s6, [#allocation2] }
 0x210   :  { %s2646_s23 = sshll.u32 %s2645_s8, 4  ;;  %s5859_s19 = smov [#allocation5 + $0x1b]  }
 0x211   :  { %s455_s22 = sshll.u32 %s5859_s19, 4  ;;  %s430_s17 = scalar_lea.hbm %s7797_s1, %s2646_s23  ;;  %s6364_s22 = int_to_ptr.vmem [resolvable:$true] %s455_s22 }
 0x212   :  { %s3561_s25 = scalar_lea.hbm %s430_s17, 16  ;;  %p3564_p0 = scmp.lt.s32.totalorder %s430_s17, %s7797_s1 }
 0x213   :  { %p3562_p13 = scmp.ne.s32.totalorder %s430_s17, %s3561_s25  ;;  %p3565_p1 = scmp.lt.s32.totalorder %s5999_s29, %s3561_s25 }
 0x215   :  { %p3566_p2 = por %p3565_p1, %p3564_p0 }
 0x217   :  { %p3567_p3 = pnand %p3566_p2, %p3562_p13 }
 0x219   :  { %3570 = shalt.err (!%p3567_p3)  }
 0x21a   :  { %s3571_s20 = scalar_lea.vmem %s6350_s7, 16  ;;  %p3576_p5 = scmp.lt.s32.totalorder %s6350_s7, %s5982_s14 }
 0x21b   :  { %p3572_p4 = scmp.ne.s32.totalorder %s6350_s7, %s3571_s20  ;;  %p3577_p7 = scmp.lt.s32.totalorder %s6008_s5, %s3571_s20 }
 0x21d   :  { %p3578_p8 = por %p3577_p7, %p3576_p5 }
 0x21f   :  { %p3579_p9 = pnand %p3578_p8, %p3572_p4 }
 0x221   :  { %3582 = shalt.err (!%p3579_p9)  }
 0x222   :  { %442 = dma.hbm_to_vmem [thread:$0]  %s430_s17, 16, %s6350_s7, [#allocation2] }
 0x223   :  { %s2648_s4 = sshll.u32 %s6348_s9, 4  ;;  %s2649_s27 = sld [smem:[#allocation4 + $0x1c]] }
 0x224   :  { %s446_s8 = scalar_lea.hbm %s7797_s1, %s2648_s4 }
 0x225   :  { %s3583_s0 = scalar_lea.hbm %s446_s8, 16  ;;  %p3586_p11 = scmp.lt.s32.totalorder %s446_s8, %s7797_s1 }
 0x226   :  { %p3584_p10 = scmp.ne.s32.totalorder %s446_s8, %s3583_s0  ;;  %p3587_p12 = scmp.lt.s32.totalorder %s5999_s29, %s3583_s0 }
 0x228   :  { %p3588_p13 = por %p3587_p12, %p3586_p11 }
 0x22a   :  { %p3589_p0 = pnand %p3588_p13, %p3584_p10 }
 0x22c   :  { %3592 = shalt.err (!%p3589_p0)  }
 0x22d   :  { %s3593_s7 = scalar_lea.vmem %s6364_s22, 16  ;;  %p3598_p2 = scmp.lt.s32.totalorder %s6364_s22, %s5982_s14 }
 0x22e   :  { %p3594_p1 = scmp.ne.s32.totalorder %s6364_s22, %s3593_s7  ;;  %p3599_p3 = scmp.lt.s32.totalorder %s6008_s5, %s3593_s7 }
 0x230   :  { %p3600_p4 = por %p3599_p3, %p3598_p2 }
 0x232   :  { %p3601_p5 = pnand %p3600_p4, %p3594_p1 }
 0x234   :  { %3604 = shalt.err (!%p3601_p5)  }
 0x235   :  { %458 = dma.hbm_to_vmem [thread:$0]  %s446_s8, 16, %s6364_s22, [#allocation2] }
 0x236   :  { %s5860_s9 = smov [#allocation5 + $0x1c]   ;;  %s2651_s16 = sld [smem:[#allocation4 + $0x1d]] }
 0x237   :  { %s471_s10 = sshll.u32 %s5860_s9, 4  ;;  %s5861_s11 = smov [#allocation5 + $0x1d]   ;;  %s472_s10 = int_to_ptr.vmem [resolvable:$true] %s471_s10 }
 0x238   :  { %s487_s15 = sshll.u32 %s5861_s11, 4  ;;  %s6390_s18 = sld [smem:[#allocation4 + $0x1e]]  ;;  %s6392_s15 = int_to_ptr.vmem [resolvable:$true] %s487_s15 }
 0x239   :  { %s2650_s12 = sshll.u32 %s2649_s27, 4 }
 0x23a   :  { %s462_s24 = scalar_lea.hbm %s7797_s1, %s2650_s12 }
 0x23b   :  { %s3605_s21 = scalar_lea.hbm %s462_s24, 16  ;;  %p3608_p8 = scmp.lt.s32.totalorder %s462_s24, %s7797_s1 }
 0x23c   :  { %p3606_p7 = scmp.ne.s32.totalorder %s462_s24, %s3605_s21  ;;  %p3609_p9 = scmp.lt.s32.totalorder %s5999_s29, %s3605_s21 }
 0x23e   :  { %p3610_p10 = por %p3609_p9, %p3608_p8 }
 0x240   :  { %p3611_p11 = pnand %p3610_p10, %p3606_p7 }
 0x242   :  { %3614 = shalt.err (!%p3611_p11)  }
 0x243   :  { %s3615_s22 = scalar_lea.vmem %s472_s10, 16  ;;  %p3620_p13 = scmp.lt.s32.totalorder %s472_s10, %s5982_s14 }
 0x244   :  { %p3616_p12 = scmp.ne.s32.totalorder %s472_s10, %s3615_s22  ;;  %p3621_p0 = scmp.lt.s32.totalorder %s6008_s5, %s3615_s22 }
 0x246   :  { %p3622_p1 = por %p3621_p0, %p3620_p13 }
 0x248   :  { %p3623_p2 = pnand %p3622_p1, %p3616_p12 }
 0x24a   :  { %3626 = shalt.err (!%p3623_p2)  }
 0x24b   :  { %474 = dma.hbm_to_vmem [thread:$0]  %s462_s24, 16, %s472_s10, [#allocation2] }
 0x24c   :  { %s2652_s28 = sshll.u32 %s2651_s16, 4  ;;  %s5862_s26 = smov [#allocation5 + $0x1e]  }
 0x24d   :  { %s503_s20 = sshll.u32 %s5862_s26, 4  ;;  %s478_s30 = scalar_lea.hbm %s7797_s1, %s2652_s28  ;;  %s6406_s20 = int_to_ptr.vmem [resolvable:$true] %s503_s20 }
 0x24e   :  { %s3627_s6 = scalar_lea.hbm %s478_s30, 16  ;;  %p3630_p4 = scmp.lt.s32.totalorder %s478_s30, %s7797_s1 }
 0x24f   :  { %p3628_p3 = scmp.ne.s32.totalorder %s478_s30, %s3627_s6  ;;  %p3631_p5 = scmp.lt.s32.totalorder %s5999_s29, %s3627_s6 }
 0x251   :  { %p3632_p7 = por %p3631_p5, %p3630_p4 }
 0x253   :  { %p3633_p8 = pnand %p3632_p7, %p3628_p3 }
 0x255   :  { %3636 = shalt.err (!%p3633_p8)  }
 0x256   :  { %s3637_s3 = scalar_lea.vmem %s6392_s15, 16  ;;  %p3642_p10 = scmp.lt.s32.totalorder %s6392_s15, %s5982_s14 }
 0x257   :  { %p3638_p9 = scmp.ne.s32.totalorder %s6392_s15, %s3637_s3  ;;  %p3643_p11 = scmp.lt.s32.totalorder %s6008_s5, %s3637_s3 }
 0x259   :  { %p3644_p12 = por %p3643_p11, %p3642_p10 }
 0x25b   :  { %p3645_p13 = pnand %p3644_p12, %p3638_p9 }
 0x25d   :  { %3648 = shalt.err (!%p3645_p13)  }
 0x25e   :  { %490 = dma.hbm_to_vmem [thread:$0]  %s478_s30, 16, %s6392_s15, [#allocation2] }
 0x25f   :  { %s2654_s13 = sshll.u32 %s6390_s18, 4  ;;  %s2655_s7 = sld [smem:[#allocation4 + $0x1f]] }
 0x260   :  { %s494_s16 = scalar_lea.hbm %s7797_s1, %s2654_s13 }
 0x261   :  { %s3649_s11 = scalar_lea.hbm %s494_s16, 16  ;;  %p3652_p1 = scmp.lt.s32.totalorder %s494_s16, %s7797_s1 }
 0x262   :  { %p3650_p0 = scmp.ne.s32.totalorder %s494_s16, %s3649_s11  ;;  %p3653_p2 = scmp.lt.s32.totalorder %s5999_s29, %s3649_s11 }
 0x264   :  { %p3654_p3 = por %p3653_p2, %p3652_p1 }
 0x266   :  { %p3655_p4 = pnand %p3654_p3, %p3650_p0 }
 0x268   :  { %3658 = shalt.err (!%p3655_p4)  }
 0x269   :  { %s3659_s15 = scalar_lea.vmem %s6406_s20, 16  ;;  %p3664_p7 = scmp.lt.s32.totalorder %s6406_s20, %s5982_s14 }
 0x26a   :  { %p3660_p5 = scmp.ne.s32.totalorder %s6406_s20, %s3659_s15  ;;  %p3665_p8 = scmp.lt.s32.totalorder %s6008_s5, %s3659_s15 }
 0x26c   :  { %p3666_p9 = por %p3665_p8, %p3664_p7 }
 0x26e   :  { %p3667_p10 = pnand %p3666_p9, %p3660_p5 }
 0x270   :  { %3670 = shalt.err (!%p3667_p10)  }
 0x271   :  { %506 = dma.hbm_to_vmem [thread:$0]  %s494_s16, 16, %s6406_s20, [#allocation2] }
 0x272   :  { %s5863_s18 = smov [#allocation5 + $0x1f]   ;;  %s2657_s24 = sld [smem:[#allocation4 + $0x20]] }
 0x273   :  { %s519_s19 = sshll.u32 %s5863_s18, 4  ;;  %s5864_s21 = smov [#allocation5 + $0x20]   ;;  %s520_s19 = int_to_ptr.vmem [resolvable:$true] %s519_s19 }
 0x274   :  { %s535_s17 = sshll.u32 %s5864_s21, 4  ;;  %s6432_s25 = sld [smem:[#allocation4 + $0x21]]  ;;  %s6434_s17 = int_to_ptr.vmem [resolvable:$true] %s535_s17 }
 0x275   :  { %s2656_s22 = sshll.u32 %s2655_s7, 4 }
 0x276   :  { %s510_s4 = scalar_lea.hbm %s7797_s1, %s2656_s22 }
 0x277   :  { %s3671_s27 = scalar_lea.hbm %s510_s4, 16  ;;  %p3674_p12 = scmp.lt.s32.totalorder %s510_s4, %s7797_s1 }
 0x278   :  { %p3672_p11 = scmp.ne.s32.totalorder %s510_s4, %s3671_s27  ;;  %p3675_p13 = scmp.lt.s32.totalorder %s5999_s29, %s3671_s27 }
 0x27a   :  { %p3676_p0 = por %p3675_p13, %p3674_p12 }
 0x27c   :  { %p3677_p1 = pnand %p3676_p0, %p3672_p11 }
 0x27e   :  { %3680 = shalt.err (!%p3677_p1)  }
 0x27f   :  { %s3681_s20 = scalar_lea.vmem %s520_s19, 16  ;;  %p3686_p3 = scmp.lt.s32.totalorder %s520_s19, %s5982_s14 }
 0x280   :  { %p3682_p2 = scmp.ne.s32.totalorder %s520_s19, %s3681_s20  ;;  %p3687_p4 = scmp.lt.s32.totalorder %s6008_s5, %s3681_s20 }
 0x282   :  { %p3688_p5 = por %p3687_p4, %p3686_p3 }
 0x284   :  { %p3689_p7 = pnand %p3688_p5, %p3682_p2 }
 0x286   :  { %3692 = shalt.err (!%p3689_p7)  }
 0x287   :  { %522 = dma.hbm_to_vmem [thread:$0]  %s510_s4, 16, %s520_s19, [#allocation2] }
 0x288   :  { %s2658_s8 = sshll.u32 %s2657_s24, 4  ;;  %s5865_s0 = smov [#allocation5 + $0x21]  }
 0x289   :  { %s551_s3 = sshll.u32 %s5865_s0, 4  ;;  %s526_s9 = scalar_lea.hbm %s7797_s1, %s2658_s8  ;;  %s6448_s3 = int_to_ptr.vmem [resolvable:$true] %s551_s3 }
 0x28a   :  { %s3693_s10 = scalar_lea.hbm %s526_s9, 16  ;;  %p3696_p9 = scmp.lt.s32.totalorder %s526_s9, %s7797_s1 }
 0x28b   :  { %p3694_p8 = scmp.ne.s32.totalorder %s526_s9, %s3693_s10  ;;  %p3697_p10 = scmp.lt.s32.totalorder %s5999_s29, %s3693_s10 }
 0x28d   :  { %p3698_p11 = por %p3697_p10, %p3696_p9 }
 0x28f   :  { %p3699_p12 = pnand %p3698_p11, %p3694_p8 }
 0x291   :  { %3702 = shalt.err (!%p3699_p12)  }
 0x292   :  { %s3703_s12 = scalar_lea.vmem %s6434_s17, 16  ;;  %p3708_p0 = scmp.lt.s32.totalorder %s6434_s17, %s5982_s14 }
 0x293   :  { %p3704_p13 = scmp.ne.s32.totalorder %s6434_s17, %s3703_s12  ;;  %p3709_p1 = scmp.lt.s32.totalorder %s6008_s5, %s3703_s12 }
 0x295   :  { %p3710_p2 = por %p3709_p1, %p3708_p0 }
 0x297   :  { %p3711_p3 = pnand %p3710_p2, %p3704_p13 }
 0x299   :  { %3714 = shalt.err (!%p3711_p3)  }
 0x29a   :  { %538 = dma.hbm_to_vmem [thread:$0]  %s526_s9, 16, %s6434_s17, [#allocation2] }
 0x29b   :  { %s2660_s23 = sshll.u32 %s6432_s25, 4  ;;  %s2661_s15 = sld [smem:[#allocation4 + $0x22]] }
 0x29c   :  { %s542_s24 = scalar_lea.hbm %s7797_s1, %s2660_s23 }
 0x29d   :  { %s3715_s21 = scalar_lea.hbm %s542_s24, 16  ;;  %p3718_p5 = scmp.lt.s32.totalorder %s542_s24, %s7797_s1 }
 0x29e   :  { %p3716_p4 = scmp.ne.s32.totalorder %s542_s24, %s3715_s21  ;;  %p3719_p7 = scmp.lt.s32.totalorder %s5999_s29, %s3715_s21 }
 0x2a0   :  { %p3720_p8 = por %p3719_p7, %p3718_p5 }
 0x2a2   :  { %p3721_p9 = pnand %p3720_p8, %p3716_p4 }
 0x2a4   :  { %3724 = shalt.err (!%p3721_p9)  }
 0x2a5   :  { %s3725_s17 = scalar_lea.vmem %s6448_s3, 16  ;;  %p3730_p11 = scmp.lt.s32.totalorder %s6448_s3, %s5982_s14 }
 0x2a6   :  { %p3726_p10 = scmp.ne.s32.totalorder %s6448_s3, %s3725_s17  ;;  %p3731_p12 = scmp.lt.s32.totalorder %s6008_s5, %s3725_s17 }
 0x2a8   :  { %p3732_p13 = por %p3731_p12, %p3730_p11 }
 0x2aa   :  { %p3733_p0 = pnand %p3732_p13, %p3726_p10 }
 0x2ac   :  { %3736 = shalt.err (!%p3733_p0)  }
 0x2ad   :  { %554 = dma.hbm_to_vmem [thread:$0]  %s542_s24, 16, %s6448_s3, [#allocation2] }
 0x2ae   :  { %s5866_s25 = smov [#allocation5 + $0x22]   ;;  %s2663_s4 = sld [smem:[#allocation4 + $0x23]] }
 0x2af   :  { %s567_s26 = sshll.u32 %s5866_s25, 4  ;;  %s5867_s27 = smov [#allocation5 + $0x23]   ;;  %s568_s26 = int_to_ptr.vmem [resolvable:$true] %s567_s26 }
 0x2b0   :  { %s583_s30 = sshll.u32 %s5867_s27, 4  ;;  %s6474_s6 = sld [smem:[#allocation4 + $0x24]]  ;;  %s6476_s30 = int_to_ptr.vmem [resolvable:$true] %s583_s30 }
 0x2b1   :  { %s2662_s20 = sshll.u32 %s2661_s15, 4 }
 0x2b2   :  { %s558_s13 = scalar_lea.hbm %s7797_s1, %s2662_s20 }
 0x2b3   :  { %s3737_s7 = scalar_lea.hbm %s558_s13, 16  ;;  %p3740_p2 = scmp.lt.s32.totalorder %s558_s13, %s7797_s1 }
 0x2b4   :  { %p3738_p1 = scmp.ne.s32.totalorder %s558_s13, %s3737_s7  ;;  %p3741_p3 = scmp.lt.s32.totalorder %s5999_s29, %s3737_s7 }
 0x2b6   :  { %p3742_p4 = por %p3741_p3, %p3740_p2 }
 0x2b8   :  { %p3743_p5 = pnand %p3742_p4, %p3738_p1 }
 0x2ba   :  { %3746 = shalt.err (!%p3743_p5)  }
 0x2bb   :  { %s3747_s3 = scalar_lea.vmem %s568_s26, 16  ;;  %p3752_p8 = scmp.lt.s32.totalorder %s568_s26, %s5982_s14 }
 0x2bc   :  { %p3748_p7 = scmp.ne.s32.totalorder %s568_s26, %s3747_s3  ;;  %p3753_p9 = scmp.lt.s32.totalorder %s6008_s5, %s3747_s3 }
 0x2be   :  { %p3754_p10 = por %p3753_p9, %p3752_p8 }
 0x2c0   :  { %p3755_p11 = pnand %p3754_p10, %p3748_p7 }
 0x2c2   :  { %3758 = shalt.err (!%p3755_p11)  }
 0x2c3   :  { %570 = dma.hbm_to_vmem [thread:$0]  %s558_s13, 16, %s568_s26, [#allocation2] }
 0x2c4   :  { %s2664_s16 = sshll.u32 %s2663_s4, 4  ;;  %s5868_s11 = smov [#allocation5 + $0x24]  }
 0x2c5   :  { %s599_s12 = sshll.u32 %s5868_s11, 4  ;;  %s574_s18 = scalar_lea.hbm %s7797_s1, %s2664_s16  ;;  %s6490_s12 = int_to_ptr.vmem [resolvable:$true] %s599_s12 }
 0x2c6   :  { %s3759_s19 = scalar_lea.hbm %s574_s18, 16  ;;  %p3762_p13 = scmp.lt.s32.totalorder %s574_s18, %s7797_s1 }
 0x2c7   :  { %p3760_p12 = scmp.ne.s32.totalorder %s574_s18, %s3759_s19  ;;  %p3763_p0 = scmp.lt.s32.totalorder %s5999_s29, %s3759_s19 }
 0x2c9   :  { %p3764_p1 = por %p3763_p0, %p3762_p13 }
 0x2cb   :  { %p3765_p2 = pnand %p3764_p1, %p3760_p12 }
 0x2cd   :  { %3768 = shalt.err (!%p3765_p2)  }
 0x2ce   :  { %s3769_s22 = scalar_lea.vmem %s6476_s30, 16  ;;  %p3774_p4 = scmp.lt.s32.totalorder %s6476_s30, %s5982_s14 }
 0x2cf   :  { %p3770_p3 = scmp.ne.s32.totalorder %s6476_s30, %s3769_s22  ;;  %p3775_p5 = scmp.lt.s32.totalorder %s6008_s5, %s3769_s22 }
 0x2d1   :  { %p3776_p7 = por %p3775_p5, %p3774_p4 }
 0x2d3   :  { %p3777_p8 = pnand %p3776_p7, %p3770_p3 }
 0x2d5   :  { %3780 = shalt.err (!%p3777_p8)  }
 0x2d6   :  { %586 = dma.hbm_to_vmem [thread:$0]  %s574_s18, 16, %s6476_s30, [#allocation2] }
 0x2d7   :  { %s2666_s28 = sshll.u32 %s6474_s6, 4  ;;  %s2667_s17 = sld [smem:[#allocation4 + $0x25]] }
 0x2d8   :  { %s590_s4 = scalar_lea.hbm %s7797_s1, %s2666_s28 }
 0x2d9   :  { %s3781_s27 = scalar_lea.hbm %s590_s4, 16  ;;  %p3784_p10 = scmp.lt.s32.totalorder %s590_s4, %s7797_s1 }
 0x2da   :  { %p3782_p9 = scmp.ne.s32.totalorder %s590_s4, %s3781_s27  ;;  %p3785_p11 = scmp.lt.s32.totalorder %s5999_s29, %s3781_s27 }
 0x2dc   :  { %p3786_p12 = por %p3785_p11, %p3784_p10 }
 0x2de   :  { %p3787_p13 = pnand %p3786_p12, %p3782_p9 }
 0x2e0   :  { %3790 = shalt.err (!%p3787_p13)  }
 0x2e1   :  { %s3791_s30 = scalar_lea.vmem %s6490_s12, 16  ;;  %p3796_p1 = scmp.lt.s32.totalorder %s6490_s12, %s5982_s14 }
 0x2e2   :  { %p3792_p0 = scmp.ne.s32.totalorder %s6490_s12, %s3791_s30  ;;  %p3797_p2 = scmp.lt.s32.totalorder %s6008_s5, %s3791_s30 }
 0x2e4   :  { %p3798_p3 = por %p3797_p2, %p3796_p1 }
 0x2e6   :  { %p3799_p4 = pnand %p3798_p3, %p3792_p0 }
 0x2e8   :  { %3802 = shalt.err (!%p3799_p4)  }
 0x2e9   :  { %602 = dma.hbm_to_vmem [thread:$0]  %s590_s4, 16, %s6490_s12, [#allocation2] }
 0x2ea   :  { %s5869_s6 = smov [#allocation5 + $0x25]   ;;  %s2669_s13 = sld [smem:[#allocation4 + $0x26]] }
 0x2eb   :  { %s615_s0 = sshll.u32 %s5869_s6, 4  ;;  %s5870_s7 = smov [#allocation5 + $0x26]   ;;  %s616_s0 = int_to_ptr.vmem [resolvable:$true] %s615_s0 }
 0x2ec   :  { %s631_s9 = sshll.u32 %s5870_s7, 4  ;;  %s6516_s10 = sld [smem:[#allocation4 + $0x27]]  ;;  %s6518_s9 = int_to_ptr.vmem [resolvable:$true] %s631_s9 }
 0x2ed   :  { %s2668_s3 = sshll.u32 %s2667_s17, 4 }
 0x2ee   :  { %s606_s23 = scalar_lea.hbm %s7797_s1, %s2668_s3 }
 0x2ef   :  { %s3803_s15 = scalar_lea.hbm %s606_s23, 16  ;;  %p3806_p7 = scmp.lt.s32.totalorder %s606_s23, %s7797_s1 }
 0x2f0   :  { %p3804_p5 = scmp.ne.s32.totalorder %s606_s23, %s3803_s15  ;;  %p3807_p8 = scmp.lt.s32.totalorder %s5999_s29, %s3803_s15 }
 0x2f2   :  { %p3808_p9 = por %p3807_p8, %p3806_p7 }
 0x2f4   :  { %p3809_p10 = pnand %p3808_p9, %p3804_p5 }
 0x2f6   :  { %3812 = shalt.err (!%p3809_p10)  }
 0x2f7   :  { %s3813_s12 = scalar_lea.vmem %s616_s0, 16  ;;  %p3818_p12 = scmp.lt.s32.totalorder %s616_s0, %s5982_s14 }
 0x2f8   :  { %p3814_p11 = scmp.ne.s32.totalorder %s616_s0, %s3813_s12  ;;  %p3819_p13 = scmp.lt.s32.totalorder %s6008_s5, %s3813_s12 }
 0x2fa   :  { %p3820_p0 = por %p3819_p13, %p3818_p12 }
 0x2fc   :  { %p3821_p1 = pnand %p3820_p0, %p3814_p11 }
 0x2fe   :  { %3824 = shalt.err (!%p3821_p1)  }
 0x2ff   :  { %618 = dma.hbm_to_vmem [thread:$0]  %s606_s23, 16, %s616_s0, [#allocation2] }
 0x300   :  { %s2670_s24 = sshll.u32 %s2669_s13, 4  ;;  %s5871_s21 = smov [#allocation5 + $0x27]  }
 0x301   :  { %s647_s22 = sshll.u32 %s5871_s21, 4  ;;  %s622_s25 = scalar_lea.hbm %s7797_s1, %s2670_s24  ;;  %s6532_s22 = int_to_ptr.vmem [resolvable:$true] %s647_s22 }
 0x302   :  { %s3825_s26 = scalar_lea.hbm %s622_s25, 16  ;;  %p3828_p3 = scmp.lt.s32.totalorder %s622_s25, %s7797_s1 }
 0x303   :  { %p3826_p2 = scmp.ne.s32.totalorder %s622_s25, %s3825_s26  ;;  %p3829_p4 = scmp.lt.s32.totalorder %s5999_s29, %s3825_s26 }
 0x305   :  { %p3830_p5 = por %p3829_p4, %p3828_p3 }
 0x307   :  { %p3831_p7 = pnand %p3830_p5, %p3826_p2 }
 0x309   :  { %3834 = shalt.err (!%p3831_p7)  }
 0x30a   :  { %s3835_s20 = scalar_lea.vmem %s6518_s9, 16  ;;  %p3840_p9 = scmp.lt.s32.totalorder %s6518_s9, %s5982_s14 }
 0x30b   :  { %p3836_p8 = scmp.ne.s32.totalorder %s6518_s9, %s3835_s20  ;;  %p3841_p10 = scmp.lt.s32.totalorder %s6008_s5, %s3835_s20 }
 0x30d   :  { %p3842_p11 = por %p3841_p10, %p3840_p9 }
 0x30f   :  { %p3843_p12 = pnand %p3842_p11, %p3836_p8 }
 0x311   :  { %3846 = shalt.err (!%p3843_p12)  }
 0x312   :  { %634 = dma.hbm_to_vmem [thread:$0]  %s622_s25, 16, %s6518_s9, [#allocation2] }
 0x313   :  { %s2672_s8 = sshll.u32 %s6516_s10, 4  ;;  %s2673_s30 = sld [smem:[#allocation4 + $0x28]] }
 0x314   :  { %s638_s13 = scalar_lea.hbm %s7797_s1, %s2672_s8 }
 0x315   :  { %s3847_s7 = scalar_lea.hbm %s638_s13, 16  ;;  %p3850_p0 = scmp.lt.s32.totalorder %s638_s13, %s7797_s1 }
 0x316   :  { %p3848_p13 = scmp.ne.s32.totalorder %s638_s13, %s3847_s7  ;;  %p3851_p1 = scmp.lt.s32.totalorder %s5999_s29, %s3847_s7 }
 0x318   :  { %p3852_p2 = por %p3851_p1, %p3850_p0 }
 0x31a   :  { %p3853_p3 = pnand %p3852_p2, %p3848_p13 }
 0x31c   :  { %3856 = shalt.err (!%p3853_p3)  }
 0x31d   :  { %s3857_s9 = scalar_lea.vmem %s6532_s22, 16  ;;  %p3862_p5 = scmp.lt.s32.totalorder %s6532_s22, %s5982_s14 }
 0x31e   :  { %p3858_p4 = scmp.ne.s32.totalorder %s6532_s22, %s3857_s9  ;;  %p3863_p7 = scmp.lt.s32.totalorder %s6008_s5, %s3857_s9 }
 0x320   :  { %p3864_p8 = por %p3863_p7, %p3862_p5 }
 0x322   :  { %p3865_p9 = pnand %p3864_p8, %p3858_p4 }
 0x324   :  { %3868 = shalt.err (!%p3865_p9)  }
 0x325   :  { %650 = dma.hbm_to_vmem [thread:$0]  %s638_s13, 16, %s6532_s22, [#allocation2] }
 0x326   :  { %s5872_s10 = smov [#allocation5 + $0x28]   ;;  %s2675_s23 = sld [smem:[#allocation4 + $0x29]] }
 0x327   :  { %s663_s11 = sshll.u32 %s5872_s10, 4  ;;  %s5873_s15 = smov [#allocation5 + $0x29]   ;;  %s664_s11 = int_to_ptr.vmem [resolvable:$true] %s663_s11 }
 0x328   :  { %s679_s18 = sshll.u32 %s5873_s15, 4  ;;  %s6558_s19 = sld [smem:[#allocation4 + $0x2a]]  ;;  %s6560_s18 = int_to_ptr.vmem [resolvable:$true] %s679_s18 }
 0x329   :  { %s2674_s12 = sshll.u32 %s2673_s30, 4 }
 0x32a   :  { %s654_s28 = scalar_lea.hbm %s7797_s1, %s2674_s12 }
 0x32b   :  { %s3869_s17 = scalar_lea.hbm %s654_s28, 16  ;;  %p3872_p11 = scmp.lt.s32.totalorder %s654_s28, %s7797_s1 }
 0x32c   :  { %p3870_p10 = scmp.ne.s32.totalorder %s654_s28, %s3869_s17  ;;  %p3873_p12 = scmp.lt.s32.totalorder %s5999_s29, %s3869_s17 }
 0x32e   :  { %p3874_p13 = por %p3873_p12, %p3872_p11 }
 0x330   :  { %p3875_p0 = pnand %p3874_p13, %p3870_p10 }
 0x332   :  { %3878 = shalt.err (!%p3875_p0)  }
 0x333   :  { %s3879_s22 = scalar_lea.vmem %s664_s11, 16  ;;  %p3884_p2 = scmp.lt.s32.totalorder %s664_s11, %s5982_s14 }
 0x334   :  { %p3880_p1 = scmp.ne.s32.totalorder %s664_s11, %s3879_s22  ;;  %p3885_p3 = scmp.lt.s32.totalorder %s6008_s5, %s3879_s22 }
 0x336   :  { %p3886_p4 = por %p3885_p3, %p3884_p2 }
 0x338   :  { %p3887_p5 = pnand %p3886_p4, %p3880_p1 }
 0x33a   :  { %3890 = shalt.err (!%p3887_p5)  }
 0x33b   :  { %666 = dma.hbm_to_vmem [thread:$0]  %s654_s28, 16, %s664_s11, [#allocation2] }
 0x33c   :  { %s2676_s4 = sshll.u32 %s2675_s23, 4  ;;  %s5874_s27 = smov [#allocation5 + $0x2a]  }
 0x33d   :  { %s695_s20 = sshll.u32 %s5874_s27, 4  ;;  %s670_s6 = scalar_lea.hbm %s7797_s1, %s2676_s4  ;;  %s6574_s20 = int_to_ptr.vmem [resolvable:$true] %s695_s20 }
 0x33e   :  { %s3891_s0 = scalar_lea.hbm %s670_s6, 16  ;;  %p3894_p8 = scmp.lt.s32.totalorder %s670_s6, %s7797_s1 }
 0x33f   :  { %p3892_p7 = scmp.ne.s32.totalorder %s670_s6, %s3891_s0  ;;  %p3895_p9 = scmp.lt.s32.totalorder %s5999_s29, %s3891_s0 }
 0x341   :  { %p3896_p10 = por %p3895_p9, %p3894_p8 }
 0x343   :  { %p3897_p11 = pnand %p3896_p10, %p3892_p7 }
 0x345   :  { %3900 = shalt.err (!%p3897_p11)  }
 0x346   :  { %s3901_s3 = scalar_lea.vmem %s6560_s18, 16  ;;  %p3906_p13 = scmp.lt.s32.totalorder %s6560_s18, %s5982_s14 }
 0x347   :  { %p3902_p12 = scmp.ne.s32.totalorder %s6560_s18, %s3901_s3  ;;  %p3907_p0 = scmp.lt.s32.totalorder %s6008_s5, %s3901_s3 }
 0x349   :  { %p3908_p1 = por %p3907_p0, %p3906_p13 }
 0x34b   :  { %p3909_p2 = pnand %p3908_p1, %p3902_p12 }
 0x34d   :  { %3912 = shalt.err (!%p3909_p2)  }
 0x34e   :  { %682 = dma.hbm_to_vmem [thread:$0]  %s670_s6, 16, %s6560_s18, [#allocation2] }
 0x34f   :  { %s2678_s16 = sshll.u32 %s6558_s19, 4  ;;  %s2679_s9 = sld [smem:[#allocation4 + $0x2b]] }
 0x350   :  { %s686_s23 = scalar_lea.hbm %s7797_s1, %s2678_s16 }
 0x351   :  { %s3913_s15 = scalar_lea.hbm %s686_s23, 16  ;;  %p3916_p4 = scmp.lt.s32.totalorder %s686_s23, %s7797_s1 }
 0x352   :  { %p3914_p3 = scmp.ne.s32.totalorder %s686_s23, %s3913_s15  ;;  %p3917_p5 = scmp.lt.s32.totalorder %s5999_s29, %s3913_s15 }
 0x354   :  { %p3918_p7 = por %p3917_p5, %p3916_p4 }
 0x356   :  { %p3919_p8 = pnand %p3918_p7, %p3914_p3 }
 0x358   :  { %3922 = shalt.err (!%p3919_p8)  }
 0x359   :  { %s3923_s18 = scalar_lea.vmem %s6574_s20, 16  ;;  %p3928_p10 = scmp.lt.s32.totalorder %s6574_s20, %s5982_s14 }
 0x35a   :  { %p3924_p9 = scmp.ne.s32.totalorder %s6574_s20, %s3923_s18  ;;  %p3929_p11 = scmp.lt.s32.totalorder %s6008_s5, %s3923_s18 }
 0x35c   :  { %p3930_p12 = por %p3929_p11, %p3928_p10 }
 0x35e   :  { %p3931_p13 = pnand %p3930_p12, %p3924_p9 }
 0x360   :  { %3934 = shalt.err (!%p3931_p13)  }
 0x361   :  { %698 = dma.hbm_to_vmem [thread:$0]  %s686_s23, 16, %s6574_s20, [#allocation2] }
 0x362   :  { %s5875_s19 = smov [#allocation5 + $0x2b]   ;;  %s2681_s28 = sld [smem:[#allocation4 + $0x2c]] }
 0x363   :  { %s711_s21 = sshll.u32 %s5875_s19, 4  ;;  %s5876_s17 = smov [#allocation5 + $0x2c]   ;;  %s712_s21 = int_to_ptr.vmem [resolvable:$true] %s711_s21 }
 0x364   :  { %s727_s25 = sshll.u32 %s5876_s17, 4  ;;  %s6600_s26 = sld [smem:[#allocation4 + $0x2d]]  ;;  %s6602_s25 = int_to_ptr.vmem [resolvable:$true] %s727_s25 }
 0x365   :  { %s2680_s22 = sshll.u32 %s2679_s9, 4 }
 0x366   :  { %s702_s8 = scalar_lea.hbm %s7797_s1, %s2680_s22 }
 0x367   :  { %s3935_s30 = scalar_lea.hbm %s702_s8, 16  ;;  %p3938_p1 = scmp.lt.s32.totalorder %s702_s8, %s7797_s1 }
 0x368   :  { %p3936_p0 = scmp.ne.s32.totalorder %s702_s8, %s3935_s30  ;;  %p3939_p2 = scmp.lt.s32.totalorder %s5999_s29, %s3935_s30 }
 0x36a   :  { %p3940_p3 = por %p3939_p2, %p3938_p1 }
 0x36c   :  { %p3941_p4 = pnand %p3940_p3, %p3936_p0 }
 0x36e   :  { %3944 = shalt.err (!%p3941_p4)  }
 0x36f   :  { %s3945_s20 = scalar_lea.vmem %s712_s21, 16  ;;  %p3950_p7 = scmp.lt.s32.totalorder %s712_s21, %s5982_s14 }
 0x370   :  { %p3946_p5 = scmp.ne.s32.totalorder %s712_s21, %s3945_s20  ;;  %p3951_p8 = scmp.lt.s32.totalorder %s6008_s5, %s3945_s20 }
 0x372   :  { %p3952_p9 = por %p3951_p8, %p3950_p7 }
 0x374   :  { %p3953_p10 = pnand %p3952_p9, %p3946_p5 }
 0x376   :  { %3956 = shalt.err (!%p3953_p10)  }
 0x377   :  { %714 = dma.hbm_to_vmem [thread:$0]  %s702_s8, 16, %s712_s21, [#allocation2] }
 0x378   :  { %s2682_s13 = sshll.u32 %s2681_s28, 4  ;;  %s5877_s7 = smov [#allocation5 + $0x2d]  }
 0x379   :  { %s743_s3 = sshll.u32 %s5877_s7, 4  ;;  %s718_s10 = scalar_lea.hbm %s7797_s1, %s2682_s13  ;;  %s6616_s3 = int_to_ptr.vmem [resolvable:$true] %s743_s3 }
 0x37a   :  { %s3957_s11 = scalar_lea.hbm %s718_s10, 16  ;;  %p3960_p12 = scmp.lt.s32.totalorder %s718_s10, %s7797_s1 }
 0x37b   :  { %p3958_p11 = scmp.ne.s32.totalorder %s718_s10, %s3957_s11  ;;  %p3961_p13 = scmp.lt.s32.totalorder %s5999_s29, %s3957_s11 }
 0x37d   :  { %p3962_p0 = por %p3961_p13, %p3960_p12 }
 0x37f   :  { %p3963_p1 = pnand %p3962_p0, %p3958_p11 }
 0x381   :  { %3966 = shalt.err (!%p3963_p1)  }
 0x382   :  { %s3967_s12 = scalar_lea.vmem %s6602_s25, 16  ;;  %p3972_p3 = scmp.lt.s32.totalorder %s6602_s25, %s5982_s14 }
 0x383   :  { %p3968_p2 = scmp.ne.s32.totalorder %s6602_s25, %s3967_s12  ;;  %p3973_p4 = scmp.lt.s32.totalorder %s6008_s5, %s3967_s12 }
 0x385   :  { %p3974_p5 = por %p3973_p4, %p3972_p3 }
 0x387   :  { %p3975_p7 = pnand %p3974_p5, %p3968_p2 }
 0x389   :  { %3978 = shalt.err (!%p3975_p7)  }
 0x38a   :  { %730 = dma.hbm_to_vmem [thread:$0]  %s718_s10, 16, %s6602_s25, [#allocation2] }
 0x38b   :  { %s2684_s24 = sshll.u32 %s6600_s26, 4  ;;  %s2685_s18 = sld [smem:[#allocation4 + $0x2e]] }
 0x38c   :  { %s734_s28 = scalar_lea.hbm %s7797_s1, %s2684_s24 }
 0x38d   :  { %s3979_s17 = scalar_lea.hbm %s734_s28, 16  ;;  %p3982_p9 = scmp.lt.s32.totalorder %s734_s28, %s7797_s1 }
 0x38e   :  { %p3980_p8 = scmp.ne.s32.totalorder %s734_s28, %s3979_s17  ;;  %p3983_p10 = scmp.lt.s32.totalorder %s5999_s29, %s3979_s17 }
 0x390   :  { %p3984_p11 = por %p3983_p10, %p3982_p9 }
 0x392   :  { %p3985_p12 = pnand %p3984_p11, %p3980_p8 }
 0x394   :  { %3988 = shalt.err (!%p3985_p12)  }
 0x395   :  { %s3989_s25 = scalar_lea.vmem %s6616_s3, 16  ;;  %p3994_p0 = scmp.lt.s32.totalorder %s6616_s3, %s5982_s14 }
 0x396   :  { %p3990_p13 = scmp.ne.s32.totalorder %s6616_s3, %s3989_s25  ;;  %p3995_p1 = scmp.lt.s32.totalorder %s6008_s5, %s3989_s25 }
 0x398   :  { %p3996_p2 = por %p3995_p1, %p3994_p0 }
 0x39a   :  { %p3997_p3 = pnand %p3996_p2, %p3990_p13 }
 0x39c   :  { %4000 = shalt.err (!%p3997_p3)  }
 0x39d   :  { %746 = dma.hbm_to_vmem [thread:$0]  %s734_s28, 16, %s6616_s3, [#allocation2] }
 0x39e   :  { %s5878_s26 = smov [#allocation5 + $0x2e]   ;;  %s2687_s8 = sld [smem:[#allocation4 + $0x2f]] }
 0x39f   :  { %s759_s27 = sshll.u32 %s5878_s26, 4  ;;  %s5879_s30 = smov [#allocation5 + $0x2f]   ;;  %s760_s27 = int_to_ptr.vmem [resolvable:$true] %s759_s27 }
 0x3a0   :  { %s775_s6 = sshll.u32 %s5879_s30, 4  ;;  %s6642_s0 = sld [smem:[#allocation4 + $0x30]]  ;;  %s6644_s6 = int_to_ptr.vmem [resolvable:$true] %s775_s6 }
 0x3a1   :  { %s2686_s20 = sshll.u32 %s2685_s18, 4 }
 0x3a2   :  { %s750_s16 = scalar_lea.hbm %s7797_s1, %s2686_s20 }
 0x3a3   :  { %s4001_s9 = scalar_lea.hbm %s750_s16, 16  ;;  %p4004_p5 = scmp.lt.s32.totalorder %s750_s16, %s7797_s1 }
 0x3a4   :  { %p4002_p4 = scmp.ne.s32.totalorder %s750_s16, %s4001_s9  ;;  %p4005_p7 = scmp.lt.s32.totalorder %s5999_s29, %s4001_s9 }
 0x3a6   :  { %p4006_p8 = por %p4005_p7, %p4004_p5 }
 0x3a8   :  { %p4007_p9 = pnand %p4006_p8, %p4002_p4 }
 0x3aa   :  { %4010 = shalt.err (!%p4007_p9)  }
 0x3ab   :  { %s4011_s3 = scalar_lea.vmem %s760_s27, 16  ;;  %p4016_p11 = scmp.lt.s32.totalorder %s760_s27, %s5982_s14 }
 0x3ac   :  { %p4012_p10 = scmp.ne.s32.totalorder %s760_s27, %s4011_s3  ;;  %p4017_p12 = scmp.lt.s32.totalorder %s6008_s5, %s4011_s3 }
 0x3ae   :  { %p4018_p13 = por %p4017_p12, %p4016_p11 }
 0x3b0   :  { %p4019_p0 = pnand %p4018_p13, %p4012_p10 }
 0x3b2   :  { %4022 = shalt.err (!%p4019_p0)  }
 0x3b3   :  { %762 = dma.hbm_to_vmem [thread:$0]  %s750_s16, 16, %s760_s27, [#allocation2] }
 0x3b4   :  { %s2688_s23 = sshll.u32 %s2687_s8, 4  ;;  %s5880_s15 = smov [#allocation5 + $0x30]  }
 0x3b5   :  { %s791_s12 = sshll.u32 %s5880_s15, 4  ;;  %s766_s19 = scalar_lea.hbm %s7797_s1, %s2688_s23  ;;  %s6658_s12 = int_to_ptr.vmem [resolvable:$true] %s791_s12 }
 0x3b6   :  { %s4023_s21 = scalar_lea.hbm %s766_s19, 16  ;;  %p4026_p2 = scmp.lt.s32.totalorder %s766_s19, %s7797_s1 }
 0x3b7   :  { %p4024_p1 = scmp.ne.s32.totalorder %s766_s19, %s4023_s21  ;;  %p4027_p3 = scmp.lt.s32.totalorder %s5999_s29, %s4023_s21 }
 0x3b9   :  { %p4028_p4 = por %p4027_p3, %p4026_p2 }
 0x3bb   :  { %p4029_p5 = pnand %p4028_p4, %p4024_p1 }
 0x3bd   :  { %4032 = shalt.err (!%p4029_p5)  }
 0x3be   :  { %s4033_s22 = scalar_lea.vmem %s6644_s6, 16  ;;  %p4038_p8 = scmp.lt.s32.totalorder %s6644_s6, %s5982_s14 }
 0x3bf   :  { %p4034_p7 = scmp.ne.s32.totalorder %s6644_s6, %s4033_s22  ;;  %p4039_p9 = scmp.lt.s32.totalorder %s6008_s5, %s4033_s22 }
 0x3c1   :  { %p4040_p10 = por %p4039_p9, %p4038_p8 }
 0x3c3   :  { %p4041_p11 = pnand %p4040_p10, %p4034_p7 }
 0x3c5   :  { %4044 = shalt.err (!%p4041_p11)  }
 0x3c6   :  { %778 = dma.hbm_to_vmem [thread:$0]  %s766_s19, 16, %s6644_s6, [#allocation2] }
 0x3c7   :  { %s2690_s4 = sshll.u32 %s6642_s0, 4  ;;  %s2691_s25 = sld [smem:[#allocation4 + $0x31]] }
 0x3c8   :  { %s782_s8 = scalar_lea.hbm %s7797_s1, %s2690_s4 }
 0x3c9   :  { %s4045_s30 = scalar_lea.hbm %s782_s8, 16  ;;  %p4048_p13 = scmp.lt.s32.totalorder %s782_s8, %s7797_s1 }
 0x3ca   :  { %p4046_p12 = scmp.ne.s32.totalorder %s782_s8, %s4045_s30  ;;  %p4049_p0 = scmp.lt.s32.totalorder %s5999_s29, %s4045_s30 }
 0x3cc   :  { %p4050_p1 = por %p4049_p0, %p4048_p13 }
 0x3ce   :  { %p4051_p2 = pnand %p4050_p1, %p4046_p12 }
 0x3d0   :  { %4054 = shalt.err (!%p4051_p2)  }
 0x3d1   :  { %s4055_s6 = scalar_lea.vmem %s6658_s12, 16  ;;  %p4060_p4 = scmp.lt.s32.totalorder %s6658_s12, %s5982_s14 }
 0x3d2   :  { %p4056_p3 = scmp.ne.s32.totalorder %s6658_s12, %s4055_s6  ;;  %p4061_p5 = scmp.lt.s32.totalorder %s6008_s5, %s4055_s6 }
 0x3d4   :  { %p4062_p7 = por %p4061_p5, %p4060_p4 }
 0x3d6   :  { %p4063_p8 = pnand %p4062_p7, %p4056_p3 }
 0x3d8   :  { %4066 = shalt.err (!%p4063_p8)  }
 0x3d9   :  { %794 = dma.hbm_to_vmem [thread:$0]  %s782_s8, 16, %s6658_s12, [#allocation2] }
 0x3da   :  { %s5881_s0 = smov [#allocation5 + $0x31]   ;;  %s2693_s16 = sld [smem:[#allocation4 + $0x32]] }
 0x3db   :  { %s807_s7 = sshll.u32 %s5881_s0, 4  ;;  %s5882_s9 = smov [#allocation5 + $0x32]   ;;  %s808_s7 = int_to_ptr.vmem [resolvable:$true] %s807_s7 }
 0x3dc   :  { %s823_s10 = sshll.u32 %s5882_s9, 4  ;;  %s6684_s11 = sld [smem:[#allocation4 + $0x33]]  ;;  %s6686_s10 = int_to_ptr.vmem [resolvable:$true] %s823_s10 }
 0x3dd   :  { %s2692_s3 = sshll.u32 %s2691_s25, 4 }
 0x3de   :  { %s798_s24 = scalar_lea.hbm %s7797_s1, %s2692_s3 }
 0x3df   :  { %s4067_s18 = scalar_lea.hbm %s798_s24, 16  ;;  %p4070_p10 = scmp.lt.s32.totalorder %s798_s24, %s7797_s1 }
 0x3e0   :  { %p4068_p9 = scmp.ne.s32.totalorder %s798_s24, %s4067_s18  ;;  %p4071_p11 = scmp.lt.s32.totalorder %s5999_s29, %s4067_s18 }
 0x3e2   :  { %p4072_p12 = por %p4071_p11, %p4070_p10 }
 0x3e4   :  { %p4073_p13 = pnand %p4072_p12, %p4068_p9 }
 0x3e6   :  { %4076 = shalt.err (!%p4073_p13)  }
 0x3e7   :  { %s4077_s12 = scalar_lea.vmem %s808_s7, 16  ;;  %p4082_p1 = scmp.lt.s32.totalorder %s808_s7, %s5982_s14 }
 0x3e8   :  { %p4078_p0 = scmp.ne.s32.totalorder %s808_s7, %s4077_s12  ;;  %p4083_p2 = scmp.lt.s32.totalorder %s6008_s5, %s4077_s12 }
 0x3ea   :  { %p4084_p3 = por %p4083_p2, %p4082_p1 }
 0x3ec   :  { %p4085_p4 = pnand %p4084_p3, %p4078_p0 }
 0x3ee   :  { %4088 = shalt.err (!%p4085_p4)  }
 0x3ef   :  { %810 = dma.hbm_to_vmem [thread:$0]  %s798_s24, 16, %s808_s7, [#allocation2] }
 0x3f0   :  { %s2694_s28 = sshll.u32 %s2693_s16, 4  ;;  %s5883_s17 = smov [#allocation5 + $0x33]  }
 0x3f1   :  { %s839_s22 = sshll.u32 %s5883_s17, 4  ;;  %s814_s26 = scalar_lea.hbm %s7797_s1, %s2694_s28  ;;  %s6700_s22 = int_to_ptr.vmem [resolvable:$true] %s839_s22 }
 0x3f2   :  { %s4089_s27 = scalar_lea.hbm %s814_s26, 16  ;;  %p4092_p7 = scmp.lt.s32.totalorder %s814_s26, %s7797_s1 }
 0x3f3   :  { %p4090_p5 = scmp.ne.s32.totalorder %s814_s26, %s4089_s27  ;;  %p4093_p8 = scmp.lt.s32.totalorder %s5999_s29, %s4089_s27 }
 0x3f5   :  { %p4094_p9 = por %p4093_p8, %p4092_p7 }
 0x3f7   :  { %p4095_p10 = pnand %p4094_p9, %p4090_p5 }
 0x3f9   :  { %4098 = shalt.err (!%p4095_p10)  }
 0x3fa   :  { %s4099_s20 = scalar_lea.vmem %s6686_s10, 16  ;;  %p4104_p12 = scmp.lt.s32.totalorder %s6686_s10, %s5982_s14 }
 0x3fb   :  { %p4100_p11 = scmp.ne.s32.totalorder %s6686_s10, %s4099_s20  ;;  %p4105_p13 = scmp.lt.s32.totalorder %s6008_s5, %s4099_s20 }
 0x3fd   :  { %p4106_p0 = por %p4105_p13, %p4104_p12 }
 0x3ff   :  { %p4107_p1 = pnand %p4106_p0, %p4100_p11 }
 0x401   :  { %4110 = shalt.err (!%p4107_p1)  }
 0x402   :  { %826 = dma.hbm_to_vmem [thread:$0]  %s814_s26, 16, %s6686_s10, [#allocation2] }
 0x403   :  { %s2696_s13 = sshll.u32 %s6684_s11, 4  ;;  %s2697_s6 = sld [smem:[#allocation4 + $0x34]] }
 0x404   :  { %s830_s16 = scalar_lea.hbm %s7797_s1, %s2696_s13 }
 0x405   :  { %s4111_s9 = scalar_lea.hbm %s830_s16, 16  ;;  %p4114_p3 = scmp.lt.s32.totalorder %s830_s16, %s7797_s1 }
 0x406   :  { %p4112_p2 = scmp.ne.s32.totalorder %s830_s16, %s4111_s9  ;;  %p4115_p4 = scmp.lt.s32.totalorder %s5999_s29, %s4111_s9 }
 0x408   :  { %p4116_p5 = por %p4115_p4, %p4114_p3 }
 0x40a   :  { %p4117_p7 = pnand %p4116_p5, %p4112_p2 }
 0x40c   :  { %4120 = shalt.err (!%p4117_p7)  }
 0x40d   :  { %s4121_s10 = scalar_lea.vmem %s6700_s22, 16  ;;  %p4126_p9 = scmp.lt.s32.totalorder %s6700_s22, %s5982_s14 }
 0x40e   :  { %p4122_p8 = scmp.ne.s32.totalorder %s6700_s22, %s4121_s10  ;;  %p4127_p10 = scmp.lt.s32.totalorder %s6008_s5, %s4121_s10 }
 0x410   :  { %p4128_p11 = por %p4127_p10, %p4126_p9 }
 0x412   :  { %p4129_p12 = pnand %p4128_p11, %p4122_p8 }
 0x414   :  { %4132 = shalt.err (!%p4129_p12)  }
 0x415   :  { %842 = dma.hbm_to_vmem [thread:$0]  %s830_s16, 16, %s6700_s22, [#allocation2] }
 0x416   :  { %s5884_s11 = smov [#allocation5 + $0x34]   ;;  %s2699_s24 = sld [smem:[#allocation4 + $0x35]] }
 0x417   :  { %s855_s15 = sshll.u32 %s5884_s11, 4  ;;  %s5885_s18 = smov [#allocation5 + $0x35]   ;;  %s856_s15 = int_to_ptr.vmem [resolvable:$true] %s855_s15 }
 0x418   :  { %s871_s19 = sshll.u32 %s5885_s18, 4  ;;  %s6726_s21 = sld [smem:[#allocation4 + $0x36]]  ;;  %s6728_s19 = int_to_ptr.vmem [resolvable:$true] %s871_s19 }
 0x419   :  { %s2698_s12 = sshll.u32 %s2697_s6, 4 }
 0x41a   :  { %s846_s4 = scalar_lea.hbm %s7797_s1, %s2698_s12 }
 0x41b   :  { %s4133_s25 = scalar_lea.hbm %s846_s4, 16  ;;  %p4136_p0 = scmp.lt.s32.totalorder %s846_s4, %s7797_s1 }
 0x41c   :  { %p4134_p13 = scmp.ne.s32.totalorder %s846_s4, %s4133_s25  ;;  %p4137_p1 = scmp.lt.s32.totalorder %s5999_s29, %s4133_s25 }
 0x41e   :  { %p4138_p2 = por %p4137_p1, %p4136_p0 }
 0x420   :  { %p4139_p3 = pnand %p4138_p2, %p4134_p13 }
 0x422   :  { %4142 = shalt.err (!%p4139_p3)  }
 0x423   :  { %s4143_s22 = scalar_lea.vmem %s856_s15, 16  ;;  %p4148_p5 = scmp.lt.s32.totalorder %s856_s15, %s5982_s14 }
 0x424   :  { %p4144_p4 = scmp.ne.s32.totalorder %s856_s15, %s4143_s22  ;;  %p4149_p7 = scmp.lt.s32.totalorder %s6008_s5, %s4143_s22 }
 0x426   :  { %p4150_p8 = por %p4149_p7, %p4148_p5 }
 0x428   :  { %p4151_p9 = pnand %p4150_p8, %p4144_p4 }
 0x42a   :  { %4154 = shalt.err (!%p4151_p9)  }
 0x42b   :  { %858 = dma.hbm_to_vmem [thread:$0]  %s846_s4, 16, %s856_s15, [#allocation2] }
 0x42c   :  { %s2700_s8 = sshll.u32 %s2699_s24, 4  ;;  %s5886_s30 = smov [#allocation5 + $0x36]  }
 0x42d   :  { %s887_s20 = sshll.u32 %s5886_s30, 4  ;;  %s862_s0 = scalar_lea.hbm %s7797_s1, %s2700_s8  ;;  %s6742_s20 = int_to_ptr.vmem [resolvable:$true] %s887_s20 }
 0x42e   :  { %s4155_s7 = scalar_lea.hbm %s862_s0, 16  ;;  %p4158_p11 = scmp.lt.s32.totalorder %s862_s0, %s7797_s1 }
 0x42f   :  { %p4156_p10 = scmp.ne.s32.totalorder %s862_s0, %s4155_s7  ;;  %p4159_p12 = scmp.lt.s32.totalorder %s5999_s29, %s4155_s7 }
 0x431   :  { %p4160_p13 = por %p4159_p12, %p4158_p11 }
 0x433   :  { %p4161_p0 = pnand %p4160_p13, %p4156_p10 }
 0x435   :  { %4164 = shalt.err (!%p4161_p0)  }
 0x436   :  { %s4165_s3 = scalar_lea.vmem %s6728_s19, 16  ;;  %p4170_p2 = scmp.lt.s32.totalorder %s6728_s19, %s5982_s14 }
 0x437   :  { %p4166_p1 = scmp.ne.s32.totalorder %s6728_s19, %s4165_s3  ;;  %p4171_p3 = scmp.lt.s32.totalorder %s6008_s5, %s4165_s3 }
 0x439   :  { %p4172_p4 = por %p4171_p3, %p4170_p2 }
 0x43b   :  { %p4173_p5 = pnand %p4172_p4, %p4166_p1 }
 0x43d   :  { %4176 = shalt.err (!%p4173_p5)  }
 0x43e   :  { %874 = dma.hbm_to_vmem [thread:$0]  %s862_s0, 16, %s6728_s19, [#allocation2] }
 0x43f   :  { %s2702_s23 = sshll.u32 %s6726_s21, 4  ;;  %s2703_s10 = sld [smem:[#allocation4 + $0x37]] }
 0x440   :  { %s878_s24 = scalar_lea.hbm %s7797_s1, %s2702_s23 }
 0x441   :  { %s4177_s18 = scalar_lea.hbm %s878_s24, 16  ;;  %p4180_p8 = scmp.lt.s32.totalorder %s878_s24, %s7797_s1 }
 0x442   :  { %p4178_p7 = scmp.ne.s32.totalorder %s878_s24, %s4177_s18  ;;  %p4181_p9 = scmp.lt.s32.totalorder %s5999_s29, %s4177_s18 }
 0x444   :  { %p4182_p10 = por %p4181_p9, %p4180_p8 }
 0x446   :  { %p4183_p11 = pnand %p4182_p10, %p4178_p7 }
 0x448   :  { %4186 = shalt.err (!%p4183_p11)  }
 0x449   :  { %s4187_s19 = scalar_lea.vmem %s6742_s20, 16  ;;  %p4192_p13 = scmp.lt.s32.totalorder %s6742_s20, %s5982_s14 }
 0x44a   :  { %p4188_p12 = scmp.ne.s32.totalorder %s6742_s20, %s4187_s19  ;;  %p4193_p0 = scmp.lt.s32.totalorder %s6008_s5, %s4187_s19 }
 0x44c   :  { %p4194_p1 = por %p4193_p0, %p4192_p13 }
 0x44e   :  { %p4195_p2 = pnand %p4194_p1, %p4188_p12 }
 0x450   :  { %4198 = shalt.err (!%p4195_p2)  }
 0x451   :  { %890 = dma.hbm_to_vmem [thread:$0]  %s878_s24, 16, %s6742_s20, [#allocation2] }
 0x452   :  { %s5887_s21 = smov [#allocation5 + $0x37]   ;;  %s2705_s4 = sld [smem:[#allocation4 + $0x38]] }
 0x453   :  { %s903_s17 = sshll.u32 %s5887_s21, 4  ;;  %s5888_s25 = smov [#allocation5 + $0x38]   ;;  %s904_s17 = int_to_ptr.vmem [resolvable:$true] %s903_s17 }
 0x454   :  { %s919_s26 = sshll.u32 %s5888_s25, 4  ;;  %s6768_s27 = sld [smem:[#allocation4 + $0x39]]  ;;  %s6770_s26 = int_to_ptr.vmem [resolvable:$true] %s919_s26 }
 0x455   :  { %s2704_s22 = sshll.u32 %s2703_s10, 4 }
 0x456   :  { %s894_s13 = scalar_lea.hbm %s7797_s1, %s2704_s22 }
 0x457   :  { %s4199_s6 = scalar_lea.hbm %s894_s13, 16  ;;  %p4202_p4 = scmp.lt.s32.totalorder %s894_s13, %s7797_s1 }
 0x458   :  { %p4200_p3 = scmp.ne.s32.totalorder %s894_s13, %s4199_s6  ;;  %p4203_p5 = scmp.lt.s32.totalorder %s5999_s29, %s4199_s6 }
 0x45a   :  { %p4204_p7 = por %p4203_p5, %p4202_p4 }
 0x45c   :  { %p4205_p8 = pnand %p4204_p7, %p4200_p3 }
 0x45e   :  { %4208 = shalt.err (!%p4205_p8)  }
 0x45f   :  { %s4209_s20 = scalar_lea.vmem %s904_s17, 16  ;;  %p4214_p10 = scmp.lt.s32.totalorder %s904_s17, %s5982_s14 }
 0x460   :  { %p4210_p9 = scmp.ne.s32.totalorder %s904_s17, %s4209_s20  ;;  %p4215_p11 = scmp.lt.s32.totalorder %s6008_s5, %s4209_s20 }
 0x462   :  { %p4216_p12 = por %p4215_p11, %p4214_p10 }
 0x464   :  { %p4217_p13 = pnand %p4216_p12, %p4210_p9 }
 0x466   :  { %4220 = shalt.err (!%p4217_p13)  }
 0x467   :  { %906 = dma.hbm_to_vmem [thread:$0]  %s894_s13, 16, %s904_s17, [#allocation2] }
 0x468   :  { %s2706_s16 = sshll.u32 %s2705_s4, 4  ;;  %s5889_s9 = smov [#allocation5 + $0x39]  }
 0x469   :  { %s935_s3 = sshll.u32 %s5889_s9, 4  ;;  %s910_s11 = scalar_lea.hbm %s7797_s1, %s2706_s16  ;;  %s6784_s3 = int_to_ptr.vmem [resolvable:$true] %s935_s3 }
 0x46a   :  { %s4221_s15 = scalar_lea.hbm %s910_s11, 16  ;;  %p4224_p1 = scmp.lt.s32.totalorder %s910_s11, %s7797_s1 }
 0x46b   :  { %p4222_p0 = scmp.ne.s32.totalorder %s910_s11, %s4221_s15  ;;  %p4225_p2 = scmp.lt.s32.totalorder %s5999_s29, %s4221_s15 }
 0x46d   :  { %p4226_p3 = por %p4225_p2, %p4224_p1 }
 0x46f   :  { %p4227_p4 = pnand %p4226_p3, %p4222_p0 }
 0x471   :  { %4230 = shalt.err (!%p4227_p4)  }
 0x472   :  { %s4231_s12 = scalar_lea.vmem %s6770_s26, 16  ;;  %p4236_p7 = scmp.lt.s32.totalorder %s6770_s26, %s5982_s14 }
 0x473   :  { %p4232_p5 = scmp.ne.s32.totalorder %s6770_s26, %s4231_s12  ;;  %p4237_p8 = scmp.lt.s32.totalorder %s6008_s5, %s4231_s12 }
 0x475   :  { %p4238_p9 = por %p4237_p8, %p4236_p7 }
 0x477   :  { %p4239_p10 = pnand %p4238_p9, %p4232_p5 }
 0x479   :  { %4242 = shalt.err (!%p4239_p10)  }
 0x47a   :  { %922 = dma.hbm_to_vmem [thread:$0]  %s910_s11, 16, %s6770_s26, [#allocation2] }
 0x47b   :  { %s2708_s28 = sshll.u32 %s6768_s27, 4  ;;  %s2709_s19 = sld [smem:[#allocation4 + $0x3a]] }
 0x47c   :  { %s926_s4 = scalar_lea.hbm %s7797_s1, %s2708_s28 }
 0x47d   :  { %s4243_s25 = scalar_lea.hbm %s926_s4, 16  ;;  %p4246_p12 = scmp.lt.s32.totalorder %s926_s4, %s7797_s1 }
 0x47e   :  { %p4244_p11 = scmp.ne.s32.totalorder %s926_s4, %s4243_s25  ;;  %p4247_p13 = scmp.lt.s32.totalorder %s5999_s29, %s4243_s25 }
 0x480   :  { %p4248_p0 = por %p4247_p13, %p4246_p12 }
 0x482   :  { %p4249_p1 = pnand %p4248_p0, %p4244_p11 }
 0x484   :  { %4252 = shalt.err (!%p4249_p1)  }
 0x485   :  { %s4253_s26 = scalar_lea.vmem %s6784_s3, 16  ;;  %p4258_p3 = scmp.lt.s32.totalorder %s6784_s3, %s5982_s14 }
 0x486   :  { %p4254_p2 = scmp.ne.s32.totalorder %s6784_s3, %s4253_s26  ;;  %p4259_p4 = scmp.lt.s32.totalorder %s6008_s5, %s4253_s26 }
 0x488   :  { %p4260_p5 = por %p4259_p4, %p4258_p3 }
 0x48a   :  { %p4261_p7 = pnand %p4260_p5, %p4254_p2 }
 0x48c   :  { %4264 = shalt.err (!%p4261_p7)  }
 0x48d   :  { %938 = dma.hbm_to_vmem [thread:$0]  %s926_s4, 16, %s6784_s3, [#allocation2] }
 0x48e   :  { %s5890_s27 = smov [#allocation5 + $0x3a]   ;;  %s2711_s13 = sld [smem:[#allocation4 + $0x3b]] }
 0x48f   :  { %s951_s30 = sshll.u32 %s5890_s27, 4  ;;  %s5891_s6 = smov [#allocation5 + $0x3b]   ;;  %s952_s30 = int_to_ptr.vmem [resolvable:$true] %s951_s30 }
 0x490   :  { %s967_s0 = sshll.u32 %s5891_s6, 4  ;;  %s6810_s7 = sld [smem:[#allocation4 + $0x3c]]  ;;  %s6812_s0 = int_to_ptr.vmem [resolvable:$true] %s967_s0 }
 0x491   :  { %s2710_s20 = sshll.u32 %s2709_s19, 4 }
 0x492   :  { %s942_s23 = scalar_lea.hbm %s7797_s1, %s2710_s20 }
 0x493   :  { %s4265_s10 = scalar_lea.hbm %s942_s23, 16  ;;  %p4268_p9 = scmp.lt.s32.totalorder %s942_s23, %s7797_s1 }
 0x494   :  { %p4266_p8 = scmp.ne.s32.totalorder %s942_s23, %s4265_s10  ;;  %p4269_p10 = scmp.lt.s32.totalorder %s5999_s29, %s4265_s10 }
 0x496   :  { %p4270_p11 = por %p4269_p10, %p4268_p9 }
 0x498   :  { %p4271_p12 = pnand %p4270_p11, %p4266_p8 }
 0x49a   :  { %4274 = shalt.err (!%p4271_p12)  }
 0x49b   :  { %s4275_s3 = scalar_lea.vmem %s952_s30, 16  ;;  %p4280_p0 = scmp.lt.s32.totalorder %s952_s30, %s5982_s14 }
 0x49c   :  { %p4276_p13 = scmp.ne.s32.totalorder %s952_s30, %s4275_s3  ;;  %p4281_p1 = scmp.lt.s32.totalorder %s6008_s5, %s4275_s3 }
 0x49e   :  { %p4282_p2 = por %p4281_p1, %p4280_p0 }
 0x4a0   :  { %p4283_p3 = pnand %p4282_p2, %p4276_p13 }
 0x4a2   :  { %4286 = shalt.err (!%p4283_p3)  }
 0x4a3   :  { %954 = dma.hbm_to_vmem [thread:$0]  %s942_s23, 16, %s952_s30, [#allocation2] }
 0x4a4   :  { %s2712_s24 = sshll.u32 %s2711_s13, 4  ;;  %s5892_s18 = smov [#allocation5 + $0x3c]  }
 0x4a5   :  { %s983_s12 = sshll.u32 %s5892_s18, 4  ;;  %s958_s21 = scalar_lea.hbm %s7797_s1, %s2712_s24  ;;  %s6826_s12 = int_to_ptr.vmem [resolvable:$true] %s983_s12 }
 0x4a6   :  { %s4287_s17 = scalar_lea.hbm %s958_s21, 16  ;;  %p4290_p5 = scmp.lt.s32.totalorder %s958_s21, %s7797_s1 }
 0x4a7   :  { %p4288_p4 = scmp.ne.s32.totalorder %s958_s21, %s4287_s17  ;;  %p4291_p7 = scmp.lt.s32.totalorder %s5999_s29, %s4287_s17 }
 0x4a9   :  { %p4292_p8 = por %p4291_p7, %p4290_p5 }
 0x4ab   :  { %p4293_p9 = pnand %p4292_p8, %p4288_p4 }
 0x4ad   :  { %4296 = shalt.err (!%p4293_p9)  }
 0x4ae   :  { %s4297_s22 = scalar_lea.vmem %s6812_s0, 16  ;;  %p4302_p11 = scmp.lt.s32.totalorder %s6812_s0, %s5982_s14 }
 0x4af   :  { %p4298_p10 = scmp.ne.s32.totalorder %s6812_s0, %s4297_s22  ;;  %p4303_p12 = scmp.lt.s32.totalorder %s6008_s5, %s4297_s22 }
 0x4b1   :  { %p4304_p13 = por %p4303_p12, %p4302_p11 }
 0x4b3   :  { %p4305_p0 = pnand %p4304_p13, %p4298_p10 }
 0x4b5   :  { %4308 = shalt.err (!%p4305_p0)  }
 0x4b6   :  { %970 = dma.hbm_to_vmem [thread:$0]  %s958_s21, 16, %s6812_s0, [#allocation2] }
 0x4b7   :  { %s2714_s8 = sshll.u32 %s6810_s7, 4  ;;  %s2715_s26 = sld [smem:[#allocation4 + $0x3d]] }
 0x4b8   :  { %s974_s13 = scalar_lea.hbm %s7797_s1, %s2714_s8 }
 0x4b9   :  { %s4309_s6 = scalar_lea.hbm %s974_s13, 16  ;;  %p4312_p2 = scmp.lt.s32.totalorder %s974_s13, %s7797_s1 }
 0x4ba   :  { %p4310_p1 = scmp.ne.s32.totalorder %s974_s13, %s4309_s6  ;;  %p4313_p3 = scmp.lt.s32.totalorder %s5999_s29, %s4309_s6 }
 0x4bc   :  { %p4314_p4 = por %p4313_p3, %p4312_p2 }
 0x4be   :  { %p4315_p5 = pnand %p4314_p4, %p4310_p1 }
 0x4c0   :  { %4318 = shalt.err (!%p4315_p5)  }
 0x4c1   :  { %s4319_s0 = scalar_lea.vmem %s6826_s12, 16  ;;  %p4324_p8 = scmp.lt.s32.totalorder %s6826_s12, %s5982_s14 }
 0x4c2   :  { %p4320_p7 = scmp.ne.s32.totalorder %s6826_s12, %s4319_s0  ;;  %p4325_p9 = scmp.lt.s32.totalorder %s6008_s5, %s4319_s0 }
 0x4c4   :  { %p4326_p10 = por %p4325_p9, %p4324_p8 }
 0x4c6   :  { %p4327_p11 = pnand %p4326_p10, %p4320_p7 }
 0x4c8   :  { %4330 = shalt.err (!%p4327_p11)  }
 0x4c9   :  { %986 = dma.hbm_to_vmem [thread:$0]  %s974_s13, 16, %s6826_s12, [#allocation2] }
 0x4ca   :  { %s5893_s7 = smov [#allocation5 + $0x3d]   ;;  %s2717_s23 = sld [smem:[#allocation4 + $0x3e]] }
 0x4cb   :  { %s999_s9 = sshll.u32 %s5893_s7, 4  ;;  %s5894_s10 = smov [#allocation5 + $0x3e]   ;;  %s1000_s9 = int_to_ptr.vmem [resolvable:$true] %s999_s9 }
 0x4cc   :  { %s1015_s11 = sshll.u32 %s5894_s10, 4  ;;  %s6852_s15 = sld [smem:[#allocation4 + $0x3f]]  ;;  %s6854_s11 = int_to_ptr.vmem [resolvable:$true] %s1015_s11 }
 0x4cd   :  { %s2716_s3 = sshll.u32 %s2715_s26, 4 }
 0x4ce   :  { %s990_s28 = scalar_lea.hbm %s7797_s1, %s2716_s3 }
 0x4cf   :  { %s4331_s19 = scalar_lea.hbm %s990_s28, 16  ;;  %p4334_p13 = scmp.lt.s32.totalorder %s990_s28, %s7797_s1 }
 0x4d0   :  { %p4332_p12 = scmp.ne.s32.totalorder %s990_s28, %s4331_s19  ;;  %p4335_p0 = scmp.lt.s32.totalorder %s5999_s29, %s4331_s19 }
 0x4d2   :  { %p4336_p1 = por %p4335_p0, %p4334_p13 }
 0x4d4   :  { %p4337_p2 = pnand %p4336_p1, %p4332_p12 }
 0x4d6   :  { %4340 = shalt.err (!%p4337_p2)  }
 0x4d7   :  { %s4341_s12 = scalar_lea.vmem %s1000_s9, 16  ;;  %p4346_p4 = scmp.lt.s32.totalorder %s1000_s9, %s5982_s14 }
 0x4d8   :  { %p4342_p3 = scmp.ne.s32.totalorder %s1000_s9, %s4341_s12  ;;  %p4347_p5 = scmp.lt.s32.totalorder %s6008_s5, %s4341_s12 }
 0x4da   :  { %p4348_p7 = por %p4347_p5, %p4346_p4 }
 0x4dc   :  { %p4349_p8 = pnand %p4348_p7, %p4342_p3 }
 0x4de   :  { %4352 = shalt.err (!%p4349_p8)  }
 0x4df   :  { %1002 = dma.hbm_to_vmem [thread:$0]  %s990_s28, 16, %s1000_s9, [#allocation2] }
 0x4e0   :  { %s2718_s4 = sshll.u32 %s2717_s23, 4  ;;  %s5895_s25 = smov [#allocation5 + $0x3f]  }
 0x4e1   :  { %s1031_s22 = sshll.u32 %s5895_s25, 4  ;;  %s1006_s27 = scalar_lea.hbm %s7797_s1, %s2718_s4  ;;  %s6868_s22 = int_to_ptr.vmem [resolvable:$true] %s1031_s22 }
 0x4e2   :  { %s4353_s30 = scalar_lea.hbm %s1006_s27, 16  ;;  %p4356_p10 = scmp.lt.s32.totalorder %s1006_s27, %s7797_s1 }
 0x4e3   :  { %p4354_p9 = scmp.ne.s32.totalorder %s1006_s27, %s4353_s30  ;;  %p4357_p11 = scmp.lt.s32.totalorder %s5999_s29, %s4353_s30 }
 0x4e5   :  { %p4358_p12 = por %p4357_p11, %p4356_p10 }
 0x4e7   :  { %p4359_p13 = pnand %p4358_p12, %p4354_p9 }
 0x4e9   :  { %4362 = shalt.err (!%p4359_p13)  }
 0x4ea   :  { %s4363_s20 = scalar_lea.vmem %s6854_s11, 16  ;;  %p4368_p1 = scmp.lt.s32.totalorder %s6854_s11, %s5982_s14 }
 0x4eb   :  { %p4364_p0 = scmp.ne.s32.totalorder %s6854_s11, %s4363_s20  ;;  %p4369_p2 = scmp.lt.s32.totalorder %s6008_s5, %s4363_s20 }
 0x4ed   :  { %p4370_p3 = por %p4369_p2, %p4368_p1 }
 0x4ef   :  { %p4371_p4 = pnand %p4370_p3, %p4364_p0 }
 0x4f1   :  { %4374 = shalt.err (!%p4371_p4)  }
 0x4f2   :  { %1018 = dma.hbm_to_vmem [thread:$0]  %s1006_s27, 16, %s6854_s11, [#allocation2] }
 0x4f3   :  { %s2720_s16 = sshll.u32 %s6852_s15, 4  ;;  %s2721_s0 = sld [smem:[#allocation4 + $0x40]] }
 0x4f4   :  { %s1022_s23 = scalar_lea.hbm %s7797_s1, %s2720_s16 }
 0x4f5   :  { %s4375_s10 = scalar_lea.hbm %s1022_s23, 16  ;;  %p4378_p7 = scmp.lt.s32.totalorder %s1022_s23, %s7797_s1 }
 0x4f6   :  { %p4376_p5 = scmp.ne.s32.totalorder %s1022_s23, %s4375_s10  ;;  %p4379_p8 = scmp.lt.s32.totalorder %s5999_s29, %s4375_s10 }
 0x4f8   :  { %p4380_p9 = por %p4379_p8, %p4378_p7 }
 0x4fa   :  { %p4381_p10 = pnand %p4380_p9, %p4376_p5 }
 0x4fc   :  { %4384 = shalt.err (!%p4381_p10)  }
 0x4fd   :  { %s4385_s11 = scalar_lea.vmem %s6868_s22, 16  ;;  %p4390_p12 = scmp.lt.s32.totalorder %s6868_s22, %s5982_s14 }
 0x4fe   :  { %p4386_p11 = scmp.ne.s32.totalorder %s6868_s22, %s4385_s11  ;;  %p4391_p13 = scmp.lt.s32.totalorder %s6008_s5, %s4385_s11 }
 0x500   :  { %p4392_p0 = por %p4391_p13, %p4390_p12 }
 0x502   :  { %p4393_p1 = pnand %p4392_p0, %p4386_p11 }
 0x504   :  { %4396 = shalt.err (!%p4393_p1)  }
 0x505   :  { %1034 = dma.hbm_to_vmem [thread:$0]  %s1022_s23, 16, %s6868_s22, [#allocation2] }
 0x506   :  { %s5896_s15 = smov [#allocation5 + $0x40]   ;;  %s2723_s28 = sld [smem:[#allocation4 + $0x41]] }
 0x507   :  { %s1047_s18 = sshll.u32 %s5896_s15, 4  ;;  %s5897_s19 = smov [#allocation5 + $0x41]   ;;  %s1048_s18 = int_to_ptr.vmem [resolvable:$true] %s1047_s18 }
 0x508   :  { %s1063_s21 = sshll.u32 %s5897_s19, 4  ;;  %s6894_s17 = sld [smem:[#allocation4 + $0x42]]  ;;  %s6896_s21 = int_to_ptr.vmem [resolvable:$true] %s1063_s21 }
 0x509   :  { %s2722_s12 = sshll.u32 %s2721_s0, 4 }
 0x50a   :  { %s1038_s8 = scalar_lea.hbm %s7797_s1, %s2722_s12 }
 0x50b   :  { %s4397_s26 = scalar_lea.hbm %s1038_s8, 16  ;;  %p4400_p3 = scmp.lt.s32.totalorder %s1038_s8, %s7797_s1 }
 0x50c   :  { %p4398_p2 = scmp.ne.s32.totalorder %s1038_s8, %s4397_s26  ;;  %p4401_p4 = scmp.lt.s32.totalorder %s5999_s29, %s4397_s26 }
 0x50e   :  { %p4402_p5 = por %p4401_p4, %p4400_p3 }
 0x510   :  { %p4403_p7 = pnand %p4402_p5, %p4398_p2 }
 0x512   :  { %4406 = shalt.err (!%p4403_p7)  }
 0x513   :  { %s4407_s22 = scalar_lea.vmem %s1048_s18, 16  ;;  %p4412_p9 = scmp.lt.s32.totalorder %s1048_s18, %s5982_s14 }
 0x514   :  { %p4408_p8 = scmp.ne.s32.totalorder %s1048_s18, %s4407_s22  ;;  %p4413_p10 = scmp.lt.s32.totalorder %s6008_s5, %s4407_s22 }
 0x516   :  { %p4414_p11 = por %p4413_p10, %p4412_p9 }
 0x518   :  { %p4415_p12 = pnand %p4414_p11, %p4408_p8 }
 0x51a   :  { %4418 = shalt.err (!%p4415_p12)  }
 0x51b   :  { %1050 = dma.hbm_to_vmem [thread:$0]  %s1038_s8, 16, %s1048_s18, [#allocation2] }
 0x51c   :  { %s2724_s13 = sshll.u32 %s2723_s28, 4  ;;  %s5898_s6 = smov [#allocation5 + $0x42]  }
 0x51d   :  { %s1079_s20 = sshll.u32 %s5898_s6, 4  ;;  %s1054_s7 = scalar_lea.hbm %s7797_s1, %s2724_s13  ;;  %s6910_s20 = int_to_ptr.vmem [resolvable:$true] %s1079_s20 }
 0x51e   :  { %s4419_s9 = scalar_lea.hbm %s1054_s7, 16  ;;  %p4422_p0 = scmp.lt.s32.totalorder %s1054_s7, %s7797_s1 }
 0x51f   :  { %p4420_p13 = scmp.ne.s32.totalorder %s1054_s7, %s4419_s9  ;;  %p4423_p1 = scmp.lt.s32.totalorder %s5999_s29, %s4419_s9 }
 0x521   :  { %p4424_p2 = por %p4423_p1, %p4422_p0 }
 0x523   :  { %p4425_p3 = pnand %p4424_p2, %p4420_p13 }
 0x525   :  { %4428 = shalt.err (!%p4425_p3)  }
 0x526   :  { %s4429_s3 = scalar_lea.vmem %s6896_s21, 16  ;;  %p4434_p5 = scmp.lt.s32.totalorder %s6896_s21, %s5982_s14 }
 0x527   :  { %p4430_p4 = scmp.ne.s32.totalorder %s6896_s21, %s4429_s3  ;;  %p4435_p7 = scmp.lt.s32.totalorder %s6008_s5, %s4429_s3 }
 0x529   :  { %p4436_p8 = por %p4435_p7, %p4434_p5 }
 0x52b   :  { %p4437_p9 = pnand %p4436_p8, %p4430_p4 }
 0x52d   :  { %4440 = shalt.err (!%p4437_p9)  }
 0x52e   :  { %1066 = dma.hbm_to_vmem [thread:$0]  %s1054_s7, 16, %s6896_s21, [#allocation2] }
 0x52f   :  { %s2726_s24 = sshll.u32 %s6894_s17, 4  ;;  %s2727_s11 = sld [smem:[#allocation4 + $0x43]] }
 0x530   :  { %s1070_s28 = scalar_lea.hbm %s7797_s1, %s2726_s24 }
 0x531   :  { %s4441_s19 = scalar_lea.hbm %s1070_s28, 16  ;;  %p4444_p11 = scmp.lt.s32.totalorder %s1070_s28, %s7797_s1 }
 0x532   :  { %p4442_p10 = scmp.ne.s32.totalorder %s1070_s28, %s4441_s19  ;;  %p4445_p12 = scmp.lt.s32.totalorder %s5999_s29, %s4441_s19 }
 0x534   :  { %p4446_p13 = por %p4445_p12, %p4444_p11 }
 0x536   :  { %p4447_p0 = pnand %p4446_p13, %p4442_p10 }
 0x538   :  { %4450 = shalt.err (!%p4447_p0)  }
 0x539   :  { %s4451_s21 = scalar_lea.vmem %s6910_s20, 16  ;;  %p4456_p2 = scmp.lt.s32.totalorder %s6910_s20, %s5982_s14 }
 0x53a   :  { %p4452_p1 = scmp.ne.s32.totalorder %s6910_s20, %s4451_s21  ;;  %p4457_p3 = scmp.lt.s32.totalorder %s6008_s5, %s4451_s21 }
 0x53c   :  { %p4458_p4 = por %p4457_p3, %p4456_p2 }
 0x53e   :  { %p4459_p5 = pnand %p4458_p4, %p4452_p1 }
 0x540   :  { %4462 = shalt.err (!%p4459_p5)  }
 0x541   :  { %1082 = dma.hbm_to_vmem [thread:$0]  %s1070_s28, 16, %s6910_s20, [#allocation2] }
 0x542   :  { %s5899_s17 = smov [#allocation5 + $0x43]   ;;  %s2729_s8 = sld [smem:[#allocation4 + $0x44]] }
 0x543   :  { %s1095_s25 = sshll.u32 %s5899_s17, 4  ;;  %s5900_s26 = smov [#allocation5 + $0x44]   ;;  %s1096_s25 = int_to_ptr.vmem [resolvable:$true] %s1095_s25 }
 0x544   :  { %s1111_s27 = sshll.u32 %s5900_s26, 4  ;;  %s6936_s30 = sld [smem:[#allocation4 + $0x45]]  ;;  %s6938_s27 = int_to_ptr.vmem [resolvable:$true] %s1111_s27 }
 0x545   :  { %s2728_s22 = sshll.u32 %s2727_s11, 4 }
 0x546   :  { %s1086_s16 = scalar_lea.hbm %s7797_s1, %s2728_s22 }
 0x547   :  { %s4463_s0 = scalar_lea.hbm %s1086_s16, 16  ;;  %p4466_p8 = scmp.lt.s32.totalorder %s1086_s16, %s7797_s1 }
 0x548   :  { %p4464_p7 = scmp.ne.s32.totalorder %s1086_s16, %s4463_s0  ;;  %p4467_p9 = scmp.lt.s32.totalorder %s5999_s29, %s4463_s0 }
 0x54a   :  { %p4468_p10 = por %p4467_p9, %p4466_p8 }
 0x54c   :  { %p4469_p11 = pnand %p4468_p10, %p4464_p7 }
 0x54e   :  { %4472 = shalt.err (!%p4469_p11)  }
 0x54f   :  { %s4473_s20 = scalar_lea.vmem %s1096_s25, 16  ;;  %p4478_p13 = scmp.lt.s32.totalorder %s1096_s25, %s5982_s14 }
 0x550   :  { %p4474_p12 = scmp.ne.s32.totalorder %s1096_s25, %s4473_s20  ;;  %p4479_p0 = scmp.lt.s32.totalorder %s6008_s5, %s4473_s20 }
 0x552   :  { %p4480_p1 = por %p4479_p0, %p4478_p13 }
 0x554   :  { %p4481_p2 = pnand %p4480_p1, %p4474_p12 }
 0x556   :  { %4484 = shalt.err (!%p4481_p2)  }
 0x557   :  { %1098 = dma.hbm_to_vmem [thread:$0]  %s1086_s16, 16, %s1096_s25, [#allocation2] }
 0x558   :  { %s2730_s23 = sshll.u32 %s2729_s8, 4  ;;  %s5901_s10 = smov [#allocation5 + $0x45]  }
 0x559   :  { %s1127_s3 = sshll.u32 %s5901_s10, 4  ;;  %s1102_s15 = scalar_lea.hbm %s7797_s1, %s2730_s23  ;;  %s6952_s3 = int_to_ptr.vmem [resolvable:$true] %s1127_s3 }
 0x55a   :  { %s4485_s18 = scalar_lea.hbm %s1102_s15, 16  ;;  %p4488_p4 = scmp.lt.s32.totalorder %s1102_s15, %s7797_s1 }
 0x55b   :  { %p4486_p3 = scmp.ne.s32.totalorder %s1102_s15, %s4485_s18  ;;  %p4489_p5 = scmp.lt.s32.totalorder %s5999_s29, %s4485_s18 }
 0x55d   :  { %p4490_p7 = por %p4489_p5, %p4488_p4 }
 0x55f   :  { %p4491_p8 = pnand %p4490_p7, %p4486_p3 }
 0x561   :  { %4494 = shalt.err (!%p4491_p8)  }
 0x562   :  { %s4495_s12 = scalar_lea.vmem %s6938_s27, 16  ;;  %p4500_p10 = scmp.lt.s32.totalorder %s6938_s27, %s5982_s14 }
 0x563   :  { %p4496_p9 = scmp.ne.s32.totalorder %s6938_s27, %s4495_s12  ;;  %p4501_p11 = scmp.lt.s32.totalorder %s6008_s5, %s4495_s12 }
 0x565   :  { %p4502_p12 = por %p4501_p11, %p4500_p10 }
 0x567   :  { %p4503_p13 = pnand %p4502_p12, %p4496_p9 }
 0x569   :  { %4506 = shalt.err (!%p4503_p13)  }
 0x56a   :  { %1114 = dma.hbm_to_vmem [thread:$0]  %s1102_s15, 16, %s6938_s27, [#allocation2] }
 0x56b   :  { %s2732_s4 = sshll.u32 %s6936_s30, 4  ;;  %s2733_s21 = sld [smem:[#allocation4 + $0x46]] }
 0x56c   :  { %s1118_s8 = scalar_lea.hbm %s7797_s1, %s2732_s4 }
 0x56d   :  { %s4507_s26 = scalar_lea.hbm %s1118_s8, 16  ;;  %p4510_p1 = scmp.lt.s32.totalorder %s1118_s8, %s7797_s1 }
 0x56e   :  { %p4508_p0 = scmp.ne.s32.totalorder %s1118_s8, %s4507_s26  ;;  %p4511_p2 = scmp.lt.s32.totalorder %s5999_s29, %s4507_s26 }
 0x570   :  { %p4512_p3 = por %p4511_p2, %p4510_p1 }
 0x572   :  { %p4513_p4 = pnand %p4512_p3, %p4508_p0 }
 0x574   :  { %4516 = shalt.err (!%p4513_p4)  }
 0x575   :  { %s4517_s27 = scalar_lea.vmem %s6952_s3, 16  ;;  %p4522_p7 = scmp.lt.s32.totalorder %s6952_s3, %s5982_s14 }
 0x576   :  { %p4518_p5 = scmp.ne.s32.totalorder %s6952_s3, %s4517_s27  ;;  %p4523_p8 = scmp.lt.s32.totalorder %s6008_s5, %s4517_s27 }
 0x578   :  { %p4524_p9 = por %p4523_p8, %p4522_p7 }
 0x57a   :  { %p4525_p10 = pnand %p4524_p9, %p4518_p5 }
 0x57c   :  { %4528 = shalt.err (!%p4525_p10)  }
 0x57d   :  { %1130 = dma.hbm_to_vmem [thread:$0]  %s1118_s8, 16, %s6952_s3, [#allocation2] }
 0x57e   :  { %s5902_s30 = smov [#allocation5 + $0x46]   ;;  %s2735_s16 = sld [smem:[#allocation4 + $0x47]] }
 0x57f   :  { %s1143_s6 = sshll.u32 %s5902_s30, 4  ;;  %s5903_s0 = smov [#allocation5 + $0x47]   ;;  %s1144_s6 = int_to_ptr.vmem [resolvable:$true] %s1143_s6 }
 0x580   :  { %s1159_s7 = sshll.u32 %s5903_s0, 4  ;;  %s6978_s9 = sld [smem:[#allocation4 + $0x48]]  ;;  %s6980_s7 = int_to_ptr.vmem [resolvable:$true] %s1159_s7 }
 0x581   :  { %s2734_s20 = sshll.u32 %s2733_s21, 4 }
 0x582   :  { %s1134_s24 = scalar_lea.hbm %s7797_s1, %s2734_s20 }
 0x583   :  { %s4529_s11 = scalar_lea.hbm %s1134_s24, 16  ;;  %p4532_p12 = scmp.lt.s32.totalorder %s1134_s24, %s7797_s1 }
 0x584   :  { %p4530_p11 = scmp.ne.s32.totalorder %s1134_s24, %s4529_s11  ;;  %p4533_p13 = scmp.lt.s32.totalorder %s5999_s29, %s4529_s11 }
 0x586   :  { %p4534_p0 = por %p4533_p13, %p4532_p12 }
 0x588   :  { %p4535_p1 = pnand %p4534_p0, %p4530_p11 }
 0x58a   :  { %4538 = shalt.err (!%p4535_p1)  }
 0x58b   :  { %s4539_s3 = scalar_lea.vmem %s1144_s6, 16  ;;  %p4544_p3 = scmp.lt.s32.totalorder %s1144_s6, %s5982_s14 }
 0x58c   :  { %p4540_p2 = scmp.ne.s32.totalorder %s1144_s6, %s4539_s3  ;;  %p4545_p4 = scmp.lt.s32.totalorder %s6008_s5, %s4539_s3 }
 0x58e   :  { %p4546_p5 = por %p4545_p4, %p4544_p3 }
 0x590   :  { %p4547_p7 = pnand %p4546_p5, %p4540_p2 }
 0x592   :  { %4550 = shalt.err (!%p4547_p7)  }
 0x593   :  { %1146 = dma.hbm_to_vmem [thread:$0]  %s1134_s24, 16, %s1144_s6, [#allocation2] }
 0x594   :  { %s2736_s28 = sshll.u32 %s2735_s16, 4  ;;  %s5904_s19 = smov [#allocation5 + $0x48]  }
 0x595   :  { %s1175_s12 = sshll.u32 %s5904_s19, 4  ;;  %s1150_s17 = scalar_lea.hbm %s7797_s1, %s2736_s28  ;;  %s6994_s12 = int_to_ptr.vmem [resolvable:$true] %s1175_s12 }
 0x596   :  { %s4551_s25 = scalar_lea.hbm %s1150_s17, 16  ;;  %p4554_p9 = scmp.lt.s32.totalorder %s1150_s17, %s7797_s1 }
 0x597   :  { %p4552_p8 = scmp.ne.s32.totalorder %s1150_s17, %s4551_s25  ;;  %p4555_p10 = scmp.lt.s32.totalorder %s5999_s29, %s4551_s25 }
 0x599   :  { %p4556_p11 = por %p4555_p10, %p4554_p9 }
 0x59b   :  { %p4557_p12 = pnand %p4556_p11, %p4552_p8 }
 0x59d   :  { %4560 = shalt.err (!%p4557_p12)  }
 0x59e   :  { %s4561_s22 = scalar_lea.vmem %s6980_s7, 16  ;;  %p4566_p0 = scmp.lt.s32.totalorder %s6980_s7, %s5982_s14 }
 0x59f   :  { %p4562_p13 = scmp.ne.s32.totalorder %s6980_s7, %s4561_s22  ;;  %p4567_p1 = scmp.lt.s32.totalorder %s6008_s5, %s4561_s22 }
 0x5a1   :  { %p4568_p2 = por %p4567_p1, %p4566_p0 }
 0x5a3   :  { %p4569_p3 = pnand %p4568_p2, %p4562_p13 }
 0x5a5   :  { %4572 = shalt.err (!%p4569_p3)  }
 0x5a6   :  { %1162 = dma.hbm_to_vmem [thread:$0]  %s1150_s17, 16, %s6980_s7, [#allocation2] }
 0x5a7   :  { %s2738_s13 = sshll.u32 %s6978_s9, 4  ;;  %s2739_s27 = sld [smem:[#allocation4 + $0x49]] }
 0x5a8   :  { %s1166_s16 = scalar_lea.hbm %s7797_s1, %s2738_s13 }
 0x5a9   :  { %s4573_s0 = scalar_lea.hbm %s1166_s16, 16  ;;  %p4576_p5 = scmp.lt.s32.totalorder %s1166_s16, %s7797_s1 }
 0x5aa   :  { %p4574_p4 = scmp.ne.s32.totalorder %s1166_s16, %s4573_s0  ;;  %p4577_p7 = scmp.lt.s32.totalorder %s5999_s29, %s4573_s0 }
 0x5ac   :  { %p4578_p8 = por %p4577_p7, %p4576_p5 }
 0x5ae   :  { %p4579_p9 = pnand %p4578_p8, %p4574_p4 }
 0x5b0   :  { %4582 = shalt.err (!%p4579_p9)  }
 0x5b1   :  { %s4583_s7 = scalar_lea.vmem %s6994_s12, 16  ;;  %p4588_p11 = scmp.lt.s32.totalorder %s6994_s12, %s5982_s14 }
 0x5b2   :  { %p4584_p10 = scmp.ne.s32.totalorder %s6994_s12, %s4583_s7  ;;  %p4589_p12 = scmp.lt.s32.totalorder %s6008_s5, %s4583_s7 }
 0x5b4   :  { %p4590_p13 = por %p4589_p12, %p4588_p11 }
 0x5b6   :  { %p4591_p0 = pnand %p4590_p13, %p4584_p10 }
 0x5b8   :  { %4594 = shalt.err (!%p4591_p0)  }
 0x5b9   :  { %1178 = dma.hbm_to_vmem [thread:$0]  %s1166_s16, 16, %s6994_s12, [#allocation2] }
 0x5ba   :  { %s5905_s9 = smov [#allocation5 + $0x49]   ;;  %s2741_s24 = sld [smem:[#allocation4 + $0x4a]] }
 0x5bb   :  { %s1191_s10 = sshll.u32 %s5905_s9, 4  ;;  %s5906_s11 = smov [#allocation5 + $0x4a]   ;;  %s1192_s10 = int_to_ptr.vmem [resolvable:$true] %s1191_s10 }
 0x5bc   :  { %s1207_s15 = sshll.u32 %s5906_s11, 4  ;;  %s7020_s18 = sld [smem:[#allocation4 + $0x4b]]  ;;  %s7022_s15 = int_to_ptr.vmem [resolvable:$true] %s1207_s15 }
 0x5bd   :  { %s2740_s3 = sshll.u32 %s2739_s27, 4 }
 0x5be   :  { %s1182_s4 = scalar_lea.hbm %s7797_s1, %s2740_s3 }
 0x5bf   :  { %s4595_s21 = scalar_lea.hbm %s1182_s4, 16  ;;  %p4598_p2 = scmp.lt.s32.totalorder %s1182_s4, %s7797_s1 }
 0x5c0   :  { %p4596_p1 = scmp.ne.s32.totalorder %s1182_s4, %s4595_s21  ;;  %p4599_p3 = scmp.lt.s32.totalorder %s5999_s29, %s4595_s21 }
 0x5c2   :  { %p4600_p4 = por %p4599_p3, %p4598_p2 }
 0x5c4   :  { %p4601_p5 = pnand %p4600_p4, %p4596_p1 }
 0x5c6   :  { %4604 = shalt.err (!%p4601_p5)  }
 0x5c7   :  { %s4605_s12 = scalar_lea.vmem %s1192_s10, 16  ;;  %p4610_p8 = scmp.lt.s32.totalorder %s1192_s10, %s5982_s14 }
 0x5c8   :  { %p4606_p7 = scmp.ne.s32.totalorder %s1192_s10, %s4605_s12  ;;  %p4611_p9 = scmp.lt.s32.totalorder %s6008_s5, %s4605_s12 }
 0x5ca   :  { %p4612_p10 = por %p4611_p9, %p4610_p8 }
 0x5cc   :  { %p4613_p11 = pnand %p4612_p10, %p4606_p7 }
 0x5ce   :  { %4616 = shalt.err (!%p4613_p11)  }
 0x5cf   :  { %1194 = dma.hbm_to_vmem [thread:$0]  %s1182_s4, 16, %s1192_s10, [#allocation2] }
 0x5d0   :  { %s2742_s8 = sshll.u32 %s2741_s24, 4  ;;  %s5907_s26 = smov [#allocation5 + $0x4b]  }
 0x5d1   :  { %s1223_s22 = sshll.u32 %s5907_s26, 4  ;;  %s1198_s30 = scalar_lea.hbm %s7797_s1, %s2742_s8  ;;  %s7036_s22 = int_to_ptr.vmem [resolvable:$true] %s1223_s22 }
 0x5d2   :  { %s4617_s6 = scalar_lea.hbm %s1198_s30, 16  ;;  %p4620_p13 = scmp.lt.s32.totalorder %s1198_s30, %s7797_s1 }
 0x5d3   :  { %p4618_p12 = scmp.ne.s32.totalorder %s1198_s30, %s4617_s6  ;;  %p4621_p0 = scmp.lt.s32.totalorder %s5999_s29, %s4617_s6 }
 0x5d5   :  { %p4622_p1 = por %p4621_p0, %p4620_p13 }
 0x5d7   :  { %p4623_p2 = pnand %p4622_p1, %p4618_p12 }
 0x5d9   :  { %4626 = shalt.err (!%p4623_p2)  }
 0x5da   :  { %s4627_s20 = scalar_lea.vmem %s7022_s15, 16  ;;  %p4632_p4 = scmp.lt.s32.totalorder %s7022_s15, %s5982_s14 }
 0x5db   :  { %p4628_p3 = scmp.ne.s32.totalorder %s7022_s15, %s4627_s20  ;;  %p4633_p5 = scmp.lt.s32.totalorder %s6008_s5, %s4627_s20 }
 0x5dd   :  { %p4634_p7 = por %p4633_p5, %p4632_p4 }
 0x5df   :  { %p4635_p8 = pnand %p4634_p7, %p4628_p3 }
 0x5e1   :  { %4638 = shalt.err (!%p4635_p8)  }
 0x5e2   :  { %1210 = dma.hbm_to_vmem [thread:$0]  %s1198_s30, 16, %s7022_s15, [#allocation2] }
 0x5e3   :  { %s2744_s23 = sshll.u32 %s7020_s18, 4  ;;  %s2745_s7 = sld [smem:[#allocation4 + $0x4c]] }
 0x5e4   :  { %s1214_s24 = scalar_lea.hbm %s7797_s1, %s2744_s23 }
 0x5e5   :  { %s4639_s11 = scalar_lea.hbm %s1214_s24, 16  ;;  %p4642_p10 = scmp.lt.s32.totalorder %s1214_s24, %s7797_s1 }
 0x5e6   :  { %p4640_p9 = scmp.ne.s32.totalorder %s1214_s24, %s4639_s11  ;;  %p4643_p11 = scmp.lt.s32.totalorder %s5999_s29, %s4639_s11 }
 0x5e8   :  { %p4644_p12 = por %p4643_p11, %p4642_p10 }
 0x5ea   :  { %p4645_p13 = pnand %p4644_p12, %p4640_p9 }
 0x5ec   :  { %4648 = shalt.err (!%p4645_p13)  }
 0x5ed   :  { %s4649_s15 = scalar_lea.vmem %s7036_s22, 16  ;;  %p4654_p1 = scmp.lt.s32.totalorder %s7036_s22, %s5982_s14 }
 0x5ee   :  { %p4650_p0 = scmp.ne.s32.totalorder %s7036_s22, %s4649_s15  ;;  %p4655_p2 = scmp.lt.s32.totalorder %s6008_s5, %s4649_s15 }
 0x5f0   :  { %p4656_p3 = por %p4655_p2, %p4654_p1 }
 0x5f2   :  { %p4657_p4 = pnand %p4656_p3, %p4650_p0 }
 0x5f4   :  { %4660 = shalt.err (!%p4657_p4)  }
 0x5f5   :  { %1226 = dma.hbm_to_vmem [thread:$0]  %s1214_s24, 16, %s7036_s22, [#allocation2] }
 0x5f6   :  { %s5908_s18 = smov [#allocation5 + $0x4c]   ;;  %s2747_s4 = sld [smem:[#allocation4 + $0x4d]] }
 0x5f7   :  { %s1239_s19 = sshll.u32 %s5908_s18, 4  ;;  %s5909_s21 = smov [#allocation5 + $0x4d]   ;;  %s1240_s19 = int_to_ptr.vmem [resolvable:$true] %s1239_s19 }
 0x5f8   :  { %s1255_s17 = sshll.u32 %s5909_s21, 4  ;;  %s7062_s25 = sld [smem:[#allocation4 + $0x4e]]  ;;  %s7064_s17 = int_to_ptr.vmem [resolvable:$true] %s1255_s17 }
 0x5f9   :  { %s2746_s12 = sshll.u32 %s2745_s7, 4 }
 0x5fa   :  { %s1230_s13 = scalar_lea.hbm %s7797_s1, %s2746_s12 }
 0x5fb   :  { %s4661_s27 = scalar_lea.hbm %s1230_s13, 16  ;;  %p4664_p7 = scmp.lt.s32.totalorder %s1230_s13, %s7797_s1 }
 0x5fc   :  { %p4662_p5 = scmp.ne.s32.totalorder %s1230_s13, %s4661_s27  ;;  %p4665_p8 = scmp.lt.s32.totalorder %s5999_s29, %s4661_s27 }
 0x5fe   :  { %p4666_p9 = por %p4665_p8, %p4664_p7 }
 0x600   :  { %p4667_p10 = pnand %p4666_p9, %p4662_p5 }
 0x602   :  { %4670 = shalt.err (!%p4667_p10)  }
 0x603   :  { %s4671_s22 = scalar_lea.vmem %s1240_s19, 16  ;;  %p4676_p12 = scmp.lt.s32.totalorder %s1240_s19, %s5982_s14 }
 0x604   :  { %p4672_p11 = scmp.ne.s32.totalorder %s1240_s19, %s4671_s22  ;;  %p4677_p13 = scmp.lt.s32.totalorder %s6008_s5, %s4671_s22 }
 0x606   :  { %p4678_p0 = por %p4677_p13, %p4676_p12 }
 0x608   :  { %p4679_p1 = pnand %p4678_p0, %p4672_p11 }
 0x60a   :  { %4682 = shalt.err (!%p4679_p1)  }
 0x60b   :  { %1242 = dma.hbm_to_vmem [thread:$0]  %s1230_s13, 16, %s1240_s19, [#allocation2] }
 0x60c   :  { %s2748_s16 = sshll.u32 %s2747_s4, 4  ;;  %s5910_s0 = smov [#allocation5 + $0x4e]  }
 0x60d   :  { %s1271_s20 = sshll.u32 %s5910_s0, 4  ;;  %s1246_s9 = scalar_lea.hbm %s7797_s1, %s2748_s16  ;;  %s7078_s20 = int_to_ptr.vmem [resolvable:$true] %s1271_s20 }
 0x60e   :  { %s4683_s10 = scalar_lea.hbm %s1246_s9, 16  ;;  %p4686_p3 = scmp.lt.s32.totalorder %s1246_s9, %s7797_s1 }
 0x60f   :  { %p4684_p2 = scmp.ne.s32.totalorder %s1246_s9, %s4683_s10  ;;  %p4687_p4 = scmp.lt.s32.totalorder %s5999_s29, %s4683_s10 }
 0x611   :  { %p4688_p5 = por %p4687_p4, %p4686_p3 }
 0x613   :  { %p4689_p7 = pnand %p4688_p5, %p4684_p2 }
 0x615   :  { %4692 = shalt.err (!%p4689_p7)  }
 0x616   :  { %s4693_s3 = scalar_lea.vmem %s7064_s17, 16  ;;  %p4698_p9 = scmp.lt.s32.totalorder %s7064_s17, %s5982_s14 }
 0x617   :  { %p4694_p8 = scmp.ne.s32.totalorder %s7064_s17, %s4693_s3  ;;  %p4699_p10 = scmp.lt.s32.totalorder %s6008_s5, %s4693_s3 }
 0x619   :  { %p4700_p11 = por %p4699_p10, %p4698_p9 }
 0x61b   :  { %p4701_p12 = pnand %p4700_p11, %p4694_p8 }
 0x61d   :  { %4704 = shalt.err (!%p4701_p12)  }
 0x61e   :  { %1258 = dma.hbm_to_vmem [thread:$0]  %s1246_s9, 16, %s7064_s17, [#allocation2] }
 0x61f   :  { %s2750_s28 = sshll.u32 %s7062_s25, 4  ;;  %s2751_s15 = sld [smem:[#allocation4 + $0x4f]] }
 0x620   :  { %s1262_s4 = scalar_lea.hbm %s7797_s1, %s2750_s28 }
 0x621   :  { %s4705_s21 = scalar_lea.hbm %s1262_s4, 16  ;;  %p4708_p0 = scmp.lt.s32.totalorder %s1262_s4, %s7797_s1 }
 0x622   :  { %p4706_p13 = scmp.ne.s32.totalorder %s1262_s4, %s4705_s21  ;;  %p4709_p1 = scmp.lt.s32.totalorder %s5999_s29, %s4705_s21 }
 0x624   :  { %p4710_p2 = por %p4709_p1, %p4708_p0 }
 0x626   :  { %p4711_p3 = pnand %p4710_p2, %p4706_p13 }
 0x628   :  { %4714 = shalt.err (!%p4711_p3)  }
 0x629   :  { %s4715_s17 = scalar_lea.vmem %s7078_s20, 16  ;;  %p4720_p5 = scmp.lt.s32.totalorder %s7078_s20, %s5982_s14 }
 0x62a   :  { %p4716_p4 = scmp.ne.s32.totalorder %s7078_s20, %s4715_s17  ;;  %p4721_p7 = scmp.lt.s32.totalorder %s6008_s5, %s4715_s17 }
 0x62c   :  { %p4722_p8 = por %p4721_p7, %p4720_p5 }
 0x62e   :  { %p4723_p9 = pnand %p4722_p8, %p4716_p4 }
 0x630   :  { %4726 = shalt.err (!%p4723_p9)  }
 0x631   :  { %1274 = dma.hbm_to_vmem [thread:$0]  %s1262_s4, 16, %s7078_s20, [#allocation2] }
 0x632   :  { %s5911_s25 = smov [#allocation5 + $0x4f]   ;;  %s2753_s13 = sld [smem:[#allocation4 + $0x50]] }
 0x633   :  { %s1287_s26 = sshll.u32 %s5911_s25, 4  ;;  %s5912_s27 = smov [#allocation5 + $0x50]   ;;  %s1288_s26 = int_to_ptr.vmem [resolvable:$true] %s1287_s26 }
 0x634   :  { %s1303_s30 = sshll.u32 %s5912_s27, 4  ;;  %s7104_s6 = sld [smem:[#allocation4 + $0x51]]  ;;  %s7106_s30 = int_to_ptr.vmem [resolvable:$true] %s1303_s30 }
 0x635   :  { %s2752_s22 = sshll.u32 %s2751_s15, 4 }
 0x636   :  { %s1278_s23 = scalar_lea.hbm %s7797_s1, %s2752_s22 }
 0x637   :  { %s4727_s7 = scalar_lea.hbm %s1278_s23, 16  ;;  %p4730_p11 = scmp.lt.s32.totalorder %s1278_s23, %s7797_s1 }
 0x638   :  { %p4728_p10 = scmp.ne.s32.totalorder %s1278_s23, %s4727_s7  ;;  %p4731_p12 = scmp.lt.s32.totalorder %s5999_s29, %s4727_s7 }
 0x63a   :  { %p4732_p13 = por %p4731_p12, %p4730_p11 }
 0x63c   :  { %p4733_p0 = pnand %p4732_p13, %p4728_p10 }
 0x63e   :  { %4736 = shalt.err (!%p4733_p0)  }
 0x63f   :  { %s4737_s20 = scalar_lea.vmem %s1288_s26, 16  ;;  %p4742_p2 = scmp.lt.s32.totalorder %s1288_s26, %s5982_s14 }
 0x640   :  { %p4738_p1 = scmp.ne.s32.totalorder %s1288_s26, %s4737_s20  ;;  %p4743_p3 = scmp.lt.s32.totalorder %s6008_s5, %s4737_s20 }
 0x642   :  { %p4744_p4 = por %p4743_p3, %p4742_p2 }
 0x644   :  { %p4745_p5 = pnand %p4744_p4, %p4738_p1 }
 0x646   :  { %4748 = shalt.err (!%p4745_p5)  }
 0x647   :  { %1290 = dma.hbm_to_vmem [thread:$0]  %s1278_s23, 16, %s1288_s26, [#allocation2] }
 0x648   :  { %s2754_s24 = sshll.u32 %s2753_s13, 4  ;;  %s5913_s11 = smov [#allocation5 + $0x51]  }
 0x649   :  { %s1319_s3 = sshll.u32 %s5913_s11, 4  ;;  %s1294_s18 = scalar_lea.hbm %s7797_s1, %s2754_s24  ;;  %s7120_s3 = int_to_ptr.vmem [resolvable:$true] %s1319_s3 }
 0x64a   :  { %s4749_s19 = scalar_lea.hbm %s1294_s18, 16  ;;  %p4752_p8 = scmp.lt.s32.totalorder %s1294_s18, %s7797_s1 }
 0x64b   :  { %p4750_p7 = scmp.ne.s32.totalorder %s1294_s18, %s4749_s19  ;;  %p4753_p9 = scmp.lt.s32.totalorder %s5999_s29, %s4749_s19 }
 0x64d   :  { %p4754_p10 = por %p4753_p9, %p4752_p8 }
 0x64f   :  { %p4755_p11 = pnand %p4754_p10, %p4750_p7 }
 0x651   :  { %4758 = shalt.err (!%p4755_p11)  }
 0x652   :  { %s4759_s12 = scalar_lea.vmem %s7106_s30, 16  ;;  %p4764_p13 = scmp.lt.s32.totalorder %s7106_s30, %s5982_s14 }
 0x653   :  { %p4760_p12 = scmp.ne.s32.totalorder %s7106_s30, %s4759_s12  ;;  %p4765_p0 = scmp.lt.s32.totalorder %s6008_s5, %s4759_s12 }
 0x655   :  { %p4766_p1 = por %p4765_p0, %p4764_p13 }
 0x657   :  { %p4767_p2 = pnand %p4766_p1, %p4760_p12 }
 0x659   :  { %4770 = shalt.err (!%p4767_p2)  }
 0x65a   :  { %1306 = dma.hbm_to_vmem [thread:$0]  %s1294_s18, 16, %s7106_s30, [#allocation2] }
 0x65b   :  { %s2756_s8 = sshll.u32 %s7104_s6, 4  ;;  %s2757_s17 = sld [smem:[#allocation4 + $0x52]] }
 0x65c   :  { %s1310_s13 = scalar_lea.hbm %s7797_s1, %s2756_s8 }
 0x65d   :  { %s4771_s27 = scalar_lea.hbm %s1310_s13, 16  ;;  %p4774_p4 = scmp.lt.s32.totalorder %s1310_s13, %s7797_s1 }
 0x65e   :  { %p4772_p3 = scmp.ne.s32.totalorder %s1310_s13, %s4771_s27  ;;  %p4775_p5 = scmp.lt.s32.totalorder %s5999_s29, %s4771_s27 }
 0x660   :  { %p4776_p7 = por %p4775_p5, %p4774_p4 }
 0x662   :  { %p4777_p8 = pnand %p4776_p7, %p4772_p3 }
 0x664   :  { %4780 = shalt.err (!%p4777_p8)  }
 0x665   :  { %s4781_s30 = scalar_lea.vmem %s7120_s3, 16  ;;  %p4786_p10 = scmp.lt.s32.totalorder %s7120_s3, %s5982_s14 }
 0x666   :  { %p4782_p9 = scmp.ne.s32.totalorder %s7120_s3, %s4781_s30  ;;  %p4787_p11 = scmp.lt.s32.totalorder %s6008_s5, %s4781_s30 }
 0x668   :  { %p4788_p12 = por %p4787_p11, %p4786_p10 }
 0x66a   :  { %p4789_p13 = pnand %p4788_p12, %p4782_p9 }
 0x66c   :  { %4792 = shalt.err (!%p4789_p13)  }
 0x66d   :  { %1322 = dma.hbm_to_vmem [thread:$0]  %s1310_s13, 16, %s7120_s3, [#allocation2] }
 0x66e   :  { %s5914_s6 = smov [#allocation5 + $0x52]   ;;  %s2759_s23 = sld [smem:[#allocation4 + $0x53]] }
 0x66f   :  { %s1335_s0 = sshll.u32 %s5914_s6, 4  ;;  %s5915_s7 = smov [#allocation5 + $0x53]   ;;  %s1336_s0 = int_to_ptr.vmem [resolvable:$true] %s1335_s0 }
 0x670   :  { %s1351_s9 = sshll.u32 %s5915_s7, 4  ;;  %s7146_s10 = sld [smem:[#allocation4 + $0x54]]  ;;  %s7148_s9 = int_to_ptr.vmem [resolvable:$true] %s1351_s9 }
 0x671   :  { %s2758_s20 = sshll.u32 %s2757_s17, 4 }
 0x672   :  { %s1326_s28 = scalar_lea.hbm %s7797_s1, %s2758_s20 }
 0x673   :  { %s4793_s15 = scalar_lea.hbm %s1326_s28, 16  ;;  %p4796_p1 = scmp.lt.s32.totalorder %s1326_s28, %s7797_s1 }
 0x674   :  { %p4794_p0 = scmp.ne.s32.totalorder %s1326_s28, %s4793_s15  ;;  %p4797_p2 = scmp.lt.s32.totalorder %s5999_s29, %s4793_s15 }
 0x676   :  { %p4798_p3 = por %p4797_p2, %p4796_p1 }
 0x678   :  { %p4799_p4 = pnand %p4798_p3, %p4794_p0 }
 0x67a   :  { %4802 = shalt.err (!%p4799_p4)  }
 0x67b   :  { %s4803_s3 = scalar_lea.vmem %s1336_s0, 16  ;;  %p4808_p7 = scmp.lt.s32.totalorder %s1336_s0, %s5982_s14 }
 0x67c   :  { %p4804_p5 = scmp.ne.s32.totalorder %s1336_s0, %s4803_s3  ;;  %p4809_p8 = scmp.lt.s32.totalorder %s6008_s5, %s4803_s3 }
 0x67e   :  { %p4810_p9 = por %p4809_p8, %p4808_p7 }
 0x680   :  { %p4811_p10 = pnand %p4810_p9, %p4804_p5 }
 0x682   :  { %4814 = shalt.err (!%p4811_p10)  }
 0x683   :  { %1338 = dma.hbm_to_vmem [thread:$0]  %s1326_s28, 16, %s1336_s0, [#allocation2] }
 0x684   :  { %s2760_s4 = sshll.u32 %s2759_s23, 4  ;;  %s5916_s21 = smov [#allocation5 + $0x54]  }
 0x685   :  { %s1367_s12 = sshll.u32 %s5916_s21, 4  ;;  %s1342_s25 = scalar_lea.hbm %s7797_s1, %s2760_s4  ;;  %s7162_s12 = int_to_ptr.vmem [resolvable:$true] %s1367_s12 }
 0x686   :  { %s4815_s26 = scalar_lea.hbm %s1342_s25, 16  ;;  %p4818_p12 = scmp.lt.s32.totalorder %s1342_s25, %s7797_s1 }
 0x687   :  { %p4816_p11 = scmp.ne.s32.totalorder %s1342_s25, %s4815_s26  ;;  %p4819_p13 = scmp.lt.s32.totalorder %s5999_s29, %s4815_s26 }
 0x689   :  { %p4820_p0 = por %p4819_p13, %p4818_p12 }
 0x68b   :  { %p4821_p1 = pnand %p4820_p0, %p4816_p11 }
 0x68d   :  { %4824 = shalt.err (!%p4821_p1)  }
 0x68e   :  { %s4825_s22 = scalar_lea.vmem %s7148_s9, 16  ;;  %p4830_p3 = scmp.lt.s32.totalorder %s7148_s9, %s5982_s14 }
 0x68f   :  { %p4826_p2 = scmp.ne.s32.totalorder %s7148_s9, %s4825_s22  ;;  %p4831_p4 = scmp.lt.s32.totalorder %s6008_s5, %s4825_s22 }
 0x691   :  { %p4832_p5 = por %p4831_p4, %p4830_p3 }
 0x693   :  { %p4833_p7 = pnand %p4832_p5, %p4826_p2 }
 0x695   :  { %4836 = shalt.err (!%p4833_p7)  }
 0x696   :  { %1354 = dma.hbm_to_vmem [thread:$0]  %s1342_s25, 16, %s7148_s9, [#allocation2] }
 0x697   :  { %s2762_s16 = sshll.u32 %s7146_s10, 4  ;;  %s2763_s30 = sld [smem:[#allocation4 + $0x55]] }
 0x698   :  { %s1358_s23 = scalar_lea.hbm %s7797_s1, %s2762_s16 }
 0x699   :  { %s4837_s7 = scalar_lea.hbm %s1358_s23, 16  ;;  %p4840_p9 = scmp.lt.s32.totalorder %s1358_s23, %s7797_s1 }
 0x69a   :  { %p4838_p8 = scmp.ne.s32.totalorder %s1358_s23, %s4837_s7  ;;  %p4841_p10 = scmp.lt.s32.totalorder %s5999_s29, %s4837_s7 }
 0x69c   :  { %p4842_p11 = por %p4841_p10, %p4840_p9 }
 0x69e   :  { %p4843_p12 = pnand %p4842_p11, %p4838_p8 }
 0x6a0   :  { %4846 = shalt.err (!%p4843_p12)  }
 0x6a1   :  { %s4847_s9 = scalar_lea.vmem %s7162_s12, 16  ;;  %p4852_p0 = scmp.lt.s32.totalorder %s7162_s12, %s5982_s14 }
 0x6a2   :  { %p4848_p13 = scmp.ne.s32.totalorder %s7162_s12, %s4847_s9  ;;  %p4853_p1 = scmp.lt.s32.totalorder %s6008_s5, %s4847_s9 }
 0x6a4   :  { %p4854_p2 = por %p4853_p1, %p4852_p0 }
 0x6a6   :  { %p4855_p3 = pnand %p4854_p2, %p4848_p13 }
 0x6a8   :  { %4858 = shalt.err (!%p4855_p3)  }
 0x6a9   :  { %1370 = dma.hbm_to_vmem [thread:$0]  %s1358_s23, 16, %s7162_s12, [#allocation2] }
 0x6aa   :  { %s5917_s10 = smov [#allocation5 + $0x55]   ;;  %s2765_s28 = sld [smem:[#allocation4 + $0x56]] }
 0x6ab   :  { %s1383_s11 = sshll.u32 %s5917_s10, 4  ;;  %s5918_s15 = smov [#allocation5 + $0x56]   ;;  %s1384_s11 = int_to_ptr.vmem [resolvable:$true] %s1383_s11 }
 0x6ac   :  { %s1399_s18 = sshll.u32 %s5918_s15, 4  ;;  %s7188_s19 = sld [smem:[#allocation4 + $0x57]]  ;;  %s7190_s18 = int_to_ptr.vmem [resolvable:$true] %s1399_s18 }
 0x6ad   :  { %s2764_s3 = sshll.u32 %s2763_s30, 4 }
 0x6ae   :  { %s1374_s8 = scalar_lea.hbm %s7797_s1, %s2764_s3 }
 0x6af   :  { %s4859_s17 = scalar_lea.hbm %s1374_s8, 16  ;;  %p4862_p5 = scmp.lt.s32.totalorder %s1374_s8, %s7797_s1 }
 0x6b0   :  { %p4860_p4 = scmp.ne.s32.totalorder %s1374_s8, %s4859_s17  ;;  %p4863_p7 = scmp.lt.s32.totalorder %s5999_s29, %s4859_s17 }
 0x6b2   :  { %p4864_p8 = por %p4863_p7, %p4862_p5 }
 0x6b4   :  { %p4865_p9 = pnand %p4864_p8, %p4860_p4 }
 0x6b6   :  { %4868 = shalt.err (!%p4865_p9)  }
 0x6b7   :  { %s4869_s12 = scalar_lea.vmem %s1384_s11, 16  ;;  %p4874_p11 = scmp.lt.s32.totalorder %s1384_s11, %s5982_s14 }
 0x6b8   :  { %p4870_p10 = scmp.ne.s32.totalorder %s1384_s11, %s4869_s12  ;;  %p4875_p12 = scmp.lt.s32.totalorder %s6008_s5, %s4869_s12 }
 0x6ba   :  { %p4876_p13 = por %p4875_p12, %p4874_p11 }
 0x6bc   :  { %p4877_p0 = pnand %p4876_p13, %p4870_p10 }
 0x6be   :  { %4880 = shalt.err (!%p4877_p0)  }
 0x6bf   :  { %1386 = dma.hbm_to_vmem [thread:$0]  %s1374_s8, 16, %s1384_s11, [#allocation2] }
 0x6c0   :  { %s2766_s13 = sshll.u32 %s2765_s28, 4  ;;  %s5919_s27 = smov [#allocation5 + $0x57]  }
 0x6c1   :  { %s1415_s22 = sshll.u32 %s5919_s27, 4  ;;  %s1390_s6 = scalar_lea.hbm %s7797_s1, %s2766_s13  ;;  %s7204_s22 = int_to_ptr.vmem [resolvable:$true] %s1415_s22 }
 0x6c2   :  { %s4881_s0 = scalar_lea.hbm %s1390_s6, 16  ;;  %p4884_p2 = scmp.lt.s32.totalorder %s1390_s6, %s7797_s1 }
 0x6c3   :  { %p4882_p1 = scmp.ne.s32.totalorder %s1390_s6, %s4881_s0  ;;  %p4885_p3 = scmp.lt.s32.totalorder %s5999_s29, %s4881_s0 }
 0x6c5   :  { %p4886_p4 = por %p4885_p3, %p4884_p2 }
 0x6c7   :  { %p4887_p5 = pnand %p4886_p4, %p4882_p1 }
 0x6c9   :  { %4890 = shalt.err (!%p4887_p5)  }
 0x6ca   :  { %s4891_s20 = scalar_lea.vmem %s7190_s18, 16  ;;  %p4896_p8 = scmp.lt.s32.totalorder %s7190_s18, %s5982_s14 }
 0x6cb   :  { %p4892_p7 = scmp.ne.s32.totalorder %s7190_s18, %s4891_s20  ;;  %p4897_p9 = scmp.lt.s32.totalorder %s6008_s5, %s4891_s20 }
 0x6cd   :  { %p4898_p10 = por %p4897_p9, %p4896_p8 }
 0x6cf   :  { %p4899_p11 = pnand %p4898_p10, %p4892_p7 }
 0x6d1   :  { %4902 = shalt.err (!%p4899_p11)  }
 0x6d2   :  { %1402 = dma.hbm_to_vmem [thread:$0]  %s1390_s6, 16, %s7190_s18, [#allocation2] }
 0x6d3   :  { %s2768_s24 = sshll.u32 %s7188_s19, 4  ;;  %s2769_s9 = sld [smem:[#allocation4 + $0x58]] }
 0x6d4   :  { %s1406_s28 = scalar_lea.hbm %s7797_s1, %s2768_s24 }
 0x6d5   :  { %s4903_s15 = scalar_lea.hbm %s1406_s28, 16  ;;  %p4906_p13 = scmp.lt.s32.totalorder %s1406_s28, %s7797_s1 }
 0x6d6   :  { %p4904_p12 = scmp.ne.s32.totalorder %s1406_s28, %s4903_s15  ;;  %p4907_p0 = scmp.lt.s32.totalorder %s5999_s29, %s4903_s15 }
 0x6d8   :  { %p4908_p1 = por %p4907_p0, %p4906_p13 }
 0x6da   :  { %p4909_p2 = pnand %p4908_p1, %p4904_p12 }
 0x6dc   :  { %4912 = shalt.err (!%p4909_p2)  }
 0x6dd   :  { %s4913_s18 = scalar_lea.vmem %s7204_s22, 16  ;;  %p4918_p4 = scmp.lt.s32.totalorder %s7204_s22, %s5982_s14 }
 0x6de   :  { %p4914_p3 = scmp.ne.s32.totalorder %s7204_s22, %s4913_s18  ;;  %p4919_p5 = scmp.lt.s32.totalorder %s6008_s5, %s4913_s18 }
 0x6e0   :  { %p4920_p7 = por %p4919_p5, %p4918_p4 }
 0x6e2   :  { %p4921_p8 = pnand %p4920_p7, %p4914_p3 }
 0x6e4   :  { %4924 = shalt.err (!%p4921_p8)  }
 0x6e5   :  { %1418 = dma.hbm_to_vmem [thread:$0]  %s1406_s28, 16, %s7204_s22, [#allocation2] }
 0x6e6   :  { %s5920_s19 = smov [#allocation5 + $0x58]   ;;  %s2771_s8 = sld [smem:[#allocation4 + $0x59]] }
 0x6e7   :  { %s1431_s21 = sshll.u32 %s5920_s19, 4  ;;  %s5921_s17 = smov [#allocation5 + $0x59]   ;;  %s1432_s21 = int_to_ptr.vmem [resolvable:$true] %s1431_s21 }
 0x6e8   :  { %s1447_s25 = sshll.u32 %s5921_s17, 4  ;;  %s7230_s26 = sld [smem:[#allocation4 + $0x5a]]  ;;  %s7232_s25 = int_to_ptr.vmem [resolvable:$true] %s1447_s25 }
 0x6e9   :  { %s2770_s12 = sshll.u32 %s2769_s9, 4 }
 0x6ea   :  { %s1422_s16 = scalar_lea.hbm %s7797_s1, %s2770_s12 }
 0x6eb   :  { %s4925_s30 = scalar_lea.hbm %s1422_s16, 16  ;;  %p4928_p10 = scmp.lt.s32.totalorder %s1422_s16, %s7797_s1 }
 0x6ec   :  { %p4926_p9 = scmp.ne.s32.totalorder %s1422_s16, %s4925_s30  ;;  %p4929_p11 = scmp.lt.s32.totalorder %s5999_s29, %s4925_s30 }
 0x6ee   :  { %p4930_p12 = por %p4929_p11, %p4928_p10 }
 0x6f0   :  { %p4931_p13 = pnand %p4930_p12, %p4926_p9 }
 0x6f2   :  { %4934 = shalt.err (!%p4931_p13)  }
 0x6f3   :  { %s4935_s22 = scalar_lea.vmem %s1432_s21, 16  ;;  %p4940_p1 = scmp.lt.s32.totalorder %s1432_s21, %s5982_s14 }
 0x6f4   :  { %p4936_p0 = scmp.ne.s32.totalorder %s1432_s21, %s4935_s22  ;;  %p4941_p2 = scmp.lt.s32.totalorder %s6008_s5, %s4935_s22 }
 0x6f6   :  { %p4942_p3 = por %p4941_p2, %p4940_p1 }
 0x6f8   :  { %p4943_p4 = pnand %p4942_p3, %p4936_p0 }
 0x6fa   :  { %4946 = shalt.err (!%p4943_p4)  }
 0x6fb   :  { %1434 = dma.hbm_to_vmem [thread:$0]  %s1422_s16, 16, %s1432_s21, [#allocation2] }
 0x6fc   :  { %s2772_s23 = sshll.u32 %s2771_s8, 4  ;;  %s5922_s7 = smov [#allocation5 + $0x5a]  }
 0x6fd   :  { %s1463_s20 = sshll.u32 %s5922_s7, 4  ;;  %s1438_s10 = scalar_lea.hbm %s7797_s1, %s2772_s23  ;;  %s7246_s20 = int_to_ptr.vmem [resolvable:$true] %s1463_s20 }
 0x6fe   :  { %s4947_s11 = scalar_lea.hbm %s1438_s10, 16  ;;  %p4950_p7 = scmp.lt.s32.totalorder %s1438_s10, %s7797_s1 }
 0x6ff   :  { %p4948_p5 = scmp.ne.s32.totalorder %s1438_s10, %s4947_s11  ;;  %p4951_p8 = scmp.lt.s32.totalorder %s5999_s29, %s4947_s11 }
 0x701   :  { %p4952_p9 = por %p4951_p8, %p4950_p7 }
 0x703   :  { %p4953_p10 = pnand %p4952_p9, %p4948_p5 }
 0x705   :  { %4956 = shalt.err (!%p4953_p10)  }
 0x706   :  { %s4957_s3 = scalar_lea.vmem %s7232_s25, 16  ;;  %p4962_p12 = scmp.lt.s32.totalorder %s7232_s25, %s5982_s14 }
 0x707   :  { %p4958_p11 = scmp.ne.s32.totalorder %s7232_s25, %s4957_s3  ;;  %p4963_p13 = scmp.lt.s32.totalorder %s6008_s5, %s4957_s3 }
 0x709   :  { %p4964_p0 = por %p4963_p13, %p4962_p12 }
 0x70b   :  { %p4965_p1 = pnand %p4964_p0, %p4958_p11 }
 0x70d   :  { %4968 = shalt.err (!%p4965_p1)  }
 0x70e   :  { %1450 = dma.hbm_to_vmem [thread:$0]  %s1438_s10, 16, %s7232_s25, [#allocation2] }
 0x70f   :  { %s2774_s4 = sshll.u32 %s7230_s26, 4  ;;  %s2775_s18 = sld [smem:[#allocation4 + $0x5b]] }
 0x710   :  { %s1454_s8 = scalar_lea.hbm %s7797_s1, %s2774_s4 }
 0x711   :  { %s4969_s17 = scalar_lea.hbm %s1454_s8, 16  ;;  %p4972_p3 = scmp.lt.s32.totalorder %s1454_s8, %s7797_s1 }
 0x712   :  { %p4970_p2 = scmp.ne.s32.totalorder %s1454_s8, %s4969_s17  ;;  %p4973_p4 = scmp.lt.s32.totalorder %s5999_s29, %s4969_s17 }
 0x714   :  { %p4974_p5 = por %p4973_p4, %p4972_p3 }
 0x716   :  { %p4975_p7 = pnand %p4974_p5, %p4970_p2 }
 0x718   :  { %4978 = shalt.err (!%p4975_p7)  }
 0x719   :  { %s4979_s25 = scalar_lea.vmem %s7246_s20, 16  ;;  %p4984_p9 = scmp.lt.s32.totalorder %s7246_s20, %s5982_s14 }
 0x71a   :  { %p4980_p8 = scmp.ne.s32.totalorder %s7246_s20, %s4979_s25  ;;  %p4985_p10 = scmp.lt.s32.totalorder %s6008_s5, %s4979_s25 }
 0x71c   :  { %p4986_p11 = por %p4985_p10, %p4984_p9 }
 0x71e   :  { %p4987_p12 = pnand %p4986_p11, %p4980_p8 }
 0x720   :  { %4990 = shalt.err (!%p4987_p12)  }
 0x721   :  { %1466 = dma.hbm_to_vmem [thread:$0]  %s1454_s8, 16, %s7246_s20, [#allocation2] }
 0x722   :  { %s5923_s26 = smov [#allocation5 + $0x5b]   ;;  %s2777_s16 = sld [smem:[#allocation4 + $0x5c]] }
 0x723   :  { %s1479_s27 = sshll.u32 %s5923_s26, 4  ;;  %s5924_s30 = smov [#allocation5 + $0x5c]   ;;  %s1480_s27 = int_to_ptr.vmem [resolvable:$true] %s1479_s27 }
 0x724   :  { %s1495_s6 = sshll.u32 %s5924_s30, 4  ;;  %s7272_s0 = sld [smem:[#allocation4 + $0x5d]]  ;;  %s7274_s6 = int_to_ptr.vmem [resolvable:$true] %s1495_s6 }
 0x725   :  { %s2776_s22 = sshll.u32 %s2775_s18, 4 }
 0x726   :  { %s1470_s24 = scalar_lea.hbm %s7797_s1, %s2776_s22 }
 0x727   :  { %s4991_s9 = scalar_lea.hbm %s1470_s24, 16  ;;  %p4994_p0 = scmp.lt.s32.totalorder %s1470_s24, %s7797_s1 }
 0x728   :  { %p4992_p13 = scmp.ne.s32.totalorder %s1470_s24, %s4991_s9  ;;  %p4995_p1 = scmp.lt.s32.totalorder %s5999_s29, %s4991_s9 }
 0x72a   :  { %p4996_p2 = por %p4995_p1, %p4994_p0 }
 0x72c   :  { %p4997_p3 = pnand %p4996_p2, %p4992_p13 }
 0x72e   :  { %5000 = shalt.err (!%p4997_p3)  }
 0x72f   :  { %s5001_s20 = scalar_lea.vmem %s1480_s27, 16  ;;  %p5006_p5 = scmp.lt.s32.totalorder %s1480_s27, %s5982_s14 }
 0x730   :  { %p5002_p4 = scmp.ne.s32.totalorder %s1480_s27, %s5001_s20  ;;  %p5007_p7 = scmp.lt.s32.totalorder %s6008_s5, %s5001_s20 }
 0x732   :  { %p5008_p8 = por %p5007_p7, %p5006_p5 }
 0x734   :  { %p5009_p9 = pnand %p5008_p8, %p5002_p4 }
 0x736   :  { %5012 = shalt.err (!%p5009_p9)  }
 0x737   :  { %1482 = dma.hbm_to_vmem [thread:$0]  %s1470_s24, 16, %s1480_s27, [#allocation2] }
 0x738   :  { %s2778_s28 = sshll.u32 %s2777_s16, 4  ;;  %s5925_s15 = smov [#allocation5 + $0x5d]  }
 0x739   :  { %s1511_s3 = sshll.u32 %s5925_s15, 4  ;;  %s1486_s19 = scalar_lea.hbm %s7797_s1, %s2778_s28  ;;  %s7288_s3 = int_to_ptr.vmem [resolvable:$true] %s1511_s3 }
 0x73a   :  { %s5013_s21 = scalar_lea.hbm %s1486_s19, 16  ;;  %p5016_p11 = scmp.lt.s32.totalorder %s1486_s19, %s7797_s1 }
 0x73b   :  { %p5014_p10 = scmp.ne.s32.totalorder %s1486_s19, %s5013_s21  ;;  %p5017_p12 = scmp.lt.s32.totalorder %s5999_s29, %s5013_s21 }
 0x73d   :  { %p5018_p13 = por %p5017_p12, %p5016_p11 }
 0x73f   :  { %p5019_p0 = pnand %p5018_p13, %p5014_p10 }
 0x741   :  { %5022 = shalt.err (!%p5019_p0)  }
 0x742   :  { %s5023_s12 = scalar_lea.vmem %s7274_s6, 16  ;;  %p5028_p2 = scmp.lt.s32.totalorder %s7274_s6, %s5982_s14 }
 0x743   :  { %p5024_p1 = scmp.ne.s32.totalorder %s7274_s6, %s5023_s12  ;;  %p5029_p3 = scmp.lt.s32.totalorder %s6008_s5, %s5023_s12 }
 0x745   :  { %p5030_p4 = por %p5029_p3, %p5028_p2 }
 0x747   :  { %p5031_p5 = pnand %p5030_p4, %p5024_p1 }
 0x749   :  { %5034 = shalt.err (!%p5031_p5)  }
 0x74a   :  { %1498 = dma.hbm_to_vmem [thread:$0]  %s1486_s19, 16, %s7274_s6, [#allocation2] }
 0x74b   :  { %s2780_s13 = sshll.u32 %s7272_s0, 4  ;;  %s2781_s25 = sld [smem:[#allocation4 + $0x5e]] }
 0x74c   :  { %s1502_s16 = scalar_lea.hbm %s7797_s1, %s2780_s13 }
 0x74d   :  { %s5035_s30 = scalar_lea.hbm %s1502_s16, 16  ;;  %p5038_p8 = scmp.lt.s32.totalorder %s1502_s16, %s7797_s1 }
 0x74e   :  { %p5036_p7 = scmp.ne.s32.totalorder %s1502_s16, %s5035_s30  ;;  %p5039_p9 = scmp.lt.s32.totalorder %s5999_s29, %s5035_s30 }
 0x750   :  { %p5040_p10 = por %p5039_p9, %p5038_p8 }
 0x752   :  { %p5041_p11 = pnand %p5040_p10, %p5036_p7 }
 0x754   :  { %5044 = shalt.err (!%p5041_p11)  }
 0x755   :  { %s5045_s6 = scalar_lea.vmem %s7288_s3, 16  ;;  %p5050_p13 = scmp.lt.s32.totalorder %s7288_s3, %s5982_s14 }
 0x756   :  { %p5046_p12 = scmp.ne.s32.totalorder %s7288_s3, %s5045_s6  ;;  %p5051_p0 = scmp.lt.s32.totalorder %s6008_s5, %s5045_s6 }
 0x758   :  { %p5052_p1 = por %p5051_p0, %p5050_p13 }
 0x75a   :  { %p5053_p2 = pnand %p5052_p1, %p5046_p12 }
 0x75c   :  { %5056 = shalt.err (!%p5053_p2)  }
 0x75d   :  { %1514 = dma.hbm_to_vmem [thread:$0]  %s1502_s16, 16, %s7288_s3, [#allocation2] }
 0x75e   :  { %s5926_s0 = smov [#allocation5 + $0x5e]   ;;  %s2783_s24 = sld [smem:[#allocation4 + $0x5f]] }
 0x75f   :  { %s1527_s7 = sshll.u32 %s5926_s0, 4  ;;  %s5927_s9 = smov [#allocation5 + $0x5f]   ;;  %s1528_s7 = int_to_ptr.vmem [resolvable:$true] %s1527_s7 }
 0x760   :  { %s1543_s10 = sshll.u32 %s5927_s9, 4  ;;  %s7314_s11 = sld [smem:[#allocation4 + $0x60]]  ;;  %s7316_s10 = int_to_ptr.vmem [resolvable:$true] %s1543_s10 }
 0x761   :  { %s2782_s20 = sshll.u32 %s2781_s25, 4 }
 0x762   :  { %s1518_s4 = scalar_lea.hbm %s7797_s1, %s2782_s20 }
 0x763   :  { %s5057_s18 = scalar_lea.hbm %s1518_s4, 16  ;;  %p5060_p4 = scmp.lt.s32.totalorder %s1518_s4, %s7797_s1 }
 0x764   :  { %p5058_p3 = scmp.ne.s32.totalorder %s1518_s4, %s5057_s18  ;;  %p5061_p5 = scmp.lt.s32.totalorder %s5999_s29, %s5057_s18 }
 0x766   :  { %p5062_p7 = por %p5061_p5, %p5060_p4 }
 0x768   :  { %p5063_p8 = pnand %p5062_p7, %p5058_p3 }
 0x76a   :  { %5066 = shalt.err (!%p5063_p8)  }
 0x76b   :  { %s5067_s3 = scalar_lea.vmem %s1528_s7, 16  ;;  %p5072_p10 = scmp.lt.s32.totalorder %s1528_s7, %s5982_s14 }
 0x76c   :  { %p5068_p9 = scmp.ne.s32.totalorder %s1528_s7, %s5067_s3  ;;  %p5073_p11 = scmp.lt.s32.totalorder %s6008_s5, %s5067_s3 }
 0x76e   :  { %p5074_p12 = por %p5073_p11, %p5072_p10 }
 0x770   :  { %p5075_p13 = pnand %p5074_p12, %p5068_p9 }
 0x772   :  { %5078 = shalt.err (!%p5075_p13)  }
 0x773   :  { %1530 = dma.hbm_to_vmem [thread:$0]  %s1518_s4, 16, %s1528_s7, [#allocation2] }
 0x774   :  { %s2784_s8 = sshll.u32 %s2783_s24, 4  ;;  %s5928_s17 = smov [#allocation5 + $0x60]  }
 0x775   :  { %s1559_s12 = sshll.u32 %s5928_s17, 4  ;;  %s1534_s26 = scalar_lea.hbm %s7797_s1, %s2784_s8  ;;  %s7330_s12 = int_to_ptr.vmem [resolvable:$true] %s1559_s12 }
 0x776   :  { %s5079_s27 = scalar_lea.hbm %s1534_s26, 16  ;;  %p5082_p1 = scmp.lt.s32.totalorder %s1534_s26, %s7797_s1 }
 0x777   :  { %p5080_p0 = scmp.ne.s32.totalorder %s1534_s26, %s5079_s27  ;;  %p5083_p2 = scmp.lt.s32.totalorder %s5999_s29, %s5079_s27 }
 0x779   :  { %p5084_p3 = por %p5083_p2, %p5082_p1 }
 0x77b   :  { %p5085_p4 = pnand %p5084_p3, %p5080_p0 }
 0x77d   :  { %5088 = shalt.err (!%p5085_p4)  }
 0x77e   :  { %s5089_s22 = scalar_lea.vmem %s7316_s10, 16  ;;  %p5094_p7 = scmp.lt.s32.totalorder %s7316_s10, %s5982_s14 }
 0x77f   :  { %p5090_p5 = scmp.ne.s32.totalorder %s7316_s10, %s5089_s22  ;;  %p5095_p8 = scmp.lt.s32.totalorder %s6008_s5, %s5089_s22 }
 0x781   :  { %p5096_p9 = por %p5095_p8, %p5094_p7 }
 0x783   :  { %p5097_p10 = pnand %p5096_p9, %p5090_p5 }
 0x785   :  { %5100 = shalt.err (!%p5097_p10)  }
 0x786   :  { %1546 = dma.hbm_to_vmem [thread:$0]  %s1534_s26, 16, %s7316_s10, [#allocation2] }
 0x787   :  { %s2786_s23 = sshll.u32 %s7314_s11, 4  ;;  %s2787_s6 = sld [smem:[#allocation4 + $0x61]] }
 0x788   :  { %s1550_s24 = scalar_lea.hbm %s7797_s1, %s2786_s23 }
 0x789   :  { %s5101_s9 = scalar_lea.hbm %s1550_s24, 16  ;;  %p5104_p12 = scmp.lt.s32.totalorder %s1550_s24, %s7797_s1 }
 0x78a   :  { %p5102_p11 = scmp.ne.s32.totalorder %s1550_s24, %s5101_s9  ;;  %p5105_p13 = scmp.lt.s32.totalorder %s5999_s29, %s5101_s9 }
 0x78c   :  { %p5106_p0 = por %p5105_p13, %p5104_p12 }
 0x78e   :  { %p5107_p1 = pnand %p5106_p0, %p5102_p11 }
 0x790   :  { %5110 = shalt.err (!%p5107_p1)  }
 0x791   :  { %s5111_s10 = scalar_lea.vmem %s7330_s12, 16  ;;  %p5116_p3 = scmp.lt.s32.totalorder %s7330_s12, %s5982_s14 }
 0x792   :  { %p5112_p2 = scmp.ne.s32.totalorder %s7330_s12, %s5111_s10  ;;  %p5117_p4 = scmp.lt.s32.totalorder %s6008_s5, %s5111_s10 }
 0x794   :  { %p5118_p5 = por %p5117_p4, %p5116_p3 }
 0x796   :  { %p5119_p7 = pnand %p5118_p5, %p5112_p2 }
 0x798   :  { %5122 = shalt.err (!%p5119_p7)  }
 0x799   :  { %1562 = dma.hbm_to_vmem [thread:$0]  %s1550_s24, 16, %s7330_s12, [#allocation2] }
 0x79a   :  { %s5929_s11 = smov [#allocation5 + $0x61]   ;;  %s2789_s4 = sld [smem:[#allocation4 + $0x62]] }
 0x79b   :  { %s1575_s15 = sshll.u32 %s5929_s11, 4  ;;  %s5930_s18 = smov [#allocation5 + $0x62]   ;;  %s1576_s15 = int_to_ptr.vmem [resolvable:$true] %s1575_s15 }
 0x79c   :  { %s1591_s19 = sshll.u32 %s5930_s18, 4  ;;  %s7356_s21 = sld [smem:[#allocation4 + $0x63]]  ;;  %s7358_s19 = int_to_ptr.vmem [resolvable:$true] %s1591_s19 }
 0x79d   :  { %s2788_s3 = sshll.u32 %s2787_s6, 4 }
 0x79e   :  { %s1566_s13 = scalar_lea.hbm %s7797_s1, %s2788_s3 }
 0x79f   :  { %s5123_s25 = scalar_lea.hbm %s1566_s13, 16  ;;  %p5126_p9 = scmp.lt.s32.totalorder %s1566_s13, %s7797_s1 }
 0x7a0   :  { %p5124_p8 = scmp.ne.s32.totalorder %s1566_s13, %s5123_s25  ;;  %p5127_p10 = scmp.lt.s32.totalorder %s5999_s29, %s5123_s25 }
 0x7a2   :  { %p5128_p11 = por %p5127_p10, %p5126_p9 }
 0x7a4   :  { %p5129_p12 = pnand %p5128_p11, %p5124_p8 }
 0x7a6   :  { %5132 = shalt.err (!%p5129_p12)  }
 0x7a7   :  { %s5133_s12 = scalar_lea.vmem %s1576_s15, 16  ;;  %p5138_p0 = scmp.lt.s32.totalorder %s1576_s15, %s5982_s14 }
 0x7a8   :  { %p5134_p13 = scmp.ne.s32.totalorder %s1576_s15, %s5133_s12  ;;  %p5139_p1 = scmp.lt.s32.totalorder %s6008_s5, %s5133_s12 }
 0x7aa   :  { %p5140_p2 = por %p5139_p1, %p5138_p0 }
 0x7ac   :  { %p5141_p3 = pnand %p5140_p2, %p5134_p13 }
 0x7ae   :  { %5144 = shalt.err (!%p5141_p3)  }
 0x7af   :  { %1578 = dma.hbm_to_vmem [thread:$0]  %s1566_s13, 16, %s1576_s15, [#allocation2] }
 0x7b0   :  { %s2790_s16 = sshll.u32 %s2789_s4, 4  ;;  %s5931_s30 = smov [#allocation5 + $0x63]  }
 0x7b1   :  { %s1607_s22 = sshll.u32 %s5931_s30, 4  ;;  %s1582_s0 = scalar_lea.hbm %s7797_s1, %s2790_s16  ;;  %s7372_s22 = int_to_ptr.vmem [resolvable:$true] %s1607_s22 }
 0x7b2   :  { %s5145_s7 = scalar_lea.hbm %s1582_s0, 16  ;;  %p5148_p5 = scmp.lt.s32.totalorder %s1582_s0, %s7797_s1 }
 0x7b3   :  { %p5146_p4 = scmp.ne.s32.totalorder %s1582_s0, %s5145_s7  ;;  %p5149_p7 = scmp.lt.s32.totalorder %s5999_s29, %s5145_s7 }
 0x7b5   :  { %p5150_p8 = por %p5149_p7, %p5148_p5 }
 0x7b7   :  { %p5151_p9 = pnand %p5150_p8, %p5146_p4 }
 0x7b9   :  { %5154 = shalt.err (!%p5151_p9)  }
 0x7ba   :  { %s5155_s20 = scalar_lea.vmem %s7358_s19, 16  ;;  %p5160_p11 = scmp.lt.s32.totalorder %s7358_s19, %s5982_s14 }
 0x7bb   :  { %p5156_p10 = scmp.ne.s32.totalorder %s7358_s19, %s5155_s20  ;;  %p5161_p12 = scmp.lt.s32.totalorder %s6008_s5, %s5155_s20 }
 0x7bd   :  { %p5162_p13 = por %p5161_p12, %p5160_p11 }
 0x7bf   :  { %p5163_p0 = pnand %p5162_p13, %p5156_p10 }
 0x7c1   :  { %5166 = shalt.err (!%p5163_p0)  }
 0x7c2   :  { %1594 = dma.hbm_to_vmem [thread:$0]  %s1582_s0, 16, %s7358_s19, [#allocation2] }
 0x7c3   :  { %s2792_s28 = sshll.u32 %s7356_s21, 4  ;;  %s2793_s10 = sld [smem:[#allocation4 + $0x64]] }
 0x7c4   :  { %s1598_s4 = scalar_lea.hbm %s7797_s1, %s2792_s28 }
 0x7c5   :  { %s5167_s18 = scalar_lea.hbm %s1598_s4, 16  ;;  %p5170_p2 = scmp.lt.s32.totalorder %s1598_s4, %s7797_s1 }
 0x7c6   :  { %p5168_p1 = scmp.ne.s32.totalorder %s1598_s4, %s5167_s18  ;;  %p5171_p3 = scmp.lt.s32.totalorder %s5999_s29, %s5167_s18 }
 0x7c8   :  { %p5172_p4 = por %p5171_p3, %p5170_p2 }
 0x7ca   :  { %p5173_p5 = pnand %p5172_p4, %p5168_p1 }
 0x7cc   :  { %5176 = shalt.err (!%p5173_p5)  }
 0x7cd   :  { %s5177_s19 = scalar_lea.vmem %s7372_s22, 16  ;;  %p5182_p8 = scmp.lt.s32.totalorder %s7372_s22, %s5982_s14 }
 0x7ce   :  { %p5178_p7 = scmp.ne.s32.totalorder %s7372_s22, %s5177_s19  ;;  %p5183_p9 = scmp.lt.s32.totalorder %s6008_s5, %s5177_s19 }
 0x7d0   :  { %p5184_p10 = por %p5183_p9, %p5182_p8 }
 0x7d2   :  { %p5185_p11 = pnand %p5184_p10, %p5178_p7 }
 0x7d4   :  { %5188 = shalt.err (!%p5185_p11)  }
 0x7d5   :  { %1610 = dma.hbm_to_vmem [thread:$0]  %s1598_s4, 16, %s7372_s22, [#allocation2] }
 0x7d6   :  { %s5932_s21 = smov [#allocation5 + $0x64]   ;;  %s2795_s13 = sld [smem:[#allocation4 + $0x65]] }
 0x7d7   :  { %s1623_s17 = sshll.u32 %s5932_s21, 4  ;;  %s5933_s25 = smov [#allocation5 + $0x65]   ;;  %s1624_s17 = int_to_ptr.vmem [resolvable:$true] %s1623_s17 }
 0x7d8   :  { %s1639_s26 = sshll.u32 %s5933_s25, 4  ;;  %s7398_s27 = sld [smem:[#allocation4 + $0x66]]  ;;  %s7400_s26 = int_to_ptr.vmem [resolvable:$true] %s1639_s26 }
 0x7d9   :  { %s2794_s12 = sshll.u32 %s2793_s10, 4 }
 0x7da   :  { %s1614_s23 = scalar_lea.hbm %s7797_s1, %s2794_s12 }
 0x7db   :  { %s5189_s6 = scalar_lea.hbm %s1614_s23, 16  ;;  %p5192_p13 = scmp.lt.s32.totalorder %s1614_s23, %s7797_s1 }
 0x7dc   :  { %p5190_p12 = scmp.ne.s32.totalorder %s1614_s23, %s5189_s6  ;;  %p5193_p0 = scmp.lt.s32.totalorder %s5999_s29, %s5189_s6 }
 0x7de   :  { %p5194_p1 = por %p5193_p0, %p5192_p13 }
 0x7e0   :  { %p5195_p2 = pnand %p5194_p1, %p5190_p12 }
 0x7e2   :  { %5198 = shalt.err (!%p5195_p2)  }
 0x7e3   :  { %s5199_s22 = scalar_lea.vmem %s1624_s17, 16  ;;  %p5204_p4 = scmp.lt.s32.totalorder %s1624_s17, %s5982_s14 }
 0x7e4   :  { %p5200_p3 = scmp.ne.s32.totalorder %s1624_s17, %s5199_s22  ;;  %p5205_p5 = scmp.lt.s32.totalorder %s6008_s5, %s5199_s22 }
 0x7e6   :  { %p5206_p7 = por %p5205_p5, %p5204_p4 }
 0x7e8   :  { %p5207_p8 = pnand %p5206_p7, %p5200_p3 }
 0x7ea   :  { %5210 = shalt.err (!%p5207_p8)  }
 0x7eb   :  { %1626 = dma.hbm_to_vmem [thread:$0]  %s1614_s23, 16, %s1624_s17, [#allocation2] }
 0x7ec   :  { %s2796_s24 = sshll.u32 %s2795_s13, 4  ;;  %s5934_s9 = smov [#allocation5 + $0x66]  }
 0x7ed   :  { %s1655_s20 = sshll.u32 %s5934_s9, 4  ;;  %s1630_s11 = scalar_lea.hbm %s7797_s1, %s2796_s24  ;;  %s7414_s20 = int_to_ptr.vmem [resolvable:$true] %s1655_s20 }
 0x7ee   :  { %s5211_s15 = scalar_lea.hbm %s1630_s11, 16  ;;  %p5214_p10 = scmp.lt.s32.totalorder %s1630_s11, %s7797_s1 }
 0x7ef   :  { %p5212_p9 = scmp.ne.s32.totalorder %s1630_s11, %s5211_s15  ;;  %p5215_p11 = scmp.lt.s32.totalorder %s5999_s29, %s5211_s15 }
 0x7f1   :  { %p5216_p12 = por %p5215_p11, %p5214_p10 }
 0x7f3   :  { %p5217_p13 = pnand %p5216_p12, %p5212_p9 }
 0x7f5   :  { %5220 = shalt.err (!%p5217_p13)  }
 0x7f6   :  { %s5221_s3 = scalar_lea.vmem %s7400_s26, 16  ;;  %p5226_p1 = scmp.lt.s32.totalorder %s7400_s26, %s5982_s14 }
 0x7f7   :  { %p5222_p0 = scmp.ne.s32.totalorder %s7400_s26, %s5221_s3  ;;  %p5227_p2 = scmp.lt.s32.totalorder %s6008_s5, %s5221_s3 }
 0x7f9   :  { %p5228_p3 = por %p5227_p2, %p5226_p1 }
 0x7fb   :  { %p5229_p4 = pnand %p5228_p3, %p5222_p0 }
 0x7fd   :  { %5232 = shalt.err (!%p5229_p4)  }
 0x7fe   :  { %1642 = dma.hbm_to_vmem [thread:$0]  %s1630_s11, 16, %s7400_s26, [#allocation2] }
 0x7ff   :  { %s2798_s8 = sshll.u32 %s7398_s27, 4  ;;  %s2799_s19 = sld [smem:[#allocation4 + $0x67]] }
 0x800   :  { %s1646_s13 = scalar_lea.hbm %s7797_s1, %s2798_s8 }
 0x801   :  { %s5233_s25 = scalar_lea.hbm %s1646_s13, 16  ;;  %p5236_p7 = scmp.lt.s32.totalorder %s1646_s13, %s7797_s1 }
 0x802   :  { %p5234_p5 = scmp.ne.s32.totalorder %s1646_s13, %s5233_s25  ;;  %p5237_p8 = scmp.lt.s32.totalorder %s5999_s29, %s5233_s25 }
 0x804   :  { %p5238_p9 = por %p5237_p8, %p5236_p7 }
 0x806   :  { %p5239_p10 = pnand %p5238_p9, %p5234_p5 }
 0x808   :  { %5242 = shalt.err (!%p5239_p10)  }
 0x809   :  { %s5243_s26 = scalar_lea.vmem %s7414_s20, 16  ;;  %p5248_p12 = scmp.lt.s32.totalorder %s7414_s20, %s5982_s14 }
 0x80a   :  { %p5244_p11 = scmp.ne.s32.totalorder %s7414_s20, %s5243_s26  ;;  %p5249_p13 = scmp.lt.s32.totalorder %s6008_s5, %s5243_s26 }
 0x80c   :  { %p5250_p0 = por %p5249_p13, %p5248_p12 }
 0x80e   :  { %p5251_p1 = pnand %p5250_p0, %p5244_p11 }
 0x810   :  { %5254 = shalt.err (!%p5251_p1)  }
 0x811   :  { %1658 = dma.hbm_to_vmem [thread:$0]  %s1646_s13, 16, %s7414_s20, [#allocation2] }
 0x812   :  { %s5935_s27 = smov [#allocation5 + $0x67]   ;;  %s2801_s23 = sld [smem:[#allocation4 + $0x68]] }
 0x813   :  { %s1671_s30 = sshll.u32 %s5935_s27, 4  ;;  %s5936_s6 = smov [#allocation5 + $0x68]   ;;  %s1672_s30 = int_to_ptr.vmem [resolvable:$true] %s1671_s30 }
 0x814   :  { %s1687_s0 = sshll.u32 %s5936_s6, 4  ;;  %s7440_s7 = sld [smem:[#allocation4 + $0x69]]  ;;  %s7442_s0 = int_to_ptr.vmem [resolvable:$true] %s1687_s0 }
 0x815   :  { %s2800_s22 = sshll.u32 %s2799_s19, 4 }
 0x816   :  { %s1662_s28 = scalar_lea.hbm %s7797_s1, %s2800_s22 }
 0x817   :  { %s5255_s10 = scalar_lea.hbm %s1662_s28, 16  ;;  %p5258_p3 = scmp.lt.s32.totalorder %s1662_s28, %s7797_s1 }
 0x818   :  { %p5256_p2 = scmp.ne.s32.totalorder %s1662_s28, %s5255_s10  ;;  %p5259_p4 = scmp.lt.s32.totalorder %s5999_s29, %s5255_s10 }
 0x81a   :  { %p5260_p5 = por %p5259_p4, %p5258_p3 }
 0x81c   :  { %p5261_p7 = pnand %p5260_p5, %p5256_p2 }
 0x81e   :  { %5264 = shalt.err (!%p5261_p7)  }
 0x81f   :  { %s5265_s20 = scalar_lea.vmem %s1672_s30, 16  ;;  %p5270_p9 = scmp.lt.s32.totalorder %s1672_s30, %s5982_s14 }
 0x820   :  { %p5266_p8 = scmp.ne.s32.totalorder %s1672_s30, %s5265_s20  ;;  %p5271_p10 = scmp.lt.s32.totalorder %s6008_s5, %s5265_s20 }
 0x822   :  { %p5272_p11 = por %p5271_p10, %p5270_p9 }
 0x824   :  { %p5273_p12 = pnand %p5272_p11, %p5266_p8 }
 0x826   :  { %5276 = shalt.err (!%p5273_p12)  }
 0x827   :  { %1674 = dma.hbm_to_vmem [thread:$0]  %s1662_s28, 16, %s1672_s30, [#allocation2] }
 0x828   :  { %s2802_s4 = sshll.u32 %s2801_s23, 4  ;;  %s5937_s18 = smov [#allocation5 + $0x69]  }
 0x829   :  { %s1703_s3 = sshll.u32 %s5937_s18, 4  ;;  %s1678_s21 = scalar_lea.hbm %s7797_s1, %s2802_s4  ;;  %s7456_s3 = int_to_ptr.vmem [resolvable:$true] %s1703_s3 }
 0x82a   :  { %s5277_s17 = scalar_lea.hbm %s1678_s21, 16  ;;  %p5280_p0 = scmp.lt.s32.totalorder %s1678_s21, %s7797_s1 }
 0x82b   :  { %p5278_p13 = scmp.ne.s32.totalorder %s1678_s21, %s5277_s17  ;;  %p5281_p1 = scmp.lt.s32.totalorder %s5999_s29, %s5277_s17 }
 0x82d   :  { %p5282_p2 = por %p5281_p1, %p5280_p0 }
 0x82f   :  { %p5283_p3 = pnand %p5282_p2, %p5278_p13 }
 0x831   :  { %5286 = shalt.err (!%p5283_p3)  }
 0x832   :  { %s5287_s12 = scalar_lea.vmem %s7442_s0, 16  ;;  %p5292_p5 = scmp.lt.s32.totalorder %s7442_s0, %s5982_s14 }
 0x833   :  { %p5288_p4 = scmp.ne.s32.totalorder %s7442_s0, %s5287_s12  ;;  %p5293_p7 = scmp.lt.s32.totalorder %s6008_s5, %s5287_s12 }
 0x835   :  { %p5294_p8 = por %p5293_p7, %p5292_p5 }
 0x837   :  { %p5295_p9 = pnand %p5294_p8, %p5288_p4 }
 0x839   :  { %5298 = shalt.err (!%p5295_p9)  }
 0x83a   :  { %1690 = dma.hbm_to_vmem [thread:$0]  %s1678_s21, 16, %s7442_s0, [#allocation2] }
 0x83b   :  { %s2804_s16 = sshll.u32 %s7440_s7, 4  ;;  %s2805_s26 = sld [smem:[#allocation4 + $0x6a]] }
 0x83c   :  { %s1694_s23 = scalar_lea.hbm %s7797_s1, %s2804_s16 }
 0x83d   :  { %s5299_s6 = scalar_lea.hbm %s1694_s23, 16  ;;  %p5302_p11 = scmp.lt.s32.totalorder %s1694_s23, %s7797_s1 }
 0x83e   :  { %p5300_p10 = scmp.ne.s32.totalorder %s1694_s23, %s5299_s6  ;;  %p5303_p12 = scmp.lt.s32.totalorder %s5999_s29, %s5299_s6 }
 0x840   :  { %p5304_p13 = por %p5303_p12, %p5302_p11 }
 0x842   :  { %p5305_p0 = pnand %p5304_p13, %p5300_p10 }
 0x844   :  { %5308 = shalt.err (!%p5305_p0)  }
 0x845   :  { %s5309_s0 = scalar_lea.vmem %s7456_s3, 16  ;;  %p5314_p2 = scmp.lt.s32.totalorder %s7456_s3, %s5982_s14 }
 0x846   :  { %p5310_p1 = scmp.ne.s32.totalorder %s7456_s3, %s5309_s0  ;;  %p5315_p3 = scmp.lt.s32.totalorder %s6008_s5, %s5309_s0 }
 0x848   :  { %p5316_p4 = por %p5315_p3, %p5314_p2 }
 0x84a   :  { %p5317_p5 = pnand %p5316_p4, %p5310_p1 }
 0x84c   :  { %5320 = shalt.err (!%p5317_p5)  }
 0x84d   :  { %1706 = dma.hbm_to_vmem [thread:$0]  %s1694_s23, 16, %s7456_s3, [#allocation2] }
 0x84e   :  { %s5938_s7 = smov [#allocation5 + $0x6a]   ;;  %s2807_s28 = sld [smem:[#allocation4 + $0x6b]] }
 0x84f   :  { %s1719_s9 = sshll.u32 %s5938_s7, 4  ;;  %s5939_s10 = smov [#allocation5 + $0x6b]   ;;  %s1720_s9 = int_to_ptr.vmem [resolvable:$true] %s1719_s9 }
 0x850   :  { %s1735_s11 = sshll.u32 %s5939_s10, 4  ;;  %s7482_s15 = sld [smem:[#allocation4 + $0x6c]]  ;;  %s7484_s11 = int_to_ptr.vmem [resolvable:$true] %s1735_s11 }
 0x851   :  { %s2806_s20 = sshll.u32 %s2805_s26, 4 }
 0x852   :  { %s1710_s8 = scalar_lea.hbm %s7797_s1, %s2806_s20 }
 0x853   :  { %s5321_s19 = scalar_lea.hbm %s1710_s8, 16  ;;  %p5324_p8 = scmp.lt.s32.totalorder %s1710_s8, %s7797_s1 }
 0x854   :  { %p5322_p7 = scmp.ne.s32.totalorder %s1710_s8, %s5321_s19  ;;  %p5325_p9 = scmp.lt.s32.totalorder %s5999_s29, %s5321_s19 }
 0x856   :  { %p5326_p10 = por %p5325_p9, %p5324_p8 }
 0x858   :  { %p5327_p11 = pnand %p5326_p10, %p5322_p7 }
 0x85a   :  { %5330 = shalt.err (!%p5327_p11)  }
 0x85b   :  { %s5331_s3 = scalar_lea.vmem %s1720_s9, 16  ;;  %p5336_p13 = scmp.lt.s32.totalorder %s1720_s9, %s5982_s14 }
 0x85c   :  { %p5332_p12 = scmp.ne.s32.totalorder %s1720_s9, %s5331_s3  ;;  %p5337_p0 = scmp.lt.s32.totalorder %s6008_s5, %s5331_s3 }
 0x85e   :  { %p5338_p1 = por %p5337_p0, %p5336_p13 }
 0x860   :  { %p5339_p2 = pnand %p5338_p1, %p5332_p12 }
 0x862   :  { %5342 = shalt.err (!%p5339_p2)  }
 0x863   :  { %1722 = dma.hbm_to_vmem [thread:$0]  %s1710_s8, 16, %s1720_s9, [#allocation2] }
 0x864   :  { %s2808_s13 = sshll.u32 %s2807_s28, 4  ;;  %s5940_s25 = smov [#allocation5 + $0x6c]  }
 0x865   :  { %s1751_s12 = sshll.u32 %s5940_s25, 4  ;;  %s1726_s27 = scalar_lea.hbm %s7797_s1, %s2808_s13  ;;  %s7498_s12 = int_to_ptr.vmem [resolvable:$true] %s1751_s12 }
 0x866   :  { %s5343_s30 = scalar_lea.hbm %s1726_s27, 16  ;;  %p5346_p4 = scmp.lt.s32.totalorder %s1726_s27, %s7797_s1 }
 0x867   :  { %p5344_p3 = scmp.ne.s32.totalorder %s1726_s27, %s5343_s30  ;;  %p5347_p5 = scmp.lt.s32.totalorder %s5999_s29, %s5343_s30 }
 0x869   :  { %p5348_p7 = por %p5347_p5, %p5346_p4 }
 0x86b   :  { %p5349_p8 = pnand %p5348_p7, %p5344_p3 }
 0x86d   :  { %5352 = shalt.err (!%p5349_p8)  }
 0x86e   :  { %s5353_s22 = scalar_lea.vmem %s7484_s11, 16  ;;  %p5358_p10 = scmp.lt.s32.totalorder %s7484_s11, %s5982_s14 }
 0x86f   :  { %p5354_p9 = scmp.ne.s32.totalorder %s7484_s11, %s5353_s22  ;;  %p5359_p11 = scmp.lt.s32.totalorder %s6008_s5, %s5353_s22 }
 0x871   :  { %p5360_p12 = por %p5359_p11, %p5358_p10 }
 0x873   :  { %p5361_p13 = pnand %p5360_p12, %p5354_p9 }
 0x875   :  { %5364 = shalt.err (!%p5361_p13)  }
 0x876   :  { %1738 = dma.hbm_to_vmem [thread:$0]  %s1726_s27, 16, %s7484_s11, [#allocation2] }
 0x877   :  { %s2810_s24 = sshll.u32 %s7482_s15, 4  ;;  %s2811_s0 = sld [smem:[#allocation4 + $0x6d]] }
 0x878   :  { %s1742_s28 = scalar_lea.hbm %s7797_s1, %s2810_s24 }
 0x879   :  { %s5365_s10 = scalar_lea.hbm %s1742_s28, 16  ;;  %p5368_p1 = scmp.lt.s32.totalorder %s1742_s28, %s7797_s1 }
 0x87a   :  { %p5366_p0 = scmp.ne.s32.totalorder %s1742_s28, %s5365_s10  ;;  %p5369_p2 = scmp.lt.s32.totalorder %s5999_s29, %s5365_s10 }
 0x87c   :  { %p5370_p3 = por %p5369_p2, %p5368_p1 }
 0x87e   :  { %p5371_p4 = pnand %p5370_p3, %p5366_p0 }
 0x880   :  { %5374 = shalt.err (!%p5371_p4)  }
 0x881   :  { %s5375_s11 = scalar_lea.vmem %s7498_s12, 16  ;;  %p5380_p7 = scmp.lt.s32.totalorder %s7498_s12, %s5982_s14 }
 0x882   :  { %p5376_p5 = scmp.ne.s32.totalorder %s7498_s12, %s5375_s11  ;;  %p5381_p8 = scmp.lt.s32.totalorder %s6008_s5, %s5375_s11 }
 0x884   :  { %p5382_p9 = por %p5381_p8, %p5380_p7 }
 0x886   :  { %p5383_p10 = pnand %p5382_p9, %p5376_p5 }
 0x888   :  { %5386 = shalt.err (!%p5383_p10)  }
 0x889   :  { %1754 = dma.hbm_to_vmem [thread:$0]  %s1742_s28, 16, %s7498_s12, [#allocation2] }
 0x88a   :  { %s5941_s15 = smov [#allocation5 + $0x6d]   ;;  %s2813_s8 = sld [smem:[#allocation4 + $0x6e]] }
 0x88b   :  { %s1767_s18 = sshll.u32 %s5941_s15, 4  ;;  %s5942_s19 = smov [#allocation5 + $0x6e]   ;;  %s1768_s18 = int_to_ptr.vmem [resolvable:$true] %s1767_s18 }
 0x88c   :  { %s1783_s21 = sshll.u32 %s5942_s19, 4  ;;  %s7524_s17 = sld [smem:[#allocation4 + $0x6f]]  ;;  %s7526_s21 = int_to_ptr.vmem [resolvable:$true] %s1783_s21 }
 0x88d   :  { %s2812_s3 = sshll.u32 %s2811_s0, 4 }
 0x88e   :  { %s1758_s16 = scalar_lea.hbm %s7797_s1, %s2812_s3 }
 0x88f   :  { %s5387_s26 = scalar_lea.hbm %s1758_s16, 16  ;;  %p5390_p12 = scmp.lt.s32.totalorder %s1758_s16, %s7797_s1 }
 0x890   :  { %p5388_p11 = scmp.ne.s32.totalorder %s1758_s16, %s5387_s26  ;;  %p5391_p13 = scmp.lt.s32.totalorder %s5999_s29, %s5387_s26 }
 0x892   :  { %p5392_p0 = por %p5391_p13, %p5390_p12 }
 0x894   :  { %p5393_p1 = pnand %p5392_p0, %p5388_p11 }
 0x896   :  { %5396 = shalt.err (!%p5393_p1)  }
 0x897   :  { %s5397_s12 = scalar_lea.vmem %s1768_s18, 16  ;;  %p5402_p3 = scmp.lt.s32.totalorder %s1768_s18, %s5982_s14 }
 0x898   :  { %p5398_p2 = scmp.ne.s32.totalorder %s1768_s18, %s5397_s12  ;;  %p5403_p4 = scmp.lt.s32.totalorder %s6008_s5, %s5397_s12 }
 0x89a   :  { %p5404_p5 = por %p5403_p4, %p5402_p3 }
 0x89c   :  { %p5405_p7 = pnand %p5404_p5, %p5398_p2 }
 0x89e   :  { %5408 = shalt.err (!%p5405_p7)  }
 0x89f   :  { %1770 = dma.hbm_to_vmem [thread:$0]  %s1758_s16, 16, %s1768_s18, [#allocation2] }
 0x8a0   :  { %s2814_s23 = sshll.u32 %s2813_s8, 4  ;;  %s5943_s6 = smov [#allocation5 + $0x6f]  }
 0x8a1   :  { %s1799_s22 = sshll.u32 %s5943_s6, 4  ;;  %s1774_s7 = scalar_lea.hbm %s7797_s1, %s2814_s23  ;;  %s7540_s22 = int_to_ptr.vmem [resolvable:$true] %s1799_s22 }
 0x8a2   :  { %s5409_s9 = scalar_lea.hbm %s1774_s7, 16  ;;  %p5412_p9 = scmp.lt.s32.totalorder %s1774_s7, %s7797_s1 }
 0x8a3   :  { %p5410_p8 = scmp.ne.s32.totalorder %s1774_s7, %s5409_s9  ;;  %p5413_p10 = scmp.lt.s32.totalorder %s5999_s29, %s5409_s9 }
 0x8a5   :  { %p5414_p11 = por %p5413_p10, %p5412_p9 }
 0x8a7   :  { %p5415_p12 = pnand %p5414_p11, %p5410_p8 }
 0x8a9   :  { %5418 = shalt.err (!%p5415_p12)  }
 0x8aa   :  { %s5419_s20 = scalar_lea.vmem %s7526_s21, 16  ;;  %p5424_p0 = scmp.lt.s32.totalorder %s7526_s21, %s5982_s14 }
 0x8ab   :  { %p5420_p13 = scmp.ne.s32.totalorder %s7526_s21, %s5419_s20  ;;  %p5425_p1 = scmp.lt.s32.totalorder %s6008_s5, %s5419_s20 }
 0x8ad   :  { %p5426_p2 = por %p5425_p1, %p5424_p0 }
 0x8af   :  { %p5427_p3 = pnand %p5426_p2, %p5420_p13 }
 0x8b1   :  { %5430 = shalt.err (!%p5427_p3)  }
 0x8b2   :  { %1786 = dma.hbm_to_vmem [thread:$0]  %s1774_s7, 16, %s7526_s21, [#allocation2] }
 0x8b3   :  { %s2816_s4 = sshll.u32 %s7524_s17, 4  ;;  %s2817_s11 = sld [smem:[#allocation4 + $0x70]] }
 0x8b4   :  { %s1790_s8 = scalar_lea.hbm %s7797_s1, %s2816_s4 }
 0x8b5   :  { %s5431_s19 = scalar_lea.hbm %s1790_s8, 16  ;;  %p5434_p5 = scmp.lt.s32.totalorder %s1790_s8, %s7797_s1 }
 0x8b6   :  { %p5432_p4 = scmp.ne.s32.totalorder %s1790_s8, %s5431_s19  ;;  %p5435_p7 = scmp.lt.s32.totalorder %s5999_s29, %s5431_s19 }
 0x8b8   :  { %p5436_p8 = por %p5435_p7, %p5434_p5 }
 0x8ba   :  { %p5437_p9 = pnand %p5436_p8, %p5432_p4 }
 0x8bc   :  { %5440 = shalt.err (!%p5437_p9)  }
 0x8bd   :  { %s5441_s21 = scalar_lea.vmem %s7540_s22, 16  ;;  %p5446_p11 = scmp.lt.s32.totalorder %s7540_s22, %s5982_s14 }
 0x8be   :  { %p5442_p10 = scmp.ne.s32.totalorder %s7540_s22, %s5441_s21  ;;  %p5447_p12 = scmp.lt.s32.totalorder %s6008_s5, %s5441_s21 }
 0x8c0   :  { %p5448_p13 = por %p5447_p12, %p5446_p11 }
 0x8c2   :  { %p5449_p0 = pnand %p5448_p13, %p5442_p10 }
 0x8c4   :  { %5452 = shalt.err (!%p5449_p0)  }
 0x8c5   :  { %1802 = dma.hbm_to_vmem [thread:$0]  %s1790_s8, 16, %s7540_s22, [#allocation2] }
 0x8c6   :  { %s5944_s17 = smov [#allocation5 + $0x70]   ;;  %s2819_s16 = sld [smem:[#allocation4 + $0x71]] }
 0x8c7   :  { %s1815_s25 = sshll.u32 %s5944_s17, 4  ;;  %s5945_s26 = smov [#allocation5 + $0x71]   ;;  %s1816_s25 = int_to_ptr.vmem [resolvable:$true] %s1815_s25 }
 0x8c8   :  { %s1831_s27 = sshll.u32 %s5945_s26, 4  ;;  %s7566_s30 = sld [smem:[#allocation4 + $0x72]]  ;;  %s7568_s27 = int_to_ptr.vmem [resolvable:$true] %s1831_s27 }
 0x8c9   :  { %s2818_s12 = sshll.u32 %s2817_s11, 4 }
 0x8ca   :  { %s1806_s24 = scalar_lea.hbm %s7797_s1, %s2818_s12 }
 0x8cb   :  { %s5453_s0 = scalar_lea.hbm %s1806_s24, 16  ;;  %p5456_p2 = scmp.lt.s32.totalorder %s1806_s24, %s7797_s1 }
 0x8cc   :  { %p5454_p1 = scmp.ne.s32.totalorder %s1806_s24, %s5453_s0  ;;  %p5457_p3 = scmp.lt.s32.totalorder %s5999_s29, %s5453_s0 }
 0x8ce   :  { %p5458_p4 = por %p5457_p3, %p5456_p2 }
 0x8d0   :  { %p5459_p5 = pnand %p5458_p4, %p5454_p1 }
 0x8d2   :  { %5462 = shalt.err (!%p5459_p5)  }
 0x8d3   :  { %s5463_s22 = scalar_lea.vmem %s1816_s25, 16  ;;  %p5468_p8 = scmp.lt.s32.totalorder %s1816_s25, %s5982_s14 }
 0x8d4   :  { %p5464_p7 = scmp.ne.s32.totalorder %s1816_s25, %s5463_s22  ;;  %p5469_p9 = scmp.lt.s32.totalorder %s6008_s5, %s5463_s22 }
 0x8d6   :  { %p5470_p10 = por %p5469_p9, %p5468_p8 }
 0x8d8   :  { %p5471_p11 = pnand %p5470_p10, %p5464_p7 }
 0x8da   :  { %5474 = shalt.err (!%p5471_p11)  }
 0x8db   :  { %1818 = dma.hbm_to_vmem [thread:$0]  %s1806_s24, 16, %s1816_s25, [#allocation2] }
 0x8dc   :  { %s2820_s28 = sshll.u32 %s2819_s16, 4  ;;  %s5946_s10 = smov [#allocation5 + $0x72]  }
 0x8dd   :  { %s1847_s20 = sshll.u32 %s5946_s10, 4  ;;  %s1822_s15 = scalar_lea.hbm %s7797_s1, %s2820_s28  ;;  %s7582_s20 = int_to_ptr.vmem [resolvable:$true] %s1847_s20 }
 0x8de   :  { %s5475_s18 = scalar_lea.hbm %s1822_s15, 16  ;;  %p5478_p13 = scmp.lt.s32.totalorder %s1822_s15, %s7797_s1 }
 0x8df   :  { %p5476_p12 = scmp.ne.s32.totalorder %s1822_s15, %s5475_s18  ;;  %p5479_p0 = scmp.lt.s32.totalorder %s5999_s29, %s5475_s18 }
 0x8e1   :  { %p5480_p1 = por %p5479_p0, %p5478_p13 }
 0x8e3   :  { %p5481_p2 = pnand %p5480_p1, %p5476_p12 }
 0x8e5   :  { %5484 = shalt.err (!%p5481_p2)  }
 0x8e6   :  { %s5485_s3 = scalar_lea.vmem %s7568_s27, 16  ;;  %p5490_p4 = scmp.lt.s32.totalorder %s7568_s27, %s5982_s14 }
 0x8e7   :  { %p5486_p3 = scmp.ne.s32.totalorder %s7568_s27, %s5485_s3  ;;  %p5491_p5 = scmp.lt.s32.totalorder %s6008_s5, %s5485_s3 }
 0x8e9   :  { %p5492_p7 = por %p5491_p5, %p5490_p4 }
 0x8eb   :  { %p5493_p8 = pnand %p5492_p7, %p5486_p3 }
 0x8ed   :  { %5496 = shalt.err (!%p5493_p8)  }
 0x8ee   :  { %1834 = dma.hbm_to_vmem [thread:$0]  %s1822_s15, 16, %s7568_s27, [#allocation2] }
 0x8ef   :  { %s2822_s13 = sshll.u32 %s7566_s30, 4  ;;  %s2823_s21 = sld [smem:[#allocation4 + $0x73]] }
 0x8f0   :  { %s1838_s16 = scalar_lea.hbm %s7797_s1, %s2822_s13 }
 0x8f1   :  { %s5497_s26 = scalar_lea.hbm %s1838_s16, 16  ;;  %p5500_p10 = scmp.lt.s32.totalorder %s1838_s16, %s7797_s1 }
 0x8f2   :  { %p5498_p9 = scmp.ne.s32.totalorder %s1838_s16, %s5497_s26  ;;  %p5501_p11 = scmp.lt.s32.totalorder %s5999_s29, %s5497_s26 }
 0x8f4   :  { %p5502_p12 = por %p5501_p11, %p5500_p10 }
 0x8f6   :  { %p5503_p13 = pnand %p5502_p12, %p5498_p9 }
 0x8f8   :  { %5506 = shalt.err (!%p5503_p13)  }
 0x8f9   :  { %s5507_s27 = scalar_lea.vmem %s7582_s20, 16  ;;  %p5512_p1 = scmp.lt.s32.totalorder %s7582_s20, %s5982_s14 }
 0x8fa   :  { %p5508_p0 = scmp.ne.s32.totalorder %s7582_s20, %s5507_s27  ;;  %p5513_p2 = scmp.lt.s32.totalorder %s6008_s5, %s5507_s27 }
 0x8fc   :  { %p5514_p3 = por %p5513_p2, %p5512_p1 }
 0x8fe   :  { %p5515_p4 = pnand %p5514_p3, %p5508_p0 }
 0x900   :  { %5518 = shalt.err (!%p5515_p4)  }
 0x901   :  { %1850 = dma.hbm_to_vmem [thread:$0]  %s1838_s16, 16, %s7582_s20, [#allocation2] }
 0x902   :  { %s5947_s30 = smov [#allocation5 + $0x73]   ;;  %s2825_s24 = sld [smem:[#allocation4 + $0x74]] }
 0x903   :  { %s1863_s6 = sshll.u32 %s5947_s30, 4  ;;  %s5948_s0 = smov [#allocation5 + $0x74]   ;;  %s1864_s6 = int_to_ptr.vmem [resolvable:$true] %s1863_s6 }
 0x904   :  { %s1879_s7 = sshll.u32 %s5948_s0, 4  ;;  %s7608_s9 = sld [smem:[#allocation4 + $0x75]]  ;;  %s7610_s7 = int_to_ptr.vmem [resolvable:$true] %s1879_s7 }
 0x905   :  { %s2824_s22 = sshll.u32 %s2823_s21, 4 }
 0x906   :  { %s1854_s4 = scalar_lea.hbm %s7797_s1, %s2824_s22 }
 0x907   :  { %s5519_s11 = scalar_lea.hbm %s1854_s4, 16  ;;  %p5522_p7 = scmp.lt.s32.totalorder %s1854_s4, %s7797_s1 }
 0x908   :  { %p5520_p5 = scmp.ne.s32.totalorder %s1854_s4, %s5519_s11  ;;  %p5523_p8 = scmp.lt.s32.totalorder %s5999_s29, %s5519_s11 }
 0x90a   :  { %p5524_p9 = por %p5523_p8, %p5522_p7 }
 0x90c   :  { %p5525_p10 = pnand %p5524_p9, %p5520_p5 }
 0x90e   :  { %5528 = shalt.err (!%p5525_p10)  }
 0x90f   :  { %s5529_s20 = scalar_lea.vmem %s1864_s6, 16  ;;  %p5534_p12 = scmp.lt.s32.totalorder %s1864_s6, %s5982_s14 }
 0x910   :  { %p5530_p11 = scmp.ne.s32.totalorder %s1864_s6, %s5529_s20  ;;  %p5535_p13 = scmp.lt.s32.totalorder %s6008_s5, %s5529_s20 }
 0x912   :  { %p5536_p0 = por %p5535_p13, %p5534_p12 }
 0x914   :  { %p5537_p1 = pnand %p5536_p0, %p5530_p11 }
 0x916   :  { %5540 = shalt.err (!%p5537_p1)  }
 0x917   :  { %1866 = dma.hbm_to_vmem [thread:$0]  %s1854_s4, 16, %s1864_s6, [#allocation2] }
 0x918   :  { %s2826_s8 = sshll.u32 %s2825_s24, 4  ;;  %s5949_s19 = smov [#allocation5 + $0x75]  }
 0x919   :  { %s1895_s3 = sshll.u32 %s5949_s19, 4  ;;  %s1870_s17 = scalar_lea.hbm %s7797_s1, %s2826_s8  ;;  %s7624_s3 = int_to_ptr.vmem [resolvable:$true] %s1895_s3 }
 0x91a   :  { %s5541_s25 = scalar_lea.hbm %s1870_s17, 16  ;;  %p5544_p3 = scmp.lt.s32.totalorder %s1870_s17, %s7797_s1 }
 0x91b   :  { %p5542_p2 = scmp.ne.s32.totalorder %s1870_s17, %s5541_s25  ;;  %p5545_p4 = scmp.lt.s32.totalorder %s5999_s29, %s5541_s25 }
 0x91d   :  { %p5546_p5 = por %p5545_p4, %p5544_p3 }
 0x91f   :  { %p5547_p7 = pnand %p5546_p5, %p5542_p2 }
 0x921   :  { %5550 = shalt.err (!%p5547_p7)  }
 0x922   :  { %s5551_s12 = scalar_lea.vmem %s7610_s7, 16  ;;  %p5556_p9 = scmp.lt.s32.totalorder %s7610_s7, %s5982_s14 }
 0x923   :  { %p5552_p8 = scmp.ne.s32.totalorder %s7610_s7, %s5551_s12  ;;  %p5557_p10 = scmp.lt.s32.totalorder %s6008_s5, %s5551_s12 }
 0x925   :  { %p5558_p11 = por %p5557_p10, %p5556_p9 }
 0x927   :  { %p5559_p12 = pnand %p5558_p11, %p5552_p8 }
 0x929   :  { %5562 = shalt.err (!%p5559_p12)  }
 0x92a   :  { %1882 = dma.hbm_to_vmem [thread:$0]  %s1870_s17, 16, %s7610_s7, [#allocation2] }
 0x92b   :  { %s2828_s23 = sshll.u32 %s7608_s9, 4  ;;  %s2829_s27 = sld [smem:[#allocation4 + $0x76]] }
 0x92c   :  { %s1886_s24 = scalar_lea.hbm %s7797_s1, %s2828_s23 }
 0x92d   :  { %s5563_s0 = scalar_lea.hbm %s1886_s24, 16  ;;  %p5566_p0 = scmp.lt.s32.totalorder %s1886_s24, %s7797_s1 }
 0x92e   :  { %p5564_p13 = scmp.ne.s32.totalorder %s1886_s24, %s5563_s0  ;;  %p5567_p1 = scmp.lt.s32.totalorder %s5999_s29, %s5563_s0 }
 0x930   :  { %p5568_p2 = por %p5567_p1, %p5566_p0 }
 0x932   :  { %p5569_p3 = pnand %p5568_p2, %p5564_p13 }
 0x934   :  { %5572 = shalt.err (!%p5569_p3)  }
 0x935   :  { %s5573_s7 = scalar_lea.vmem %s7624_s3, 16  ;;  %p5578_p5 = scmp.lt.s32.totalorder %s7624_s3, %s5982_s14 }
 0x936   :  { %p5574_p4 = scmp.ne.s32.totalorder %s7624_s3, %s5573_s7  ;;  %p5579_p7 = scmp.lt.s32.totalorder %s6008_s5, %s5573_s7 }
 0x938   :  { %p5580_p8 = por %p5579_p7, %p5578_p5 }
 0x93a   :  { %p5581_p9 = pnand %p5580_p8, %p5574_p4 }
 0x93c   :  { %5584 = shalt.err (!%p5581_p9)  }
 0x93d   :  { %1898 = dma.hbm_to_vmem [thread:$0]  %s1886_s24, 16, %s7624_s3, [#allocation2] }
 0x93e   :  { %s5950_s9 = smov [#allocation5 + $0x76]   ;;  %s2831_s4 = sld [smem:[#allocation4 + $0x77]] }
 0x93f   :  { %s1911_s10 = sshll.u32 %s5950_s9, 4  ;;  %s5951_s11 = smov [#allocation5 + $0x77]   ;;  %s1912_s10 = int_to_ptr.vmem [resolvable:$true] %s1911_s10 }
 0x940   :  { %s1927_s15 = sshll.u32 %s5951_s11, 4  ;;  %s7650_s18 = sld [smem:[#allocation4 + $0x78]]  ;;  %s7652_s15 = int_to_ptr.vmem [resolvable:$true] %s1927_s15 }
 0x941   :  { %s2830_s20 = sshll.u32 %s2829_s27, 4 }
 0x942   :  { %s1902_s13 = scalar_lea.hbm %s7797_s1, %s2830_s20 }
 0x943   :  { %s5585_s21 = scalar_lea.hbm %s1902_s13, 16  ;;  %p5588_p11 = scmp.lt.s32.totalorder %s1902_s13, %s7797_s1 }
 0x944   :  { %p5586_p10 = scmp.ne.s32.totalorder %s1902_s13, %s5585_s21  ;;  %p5589_p12 = scmp.lt.s32.totalorder %s5999_s29, %s5585_s21 }
 0x946   :  { %p5590_p13 = por %p5589_p12, %p5588_p11 }
 0x948   :  { %p5591_p0 = pnand %p5590_p13, %p5586_p10 }
 0x94a   :  { %5594 = shalt.err (!%p5591_p0)  }
 0x94b   :  { %s5595_s3 = scalar_lea.vmem %s1912_s10, 16  ;;  %p5600_p2 = scmp.lt.s32.totalorder %s1912_s10, %s5982_s14 }
 0x94c   :  { %p5596_p1 = scmp.ne.s32.totalorder %s1912_s10, %s5595_s3  ;;  %p5601_p3 = scmp.lt.s32.totalorder %s6008_s5, %s5595_s3 }
 0x94e   :  { %p5602_p4 = por %p5601_p3, %p5600_p2 }
 0x950   :  { %p5603_p5 = pnand %p5602_p4, %p5596_p1 }
 0x952   :  { %5606 = shalt.err (!%p5603_p5)  }
 0x953   :  { %1914 = dma.hbm_to_vmem [thread:$0]  %s1902_s13, 16, %s1912_s10, [#allocation2] }
 0x954   :  { %s2832_s16 = sshll.u32 %s2831_s4, 4  ;;  %s5952_s26 = smov [#allocation5 + $0x78]  }
 0x955   :  { %s1943_s12 = sshll.u32 %s5952_s26, 4  ;;  %s1918_s30 = scalar_lea.hbm %s7797_s1, %s2832_s16  ;;  %s7666_s12 = int_to_ptr.vmem [resolvable:$true] %s1943_s12 }
 0x956   :  { %s5607_s6 = scalar_lea.hbm %s1918_s30, 16  ;;  %p5610_p8 = scmp.lt.s32.totalorder %s1918_s30, %s7797_s1 }
 0x957   :  { %p5608_p7 = scmp.ne.s32.totalorder %s1918_s30, %s5607_s6  ;;  %p5611_p9 = scmp.lt.s32.totalorder %s5999_s29, %s5607_s6 }
 0x959   :  { %p5612_p10 = por %p5611_p9, %p5610_p8 }
 0x95b   :  { %p5613_p11 = pnand %p5612_p10, %p5608_p7 }
 0x95d   :  { %5616 = shalt.err (!%p5613_p11)  }
 0x95e   :  { %s5617_s22 = scalar_lea.vmem %s7652_s15, 16  ;;  %p5622_p13 = scmp.lt.s32.totalorder %s7652_s15, %s5982_s14 }
 0x95f   :  { %p5618_p12 = scmp.ne.s32.totalorder %s7652_s15, %s5617_s22  ;;  %p5623_p0 = scmp.lt.s32.totalorder %s6008_s5, %s5617_s22 }
 0x961   :  { %p5624_p1 = por %p5623_p0, %p5622_p13 }
 0x963   :  { %p5625_p2 = pnand %p5624_p1, %p5618_p12 }
 0x965   :  { %5628 = shalt.err (!%p5625_p2)  }
 0x966   :  { %1930 = dma.hbm_to_vmem [thread:$0]  %s1918_s30, 16, %s7652_s15, [#allocation2] }
 0x967   :  { %s2834_s28 = sshll.u32 %s7650_s18, 4  ;;  %s2835_s7 = sld [smem:[#allocation4 + $0x79]] }
 0x968   :  { %s1934_s4 = scalar_lea.hbm %s7797_s1, %s2834_s28 }
 0x969   :  { %s5629_s11 = scalar_lea.hbm %s1934_s4, 16  ;;  %p5632_p4 = scmp.lt.s32.totalorder %s1934_s4, %s7797_s1 }
 0x96a   :  { %p5630_p3 = scmp.ne.s32.totalorder %s1934_s4, %s5629_s11  ;;  %p5633_p5 = scmp.lt.s32.totalorder %s5999_s29, %s5629_s11 }
 0x96c   :  { %p5634_p7 = por %p5633_p5, %p5632_p4 }
 0x96e   :  { %p5635_p8 = pnand %p5634_p7, %p5630_p3 }
 0x970   :  { %5638 = shalt.err (!%p5635_p8)  }
 0x971   :  { %s5639_s15 = scalar_lea.vmem %s7666_s12, 16  ;;  %p5644_p10 = scmp.lt.s32.totalorder %s7666_s12, %s5982_s14 }
 0x972   :  { %p5640_p9 = scmp.ne.s32.totalorder %s7666_s12, %s5639_s15  ;;  %p5645_p11 = scmp.lt.s32.totalorder %s6008_s5, %s5639_s15 }
 0x974   :  { %p5646_p12 = por %p5645_p11, %p5644_p10 }
 0x976   :  { %p5647_p13 = pnand %p5646_p12, %p5640_p9 }
 0x978   :  { %5650 = shalt.err (!%p5647_p13)  }
 0x979   :  { %1946 = dma.hbm_to_vmem [thread:$0]  %s1934_s4, 16, %s7666_s12, [#allocation2] }
 0x97a   :  { %s5953_s18 = smov [#allocation5 + $0x79]   ;;  %s2837_s13 = sld [smem:[#allocation4 + $0x7a]] }
 0x97b   :  { %s1959_s19 = sshll.u32 %s5953_s18, 4  ;;  %s5954_s21 = smov [#allocation5 + $0x7a]   ;;  %s1960_s19 = int_to_ptr.vmem [resolvable:$true] %s1959_s19 }
 0x97c   :  { %s1975_s17 = sshll.u32 %s5954_s21, 4  ;;  %s7692_s25 = sld [smem:[#allocation4 + $0x7b]]  ;;  %s7694_s17 = int_to_ptr.vmem [resolvable:$true] %s1975_s17 }
 0x97d   :  { %s2836_s3 = sshll.u32 %s2835_s7, 4 }
 0x97e   :  { %s1950_s23 = scalar_lea.hbm %s7797_s1, %s2836_s3 }
 0x97f   :  { %s5651_s27 = scalar_lea.hbm %s1950_s23, 16  ;;  %p5654_p1 = scmp.lt.s32.totalorder %s1950_s23, %s7797_s1 }
 0x980   :  { %p5652_p0 = scmp.ne.s32.totalorder %s1950_s23, %s5651_s27  ;;  %p5655_p2 = scmp.lt.s32.totalorder %s5999_s29, %s5651_s27 }
 0x982   :  { %p5656_p3 = por %p5655_p2, %p5654_p1 }
 0x984   :  { %p5657_p4 = pnand %p5656_p3, %p5652_p0 }
 0x986   :  { %5660 = shalt.err (!%p5657_p4)  }
 0x987   :  { %s5661_s12 = scalar_lea.vmem %s1960_s19, 16  ;;  %p5666_p7 = scmp.lt.s32.totalorder %s1960_s19, %s5982_s14 }
 0x988   :  { %p5662_p5 = scmp.ne.s32.totalorder %s1960_s19, %s5661_s12  ;;  %p5667_p8 = scmp.lt.s32.totalorder %s6008_s5, %s5661_s12 }
 0x98a   :  { %p5668_p9 = por %p5667_p8, %p5666_p7 }
 0x98c   :  { %p5669_p10 = pnand %p5668_p9, %p5662_p5 }
 0x98e   :  { %5672 = shalt.err (!%p5669_p10)  }
 0x98f   :  { %1962 = dma.hbm_to_vmem [thread:$0]  %s1950_s23, 16, %s1960_s19, [#allocation2] }
 0x990   :  { %s2838_s24 = sshll.u32 %s2837_s13, 4  ;;  %s5955_s0 = smov [#allocation5 + $0x7b]  }
 0x991   :  { %s1991_s22 = sshll.u32 %s5955_s0, 4  ;;  %s1966_s9 = scalar_lea.hbm %s7797_s1, %s2838_s24  ;;  %s7708_s22 = int_to_ptr.vmem [resolvable:$true] %s1991_s22 }
 0x992   :  { %s5673_s10 = scalar_lea.hbm %s1966_s9, 16  ;;  %p5676_p12 = scmp.lt.s32.totalorder %s1966_s9, %s7797_s1 }
 0x993   :  { %p5674_p11 = scmp.ne.s32.totalorder %s1966_s9, %s5673_s10  ;;  %p5677_p13 = scmp.lt.s32.totalorder %s5999_s29, %s5673_s10 }
 0x995   :  { %p5678_p0 = por %p5677_p13, %p5676_p12 }
 0x997   :  { %p5679_p1 = pnand %p5678_p0, %p5674_p11 }
 0x999   :  { %5682 = shalt.err (!%p5679_p1)  }
 0x99a   :  { %s5683_s20 = scalar_lea.vmem %s7694_s17, 16  ;;  %p5688_p3 = scmp.lt.s32.totalorder %s7694_s17, %s5982_s14 }
 0x99b   :  { %p5684_p2 = scmp.ne.s32.totalorder %s7694_s17, %s5683_s20  ;;  %p5689_p4 = scmp.lt.s32.totalorder %s6008_s5, %s5683_s20 }
 0x99d   :  { %p5690_p5 = por %p5689_p4, %p5688_p3 }
 0x99f   :  { %p5691_p7 = pnand %p5690_p5, %p5684_p2 }
 0x9a1   :  { %5694 = shalt.err (!%p5691_p7)  }
 0x9a2   :  { %1978 = dma.hbm_to_vmem [thread:$0]  %s1966_s9, 16, %s7694_s17, [#allocation2] }
 0x9a3   :  { %s2840_s8 = sshll.u32 %s7692_s25, 4  ;;  %s2841_s15 = sld [smem:[#allocation4 + $0x7c]] }
 0x9a4   :  { %s1982_s13 = scalar_lea.hbm %s7797_s1, %s2840_s8 }
 0x9a5   :  { %s5695_s21 = scalar_lea.hbm %s1982_s13, 16  ;;  %p5698_p9 = scmp.lt.s32.totalorder %s1982_s13, %s7797_s1 }
 0x9a6   :  { %p5696_p8 = scmp.ne.s32.totalorder %s1982_s13, %s5695_s21  ;;  %p5699_p10 = scmp.lt.s32.totalorder %s5999_s29, %s5695_s21 }
 0x9a8   :  { %p5700_p11 = por %p5699_p10, %p5698_p9 }
 0x9aa   :  { %p5701_p12 = pnand %p5700_p11, %p5696_p8 }
 0x9ac   :  { %5704 = shalt.err (!%p5701_p12)  }
 0x9ad   :  { %s5705_s17 = scalar_lea.vmem %s7708_s22, 16  ;;  %p5710_p0 = scmp.lt.s32.totalorder %s7708_s22, %s5982_s14 }
 0x9ae   :  { %p5706_p13 = scmp.ne.s32.totalorder %s7708_s22, %s5705_s17  ;;  %p5711_p1 = scmp.lt.s32.totalorder %s6008_s5, %s5705_s17 }
 0x9b0   :  { %p5712_p2 = por %p5711_p1, %p5710_p0 }
 0x9b2   :  { %p5713_p3 = pnand %p5712_p2, %p5706_p13 }
 0x9b4   :  { %5716 = shalt.err (!%p5713_p3)  }
 0x9b5   :  { %1994 = dma.hbm_to_vmem [thread:$0]  %s1982_s13, 16, %s7708_s22, [#allocation2] }
 0x9b6   :  { %s5956_s25 = smov [#allocation5 + $0x7c]   ;;  %s2843_s23 = sld [smem:[#allocation4 + $0x7d]] }
 0x9b7   :  { %s2007_s26 = sshll.u32 %s5956_s25, 4  ;;  %s5957_s27 = smov [#allocation5 + $0x7d]   ;;  %s2008_s26 = int_to_ptr.vmem [resolvable:$true] %s2007_s26 }
 0x9b8   :  { %s2023_s30 = sshll.u32 %s5957_s27, 4  ;;  %s7734_s6 = sld [smem:[#allocation4 + $0x7e]]  ;;  %s7736_s30 = int_to_ptr.vmem [resolvable:$true] %s2023_s30 }
 0x9b9   :  { %s2842_s12 = sshll.u32 %s2841_s15, 4 }
 0x9ba   :  { %s1998_s28 = scalar_lea.hbm %s7797_s1, %s2842_s12 }
 0x9bb   :  { %s5717_s7 = scalar_lea.hbm %s1998_s28, 16  ;;  %p5720_p5 = scmp.lt.s32.totalorder %s1998_s28, %s7797_s1 }
 0x9bc   :  { %p5718_p4 = scmp.ne.s32.totalorder %s1998_s28, %s5717_s7  ;;  %p5721_p7 = scmp.lt.s32.totalorder %s5999_s29, %s5717_s7 }
 0x9be   :  { %p5722_p8 = por %p5721_p7, %p5720_p5 }
 0x9c0   :  { %p5723_p9 = pnand %p5722_p8, %p5718_p4 }
 0x9c2   :  { %5726 = shalt.err (!%p5723_p9)  }
 0x9c3   :  { %s5727_s22 = scalar_lea.vmem %s2008_s26, 16  ;;  %p5732_p11 = scmp.lt.s32.totalorder %s2008_s26, %s5982_s14 }
 0x9c4   :  { %p5728_p10 = scmp.ne.s32.totalorder %s2008_s26, %s5727_s22  ;;  %p5733_p12 = scmp.lt.s32.totalorder %s6008_s5, %s5727_s22 }
 0x9c6   :  { %p5734_p13 = por %p5733_p12, %p5732_p11 }
 0x9c8   :  { %p5735_p0 = pnand %p5734_p13, %p5728_p10 }
 0x9ca   :  { %5738 = shalt.err (!%p5735_p0)  }
 0x9cb   :  { %2010 = dma.hbm_to_vmem [thread:$0]  %s1998_s28, 16, %s2008_s26, [#allocation2] }
 0x9cc   :  { %s2844_s4 = sshll.u32 %s2843_s23, 4  ;;  %s5958_s11 = smov [#allocation5 + $0x7e]  }
 0x9cd   :  { %s2039_s20 = sshll.u32 %s5958_s11, 4  ;;  %s2014_s18 = scalar_lea.hbm %s7797_s1, %s2844_s4  ;;  %s7750_s20 = int_to_ptr.vmem [resolvable:$true] %s2039_s20 }
 0x9ce   :  { %s5739_s19 = scalar_lea.hbm %s2014_s18, 16  ;;  %p5742_p2 = scmp.lt.s32.totalorder %s2014_s18, %s7797_s1 }
 0x9cf   :  { %p5740_p1 = scmp.ne.s32.totalorder %s2014_s18, %s5739_s19  ;;  %p5743_p3 = scmp.lt.s32.totalorder %s5999_s29, %s5739_s19 }
 0x9d1   :  { %p5744_p4 = por %p5743_p3, %p5742_p2 }
 0x9d3   :  { %p5745_p5 = pnand %p5744_p4, %p5740_p1 }
 0x9d5   :  { %5748 = shalt.err (!%p5745_p5)  }
 0x9d6   :  { %s5749_s3 = scalar_lea.vmem %s7736_s30, 16  ;;  %p5754_p8 = scmp.lt.s32.totalorder %s7736_s30, %s5982_s14 }
 0x9d7   :  { %p5750_p7 = scmp.ne.s32.totalorder %s7736_s30, %s5749_s3  ;;  %p5755_p9 = scmp.lt.s32.totalorder %s6008_s5, %s5749_s3 }
 0x9d9   :  { %p5756_p10 = por %p5755_p9, %p5754_p8 }
 0x9db   :  { %p5757_p11 = pnand %p5756_p10, %p5750_p7 }
 0x9dd   :  { %5760 = shalt.err (!%p5757_p11)  }
 0x9de   :  { %2026 = dma.hbm_to_vmem [thread:$0]  %s2014_s18, 16, %s7736_s30, [#allocation2] }
 0x9df   :  { %s2846_s16 = sshll.u32 %s7734_s6, 4  ;;  %s2847_s17 = sld [smem:[#allocation4 + $0x7f]] }
 0x9e0   :  { %s2030_s23 = scalar_lea.hbm %s7797_s1, %s2846_s16 }
 0x9e1   :  { %s5761_s27 = scalar_lea.hbm %s2030_s23, 16  ;;  %p5764_p13 = scmp.lt.s32.totalorder %s2030_s23, %s7797_s1 }
 0x9e2   :  { %p5762_p12 = scmp.ne.s32.totalorder %s2030_s23, %s5761_s27  ;;  %p5765_p0 = scmp.lt.s32.totalorder %s5999_s29, %s5761_s27 }
 0x9e4   :  { %p5766_p1 = por %p5765_p0, %p5764_p13 }
 0x9e6   :  { %p5767_p2 = pnand %p5766_p1, %p5762_p12 }
 0x9e8   :  { %5770 = shalt.err (!%p5767_p2)  }
 0x9e9   :  { %s5771_s30 = scalar_lea.vmem %s7750_s20, 16  ;;  %p5776_p4 = scmp.lt.s32.totalorder %s7750_s20, %s5982_s14 }
 0x9ea   :  { %p5772_p3 = scmp.ne.s32.totalorder %s7750_s20, %s5771_s30  ;;  %p5777_p5 = scmp.lt.s32.totalorder %s6008_s5, %s5771_s30 }
 0x9ec   :  { %p5778_p7 = por %p5777_p5, %p5776_p4 }
 0x9ee   :  { %p5779_p8 = pnand %p5778_p7, %p5772_p3 }
 0x9f0   :  { %5782 = shalt.err (!%p5779_p8)  }
 0x9f1   :  { %2042 = dma.hbm_to_vmem [thread:$0]  %s2030_s23, 16, %s7750_s20, [#allocation2] }
 0x9f2   :  { %s5959_s6 = smov [#allocation5 + $0x7f]   ;;  %s2848_s28 = sshll.u32 %s2847_s17, 4 }
 0x9f3   :  { %s2055_s0 = sshll.u32 %s5959_s6, 4  ;;  %s2046_s10 = scalar_lea.hbm %s7797_s1, %s2848_s28  ;;  %s2056_s0 = int_to_ptr.vmem [resolvable:$true] %s2055_s0 }
 0x9f4   :  { %s5783_s22 = scalar_lea.hbm %s2046_s10, 16  ;;  %p5786_p10 = scmp.lt.s32.totalorder %s2046_s10, %s7797_s1 }
 0x9f5   :  { %p5784_p9 = scmp.ne.s32.totalorder %s2046_s10, %s5783_s22  ;;  %p5787_p11 = scmp.lt.s32.totalorder %s5999_s29, %s5783_s22 }
 0x9f7   :  { %p5788_p12 = por %p5787_p11, %p5786_p10 }
 0x9f9   :  { %p5789_p13 = pnand %p5788_p12, %p5784_p9 }
 0x9fb   :  { %5792 = shalt.err (!%p5789_p13)  }
 0x9fc   :  { %s5793_s8 = scalar_lea.vmem %s2056_s0, 16  ;;  %p5798_p1 = scmp.lt.s32.totalorder %s2056_s0, %s5982_s14 }
 0x9fd   :  { %p5794_p0 = scmp.ne.s32.totalorder %s2056_s0, %s5793_s8  ;;  %p5799_p2 = scmp.lt.s32.totalorder %s6008_s5, %s5793_s8 }
 0x9ff   :  { %p5800_p3 = por %p5799_p2, %p5798_p1 }
 0xa01   :  { %p5801_p4 = pnand %p5800_p3, %p5794_p0 }
 0xa03   :  { %5804 = shalt.err (!%p5801_p4)  }
 0xa04   :  { %2058 = dma.hbm_to_vmem [thread:$0]  %s2046_s10, 16, %s2056_s0, [#allocation2] }
 0xa05   :  { %5827 = dma.done.wait [#allocation2], 2048 }
 0xa06   :  { %5828 = vsyncadd [#allocation2], 4294965248  ;;  %p5806_p5 = scmp.ne.s32.totalorder %s5982_s14, %s6008_s5  ;;  %p5811_p7 = scmp.lt.s32.totalorder %s6008_s5, %s6008_s5 }
 0xa08   :  { %p5812_p8 = por %p5811_p7, %p3004_p6 }
 0xa0a   :  { %p5813_p9 = pnand %p5812_p8, %p5806_p5 }
 0xa0c   :  { %5816 = shalt.err (!%p5813_p9)
}
 0xa0d   :  { %s5960_s1 = smov 128   ;;  %s5961_s29 = smov 8  }
 0xa0e   :  { %2327 = dma.vmem_to_hbm [thread:$0]  %s5982_s14, 2048, %s7798_s2, [#allocation6], %s5960_s1, %s5960_s1, %s5961_s29  }
 0xa0f   :  { %5829 = dma.done.wait [#allocation6], 2048  }
 0xa10   :  { %5830 = vsyncadd [#allocation6], 4294965248 }
 0xa11   :  { %2331 = vsyncpa [#allocation6], 1 }
 0xa12   :  { %2332 = vsyncmov [#allocation2] }
 0xa15   :  { %s2333_s18 = vpop.sfrf %2332 }
 0xa16   :  { %p2849_p10 = scmp.ne.s32.totalorder %s2333_s18, 0 }
 0xa18   :  { %2337 = shalt.err (%p2849_p10)  }

</bundles_post_ra>
